<compile_context>
chip_gen: v5e
topology: v5e:2x2
jax: 0.10.0
libtpu: 0.0.40
codegen_flags: <defaults>
</compile_context>

<pallas_src>
import functools
import math

import jax
import jax.numpy as jnp
from jax.experimental import pallas as pl
from jax.experimental.pallas import tpu as pltpu


MATMUL_DTYPE = jnp.bfloat16   # MXU operand dtype; accumulation stays float32.
GN_EPS = 1e-5                 # nn.GroupNorm default.


def _round_up(x, m):
    return (x + m - 1) // m * m


def _bytes(shape, itemsize):
    n = 1
    for s in shape:
        n *= int(s)
    return n * itemsize


def _vmem_limit(est_bytes):
    # Explicit scoped-VMEM budget: at least 32 MiB (above v5e/v6e defaults),
    # never above v7x's 64 MiB physical VMEM.
    return int(min(max(est_bytes, 32 * 1024 * 1024), 64 * 1024 * 1024))


# --------------------------------------------------------------------------
# In-kernel helpers (operate on (N, C) channels-last f32 values)
# --------------------------------------------------------------------------
def _group_norm(x, gamma, beta, sel, eps, silu):
    """GroupNorm (+ optional SiLU) on an (N, C) tile.

    `sel` is a precomputed (C, C) block-diagonal matrix scaled by
    1 / (N * channels_per_group).  Row sums are reduced first (cheap VPU/XLU
    work), then the tiny (1,C)x(C,C) matmul broadcasts each group's statistic
    back to its channels.
    """
    colsum = jnp.sum(x, axis=0, keepdims=True)                 # (1, C)
    colsum2 = jnp.sum(x * x, axis=0, keepdims=True)            # (1, C)
    mean = jnp.dot(colsum, sel, preferred_element_type=jnp.float32)
    ex2 = jnp.dot(colsum2, sel, preferred_element_type=jnp.float32)
    var = jnp.maximum(ex2 - mean * mean, 0.0)                  # guard cancellation
    y = (x - mean) * jax.lax.rsqrt(var + eps) * gamma + beta
    if silu:
        y = y * jax.nn.sigmoid(y)
    return y


def _fill_padded(pad_ref, h_nc, H, W):
    """Write (HW, C) activation (cast to bf16) into the interior of the padded
    scratch; zero only the 1-px halo that the 3x3 taps actually read.

    Halo is re-zeroed every grid step (cheap) because with "parallel" megacore
    sharding there is no single 'first iteration' per core."""
    Wp = pad_ref.shape[1]
    C = pad_ref.shape[2]
    dt = pad_ref.dtype
    zrow = jnp.zeros((1, Wp, C), dt)
    pad_ref[0:1, :, :] = zrow
    pad_ref[H + 1:H + 2, :, :] = zrow
    zcol = jnp.zeros((H + 2, 1, C), dt)
    pad_ref[:, 0:1, :] = zcol
    pad_ref[:, W + 1:W + 2, :] = zcol
    pad_ref[1:H + 1, 1:W + 1, :] = h_nc.reshape(H, W, C).astype(dt)


def _conv3x3(pad_ref, w_ref, bias, H, W):
    """3x3 conv (padding=1) as 9 accumulated (HW, C)x(C, Cout) bf16 matmuls over
    shifted views of the padded buffer; no patch-matrix materialization."""
    C = pad_ref.shape[2]
    acc = bias                                                 # (1, Cout) f32
    for dh in range(3):
        for dw in range(3):
            lhs = pad_ref[dh:dh + H, dw:dw + W, :].reshape(H * W, C)
            tap = w_ref[(dh * 3 + dw) * C:(dh * 3 + dw + 1) * C, :]
            acc = acc + jnp.dot(lhs, tap, preferred_element_type=jnp.float32)
    return acc                                                 # (HW, Cout) f32


# --------------------------------------------------------------------------
# Kernels
# --------------------------------------------------------------------------
def _resnet_block_kernel(x_ref, tb_ref, g1_ref, b1_ref, sel1_ref, w1_ref,
                         g2_ref, b2_ref, sel2_ref, w2_ref, c2b_ref,
                         wr_ref, br_ref, o_ref, pad1_ref, pad2_ref,
                         *, H, W, eps):
    """GN+SiLU -> conv3x3 (+temb-as-bias) -> GN+SiLU -> conv3x3 -> +1x1 residual."""
    x = x_ref[0].astype(jnp.float32)                           # (HW, Cin)

    # GroupNorm + SiLU on the block input, then conv1.  tb_ref already holds
    # silu(t_emb) @ W_t + b_t + conv1_b for this batch element.
    h = _group_norm(x, g1_ref[...], b1_ref[...], sel1_ref[...], eps, silu=True)
    _fill_padded(pad1_ref, h, H, W)
    h = _conv3x3(pad1_ref, w1_ref, tb_ref[0], H, W)            # (HW, Cout)

    # GroupNorm + SiLU + conv2.
    h = _group_norm(h, g2_ref[...], b2_ref[...], sel2_ref[...], eps, silu=True)
    _fill_padded(pad2_ref, h, H, W)
    h = _conv3x3(pad2_ref, w2_ref, c2b_ref[...], H, W)

    # 1x1 residual conv on the block input, fused add.
    res = jnp.dot(x.astype(MATMUL_DTYPE), wr_ref[...],
                  preferred_element_type=jnp.float32) + br_ref[...]
    o_ref[0] = h + res


def _attention_block_kernel(x_ref, g_ref, b_ref, sel_ref, wqkv_ref, bqkv_ref,
                            wo_ref, bo_ref, o_ref, *, num_heads, eps):
    """GroupNorm -> multi-head self-attention -> out-proj -> residual add."""
    S, C = x_ref.shape[1], x_ref.shape[2]
    hd = C // num_heads
    scale = 1.0 / math.sqrt(hd)

    x = x_ref[0].astype(jnp.float32)                           # (S, C)
    xn = _group_norm(x, g_ref[...], b_ref[...], sel_ref[...], eps, silu=False)

    # Fused QKV projection: (S, C) x (C, 3C).
    qkv = jnp.dot(xn.astype(MATMUL_DTYPE), wqkv_ref[...],
                  preferred_element_type=jnp.float32) + bqkv_ref[...]

    # TODO(synk): per-head loop uses narrow (head_dim) lane slices; a batched
    # (num_heads, S, head_dim) einsum layout + flash-style KV tiling would use
    # the MXU full-width and bound VMEM for large S / head_dim.
    heads = []
    for h in range(num_heads):
        q = qkv[:, h * hd:(h + 1) * hd].astype(MATMUL_DTYPE)
        k = qkv[:, C + h * hd:C + (h + 1) * hd].astype(MATMUL_DTYPE)
        v = qkv[:, 2 * C + h * hd:2 * C + (h + 1) * hd].astype(MATMUL_DTYPE)
        s = jax.lax.dot_general(q, k, (((1,), (1,)), ((), ())),
                                preferred_element_type=jnp.float32) * scale
        s = s - jnp.max(s, axis=-1, keepdims=True)
        p = jnp.exp(s)
        p = p * pl.reciprocal(jnp.sum(p, axis=-1, keepdims=True), approx=True)
        heads.append(jnp.dot(p.astype(MATMUL_DTYPE), v,
                             preferred_element_type=jnp.float32))
    attn = jnp.concatenate(heads, axis=-1)                     # (S, C)

    out = jnp.dot(attn.astype(MATMUL_DTYPE), wo_ref[...],
                  preferred_element_type=jnp.float32) + bo_ref[...]
    o_ref[0] = x + out                                         # residual add


# --------------------------------------------------------------------------
# Wrappers (one pallas_call per fused block)
# --------------------------------------------------------------------------
def _const_spec(shape):
    # Constant-index weights/biases/sel: single-buffered (never re-fetched).
    return pl.BlockSpec(shape, lambda b: (0, 0), pipeline_mode=pl.Buffered(1))


def resnet_block(x_bnc, tb_row, pk, idx, H, W, eps=GN_EPS):
    B, HW, Cin = x_bnc.shape
    Cout = pk[f"wr_{idx}"].shape[1]
    Wp = _round_up(W + 2, 8)    # keep the padded scratch's sublane dim 8-aligned

    est = (2 * _bytes((HW, Cin), 4) + 2 * _bytes((HW, Cout), 4)          # x / out (dbl-buf)
           + _bytes((9 * Cin, Cout), 2) + _bytes((9 * Cout, Cout), 2)    # conv weights
           + _bytes((Cin, Cout), 2)                                      # residual weight
           + _bytes((Cin, Cin), 4) + _bytes((Cout, Cout), 4)             # sel matrices
           + _bytes((H + 2, Wp, Cin), 2) + _bytes((H + 2, Wp, Cout), 2)  # pad scratch
           + 4 * _bytes((HW, Cout), 4)                                   # f32 temporaries
           + 8 * 1024 * 1024)

    kernel = functools.partial(_resnet_block_kernel, H=H, W=W, eps=eps)
    return pl.pallas_call(
        kernel,
        out_shape=jax.ShapeDtypeStruct((B, HW, Cout), jnp.float32),
        grid=(B,),
        in_specs=[
            pl.BlockSpec((1, HW, Cin), lambda b: (b, 0, 0)),     # x
            pl.BlockSpec((1, 1, Cout), lambda b: (b, 0, 0)),     # per-batch temb+bias row
            _const_spec((1, Cin)),                               # gn1 gamma
            _const_spec((1, Cin)),                               # gn1 beta
            _const_spec((Cin, Cin)),                             # gn1 sel
            _const_spec((9 * Cin, Cout)),                        # conv1 w
            _const_spec((1, Cout)),                              # gn2 gamma
            _const_spec((1, Cout)),                              # gn2 beta
            _const_spec((Cout, Cout)),                           # gn2 sel
            _const_spec((9 * Cout, Cout)),                       # conv2 w
            _const_spec((1, Cout)),                              # conv2 b
            _const_spec((Cin, Cout)),                            # res 1x1 w
            _const_spec((1, Cout)),                              # res 1x1 b
        ],
        out_specs=pl.BlockSpec((1, HW, Cout), lambda b: (b, 0, 0)),
        scratch_shapes=[
            pltpu.VMEM((H + 2, Wp, Cin), MATMUL_DTYPE),          # padded buf (conv1)
            pltpu.VMEM((H + 2, Wp, Cout), MATMUL_DTYPE),         # padded buf (conv2)
        ],
        compiler_params=pltpu.CompilerParams(
            dimension_semantics=("parallel",),
            vmem_limit_bytes=_vmem_limit(est)),
    )(x_bnc, tb_row,
      pk[f"g1_{idx}"], pk[f"b1_{idx}"], pk[f"sel1_{idx}"], pk[f"w1_{idx}"],
      pk[f"g2_{idx}"], pk[f"b2_{idx}"], pk[f"sel2_{idx}"], pk[f"w2_{idx}"],
      pk[f"c2b_{idx}"], pk[f"wr_{idx}"], pk[f"br_{idx}"])


def attention_block(x_bnc, pk, num_heads, eps=GN_EPS):
    B, S, C = x_bnc.shape

    est = (4 * _bytes((S, C), 4)                                 # x / out (dbl-buf)
           + _bytes((C, 3 * C), 2) + _bytes((C, C), 2)           # Wqkv, Wo
           + _bytes((C, C), 4)                                   # sel
           + _bytes((S, 3 * C), 4) + _bytes((S, S), 4)           # qkv, scores
           + 2 * _bytes((S, C), 4)                               # temporaries
           + 8 * 1024 * 1024)

    kernel = functools.partial(_attention_block_kernel,
                               num_heads=num_heads, eps=eps)
    return pl.pallas_call(
        kernel,
        out_shape=jax.ShapeDtypeStruct((B, S, C), jnp.float32),
        grid=(B,),
        in_specs=[
            pl.BlockSpec((1, S, C), lambda b: (b, 0, 0)),        # x
            _const_spec((1, C)),                                 # gn gamma
            _const_spec((1, C)),                                 # gn beta
            _const_spec((C, C)),                                 # gn sel
            _const_spec((C, 3 * C)),                             # Wqkv
            _const_spec((1, 3 * C)),                             # bqkv
            _const_spec((C, C)),                                 # Wo
            _const_spec((1, C)),                                 # bo
        ],
        out_specs=pl.BlockSpec((1, S, C), lambda b: (b, 0, 0)),
        compiler_params=pltpu.CompilerParams(
            dimension_semantics=("parallel",),
            vmem_limit_bytes=_vmem_limit(est)),
    )(x_bnc, pk["attn_g"], pk["attn_b"], pk["attn_sel"],
      pk["wqkv"], pk["bqkv"], pk["wo"], pk["bo"])


# --------------------------------------------------------------------------
# Parameter packing (done ONCE, outside the jitted forward)
# --------------------------------------------------------------------------
def _row(v):
    return v.reshape(1, -1).astype(jnp.float32)


def _make_sel(C, groups, n_rows):
    cg = C // groups
    gi = jnp.arange(C)[:, None] // cg
    gj = jnp.arange(C)[None, :] // cg
    return jnp.where(gi == gj, 1.0 / (n_rows * cg), 0.0).astype(jnp.float32)


def pack_params(p, H, W, groups=8):
    """Pre-pack / pre-cast weights and build the GroupNorm `sel` mix matrices."""
    HW = H * W
    pk = {}
    for i in range(2):
        cin, cout = p[f"res_{i}_w"].shape
        pk[f"w1_{i}"] = p[f"conv1_{i}_w"].reshape(9 * cin, cout).astype(MATMUL_DTYPE)
        pk[f"w2_{i}"] = p[f"conv2_{i}_w"].reshape(9 * cout, cout).astype(MATMUL_DTYPE)
        pk[f"wr_{i}"] = p[f"res_{i}_w"].astype(MATMUL_DTYPE)
        pk[f"br_{i}"] = _row(p[f"res_{i}_b"])
        pk[f"c1b_{i}"] = _row(p[f"conv1_{i}_b"])
        pk[f"c2b_{i}"] = _row(p[f"conv2_{i}_b"])
        pk[f"g1_{i}"] = _row(p[f"gn1_{i}_g"])
        pk[f"b1_{i}"] = _row(p[f"gn1_{i}_b"])
        pk[f"g2_{i}"] = _row(p[f"gn2_{i}_g"])
        pk[f"b2_{i}"] = _row(p[f"gn2_{i}_b"])
        pk[f"sel1_{i}"] = _make_sel(cin, groups, HW)
        pk[f"sel2_{i}"] = _make_sel(cout, groups, HW)
        pk[f"tw_{i}"] = p[f"temb_{i}_w"].astype(jnp.float32)
        pk[f"tb_{i}"] = _row(p[f"temb_{i}_b"])
    C = p["wo"].shape[0]
    pk["wqkv"] = jnp.concatenate([p["wq"], p["wk"], p["wv"]], axis=1).astype(MATMUL_DTYPE)
    pk["bqkv"] = jnp.concatenate([p["bq"], p["bk"], p["bv"]]).reshape(1, 3 * C).astype(jnp.float32)
    pk["wo"] = p["wo"].astype(MATMUL_DTYPE)
    pk["bo"] = _row(p["bo"])
    pk["attn_g"] = _row(p["attn_gn_g"])
    pk["attn_b"] = _row(p["attn_gn_b"])
    pk["attn_sel"] = _make_sel(C, groups, HW)
    return pk


# --------------------------------------------------------------------------
# MidBlock forward (Pallas)
# --------------------------------------------------------------------------
def midblock_forward(pk, X, t_emb, num_heads):
    B, Cin, H, W = X.shape
    # Boundary transpose only: NCHW -> channels-last (B, HW, C).
    x = jnp.transpose(X, (0, 2, 3, 1)).reshape(B, H * W, Cin)

    def temb_row(idx):
        # Rank-1 per-batch contribution, folded with conv1's bias.
        t = jax.nn.silu(t_emb)
        row = t @ pk[f"tw_{idx}"] + pk[f"tb_{idx}"] + pk[f"c1b_{idx}"]   # (B, Cout)
        return row.reshape(B, 1, -1)

    out = resnet_block(x, temb_row(0), pk, 0, H, W)        # resnet block 0
    out = attention_block(out, pk, num_heads)              # GN + MHA + residual
    out = resnet_block(out, temb_row(1), pk, 1, H, W)      # resnet block 1

    Cout = out.shape[-1]
    return jnp.transpose(out.reshape(B, H, W, Cout), (0, 3, 1, 2))


# --------------------------------------------------------------------------
# Pure-JAX reference (f32, no Pallas) for correctness checking
# --------------------------------------------------------------------------
def _gn_ref(x_bnc, gamma, beta, groups, eps):
    B, N, C = x_bnc.shape
    cg = C // groups
    xg = x_bnc.reshape(B, N, groups, cg)
    mean = xg.mean(axis=(1, 3), keepdims=True)
    var = ((xg - mean) ** 2).mean(axis=(1, 3), keepdims=True)
    xn = ((xg - mean) / jnp.sqrt(var + eps)).reshape(B, N, C)
    return xn * gamma + beta


def _conv3x3_ref(x_bhwc, w_hwio, b):
    out = jax.lax.conv_general_dilated(
        x_bhwc, w_hwio, window_strides=(1, 1), padding="SAME",
        dimension_numbers=("NHWC", "HWIO", "NHWC"))
    return out + b


def midblock_reference(p, X, t_emb, num_heads, groups=8, eps=GN_EPS):
    B, Cin, H, W = X.shape
    x = jnp.transpose(X, (0, 2, 3, 1))

    def resnet(x_bhwc, idx):
        cin = x_bhwc.shape[-1]
        cout = p[f"res_{idx}_w"].shape[1]
        h = _gn_ref(x_bhwc.reshape(B, H * W, cin),
                    p[f"gn1_{idx}_g"], p[f"gn1_{idx}_b"], groups, eps)
        h = jax.nn.silu(h).reshape(B, H, W, cin)
        h = _conv3x3_ref(h, p[f"conv1_{idx}_w"], p[f"conv1_{idx}_b"])
        t = jax.nn.silu(t_emb) @ p[f"temb_{idx}_w"] + p[f"temb_{idx}_b"]
        h = h + t[:, None, None, :]
        h2 = _gn_ref(h.reshape(B, H * W, cout),
                     p[f"gn2_{idx}_g"], p[f"gn2_{idx}_b"], groups, eps)
        h2 = jax.nn.silu(h2).reshape(B, H, W, cout)
        h2 = _conv3x3_ref(h2, p[f"conv2_{idx}_w"], p[f"conv2_{idx}_b"])
        res = x_bhwc @ p[f"res_{idx}_w"] + p[f"res_{idx}_b"]
        return h2 + res

    out = resnet(x, 0)
    C = out.shape[-1]
    hd = C // num_heads
    xa = out.reshape(B, H * W, C)
    xn = _gn_ref(xa, p["attn_gn_g"], p["attn_gn_b"], groups, eps)
    q = xn @ p["wq"] + p["bq"]
    k = xn @ p["wk"] + p["bk"]
    v = xn @ p["wv"] + p["bv"]
    qh = q.reshape(B, H * W, num_heads, hd).transpose(0, 2, 1, 3)
    kh = k.reshape(B, H * W, num_heads, hd).transpose(0, 2, 1, 3)
    vh = v.reshape(B, H * W, num_heads, hd).transpose(0, 2, 1, 3)
    s = jnp.einsum("bhqd,bhkd->bhqk", qh, kh) / math.sqrt(hd)
    pm = jax.nn.softmax(s, axis=-1)
    oh = jnp.einsum("bhqk,bhkd->bhqd", pm, vh)
    attn = oh.transpose(0, 2, 1, 3).reshape(B, H * W, C) @ p["wo"] + p["bo"]
    out = out + attn.reshape(B, H, W, C)

    out = resnet(out, 1)
    return jnp.transpose(out, (0, 3, 1, 2))


# --------------------------------------------------------------------------
# Deterministic synthetic parameters
# --------------------------------------------------------------------------
def init_params(key, in_c, out_c, t_dim):
    state = [key]

    def nk():
        state[0], sub = jax.random.split(state[0])
        return sub

    def w(shape, scale=0.1):
        return jax.random.normal(nk(), shape, jnp.float32) * scale

    p = {}
    for i in range(2):
        cin = in_c if i == 0 else out_c
        p[f"gn1_{i}_g"] = 1.0 + w((cin,))
        p[f"gn1_{i}_b"] = w((cin,))
        p[f"conv1_{i}_w"] = w((3, 3, cin, out_c))          # HWIO
        p[f"conv1_{i}_b"] = w((out_c,))
        p[f"temb_{i}_w"] = w((t_dim, out_c))               # (in, out)
        p[f"temb_{i}_b"] = w((out_c,))
        p[f"gn2_{i}_g"] = 1.0 + w((out_c,))
        p[f"gn2_{i}_b"] = w((out_c,))
        p[f"conv2_{i}_w"] = w((3, 3, out_c, out_c))
        p[f"conv2_{i}_b"] = w((out_c,))
        p[f"res_{i}_w"] = w((cin, out_c))                  # 1x1 conv as (in, out)
        p[f"res_{i}_b"] = w((out_c,))
    p["attn_gn_g"] = 1.0 + w((out_c,))
    p["attn_gn_b"] = w((out_c,))
    for nm in ("wq", "wk", "wv", "wo"):
        p[nm] = w((out_c, out_c))                          # (in, out)
    for nm in ("bq", "bk", "bv", "bo"):
        p[nm] = w((out_c,))
    return p


if __name__ == "__main__":
    IN_C, OUT_C, T_DIM, NUM_HEADS = 16, 32, 32, 4
    B, H, W = 2, 8, 8

    key = jax.random.PRNGKey(0)
    kx, kt, kp = jax.random.split(key, 3)
    X = jax.random.normal(kx, (B, IN_C, H, W), jnp.float32)
    t_emb = jax.random.normal(kt, (B, T_DIM), jnp.float32)
    params = init_params(kp, IN_C, OUT_C, T_DIM)

    packed = pack_params(params, H, W, groups=8)           # once, outside jit

    fwd = jax.jit(functools.partial(midblock_forward, num_heads=NUM_HEADS))
    out = jax.block_until_ready(fwd(packed, X, t_emb))
    assert out.shape == (B, OUT_C, H, W)
    assert bool(jnp.all(jnp.isfinite(out)))

    ref = jax.jit(functools.partial(midblock_reference, num_heads=NUM_HEADS))(
        params, X, t_emb)
    rel = float(jnp.linalg.norm(out - ref) / (jnp.linalg.norm(ref) + 1e-6))
    assert rel < 5e-2, f"relative error vs f32 reference too large: {rel}"
    print("KERNEL_OK")
</pallas_src>

<mosaic_0001>
module attributes {stable_mosaic.version = 11 : i64} {
  func.func @_attention_block_kernel(%arg0: i32, %arg1: memref<1x64x32xf32, #tpu.memory_space<vmem>>, %arg2: memref<1x32xf32, #tpu.memory_space<vmem>>, %arg3: memref<1x32xf32, #tpu.memory_space<vmem>>, %arg4: memref<32x32xf32, #tpu.memory_space<vmem>>, %arg5: memref<32x96xbf16, #tpu.memory_space<vmem>>, %arg6: memref<1x96xf32, #tpu.memory_space<vmem>>, %arg7: memref<32x32xbf16, #tpu.memory_space<vmem>>, %arg8: memref<1x32xf32, #tpu.memory_space<vmem>>, %arg9: memref<1x64x32xf32, #tpu.memory_space<vmem>>) attributes {dimension_semantics = [#tpu.dimension_semantics<parallel>], iteration_bounds = array<i64: 2>, scalar_prefetch = 0 : i64, scratch_operands = 0 : i64, tpu.core_type = #tpu.core_type<tc>, window_params = [{transform_indices = @transform_0, window_bounds = array<i64: 1, 64, 32>}, {pipeline_mode = #tpu.pipeline_mode<synchronous>, transform_indices = @transform_1, window_bounds = array<i64: 1, 32>}, {pipeline_mode = #tpu.pipeline_mode<synchronous>, transform_indices = @transform_2, window_bounds = array<i64: 1, 32>}, {pipeline_mode = #tpu.pipeline_mode<synchronous>, transform_indices = @transform_3, window_bounds = array<i64: 32, 32>}, {pipeline_mode = #tpu.pipeline_mode<synchronous>, transform_indices = @transform_4, window_bounds = array<i64: 32, 96>}, {pipeline_mode = #tpu.pipeline_mode<synchronous>, transform_indices = @transform_5, window_bounds = array<i64: 1, 96>}, {pipeline_mode = #tpu.pipeline_mode<synchronous>, transform_indices = @transform_6, window_bounds = array<i64: 32, 32>}, {pipeline_mode = #tpu.pipeline_mode<synchronous>, transform_indices = @transform_7, window_bounds = array<i64: 1, 32>}, {transform_indices = @transform_8, window_bounds = array<i64: 1, 64, 32>}]} {
    %c0 = arith.constant 0 : index
    %c0_0 = arith.constant 0 : index
    %c0_1 = arith.constant 0 : index
    %0 = vector.load %arg1[%c0, %c0_0, %c0_1] : memref<1x64x32xf32, #tpu.memory_space<vmem>>, vector<1x64x32xf32>
    %1 = vector.shape_cast %0 : vector<1x64x32xf32> to vector<64x32xf32>
    %c0_2 = arith.constant 0 : index
    %c0_3 = arith.constant 0 : index
    %2 = vector.load %arg2[%c0_2, %c0_3] : memref<1x32xf32, #tpu.memory_space<vmem>>, vector<1x32xf32>
    %c0_4 = arith.constant 0 : index
    %c0_5 = arith.constant 0 : index
    %3 = vector.load %arg3[%c0_4, %c0_5] : memref<1x32xf32, #tpu.memory_space<vmem>>, vector<1x32xf32>
    %c0_6 = arith.constant 0 : index
    %c0_7 = arith.constant 0 : index
    %4 = vector.load %arg4[%c0_6, %c0_7] : memref<32x32xf32, #tpu.memory_space<vmem>>, vector<32x32xf32>
    %cst = arith.constant dense<0.000000e+00> : vector<32xf32>
    %5 = vector.multi_reduction <add>, %1, %cst [0] : vector<64x32xf32> to vector<32xf32>
    %6 = vector.shape_cast %5 : vector<32xf32> to vector<1x32xf32>
    %7 = arith.mulf %1, %1 : vector<64x32xf32>
    %cst_8 = arith.constant dense<0.000000e+00> : vector<32xf32>
    %8 = vector.multi_reduction <add>, %7, %cst_8 [0] : vector<64x32xf32> to vector<32xf32>
    %9 = vector.shape_cast %8 : vector<32xf32> to vector<1x32xf32>
    %cst_9 = arith.constant dense<0.000000e+00> : vector<1x32xf32>
    %10 = tpu.matmul %6, %4, %cst_9 {dimension_numbers = #tpu.dot_dimension_numbers<[1], [0], [0], [1], [0, 0, 1, 1], [], []>} : vector<1x32xf32>, vector<32x32xf32>, vector<1x32xf32> -> vector<1x32xf32>
    %cst_10 = arith.constant dense<0.000000e+00> : vector<1x32xf32>
    %11 = tpu.matmul %9, %4, %cst_10 {dimension_numbers = #tpu.dot_dimension_numbers<[1], [0], [0], [1], [0, 0, 1, 1], [], []>} : vector<1x32xf32>, vector<32x32xf32>, vector<1x32xf32> -> vector<1x32xf32>
    %12 = arith.mulf %10, %10 : vector<1x32xf32>
    %13 = arith.subf %11, %12 : vector<1x32xf32>
    %cst_11 = arith.constant 0.000000e+00 : f32
    %14 = vector.broadcast %cst_11 : f32 to vector<1x32xf32>
    %15 = arith.maximumf %13, %14 : vector<1x32xf32>
    %16 = vector.broadcast %10 : vector<1x32xf32> to vector<64x32xf32>
    %17 = arith.subf %1, %16 : vector<64x32xf32>
    %cst_12 = arith.constant 9.99999974E-6 : f32
    %18 = vector.broadcast %cst_12 : f32 to vector<1x32xf32>
    %19 = arith.addf %15, %18 : vector<1x32xf32>
    %20 = math.rsqrt %19 : vector<1x32xf32>
    %21 = vector.broadcast %20 : vector<1x32xf32> to vector<64x32xf32>
    %22 = arith.mulf %17, %21 : vector<64x32xf32>
    %23 = vector.broadcast %2 : vector<1x32xf32> to vector<64x32xf32>
    %24 = arith.mulf %22, %23 : vector<64x32xf32>
    %25 = vector.broadcast %3 : vector<1x32xf32> to vector<64x32xf32>
    %26 = arith.addf %24, %25 : vector<64x32xf32>
    %27 = arith.truncf %26 : vector<64x32xf32> to vector<64x32xbf16>
    %c0_13 = arith.constant 0 : index
    %c0_14 = arith.constant 0 : index
    %28 = vector.load %arg5[%c0_13, %c0_14] : memref<32x96xbf16, #tpu.memory_space<vmem>>, vector<32x96xbf16>
    %cst_15 = arith.constant dense<0.000000e+00> : vector<64x96xf32>
    %29 = tpu.matmul %27, %28, %cst_15 {dimension_numbers = #tpu.dot_dimension_numbers<[1], [0], [0], [1], [0, 0, 1, 1], [], []>} : vector<64x32xbf16>, vector<32x96xbf16>, vector<64x96xf32> -> vector<64x96xf32>
    %c0_16 = arith.constant 0 : index
    %c0_17 = arith.constant 0 : index
    %30 = vector.load %arg6[%c0_16, %c0_17] : memref<1x96xf32, #tpu.memory_space<vmem>>, vector<1x96xf32>
    %31 = vector.broadcast %30 : vector<1x96xf32> to vector<64x96xf32>
    %32 = arith.addf %29, %31 : vector<64x96xf32>
    %33 = vector.extract_strided_slice %32 {offsets = [0, 0], sizes = [64, 8], strides = [1, 1]} : vector<64x96xf32> to vector<64x8xf32>
    %34 = arith.truncf %33 : vector<64x8xf32> to vector<64x8xbf16>
    %35 = vector.extract_strided_slice %32 {offsets = [0, 32], sizes = [64, 8], strides = [1, 1]} : vector<64x96xf32> to vector<64x8xf32>
    %36 = arith.truncf %35 : vector<64x8xf32> to vector<64x8xbf16>
    %37 = vector.extract_strided_slice %32 {offsets = [0, 64], sizes = [64, 8], strides = [1, 1]} : vector<64x96xf32> to vector<64x8xf32>
    %38 = arith.truncf %37 : vector<64x8xf32> to vector<64x8xbf16>
    %cst_18 = arith.constant dense<0.000000e+00> : vector<64x64xf32>
    %39 = tpu.matmul %34, %36, %cst_18 {dimension_numbers = #tpu.dot_dimension_numbers<[1], [1], [0], [0], [0, 0, 1, 0], [], []>} : vector<64x8xbf16>, vector<64x8xbf16>, vector<64x64xf32> -> vector<64x64xf32>
    %cst_19 = arith.constant 0.353553385 : f32
    %40 = vector.broadcast %cst_19 : f32 to vector<64x64xf32>
    %41 = arith.mulf %39, %40 : vector<64x64xf32>
    %cst_20 = arith.constant dense<0xFF800000> : vector<64xf32>
    %42 = vector.multi_reduction <maximumf>, %41, %cst_20 [1] : vector<64x64xf32> to vector<64xf32>
    %43 = vector.shape_cast %42 : vector<64xf32> to vector<64x1xf32>
    %44 = vector.broadcast %43 : vector<64x1xf32> to vector<64x64xf32>
    %45 = arith.subf %41, %44 : vector<64x64xf32>
    %46 = math.exp %45 : vector<64x64xf32>
    %cst_21 = arith.constant dense<0.000000e+00> : vector<64xf32>
    %47 = vector.multi_reduction <add>, %46, %cst_21 [1] : vector<64x64xf32> to vector<64xf32>
    %48 = vector.shape_cast %47 : vector<64xf32> to vector<64x1xf32>
    %49 = tpu.reciprocal %48 {approx = true} : vector<64x1xf32> -> vector<64x1xf32>
    %50 = vector.broadcast %49 : vector<64x1xf32> to vector<64x64xf32>
    %51 = arith.mulf %46, %50 : vector<64x64xf32>
    %52 = arith.truncf %51 : vector<64x64xf32> to vector<64x64xbf16>
    %cst_22 = arith.constant dense<0.000000e+00> : vector<64x8xf32>
    %53 = tpu.matmul %52, %38, %cst_22 {dimension_numbers = #tpu.dot_dimension_numbers<[1], [0], [0], [1], [0, 0, 1, 1], [], []>} : vector<64x64xbf16>, vector<64x8xbf16>, vector<64x8xf32> -> vector<64x8xf32>
    %54 = vector.extract_strided_slice %32 {offsets = [0, 8], sizes = [64, 8], strides = [1, 1]} : vector<64x96xf32> to vector<64x8xf32>
    %55 = arith.truncf %54 : vector<64x8xf32> to vector<64x8xbf16>
    %56 = vector.extract_strided_slice %32 {offsets = [0, 40], sizes = [64, 8], strides = [1, 1]} : vector<64x96xf32> to vector<64x8xf32>
    %57 = arith.truncf %56 : vector<64x8xf32> to vector<64x8xbf16>
    %58 = vector.extract_strided_slice %32 {offsets = [0, 72], sizes = [64, 8], strides = [1, 1]} : vector<64x96xf32> to vector<64x8xf32>
    %59 = arith.truncf %58 : vector<64x8xf32> to vector<64x8xbf16>
    %cst_23 = arith.constant dense<0.000000e+00> : vector<64x64xf32>
    %60 = tpu.matmul %55, %57, %cst_23 {dimension_numbers = #tpu.dot_dimension_numbers<[1], [1], [0], [0], [0, 0, 1, 0], [], []>} : vector<64x8xbf16>, vector<64x8xbf16>, vector<64x64xf32> -> vector<64x64xf32>
    %cst_24 = arith.constant 0.353553385 : f32
    %61 = vector.broadcast %cst_24 : f32 to vector<64x64xf32>
    %62 = arith.mulf %60, %61 : vector<64x64xf32>
    %cst_25 = arith.constant dense<0xFF800000> : vector<64xf32>
    %63 = vector.multi_reduction <maximumf>, %62, %cst_25 [1] : vector<64x64xf32> to vector<64xf32>
    %64 = vector.shape_cast %63 : vector<64xf32> to vector<64x1xf32>
    %65 = vector.broadcast %64 : vector<64x1xf32> to vector<64x64xf32>
    %66 = arith.subf %62, %65 : vector<64x64xf32>
    %67 = math.exp %66 : vector<64x64xf32>
    %cst_26 = arith.constant dense<0.000000e+00> : vector<64xf32>
    %68 = vector.multi_reduction <add>, %67, %cst_26 [1] : vector<64x64xf32> to vector<64xf32>
    %69 = vector.shape_cast %68 : vector<64xf32> to vector<64x1xf32>
    %70 = tpu.reciprocal %69 {approx = true} : vector<64x1xf32> -> vector<64x1xf32>
    %71 = vector.broadcast %70 : vector<64x1xf32> to vector<64x64xf32>
    %72 = arith.mulf %67, %71 : vector<64x64xf32>
    %73 = arith.truncf %72 : vector<64x64xf32> to vector<64x64xbf16>
    %cst_27 = arith.constant dense<0.000000e+00> : vector<64x8xf32>
    %74 = tpu.matmul %73, %59, %cst_27 {dimension_numbers = #tpu.dot_dimension_numbers<[1], [0], [0], [1], [0, 0, 1, 1], [], []>} : vector<64x64xbf16>, vector<64x8xbf16>, vector<64x8xf32> -> vector<64x8xf32>
    %75 = vector.extract_strided_slice %32 {offsets = [0, 16], sizes = [64, 8], strides = [1, 1]} : vector<64x96xf32> to vector<64x8xf32>
    %76 = arith.truncf %75 : vector<64x8xf32> to vector<64x8xbf16>
    %77 = vector.extract_strided_slice %32 {offsets = [0, 48], sizes = [64, 8], strides = [1, 1]} : vector<64x96xf32> to vector<64x8xf32>
    %78 = arith.truncf %77 : vector<64x8xf32> to vector<64x8xbf16>
    %79 = vector.extract_strided_slice %32 {offsets = [0, 80], sizes = [64, 8], strides = [1, 1]} : vector<64x96xf32> to vector<64x8xf32>
    %80 = arith.truncf %79 : vector<64x8xf32> to vector<64x8xbf16>
    %cst_28 = arith.constant dense<0.000000e+00> : vector<64x64xf32>
    %81 = tpu.matmul %76, %78, %cst_28 {dimension_numbers = #tpu.dot_dimension_numbers<[1], [1], [0], [0], [0, 0, 1, 0], [], []>} : vector<64x8xbf16>, vector<64x8xbf16>, vector<64x64xf32> -> vector<64x64xf32>
    %cst_29 = arith.constant 0.353553385 : f32
    %82 = vector.broadcast %cst_29 : f32 to vector<64x64xf32>
    %83 = arith.mulf %81, %82 : vector<64x64xf32>
    %cst_30 = arith.constant dense<0xFF800000> : vector<64xf32>
    %84 = vector.multi_reduction <maximumf>, %83, %cst_30 [1] : vector<64x64xf32> to vector<64xf32>
    %85 = vector.shape_cast %84 : vector<64xf32> to vector<64x1xf32>
    %86 = vector.broadcast %85 : vector<64x1xf32> to vector<64x64xf32>
    %87 = arith.subf %83, %86 : vector<64x64xf32>
    %88 = math.exp %87 : vector<64x64xf32>
    %cst_31 = arith.constant dense<0.000000e+00> : vector<64xf32>
    %89 = vector.multi_reduction <add>, %88, %cst_31 [1] : vector<64x64xf32> to vector<64xf32>
    %90 = vector.shape_cast %89 : vector<64xf32> to vector<64x1xf32>
    %91 = tpu.reciprocal %90 {approx = true} : vector<64x1xf32> -> vector<64x1xf32>
    %92 = vector.broadcast %91 : vector<64x1xf32> to vector<64x64xf32>
    %93 = arith.mulf %88, %92 : vector<64x64xf32>
    %94 = arith.truncf %93 : vector<64x64xf32> to vector<64x64xbf16>
    %cst_32 = arith.constant dense<0.000000e+00> : vector<64x8xf32>
    %95 = tpu.matmul %94, %80, %cst_32 {dimension_numbers = #tpu.dot_dimension_numbers<[1], [0], [0], [1], [0, 0, 1, 1], [], []>} : vector<64x64xbf16>, vector<64x8xbf16>, vector<64x8xf32> -> vector<64x8xf32>
    %96 = vector.extract_strided_slice %32 {offsets = [0, 24], sizes = [64, 8], strides = [1, 1]} : vector<64x96xf32> to vector<64x8xf32>
    %97 = arith.truncf %96 : vector<64x8xf32> to vector<64x8xbf16>
    %98 = vector.extract_strided_slice %32 {offsets = [0, 56], sizes = [64, 8], strides = [1, 1]} : vector<64x96xf32> to vector<64x8xf32>
    %99 = arith.truncf %98 : vector<64x8xf32> to vector<64x8xbf16>
    %100 = vector.extract_strided_slice %32 {offsets = [0, 88], sizes = [64, 8], strides = [1, 1]} : vector<64x96xf32> to vector<64x8xf32>
    %101 = arith.truncf %100 : vector<64x8xf32> to vector<64x8xbf16>
    %cst_33 = arith.constant dense<0.000000e+00> : vector<64x64xf32>
    %102 = tpu.matmul %97, %99, %cst_33 {dimension_numbers = #tpu.dot_dimension_numbers<[1], [1], [0], [0], [0, 0, 1, 0], [], []>} : vector<64x8xbf16>, vector<64x8xbf16>, vector<64x64xf32> -> vector<64x64xf32>
    %cst_34 = arith.constant 0.353553385 : f32
    %103 = vector.broadcast %cst_34 : f32 to vector<64x64xf32>
    %104 = arith.mulf %102, %103 : vector<64x64xf32>
    %cst_35 = arith.constant dense<0xFF800000> : vector<64xf32>
    %105 = vector.multi_reduction <maximumf>, %104, %cst_35 [1] : vector<64x64xf32> to vector<64xf32>
    %106 = vector.shape_cast %105 : vector<64xf32> to vector<64x1xf32>
    %107 = vector.broadcast %106 : vector<64x1xf32> to vector<64x64xf32>
    %108 = arith.subf %104, %107 : vector<64x64xf32>
    %109 = math.exp %108 : vector<64x64xf32>
    %cst_36 = arith.constant dense<0.000000e+00> : vector<64xf32>
    %110 = vector.multi_reduction <add>, %109, %cst_36 [1] : vector<64x64xf32> to vector<64xf32>
    %111 = vector.shape_cast %110 : vector<64xf32> to vector<64x1xf32>
    %112 = tpu.reciprocal %111 {approx = true} : vector<64x1xf32> -> vector<64x1xf32>
    %113 = vector.broadcast %112 : vector<64x1xf32> to vector<64x64xf32>
    %114 = arith.mulf %109, %113 : vector<64x64xf32>
    %115 = arith.truncf %114 : vector<64x64xf32> to vector<64x64xbf16>
    %cst_37 = arith.constant dense<0.000000e+00> : vector<64x8xf32>
    %116 = tpu.matmul %115, %101, %cst_37 {dimension_numbers = #tpu.dot_dimension_numbers<[1], [0], [0], [1], [0, 0, 1, 1], [], []>} : vector<64x64xbf16>, vector<64x8xbf16>, vector<64x8xf32> -> vector<64x8xf32>
    %117 = tpu.concatenate %53, %74, %95, %116 in 1 : vector<64x8xf32>, vector<64x8xf32>, vector<64x8xf32>, vector<64x8xf32> -> vector<64x32xf32>
    %118 = arith.truncf %117 : vector<64x32xf32> to vector<64x32xbf16>
    %c0_38 = arith.constant 0 : index
    %c0_39 = arith.constant 0 : index
    %119 = vector.load %arg7[%c0_38, %c0_39] : memref<32x32xbf16, #tpu.memory_space<vmem>>, vector<32x32xbf16>
    %cst_40 = arith.constant dense<0.000000e+00> : vector<64x32xf32>
    %120 = tpu.matmul %118, %119, %cst_40 {dimension_numbers = #tpu.dot_dimension_numbers<[1], [0], [0], [1], [0, 0, 1, 1], [], []>} : vector<64x32xbf16>, vector<32x32xbf16>, vector<64x32xf32> -> vector<64x32xf32>
    %c0_41 = arith.constant 0 : index
    %c0_42 = arith.constant 0 : index
    %121 = vector.load %arg8[%c0_41, %c0_42] : memref<1x32xf32, #tpu.memory_space<vmem>>, vector<1x32xf32>
    %122 = vector.broadcast %121 : vector<1x32xf32> to vector<64x32xf32>
    %123 = arith.addf %120, %122 : vector<64x32xf32>
    %124 = arith.addf %1, %123 : vector<64x32xf32>
    %c0_43 = arith.constant 0 : index
    %c0_44 = arith.constant 0 : index
    %c0_45 = arith.constant 0 : index
    %125 = vector.load %arg9[%c0_43, %c0_44, %c0_45] : memref<1x64x32xf32, #tpu.memory_space<vmem>>, vector<1x64x32xf32>
    %126 = vector.shape_cast %125 : vector<1x64x32xf32> to vector<64x32xf32>
    %127 = vector.shape_cast %124 : vector<64x32xf32> to vector<1x64x32xf32>
    tpu.vector_store %arg9[%c0_43, %c0_44, %c0_45], %127 {strides = array<i32>} : memref<1x64x32xf32, #tpu.memory_space<vmem>>, vector<1x64x32xf32>,
    return
  }
  func.func @transform_0(%arg0: i32) -> (i32, i32, i32) {
    %c0_i32 = arith.constant 0 : i32
    %c0_i32_0 = arith.constant 0 : i32
    %c0_i32_1 = arith.constant 0 : i32
    return %arg0, %c0_i32, %c0_i32_0 : i32, i32, i32
  }
  func.func @transform_1(%arg0: i32) -> (i32, i32) {
    %c0_i32 = arith.constant 0 : i32
    %c0_i32_0 = arith.constant 0 : i32
    %c0_i32_1 = arith.constant 0 : i32
    return %c0_i32, %c0_i32_0 : i32, i32
  }
  func.func @transform_2(%arg0: i32) -> (i32, i32) {
    %c0_i32 = arith.constant 0 : i32
    %c0_i32_0 = arith.constant 0 : i32
    %c0_i32_1 = arith.constant 0 : i32
    return %c0_i32, %c0_i32_0 : i32, i32
  }
  func.func @transform_3(%arg0: i32) -> (i32, i32) {
    %c0_i32 = arith.constant 0 : i32
    %c0_i32_0 = arith.constant 0 : i32
    %c0_i32_1 = arith.constant 0 : i32
    return %c0_i32, %c0_i32_0 : i32, i32
  }
  func.func @transform_4(%arg0: i32) -> (i32, i32) {
    %c0_i32 = arith.constant 0 : i32
    %c0_i32_0 = arith.constant 0 : i32
    %c0_i32_1 = arith.constant 0 : i32
    return %c0_i32, %c0_i32_0 : i32, i32
  }
  func.func @transform_5(%arg0: i32) -> (i32, i32) {
    %c0_i32 = arith.constant 0 : i32
    %c0_i32_0 = arith.constant 0 : i32
    %c0_i32_1 = arith.constant 0 : i32
    return %c0_i32, %c0_i32_0 : i32, i32
  }
  func.func @transform_6(%arg0: i32) -> (i32, i32) {
    %c0_i32 = arith.constant 0 : i32
    %c0_i32_0 = arith.constant 0 : i32
    %c0_i32_1 = arith.constant 0 : i32
    return %c0_i32, %c0_i32_0 : i32, i32
  }
  func.func @transform_7(%arg0: i32) -> (i32, i32) {
    %c0_i32 = arith.constant 0 : i32
    %c0_i32_0 = arith.constant 0 : i32
    %c0_i32_1 = arith.constant 0 : i32
    return %c0_i32, %c0_i32_0 : i32, i32
  }
  func.func @transform_8(%arg0: i32) -> (i32, i32, i32) {
    %c0_i32 = arith.constant 0 : i32
    %c0_i32_0 = arith.constant 0 : i32
    %c0_i32_1 = arith.constant 0 : i32
    return %arg0, %c0_i32, %c0_i32_0 : i32, i32, i32
  }
}

module attributes {stable_mosaic.version = 11 : i64} {
  func.func @_resnet_block_kernel(%arg0: i32, %arg1: memref<1x64x32xf32, #tpu.memory_space<vmem>>, %arg2: memref<1x1x32xf32, #tpu.memory_space<vmem>>, %arg3: memref<1x32xf32, #tpu.memory_space<vmem>>, %arg4: memref<1x32xf32, #tpu.memory_space<vmem>>, %arg5: memref<32x32xf32, #tpu.memory_space<vmem>>, %arg6: memref<288x32xbf16, #tpu.memory_space<vmem>>, %arg7: memref<1x32xf32, #tpu.memory_space<vmem>>, %arg8: memref<1x32xf32, #tpu.memory_space<vmem>>, %arg9: memref<32x32xf32, #tpu.memory_space<vmem>>, %arg10: memref<288x32xbf16, #tpu.memory_space<vmem>>, %arg11: memref<1x32xf32, #tpu.memory_space<vmem>>, %arg12: memref<32x32xbf16, #tpu.memory_space<vmem>>, %arg13: memref<1x32xf32, #tpu.memory_space<vmem>>, %arg14: memref<1x64x32xf32, #tpu.memory_space<vmem>>, %arg15: memref<10x16x32xbf16, #tpu.memory_space<vmem>>, %arg16: memref<10x16x32xbf16, #tpu.memory_space<vmem>>) attributes {dimension_semantics = [#tpu.dimension_semantics<parallel>], iteration_bounds = array<i64: 2>, scalar_prefetch = 0 : i64, scratch_operands = 2 : i64, tpu.core_type = #tpu.core_type<tc>, window_params = [{transform_indices = @transform_0, window_bounds = array<i64: 1, 64, 32>}, {transform_indices = @transform_1, window_bounds = array<i64: 1, 1, 32>}, {pipeline_mode = #tpu.pipeline_mode<synchronous>, transform_indices = @transform_2, window_bounds = array<i64: 1, 32>}, {pipeline_mode = #tpu.pipeline_mode<synchronous>, transform_indices = @transform_3, window_bounds = array<i64: 1, 32>}, {pipeline_mode = #tpu.pipeline_mode<synchronous>, transform_indices = @transform_4, window_bounds = array<i64: 32, 32>}, {pipeline_mode = #tpu.pipeline_mode<synchronous>, transform_indices = @transform_5, window_bounds = array<i64: 288, 32>}, {pipeline_mode = #tpu.pipeline_mode<synchronous>, transform_indices = @transform_6, window_bounds = array<i64: 1, 32>}, {pipeline_mode = #tpu.pipeline_mode<synchronous>, transform_indices = @transform_7, window_bounds = array<i64: 1, 32>}, {pipeline_mode = #tpu.pipeline_mode<synchronous>, transform_indices = @transform_8, window_bounds = array<i64: 32, 32>}, {pipeline_mode = #tpu.pipeline_mode<synchronous>, transform_indices = @transform_9, window_bounds = array<i64: 288, 32>}, {pipeline_mode = #tpu.pipeline_mode<synchronous>, transform_indices = @transform_10, window_bounds = array<i64: 1, 32>}, {pipeline_mode = #tpu.pipeline_mode<synchronous>, transform_indices = @transform_11, window_bounds = array<i64: 32, 32>}, {pipeline_mode = #tpu.pipeline_mode<synchronous>, transform_indices = @transform_12, window_bounds = array<i64: 1, 32>}, {transform_indices = @transform_13, window_bounds = array<i64: 1, 64, 32>}]} {
    %c0 = arith.constant 0 : index
    %c0_0 = arith.constant 0 : index
    %c0_1 = arith.constant 0 : index
    %0 = vector.load %arg1[%c0, %c0_0, %c0_1] : memref<1x64x32xf32, #tpu.memory_space<vmem>>, vector<1x64x32xf32>
    %1 = vector.shape_cast %0 : vector<1x64x32xf32> to vector<64x32xf32>
    %c0_2 = arith.constant 0 : index
    %c0_3 = arith.constant 0 : index
    %2 = vector.load %arg3[%c0_2, %c0_3] : memref<1x32xf32, #tpu.memory_space<vmem>>, vector<1x32xf32>
    %c0_4 = arith.constant 0 : index
    %c0_5 = arith.constant 0 : index
    %3 = vector.load %arg4[%c0_4, %c0_5] : memref<1x32xf32, #tpu.memory_space<vmem>>, vector<1x32xf32>
    %c0_6 = arith.constant 0 : index
    %c0_7 = arith.constant 0 : index
    %4 = vector.load %arg5[%c0_6, %c0_7] : memref<32x32xf32, #tpu.memory_space<vmem>>, vector<32x32xf32>
    %cst = arith.constant dense<0.000000e+00> : vector<32xf32>
    %5 = vector.multi_reduction <add>, %1, %cst [0] : vector<64x32xf32> to vector<32xf32>
    %6 = vector.shape_cast %5 : vector<32xf32> to vector<1x32xf32>
    %7 = arith.mulf %1, %1 : vector<64x32xf32>
    %cst_8 = arith.constant dense<0.000000e+00> : vector<32xf32>
    %8 = vector.multi_reduction <add>, %7, %cst_8 [0] : vector<64x32xf32> to vector<32xf32>
    %9 = vector.shape_cast %8 : vector<32xf32> to vector<1x32xf32>
    %cst_9 = arith.constant dense<0.000000e+00> : vector<1x32xf32>
    %10 = tpu.matmul %6, %4, %cst_9 {dimension_numbers = #tpu.dot_dimension_numbers<[1], [0], [0], [1], [0, 0, 1, 1], [], []>} : vector<1x32xf32>, vector<32x32xf32>, vector<1x32xf32> -> vector<1x32xf32>
    %cst_10 = arith.constant dense<0.000000e+00> : vector<1x32xf32>
    %11 = tpu.matmul %9, %4, %cst_10 {dimension_numbers = #tpu.dot_dimension_numbers<[1], [0], [0], [1], [0, 0, 1, 1], [], []>} : vector<1x32xf32>, vector<32x32xf32>, vector<1x32xf32> -> vector<1x32xf32>
    %12 = arith.mulf %10, %10 : vector<1x32xf32>
    %13 = arith.subf %11, %12 : vector<1x32xf32>
    %cst_11 = arith.constant 0.000000e+00 : f32
    %14 = vector.broadcast %cst_11 : f32 to vector<1x32xf32>
    %15 = arith.maximumf %13, %14 : vector<1x32xf32>
    %16 = vector.broadcast %10 : vector<1x32xf32> to vector<64x32xf32>
    %17 = arith.subf %1, %16 : vector<64x32xf32>
    %cst_12 = arith.constant 9.99999974E-6 : f32
    %18 = vector.broadcast %cst_12 : f32 to vector<1x32xf32>
    %19 = arith.addf %15, %18 : vector<1x32xf32>
    %20 = math.rsqrt %19 : vector<1x32xf32>
    %21 = vector.broadcast %20 : vector<1x32xf32> to vector<64x32xf32>
    %22 = arith.mulf %17, %21 : vector<64x32xf32>
    %23 = vector.broadcast %2 : vector<1x32xf32> to vector<64x32xf32>
    %24 = arith.mulf %22, %23 : vector<64x32xf32>
    %25 = vector.broadcast %3 : vector<1x32xf32> to vector<64x32xf32>
    %26 = arith.addf %24, %25 : vector<64x32xf32>
    %27 = arith.negf %26 : vector<64x32xf32>
    %28 = math.exp %27 : vector<64x32xf32>
    %cst_13 = arith.constant 1.000000e+00 : f32
    %29 = vector.broadcast %cst_13 : f32 to vector<64x32xf32>
    %30 = arith.addf %29, %28 : vector<64x32xf32>
    %31 = arith.divf %29, %30 : vector<64x32xf32>
    %32 = arith.mulf %26, %31 : vector<64x32xf32>
    %cst_14 = arith.constant 0.000000e+00 : bf16
    %33 = vector.broadcast %cst_14 : bf16 to vector<1x16x32xbf16>
    %c0_15 = arith.constant 0 : index
    %c0_16 = arith.constant 0 : index
    %c0_17 = arith.constant 0 : index
    %34 = vector.load %arg15[%c0_15, %c0_16, %c0_17] : memref<10x16x32xbf16, #tpu.memory_space<vmem>>, vector<1x16x32xbf16>
    tpu.vector_store %arg15[%c0_15, %c0_16, %c0_17], %33 {strides = array<i32>} : memref<10x16x32xbf16, #tpu.memory_space<vmem>>, vector<1x16x32xbf16>,
    %c9 = arith.constant 9 : index
    %c0_18 = arith.constant 0 : index
    %c0_19 = arith.constant 0 : index
    %35 = vector.load %arg15[%c9, %c0_18, %c0_19] : memref<10x16x32xbf16, #tpu.memory_space<vmem>>, vector<1x16x32xbf16>
    tpu.vector_store %arg15[%c9, %c0_18, %c0_19], %33 {strides = array<i32>} : memref<10x16x32xbf16, #tpu.memory_space<vmem>>, vector<1x16x32xbf16>,
    %cst_20 = arith.constant 0.000000e+00 : bf16
    %36 = vector.broadcast %cst_20 : bf16 to vector<10x1x32xbf16>
    %c0_21 = arith.constant 0 : index
    %c0_22 = arith.constant 0 : index
    %c0_23 = arith.constant 0 : index
    %37 = vector.load %arg15[%c0_21, %c0_22, %c0_23] : memref<10x16x32xbf16, #tpu.memory_space<vmem>>, vector<10x1x32xbf16>
    tpu.vector_store %arg15[%c0_21, %c0_22, %c0_23], %36 {strides = array<i32>} : memref<10x16x32xbf16, #tpu.memory_space<vmem>>, vector<10x1x32xbf16>,
    %c0_24 = arith.constant 0 : index
    %c9_25 = arith.constant 9 : index
    %c0_26 = arith.constant 0 : index
    %38 = vector.load %arg15[%c0_24, %c9_25, %c0_26] : memref<10x16x32xbf16, #tpu.memory_space<vmem>>, vector<10x1x32xbf16>
    tpu.vector_store %arg15[%c0_24, %c9_25, %c0_26], %36 {strides = array<i32>} : memref<10x16x32xbf16, #tpu.memory_space<vmem>>, vector<10x1x32xbf16>,
    %39 = vector.shape_cast %32 : vector<64x32xf32> to vector<8x8x32xf32>
    %40 = arith.truncf %39 : vector<8x8x32xf32> to vector<8x8x32xbf16>
    %c1 = arith.constant 1 : index
    %c1_27 = arith.constant 1 : index
    %c0_28 = arith.constant 0 : index
    %41 = vector.load %arg15[%c1, %c1_27, %c0_28] : memref<10x16x32xbf16, #tpu.memory_space<vmem>>, vector<8x8x32xbf16>
    tpu.vector_store %arg15[%c1, %c1_27, %c0_28], %40 {strides = array<i32>} : memref<10x16x32xbf16, #tpu.memory_space<vmem>>, vector<8x8x32xbf16>,
    %c0_29 = arith.constant 0 : index
    %c0_30 = arith.constant 0 : index
    %c0_31 = arith.constant 0 : index
    %42 = vector.load %arg2[%c0_29, %c0_30, %c0_31] : memref<1x1x32xf32, #tpu.memory_space<vmem>>, vector<1x1x32xf32>
    %43 = vector.shape_cast %42 : vector<1x1x32xf32> to vector<1x32xf32>
    %c0_32 = arith.constant 0 : index
    %c0_33 = arith.constant 0 : index
    %c0_34 = arith.constant 0 : index
    %44 = vector.load %arg15[%c0_32, %c0_33, %c0_34] : memref<10x16x32xbf16, #tpu.memory_space<vmem>>, vector<8x8x32xbf16>
    %45 = vector.shape_cast %44 : vector<8x8x32xbf16> to vector<64x32xbf16>
    %c0_35 = arith.constant 0 : index
    %c0_36 = arith.constant 0 : index
    %46 = vector.load %arg6[%c0_35, %c0_36] : memref<288x32xbf16, #tpu.memory_space<vmem>>, vector<32x32xbf16>
    %cst_37 = arith.constant dense<0.000000e+00> : vector<64x32xf32>
    %47 = tpu.matmul %45, %46, %cst_37 {dimension_numbers = #tpu.dot_dimension_numbers<[1], [0], [0], [1], [0, 0, 1, 1], [], []>} : vector<64x32xbf16>, vector<32x32xbf16>, vector<64x32xf32> -> vector<64x32xf32>
    %48 = vector.broadcast %43 : vector<1x32xf32> to vector<64x32xf32>
    %49 = arith.addf %48, %47 : vector<64x32xf32>
    %c0_38 = arith.constant 0 : index
    %c1_39 = arith.constant 1 : index
    %c0_40 = arith.constant 0 : index
    %50 = vector.load %arg15[%c0_38, %c1_39, %c0_40] : memref<10x16x32xbf16, #tpu.memory_space<vmem>>, vector<8x8x32xbf16>
    %51 = vector.shape_cast %50 : vector<8x8x32xbf16> to vector<64x32xbf16>
    %c32 = arith.constant 32 : index
    %c0_41 = arith.constant 0 : index
    %52 = vector.load %arg6[%c32, %c0_41] : memref<288x32xbf16, #tpu.memory_space<vmem>>, vector<32x32xbf16>
    %cst_42 = arith.constant dense<0.000000e+00> : vector<64x32xf32>
    %53 = tpu.matmul %51, %52, %cst_42 {dimension_numbers = #tpu.dot_dimension_numbers<[1], [0], [0], [1], [0, 0, 1, 1], [], []>} : vector<64x32xbf16>, vector<32x32xbf16>, vector<64x32xf32> -> vector<64x32xf32>
    %54 = arith.addf %49, %53 : vector<64x32xf32>
    %c0_43 = arith.constant 0 : index
    %c2 = arith.constant 2 : index
    %c0_44 = arith.constant 0 : index
    %55 = vector.load %arg15[%c0_43, %c2, %c0_44] : memref<10x16x32xbf16, #tpu.memory_space<vmem>>, vector<8x8x32xbf16>
    %56 = vector.shape_cast %55 : vector<8x8x32xbf16> to vector<64x32xbf16>
    %c64 = arith.constant 64 : index
    %c0_45 = arith.constant 0 : index
    %57 = vector.load %arg6[%c64, %c0_45] : memref<288x32xbf16, #tpu.memory_space<vmem>>, vector<32x32xbf16>
    %cst_46 = arith.constant dense<0.000000e+00> : vector<64x32xf32>
    %58 = tpu.matmul %56, %57, %cst_46 {dimension_numbers = #tpu.dot_dimension_numbers<[1], [0], [0], [1], [0, 0, 1, 1], [], []>} : vector<64x32xbf16>, vector<32x32xbf16>, vector<64x32xf32> -> vector<64x32xf32>
    %59 = arith.addf %54, %58 : vector<64x32xf32>
    %c1_47 = arith.constant 1 : index
    %c0_48 = arith.constant 0 : index
    %c0_49 = arith.constant 0 : index
    %60 = vector.load %arg15[%c1_47, %c0_48, %c0_49] : memref<10x16x32xbf16, #tpu.memory_space<vmem>>, vector<8x8x32xbf16>
    %61 = vector.shape_cast %60 : vector<8x8x32xbf16> to vector<64x32xbf16>
    %c96 = arith.constant 96 : index
    %c0_50 = arith.constant 0 : index
    %62 = vector.load %arg6[%c96, %c0_50] : memref<288x32xbf16, #tpu.memory_space<vmem>>, vector<32x32xbf16>
    %cst_51 = arith.constant dense<0.000000e+00> : vector<64x32xf32>
    %63 = tpu.matmul %61, %62, %cst_51 {dimension_numbers = #tpu.dot_dimension_numbers<[1], [0], [0], [1], [0, 0, 1, 1], [], []>} : vector<64x32xbf16>, vector<32x32xbf16>, vector<64x32xf32> -> vector<64x32xf32>
    %64 = arith.addf %59, %63 : vector<64x32xf32>
    %c1_52 = arith.constant 1 : index
    %c1_53 = arith.constant 1 : index
    %c0_54 = arith.constant 0 : index
    %65 = vector.load %arg15[%c1_52, %c1_53, %c0_54] : memref<10x16x32xbf16, #tpu.memory_space<vmem>>, vector<8x8x32xbf16>
    %66 = vector.shape_cast %65 : vector<8x8x32xbf16> to vector<64x32xbf16>
    %c128 = arith.constant 128 : index
    %c0_55 = arith.constant 0 : index
    %67 = vector.load %arg6[%c128, %c0_55] : memref<288x32xbf16, #tpu.memory_space<vmem>>, vector<32x32xbf16>
    %cst_56 = arith.constant dense<0.000000e+00> : vector<64x32xf32>
    %68 = tpu.matmul %66, %67, %cst_56 {dimension_numbers = #tpu.dot_dimension_numbers<[1], [0], [0], [1], [0, 0, 1, 1], [], []>} : vector<64x32xbf16>, vector<32x32xbf16>, vector<64x32xf32> -> vector<64x32xf32>
    %69 = arith.addf %64, %68 : vector<64x32xf32>
    %c1_57 = arith.constant 1 : index
    %c2_58 = arith.constant 2 : index
    %c0_59 = arith.constant 0 : index
    %70 = vector.load %arg15[%c1_57, %c2_58, %c0_59] : memref<10x16x32xbf16, #tpu.memory_space<vmem>>, vector<8x8x32xbf16>
    %71 = vector.shape_cast %70 : vector<8x8x32xbf16> to vector<64x32xbf16>
    %c160 = arith.constant 160 : index
    %c0_60 = arith.constant 0 : index
    %72 = vector.load %arg6[%c160, %c0_60] : memref<288x32xbf16, #tpu.memory_space<vmem>>, vector<32x32xbf16>
    %cst_61 = arith.constant dense<0.000000e+00> : vector<64x32xf32>
    %73 = tpu.matmul %71, %72, %cst_61 {dimension_numbers = #tpu.dot_dimension_numbers<[1], [0], [0], [1], [0, 0, 1, 1], [], []>} : vector<64x32xbf16>, vector<32x32xbf16>, vector<64x32xf32> -> vector<64x32xf32>
    %74 = arith.addf %69, %73 : vector<64x32xf32>
    %c2_62 = arith.constant 2 : index
    %c0_63 = arith.constant 0 : index
    %c0_64 = arith.constant 0 : index
    %75 = vector.load %arg15[%c2_62, %c0_63, %c0_64] : memref<10x16x32xbf16, #tpu.memory_space<vmem>>, vector<8x8x32xbf16>
    %76 = vector.shape_cast %75 : vector<8x8x32xbf16> to vector<64x32xbf16>
    %c192 = arith.constant 192 : index
    %c0_65 = arith.constant 0 : index
    %77 = vector.load %arg6[%c192, %c0_65] : memref<288x32xbf16, #tpu.memory_space<vmem>>, vector<32x32xbf16>
    %cst_66 = arith.constant dense<0.000000e+00> : vector<64x32xf32>
    %78 = tpu.matmul %76, %77, %cst_66 {dimension_numbers = #tpu.dot_dimension_numbers<[1], [0], [0], [1], [0, 0, 1, 1], [], []>} : vector<64x32xbf16>, vector<32x32xbf16>, vector<64x32xf32> -> vector<64x32xf32>
    %79 = arith.addf %74, %78 : vector<64x32xf32>
    %c2_67 = arith.constant 2 : index
    %c1_68 = arith.constant 1 : index
    %c0_69 = arith.constant 0 : index
    %80 = vector.load %arg15[%c2_67, %c1_68, %c0_69] : memref<10x16x32xbf16, #tpu.memory_space<vmem>>, vector<8x8x32xbf16>
    %81 = vector.shape_cast %80 : vector<8x8x32xbf16> to vector<64x32xbf16>
    %c224 = arith.constant 224 : index
    %c0_70 = arith.constant 0 : index
    %82 = vector.load %arg6[%c224, %c0_70] : memref<288x32xbf16, #tpu.memory_space<vmem>>, vector<32x32xbf16>
    %cst_71 = arith.constant dense<0.000000e+00> : vector<64x32xf32>
    %83 = tpu.matmul %81, %82, %cst_71 {dimension_numbers = #tpu.dot_dimension_numbers<[1], [0], [0], [1], [0, 0, 1, 1], [], []>} : vector<64x32xbf16>, vector<32x32xbf16>, vector<64x32xf32> -> vector<64x32xf32>
    %84 = arith.addf %79, %83 : vector<64x32xf32>
    %c2_72 = arith.constant 2 : index
    %c2_73 = arith.constant 2 : index
    %c0_74 = arith.constant 0 : index
    %85 = vector.load %arg15[%c2_72, %c2_73, %c0_74] : memref<10x16x32xbf16, #tpu.memory_space<vmem>>, vector<8x8x32xbf16>
    %86 = vector.shape_cast %85 : vector<8x8x32xbf16> to vector<64x32xbf16>
    %c256 = arith.constant 256 : index
    %c0_75 = arith.constant 0 : index
    %87 = vector.load %arg6[%c256, %c0_75] : memref<288x32xbf16, #tpu.memory_space<vmem>>, vector<32x32xbf16>
    %cst_76 = arith.constant dense<0.000000e+00> : vector<64x32xf32>
    %88 = tpu.matmul %86, %87, %cst_76 {dimension_numbers = #tpu.dot_dimension_numbers<[1], [0], [0], [1], [0, 0, 1, 1], [], []>} : vector<64x32xbf16>, vector<32x32xbf16>, vector<64x32xf32> -> vector<64x32xf32>
    %89 = arith.addf %84, %88 : vector<64x32xf32>
    %c0_77 = arith.constant 0 : index
    %c0_78 = arith.constant 0 : index
    %90 = vector.load %arg7[%c0_77, %c0_78] : memref<1x32xf32, #tpu.memory_space<vmem>>, vector<1x32xf32>
    %c0_79 = arith.constant 0 : index
    %c0_80 = arith.constant 0 : index
    %91 = vector.load %arg8[%c0_79, %c0_80] : memref<1x32xf32, #tpu.memory_space<vmem>>, vector<1x32xf32>
    %c0_81 = arith.constant 0 : index
    %c0_82 = arith.constant 0 : index
    %92 = vector.load %arg9[%c0_81, %c0_82] : memref<32x32xf32, #tpu.memory_space<vmem>>, vector<32x32xf32>
    %cst_83 = arith.constant dense<0.000000e+00> : vector<32xf32>
    %93 = vector.multi_reduction <add>, %89, %cst_83 [0] : vector<64x32xf32> to vector<32xf32>
    %94 = vector.shape_cast %93 : vector<32xf32> to vector<1x32xf32>
    %95 = arith.mulf %89, %89 : vector<64x32xf32>
    %cst_84 = arith.constant dense<0.000000e+00> : vector<32xf32>
    %96 = vector.multi_reduction <add>, %95, %cst_84 [0] : vector<64x32xf32> to vector<32xf32>
    %97 = vector.shape_cast %96 : vector<32xf32> to vector<1x32xf32>
    %cst_85 = arith.constant dense<0.000000e+00> : vector<1x32xf32>
    %98 = tpu.matmul %94, %92, %cst_85 {dimension_numbers = #tpu.dot_dimension_numbers<[1], [0], [0], [1], [0, 0, 1, 1], [], []>} : vector<1x32xf32>, vector<32x32xf32>, vector<1x32xf32> -> vector<1x32xf32>
    %cst_86 = arith.constant dense<0.000000e+00> : vector<1x32xf32>
    %99 = tpu.matmul %97, %92, %cst_86 {dimension_numbers = #tpu.dot_dimension_numbers<[1], [0], [0], [1], [0, 0, 1, 1], [], []>} : vector<1x32xf32>, vector<32x32xf32>, vector<1x32xf32> -> vector<1x32xf32>
    %100 = arith.mulf %98, %98 : vector<1x32xf32>
    %101 = arith.subf %99, %100 : vector<1x32xf32>
    %cst_87 = arith.constant 0.000000e+00 : f32
    %102 = vector.broadcast %cst_87 : f32 to vector<1x32xf32>
    %103 = arith.maximumf %101, %102 : vector<1x32xf32>
    %104 = vector.broadcast %98 : vector<1x32xf32> to vector<64x32xf32>
    %105 = arith.subf %89, %104 : vector<64x32xf32>
    %cst_88 = arith.constant 9.99999974E-6 : f32
    %106 = vector.broadcast %cst_88 : f32 to vector<1x32xf32>
    %107 = arith.addf %103, %106 : vector<1x32xf32>
    %108 = math.rsqrt %107 : vector<1x32xf32>
    %109 = vector.broadcast %108 : vector<1x32xf32> to vector<64x32xf32>
    %110 = arith.mulf %105, %109 : vector<64x32xf32>
    %111 = vector.broadcast %90 : vector<1x32xf32> to vector<64x32xf32>
    %112 = arith.mulf %110, %111 : vector<64x32xf32>
    %113 = vector.broadcast %91 : vector<1x32xf32> to vector<64x32xf32>
    %114 = arith.addf %112, %113 : vector<64x32xf32>
    %115 = arith.negf %114 : vector<64x32xf32>
    %116 = math.exp %115 : vector<64x32xf32>
    %cst_89 = arith.constant 1.000000e+00 : f32
    %117 = vector.broadcast %cst_89 : f32 to vector<64x32xf32>
    %118 = arith.addf %117, %116 : vector<64x32xf32>
    %119 = arith.divf %117, %118 : vector<64x32xf32>
    %120 = arith.mulf %114, %119 : vector<64x32xf32>
    %cst_90 = arith.constant 0.000000e+00 : bf16
    %121 = vector.broadcast %cst_90 : bf16 to vector<1x16x32xbf16>
    %c0_91 = arith.constant 0 : index
    %c0_92 = arith.constant 0 : index
    %c0_93 = arith.constant 0 : index
    %122 = vector.load %arg16[%c0_91, %c0_92, %c0_93] : memref<10x16x32xbf16, #tpu.memory_space<vmem>>, vector<1x16x32xbf16>
    tpu.vector_store %arg16[%c0_91, %c0_92, %c0_93], %121 {strides = array<i32>} : memref<10x16x32xbf16, #tpu.memory_space<vmem>>, vector<1x16x32xbf16>,
    %c9_94 = arith.constant 9 : index
    %c0_95 = arith.constant 0 : index
    %c0_96 = arith.constant 0 : index
    %123 = vector.load %arg16[%c9_94, %c0_95, %c0_96] : memref<10x16x32xbf16, #tpu.memory_space<vmem>>, vector<1x16x32xbf16>
    tpu.vector_store %arg16[%c9_94, %c0_95, %c0_96], %121 {strides = array<i32>} : memref<10x16x32xbf16, #tpu.memory_space<vmem>>, vector<1x16x32xbf16>,
    %cst_97 = arith.constant 0.000000e+00 : bf16
    %124 = vector.broadcast %cst_97 : bf16 to vector<10x1x32xbf16>
    %c0_98 = arith.constant 0 : index
    %c0_99 = arith.constant 0 : index
    %c0_100 = arith.constant 0 : index
    %125 = vector.load %arg16[%c0_98, %c0_99, %c0_100] : memref<10x16x32xbf16, #tpu.memory_space<vmem>>, vector<10x1x32xbf16>
    tpu.vector_store %arg16[%c0_98, %c0_99, %c0_100], %124 {strides = array<i32>} : memref<10x16x32xbf16, #tpu.memory_space<vmem>>, vector<10x1x32xbf16>,
    %c0_101 = arith.constant 0 : index
    %c9_102 = arith.constant 9 : index
    %c0_103 = arith.constant 0 : index
    %126 = vector.load %arg16[%c0_101, %c9_102, %c0_103] : memref<10x16x32xbf16, #tpu.memory_space<vmem>>, vector<10x1x32xbf16>
    tpu.vector_store %arg16[%c0_101, %c9_102, %c0_103], %124 {strides = array<i32>} : memref<10x16x32xbf16, #tpu.memory_space<vmem>>, vector<10x1x32xbf16>,
    %127 = vector.shape_cast %120 : vector<64x32xf32> to vector<8x8x32xf32>
    %128 = arith.truncf %127 : vector<8x8x32xf32> to vector<8x8x32xbf16>
    %c1_104 = arith.constant 1 : index
    %c1_105 = arith.constant 1 : index
    %c0_106 = arith.constant 0 : index
    %129 = vector.load %arg16[%c1_104, %c1_105, %c0_106] : memref<10x16x32xbf16, #tpu.memory_space<vmem>>, vector<8x8x32xbf16>
    tpu.vector_store %arg16[%c1_104, %c1_105, %c0_106], %128 {strides = array<i32>} : memref<10x16x32xbf16, #tpu.memory_space<vmem>>, vector<8x8x32xbf16>,
    %c0_107 = arith.constant 0 : index
    %c0_108 = arith.constant 0 : index
    %130 = vector.load %arg11[%c0_107, %c0_108] : memref<1x32xf32, #tpu.memory_space<vmem>>, vector<1x32xf32>
    %c0_109 = arith.constant 0 : index
    %c0_110 = arith.constant 0 : index
    %c0_111 = arith.constant 0 : index
    %131 = vector.load %arg16[%c0_109, %c0_110, %c0_111] : memref<10x16x32xbf16, #tpu.memory_space<vmem>>, vector<8x8x32xbf16>
    %132 = vector.shape_cast %131 : vector<8x8x32xbf16> to vector<64x32xbf16>
    %c0_112 = arith.constant 0 : index
    %c0_113 = arith.constant 0 : index
    %133 = vector.load %arg10[%c0_112, %c0_113] : memref<288x32xbf16, #tpu.memory_space<vmem>>, vector<32x32xbf16>
    %cst_114 = arith.constant dense<0.000000e+00> : vector<64x32xf32>
    %134 = tpu.matmul %132, %133, %cst_114 {dimension_numbers = #tpu.dot_dimension_numbers<[1], [0], [0], [1], [0, 0, 1, 1], [], []>} : vector<64x32xbf16>, vector<32x32xbf16>, vector<64x32xf32> -> vector<64x32xf32>
    %135 = vector.broadcast %130 : vector<1x32xf32> to vector<64x32xf32>
    %136 = arith.addf %135, %134 : vector<64x32xf32>
    %c0_115 = arith.constant 0 : index
    %c1_116 = arith.constant 1 : index
    %c0_117 = arith.constant 0 : index
    %137 = vector.load %arg16[%c0_115, %c1_116, %c0_117] : memref<10x16x32xbf16, #tpu.memory_space<vmem>>, vector<8x8x32xbf16>
    %138 = vector.shape_cast %137 : vector<8x8x32xbf16> to vector<64x32xbf16>
    %c32_118 = arith.constant 32 : index
    %c0_119 = arith.constant 0 : index
    %139 = vector.load %arg10[%c32_118, %c0_119] : memref<288x32xbf16, #tpu.memory_space<vmem>>, vector<32x32xbf16>
    %cst_120 = arith.constant dense<0.000000e+00> : vector<64x32xf32>
    %140 = tpu.matmul %138, %139, %cst_120 {dimension_numbers = #tpu.dot_dimension_numbers<[1], [0], [0], [1], [0, 0, 1, 1], [], []>} : vector<64x32xbf16>, vector<32x32xbf16>, vector<64x32xf32> -> vector<64x32xf32>
    %141 = arith.addf %136, %140 : vector<64x32xf32>
    %c0_121 = arith.constant 0 : index
    %c2_122 = arith.constant 2 : index
    %c0_123 = arith.constant 0 : index
    %142 = vector.load %arg16[%c0_121, %c2_122, %c0_123] : memref<10x16x32xbf16, #tpu.memory_space<vmem>>, vector<8x8x32xbf16>
    %143 = vector.shape_cast %142 : vector<8x8x32xbf16> to vector<64x32xbf16>
    %c64_124 = arith.constant 64 : index
    %c0_125 = arith.constant 0 : index
    %144 = vector.load %arg10[%c64_124, %c0_125] : memref<288x32xbf16, #tpu.memory_space<vmem>>, vector<32x32xbf16>
    %cst_126 = arith.constant dense<0.000000e+00> : vector<64x32xf32>
    %145 = tpu.matmul %143, %144, %cst_126 {dimension_numbers = #tpu.dot_dimension_numbers<[1], [0], [0], [1], [0, 0, 1, 1], [], []>} : vector<64x32xbf16>, vector<32x32xbf16>, vector<64x32xf32> -> vector<64x32xf32>
    %146 = arith.addf %141, %145 : vector<64x32xf32>
    %c1_127 = arith.constant 1 : index
    %c0_128 = arith.constant 0 : index
    %c0_129 = arith.constant 0 : index
    %147 = vector.load %arg16[%c1_127, %c0_128, %c0_129] : memref<10x16x32xbf16, #tpu.memory_space<vmem>>, vector<8x8x32xbf16>
    %148 = vector.shape_cast %147 : vector<8x8x32xbf16> to vector<64x32xbf16>
    %c96_130 = arith.constant 96 : index
    %c0_131 = arith.constant 0 : index
    %149 = vector.load %arg10[%c96_130, %c0_131] : memref<288x32xbf16, #tpu.memory_space<vmem>>, vector<32x32xbf16>
    %cst_132 = arith.constant dense<0.000000e+00> : vector<64x32xf32>
    %150 = tpu.matmul %148, %149, %cst_132 {dimension_numbers = #tpu.dot_dimension_numbers<[1], [0], [0], [1], [0, 0, 1, 1], [], []>} : vector<64x32xbf16>, vector<32x32xbf16>, vector<64x32xf32> -> vector<64x32xf32>
    %151 = arith.addf %146, %150 : vector<64x32xf32>
    %c1_133 = arith.constant 1 : index
    %c1_134 = arith.constant 1 : index
    %c0_135 = arith.constant 0 : index
    %152 = vector.load %arg16[%c1_133, %c1_134, %c0_135] : memref<10x16x32xbf16, #tpu.memory_space<vmem>>, vector<8x8x32xbf16>
    %153 = vector.shape_cast %152 : vector<8x8x32xbf16> to vector<64x32xbf16>
    %c128_136 = arith.constant 128 : index
    %c0_137 = arith.constant 0 : index
    %154 = vector.load %arg10[%c128_136, %c0_137] : memref<288x32xbf16, #tpu.memory_space<vmem>>, vector<32x32xbf16>
    %cst_138 = arith.constant dense<0.000000e+00> : vector<64x32xf32>
    %155 = tpu.matmul %153, %154, %cst_138 {dimension_numbers = #tpu.dot_dimension_numbers<[1], [0], [0], [1], [0, 0, 1, 1], [], []>} : vector<64x32xbf16>, vector<32x32xbf16>, vector<64x32xf32> -> vector<64x32xf32>
    %156 = arith.addf %151, %155 : vector<64x32xf32>
    %c1_139 = arith.constant 1 : index
    %c2_140 = arith.constant 2 : index
    %c0_141 = arith.constant 0 : index
    %157 = vector.load %arg16[%c1_139, %c2_140, %c0_141] : memref<10x16x32xbf16, #tpu.memory_space<vmem>>, vector<8x8x32xbf16>
    %158 = vector.shape_cast %157 : vector<8x8x32xbf16> to vector<64x32xbf16>
    %c160_142 = arith.constant 160 : index
    %c0_143 = arith.constant 0 : index
    %159 = vector.load %arg10[%c160_142, %c0_143] : memref<288x32xbf16, #tpu.memory_space<vmem>>, vector<32x32xbf16>
    %cst_144 = arith.constant dense<0.000000e+00> : vector<64x32xf32>
    %160 = tpu.matmul %158, %159, %cst_144 {dimension_numbers = #tpu.dot_dimension_numbers<[1], [0], [0], [1], [0, 0, 1, 1], [], []>} : vector<64x32xbf16>, vector<32x32xbf16>, vector<64x32xf32> -> vector<64x32xf32>
    %161 = arith.addf %156, %160 : vector<64x32xf32>
    %c2_145 = arith.constant 2 : index
    %c0_146 = arith.constant 0 : index
    %c0_147 = arith.constant 0 : index
    %162 = vector.load %arg16[%c2_145, %c0_146, %c0_147] : memref<10x16x32xbf16, #tpu.memory_space<vmem>>, vector<8x8x32xbf16>
    %163 = vector.shape_cast %162 : vector<8x8x32xbf16> to vector<64x32xbf16>
    %c192_148 = arith.constant 192 : index
    %c0_149 = arith.constant 0 : index
    %164 = vector.load %arg10[%c192_148, %c0_149] : memref<288x32xbf16, #tpu.memory_space<vmem>>, vector<32x32xbf16>
    %cst_150 = arith.constant dense<0.000000e+00> : vector<64x32xf32>
    %165 = tpu.matmul %163, %164, %cst_150 {dimension_numbers = #tpu.dot_dimension_numbers<[1], [0], [0], [1], [0, 0, 1, 1], [], []>} : vector<64x32xbf16>, vector<32x32xbf16>, vector<64x32xf32> -> vector<64x32xf32>
    %166 = arith.addf %161, %165 : vector<64x32xf32>
    %c2_151 = arith.constant 2 : index
    %c1_152 = arith.constant 1 : index
    %c0_153 = arith.constant 0 : index
    %167 = vector.load %arg16[%c2_151, %c1_152, %c0_153] : memref<10x16x32xbf16, #tpu.memory_space<vmem>>, vector<8x8x32xbf16>
    %168 = vector.shape_cast %167 : vector<8x8x32xbf16> to vector<64x32xbf16>
    %c224_154 = arith.constant 224 : index
    %c0_155 = arith.constant 0 : index
    %169 = vector.load %arg10[%c224_154, %c0_155] : memref<288x32xbf16, #tpu.memory_space<vmem>>, vector<32x32xbf16>
    %cst_156 = arith.constant dense<0.000000e+00> : vector<64x32xf32>
    %170 = tpu.matmul %168, %169, %cst_156 {dimension_numbers = #tpu.dot_dimension_numbers<[1], [0], [0], [1], [0, 0, 1, 1], [], []>} : vector<64x32xbf16>, vector<32x32xbf16>, vector<64x32xf32> -> vector<64x32xf32>
    %171 = arith.addf %166, %170 : vector<64x32xf32>
    %c2_157 = arith.constant 2 : index
    %c2_158 = arith.constant 2 : index
    %c0_159 = arith.constant 0 : index
    %172 = vector.load %arg16[%c2_157, %c2_158, %c0_159] : memref<10x16x32xbf16, #tpu.memory_space<vmem>>, vector<8x8x32xbf16>
    %173 = vector.shape_cast %172 : vector<8x8x32xbf16> to vector<64x32xbf16>
    %c256_160 = arith.constant 256 : index
    %c0_161 = arith.constant 0 : index
    %174 = vector.load %arg10[%c256_160, %c0_161] : memref<288x32xbf16, #tpu.memory_space<vmem>>, vector<32x32xbf16>
    %cst_162 = arith.constant dense<0.000000e+00> : vector<64x32xf32>
    %175 = tpu.matmul %173, %174, %cst_162 {dimension_numbers = #tpu.dot_dimension_numbers<[1], [0], [0], [1], [0, 0, 1, 1], [], []>} : vector<64x32xbf16>, vector<32x32xbf16>, vector<64x32xf32> -> vector<64x32xf32>
    %176 = arith.addf %171, %175 : vector<64x32xf32>
    %177 = arith.truncf %1 : vector<64x32xf32> to vector<64x32xbf16>
    %c0_163 = arith.constant 0 : index
    %c0_164 = arith.constant 0 : index
    %178 = vector.load %arg12[%c0_163, %c0_164] : memref<32x32xbf16, #tpu.memory_space<vmem>>, vector<32x32xbf16>
    %cst_165 = arith.constant dense<0.000000e+00> : vector<64x32xf32>
    %179 = tpu.matmul %177, %178, %cst_165 {dimension_numbers = #tpu.dot_dimension_numbers<[1], [0], [0], [1], [0, 0, 1, 1], [], []>} : vector<64x32xbf16>, vector<32x32xbf16>, vector<64x32xf32> -> vector<64x32xf32>
    %c0_166 = arith.constant 0 : index
    %c0_167 = arith.constant 0 : index
    %180 = vector.load %arg13[%c0_166, %c0_167] : memref<1x32xf32, #tpu.memory_space<vmem>>, vector<1x32xf32>
    %181 = vector.broadcast %180 : vector<1x32xf32> to vector<64x32xf32>
    %182 = arith.addf %179, %181 : vector<64x32xf32>
    %183 = arith.addf %176, %182 : vector<64x32xf32>
    %c0_168 = arith.constant 0 : index
    %c0_169 = arith.constant 0 : index
    %c0_170 = arith.constant 0 : index
    %184 = vector.load %arg14[%c0_168, %c0_169, %c0_170] : memref<1x64x32xf32, #tpu.memory_space<vmem>>, vector<1x64x32xf32>
    %185 = vector.shape_cast %184 : vector<1x64x32xf32> to vector<64x32xf32>
    %186 = vector.shape_cast %183 : vector<64x32xf32> to vector<1x64x32xf32>
    tpu.vector_store %arg14[%c0_168, %c0_169, %c0_170], %186 {strides = array<i32>} : memref<1x64x32xf32, #tpu.memory_space<vmem>>, vector<1x64x32xf32>,
    return
  }
  func.func @transform_0(%arg0: i32) -> (i32, i32, i32) {
    %c0_i32 = arith.constant 0 : i32
    %c0_i32_0 = arith.constant 0 : i32
    %c0_i32_1 = arith.constant 0 : i32
    return %arg0, %c0_i32, %c0_i32_0 : i32, i32, i32
  }
  func.func @transform_1(%arg0: i32) -> (i32, i32, i32) {
    %c0_i32 = arith.constant 0 : i32
    %c0_i32_0 = arith.constant 0 : i32
    %c0_i32_1 = arith.constant 0 : i32
    return %arg0, %c0_i32, %c0_i32_0 : i32, i32, i32
  }
  func.func @transform_2(%arg0: i32) -> (i32, i32) {
    %c0_i32 = arith.constant 0 : i32
    %c0_i32_0 = arith.constant 0 : i32
    %c0_i32_1 = arith.constant 0 : i32
    return %c0_i32, %c0_i32_0 : i32, i32
  }
  func.func @transform_3(%arg0: i32) -> (i32, i32) {
    %c0_i32 = arith.constant 0 : i32
    %c0_i32_0 = arith.constant 0 : i32
    %c0_i32_1 = arith.constant 0 : i32
    return %c0_i32, %c0_i32_0 : i32, i32
  }
  func.func @transform_4(%arg0: i32) -> (i32, i32) {
    %c0_i32 = arith.constant 0 : i32
    %c0_i32_0 = arith.constant 0 : i32
    %c0_i32_1 = arith.constant 0 : i32
    return %c0_i32, %c0_i32_0 : i32, i32
  }
  func.func @transform_5(%arg0: i32) -> (i32, i32) {
    %c0_i32 = arith.constant 0 : i32
    %c0_i32_0 = arith.constant 0 : i32
    %c0_i32_1 = arith.constant 0 : i32
    return %c0_i32, %c0_i32_0 : i32, i32
  }
  func.func @transform_6(%arg0: i32) -> (i32, i32) {
    %c0_i32 = arith.constant 0 : i32
    %c0_i32_0 = arith.constant 0 : i32
    %c0_i32_1 = arith.constant 0 : i32
    return %c0_i32, %c0_i32_0 : i32, i32
  }
  func.func @transform_7(%arg0: i32) -> (i32, i32) {
    %c0_i32 = arith.constant 0 : i32
    %c0_i32_0 = arith.constant 0 : i32
    %c0_i32_1 = arith.constant 0 : i32
    return %c0_i32, %c0_i32_0 : i32, i32
  }
  func.func @transform_8(%arg0: i32) -> (i32, i32) {
    %c0_i32 = arith.constant 0 : i32
    %c0_i32_0 = arith.constant 0 : i32
    %c0_i32_1 = arith.constant 0 : i32
    return %c0_i32, %c0_i32_0 : i32, i32
  }
  func.func @transform_9(%arg0: i32) -> (i32, i32) {
    %c0_i32 = arith.constant 0 : i32
    %c0_i32_0 = arith.constant 0 : i32
    %c0_i32_1 = arith.constant 0 : i32
    return %c0_i32, %c0_i32_0 : i32, i32
  }
  func.func @transform_10(%arg0: i32) -> (i32, i32) {
    %c0_i32 = arith.constant 0 : i32
    %c0_i32_0 = arith.constant 0 : i32
    %c0_i32_1 = arith.constant 0 : i32
    return %c0_i32, %c0_i32_0 : i32, i32
  }
  func.func @transform_11(%arg0: i32) -> (i32, i32) {
    %c0_i32 = arith.constant 0 : i32
    %c0_i32_0 = arith.constant 0 : i32
    %c0_i32_1 = arith.constant 0 : i32
    return %c0_i32, %c0_i32_0 : i32, i32
  }
  func.func @transform_12(%arg0: i32) -> (i32, i32) {
    %c0_i32 = arith.constant 0 : i32
    %c0_i32_0 = arith.constant 0 : i32
    %c0_i32_1 = arith.constant 0 : i32
    return %c0_i32, %c0_i32_0 : i32, i32
  }
  func.func @transform_13(%arg0: i32) -> (i32, i32, i32) {
    %c0_i32 = arith.constant 0 : i32
    %c0_i32_0 = arith.constant 0 : i32
    %c0_i32_1 = arith.constant 0 : i32
    return %arg0, %c0_i32, %c0_i32_0 : i32, i32, i32
  }
}

module attributes {stable_mosaic.version = 11 : i64} {
  func.func @_resnet_block_kernel(%arg0: i32, %arg1: memref<1x64x16xf32, #tpu.memory_space<vmem>>, %arg2: memref<1x1x32xf32, #tpu.memory_space<vmem>>, %arg3: memref<1x16xf32, #tpu.memory_space<vmem>>, %arg4: memref<1x16xf32, #tpu.memory_space<vmem>>, %arg5: memref<16x16xf32, #tpu.memory_space<vmem>>, %arg6: memref<144x32xbf16, #tpu.memory_space<vmem>>, %arg7: memref<1x32xf32, #tpu.memory_space<vmem>>, %arg8: memref<1x32xf32, #tpu.memory_space<vmem>>, %arg9: memref<32x32xf32, #tpu.memory_space<vmem>>, %arg10: memref<288x32xbf16, #tpu.memory_space<vmem>>, %arg11: memref<1x32xf32, #tpu.memory_space<vmem>>, %arg12: memref<16x32xbf16, #tpu.memory_space<vmem>>, %arg13: memref<1x32xf32, #tpu.memory_space<vmem>>, %arg14: memref<1x64x32xf32, #tpu.memory_space<vmem>>, %arg15: memref<10x16x16xbf16, #tpu.memory_space<vmem>>, %arg16: memref<10x16x32xbf16, #tpu.memory_space<vmem>>) attributes {dimension_semantics = [#tpu.dimension_semantics<parallel>], iteration_bounds = array<i64: 2>, scalar_prefetch = 0 : i64, scratch_operands = 2 : i64, tpu.core_type = #tpu.core_type<tc>, window_params = [{transform_indices = @transform_0, window_bounds = array<i64: 1, 64, 16>}, {transform_indices = @transform_1, window_bounds = array<i64: 1, 1, 32>}, {pipeline_mode = #tpu.pipeline_mode<synchronous>, transform_indices = @transform_2, window_bounds = array<i64: 1, 16>}, {pipeline_mode = #tpu.pipeline_mode<synchronous>, transform_indices = @transform_3, window_bounds = array<i64: 1, 16>}, {pipeline_mode = #tpu.pipeline_mode<synchronous>, transform_indices = @transform_4, window_bounds = array<i64: 16, 16>}, {pipeline_mode = #tpu.pipeline_mode<synchronous>, transform_indices = @transform_5, window_bounds = array<i64: 144, 32>}, {pipeline_mode = #tpu.pipeline_mode<synchronous>, transform_indices = @transform_6, window_bounds = array<i64: 1, 32>}, {pipeline_mode = #tpu.pipeline_mode<synchronous>, transform_indices = @transform_7, window_bounds = array<i64: 1, 32>}, {pipeline_mode = #tpu.pipeline_mode<synchronous>, transform_indices = @transform_8, window_bounds = array<i64: 32, 32>}, {pipeline_mode = #tpu.pipeline_mode<synchronous>, transform_indices = @transform_9, window_bounds = array<i64: 288, 32>}, {pipeline_mode = #tpu.pipeline_mode<synchronous>, transform_indices = @transform_10, window_bounds = array<i64: 1, 32>}, {pipeline_mode = #tpu.pipeline_mode<synchronous>, transform_indices = @transform_11, window_bounds = array<i64: 16, 32>}, {pipeline_mode = #tpu.pipeline_mode<synchronous>, transform_indices = @transform_12, window_bounds = array<i64: 1, 32>}, {transform_indices = @transform_13, window_bounds = array<i64: 1, 64, 32>}]} {
    %c0 = arith.constant 0 : index
    %c0_0 = arith.constant 0 : index
    %c0_1 = arith.constant 0 : index
    %0 = vector.load %arg1[%c0, %c0_0, %c0_1] : memref<1x64x16xf32, #tpu.memory_space<vmem>>, vector<1x64x16xf32>
    %1 = vector.shape_cast %0 : vector<1x64x16xf32> to vector<64x16xf32>
    %c0_2 = arith.constant 0 : index
    %c0_3 = arith.constant 0 : index
    %2 = vector.load %arg3[%c0_2, %c0_3] : memref<1x16xf32, #tpu.memory_space<vmem>>, vector<1x16xf32>
    %c0_4 = arith.constant 0 : index
    %c0_5 = arith.constant 0 : index
    %3 = vector.load %arg4[%c0_4, %c0_5] : memref<1x16xf32, #tpu.memory_space<vmem>>, vector<1x16xf32>
    %c0_6 = arith.constant 0 : index
    %c0_7 = arith.constant 0 : index
    %4 = vector.load %arg5[%c0_6, %c0_7] : memref<16x16xf32, #tpu.memory_space<vmem>>, vector<16x16xf32>
    %cst = arith.constant dense<0.000000e+00> : vector<16xf32>
    %5 = vector.multi_reduction <add>, %1, %cst [0] : vector<64x16xf32> to vector<16xf32>
    %6 = vector.shape_cast %5 : vector<16xf32> to vector<1x16xf32>
    %7 = arith.mulf %1, %1 : vector<64x16xf32>
    %cst_8 = arith.constant dense<0.000000e+00> : vector<16xf32>
    %8 = vector.multi_reduction <add>, %7, %cst_8 [0] : vector<64x16xf32> to vector<16xf32>
    %9 = vector.shape_cast %8 : vector<16xf32> to vector<1x16xf32>
    %cst_9 = arith.constant dense<0.000000e+00> : vector<1x16xf32>
    %10 = tpu.matmul %6, %4, %cst_9 {dimension_numbers = #tpu.dot_dimension_numbers<[1], [0], [0], [1], [0, 0, 1, 1], [], []>} : vector<1x16xf32>, vector<16x16xf32>, vector<1x16xf32> -> vector<1x16xf32>
    %cst_10 = arith.constant dense<0.000000e+00> : vector<1x16xf32>
    %11 = tpu.matmul %9, %4, %cst_10 {dimension_numbers = #tpu.dot_dimension_numbers<[1], [0], [0], [1], [0, 0, 1, 1], [], []>} : vector<1x16xf32>, vector<16x16xf32>, vector<1x16xf32> -> vector<1x16xf32>
    %12 = arith.mulf %10, %10 : vector<1x16xf32>
    %13 = arith.subf %11, %12 : vector<1x16xf32>
    %cst_11 = arith.constant 0.000000e+00 : f32
    %14 = vector.broadcast %cst_11 : f32 to vector<1x16xf32>
    %15 = arith.maximumf %13, %14 : vector<1x16xf32>
    %16 = vector.broadcast %10 : vector<1x16xf32> to vector<64x16xf32>
    %17 = arith.subf %1, %16 : vector<64x16xf32>
    %cst_12 = arith.constant 9.99999974E-6 : f32
    %18 = vector.broadcast %cst_12 : f32 to vector<1x16xf32>
    %19 = arith.addf %15, %18 : vector<1x16xf32>
    %20 = math.rsqrt %19 : vector<1x16xf32>
    %21 = vector.broadcast %20 : vector<1x16xf32> to vector<64x16xf32>
    %22 = arith.mulf %17, %21 : vector<64x16xf32>
    %23 = vector.broadcast %2 : vector<1x16xf32> to vector<64x16xf32>
    %24 = arith.mulf %22, %23 : vector<64x16xf32>
    %25 = vector.broadcast %3 : vector<1x16xf32> to vector<64x16xf32>
    %26 = arith.addf %24, %25 : vector<64x16xf32>
    %27 = arith.negf %26 : vector<64x16xf32>
    %28 = math.exp %27 : vector<64x16xf32>
    %cst_13 = arith.constant 1.000000e+00 : f32
    %29 = vector.broadcast %cst_13 : f32 to vector<64x16xf32>
    %30 = arith.addf %29, %28 : vector<64x16xf32>
    %31 = arith.divf %29, %30 : vector<64x16xf32>
    %32 = arith.mulf %26, %31 : vector<64x16xf32>
    %cst_14 = arith.constant 0.000000e+00 : bf16
    %33 = vector.broadcast %cst_14 : bf16 to vector<1x16x16xbf16>
    %c0_15 = arith.constant 0 : index
    %c0_16 = arith.constant 0 : index
    %c0_17 = arith.constant 0 : index
    %34 = vector.load %arg15[%c0_15, %c0_16, %c0_17] : memref<10x16x16xbf16, #tpu.memory_space<vmem>>, vector<1x16x16xbf16>
    tpu.vector_store %arg15[%c0_15, %c0_16, %c0_17], %33 {strides = array<i32>} : memref<10x16x16xbf16, #tpu.memory_space<vmem>>, vector<1x16x16xbf16>,
    %c9 = arith.constant 9 : index
    %c0_18 = arith.constant 0 : index
    %c0_19 = arith.constant 0 : index
    %35 = vector.load %arg15[%c9, %c0_18, %c0_19] : memref<10x16x16xbf16, #tpu.memory_space<vmem>>, vector<1x16x16xbf16>
    tpu.vector_store %arg15[%c9, %c0_18, %c0_19], %33 {strides = array<i32>} : memref<10x16x16xbf16, #tpu.memory_space<vmem>>, vector<1x16x16xbf16>,
    %cst_20 = arith.constant 0.000000e+00 : bf16
    %36 = vector.broadcast %cst_20 : bf16 to vector<10x1x16xbf16>
    %c0_21 = arith.constant 0 : index
    %c0_22 = arith.constant 0 : index
    %c0_23 = arith.constant 0 : index
    %37 = vector.load %arg15[%c0_21, %c0_22, %c0_23] : memref<10x16x16xbf16, #tpu.memory_space<vmem>>, vector<10x1x16xbf16>
    tpu.vector_store %arg15[%c0_21, %c0_22, %c0_23], %36 {strides = array<i32>} : memref<10x16x16xbf16, #tpu.memory_space<vmem>>, vector<10x1x16xbf16>,
    %c0_24 = arith.constant 0 : index
    %c9_25 = arith.constant 9 : index
    %c0_26 = arith.constant 0 : index
    %38 = vector.load %arg15[%c0_24, %c9_25, %c0_26] : memref<10x16x16xbf16, #tpu.memory_space<vmem>>, vector<10x1x16xbf16>
    tpu.vector_store %arg15[%c0_24, %c9_25, %c0_26], %36 {strides = array<i32>} : memref<10x16x16xbf16, #tpu.memory_space<vmem>>, vector<10x1x16xbf16>,
    %39 = vector.shape_cast %32 : vector<64x16xf32> to vector<8x8x16xf32>
    %40 = arith.truncf %39 : vector<8x8x16xf32> to vector<8x8x16xbf16>
    %c1 = arith.constant 1 : index
    %c1_27 = arith.constant 1 : index
    %c0_28 = arith.constant 0 : index
    %41 = vector.load %arg15[%c1, %c1_27, %c0_28] : memref<10x16x16xbf16, #tpu.memory_space<vmem>>, vector<8x8x16xbf16>
    tpu.vector_store %arg15[%c1, %c1_27, %c0_28], %40 {strides = array<i32>} : memref<10x16x16xbf16, #tpu.memory_space<vmem>>, vector<8x8x16xbf16>,
    %c0_29 = arith.constant 0 : index
    %c0_30 = arith.constant 0 : index
    %c0_31 = arith.constant 0 : index
    %42 = vector.load %arg2[%c0_29, %c0_30, %c0_31] : memref<1x1x32xf32, #tpu.memory_space<vmem>>, vector<1x1x32xf32>
    %43 = vector.shape_cast %42 : vector<1x1x32xf32> to vector<1x32xf32>
    %c0_32 = arith.constant 0 : index
    %c0_33 = arith.constant 0 : index
    %c0_34 = arith.constant 0 : index
    %44 = vector.load %arg15[%c0_32, %c0_33, %c0_34] : memref<10x16x16xbf16, #tpu.memory_space<vmem>>, vector<8x8x16xbf16>
    %45 = vector.shape_cast %44 : vector<8x8x16xbf16> to vector<64x16xbf16>
    %c0_35 = arith.constant 0 : index
    %c0_36 = arith.constant 0 : index
    %46 = vector.load %arg6[%c0_35, %c0_36] : memref<144x32xbf16, #tpu.memory_space<vmem>>, vector<16x32xbf16>
    %cst_37 = arith.constant dense<0.000000e+00> : vector<64x32xf32>
    %47 = tpu.matmul %45, %46, %cst_37 {dimension_numbers = #tpu.dot_dimension_numbers<[1], [0], [0], [1], [0, 0, 1, 1], [], []>} : vector<64x16xbf16>, vector<16x32xbf16>, vector<64x32xf32> -> vector<64x32xf32>
    %48 = vector.broadcast %43 : vector<1x32xf32> to vector<64x32xf32>
    %49 = arith.addf %48, %47 : vector<64x32xf32>
    %c0_38 = arith.constant 0 : index
    %c1_39 = arith.constant 1 : index
    %c0_40 = arith.constant 0 : index
    %50 = vector.load %arg15[%c0_38, %c1_39, %c0_40] : memref<10x16x16xbf16, #tpu.memory_space<vmem>>, vector<8x8x16xbf16>
    %51 = vector.shape_cast %50 : vector<8x8x16xbf16> to vector<64x16xbf16>
    %c16 = arith.constant 16 : index
    %c0_41 = arith.constant 0 : index
    %52 = vector.load %arg6[%c16, %c0_41] : memref<144x32xbf16, #tpu.memory_space<vmem>>, vector<16x32xbf16>
    %cst_42 = arith.constant dense<0.000000e+00> : vector<64x32xf32>
    %53 = tpu.matmul %51, %52, %cst_42 {dimension_numbers = #tpu.dot_dimension_numbers<[1], [0], [0], [1], [0, 0, 1, 1], [], []>} : vector<64x16xbf16>, vector<16x32xbf16>, vector<64x32xf32> -> vector<64x32xf32>
    %54 = arith.addf %49, %53 : vector<64x32xf32>
    %c0_43 = arith.constant 0 : index
    %c2 = arith.constant 2 : index
    %c0_44 = arith.constant 0 : index
    %55 = vector.load %arg15[%c0_43, %c2, %c0_44] : memref<10x16x16xbf16, #tpu.memory_space<vmem>>, vector<8x8x16xbf16>
    %56 = vector.shape_cast %55 : vector<8x8x16xbf16> to vector<64x16xbf16>
    %c32 = arith.constant 32 : index
    %c0_45 = arith.constant 0 : index
    %57 = vector.load %arg6[%c32, %c0_45] : memref<144x32xbf16, #tpu.memory_space<vmem>>, vector<16x32xbf16>
    %cst_46 = arith.constant dense<0.000000e+00> : vector<64x32xf32>
    %58 = tpu.matmul %56, %57, %cst_46 {dimension_numbers = #tpu.dot_dimension_numbers<[1], [0], [0], [1], [0, 0, 1, 1], [], []>} : vector<64x16xbf16>, vector<16x32xbf16>, vector<64x32xf32> -> vector<64x32xf32>
    %59 = arith.addf %54, %58 : vector<64x32xf32>
    %c1_47 = arith.constant 1 : index
    %c0_48 = arith.constant 0 : index
    %c0_49 = arith.constant 0 : index
    %60 = vector.load %arg15[%c1_47, %c0_48, %c0_49] : memref<10x16x16xbf16, #tpu.memory_space<vmem>>, vector<8x8x16xbf16>
    %61 = vector.shape_cast %60 : vector<8x8x16xbf16> to vector<64x16xbf16>
    %c48 = arith.constant 48 : index
    %c0_50 = arith.constant 0 : index
    %62 = vector.load %arg6[%c48, %c0_50] : memref<144x32xbf16, #tpu.memory_space<vmem>>, vector<16x32xbf16>
    %cst_51 = arith.constant dense<0.000000e+00> : vector<64x32xf32>
    %63 = tpu.matmul %61, %62, %cst_51 {dimension_numbers = #tpu.dot_dimension_numbers<[1], [0], [0], [1], [0, 0, 1, 1], [], []>} : vector<64x16xbf16>, vector<16x32xbf16>, vector<64x32xf32> -> vector<64x32xf32>
    %64 = arith.addf %59, %63 : vector<64x32xf32>
    %c1_52 = arith.constant 1 : index
    %c1_53 = arith.constant 1 : index
    %c0_54 = arith.constant 0 : index
    %65 = vector.load %arg15[%c1_52, %c1_53, %c0_54] : memref<10x16x16xbf16, #tpu.memory_space<vmem>>, vector<8x8x16xbf16>
    %66 = vector.shape_cast %65 : vector<8x8x16xbf16> to vector<64x16xbf16>
    %c64 = arith.constant 64 : index
    %c0_55 = arith.constant 0 : index
    %67 = vector.load %arg6[%c64, %c0_55] : memref<144x32xbf16, #tpu.memory_space<vmem>>, vector<16x32xbf16>
    %cst_56 = arith.constant dense<0.000000e+00> : vector<64x32xf32>
    %68 = tpu.matmul %66, %67, %cst_56 {dimension_numbers = #tpu.dot_dimension_numbers<[1], [0], [0], [1], [0, 0, 1, 1], [], []>} : vector<64x16xbf16>, vector<16x32xbf16>, vector<64x32xf32> -> vector<64x32xf32>
    %69 = arith.addf %64, %68 : vector<64x32xf32>
    %c1_57 = arith.constant 1 : index
    %c2_58 = arith.constant 2 : index
    %c0_59 = arith.constant 0 : index
    %70 = vector.load %arg15[%c1_57, %c2_58, %c0_59] : memref<10x16x16xbf16, #tpu.memory_space<vmem>>, vector<8x8x16xbf16>
    %71 = vector.shape_cast %70 : vector<8x8x16xbf16> to vector<64x16xbf16>
    %c80 = arith.constant 80 : index
    %c0_60 = arith.constant 0 : index
    %72 = vector.load %arg6[%c80, %c0_60] : memref<144x32xbf16, #tpu.memory_space<vmem>>, vector<16x32xbf16>
    %cst_61 = arith.constant dense<0.000000e+00> : vector<64x32xf32>
    %73 = tpu.matmul %71, %72, %cst_61 {dimension_numbers = #tpu.dot_dimension_numbers<[1], [0], [0], [1], [0, 0, 1, 1], [], []>} : vector<64x16xbf16>, vector<16x32xbf16>, vector<64x32xf32> -> vector<64x32xf32>
    %74 = arith.addf %69, %73 : vector<64x32xf32>
    %c2_62 = arith.constant 2 : index
    %c0_63 = arith.constant 0 : index
    %c0_64 = arith.constant 0 : index
    %75 = vector.load %arg15[%c2_62, %c0_63, %c0_64] : memref<10x16x16xbf16, #tpu.memory_space<vmem>>, vector<8x8x16xbf16>
    %76 = vector.shape_cast %75 : vector<8x8x16xbf16> to vector<64x16xbf16>
    %c96 = arith.constant 96 : index
    %c0_65 = arith.constant 0 : index
    %77 = vector.load %arg6[%c96, %c0_65] : memref<144x32xbf16, #tpu.memory_space<vmem>>, vector<16x32xbf16>
    %cst_66 = arith.constant dense<0.000000e+00> : vector<64x32xf32>
    %78 = tpu.matmul %76, %77, %cst_66 {dimension_numbers = #tpu.dot_dimension_numbers<[1], [0], [0], [1], [0, 0, 1, 1], [], []>} : vector<64x16xbf16>, vector<16x32xbf16>, vector<64x32xf32> -> vector<64x32xf32>
    %79 = arith.addf %74, %78 : vector<64x32xf32>
    %c2_67 = arith.constant 2 : index
    %c1_68 = arith.constant 1 : index
    %c0_69 = arith.constant 0 : index
    %80 = vector.load %arg15[%c2_67, %c1_68, %c0_69] : memref<10x16x16xbf16, #tpu.memory_space<vmem>>, vector<8x8x16xbf16>
    %81 = vector.shape_cast %80 : vector<8x8x16xbf16> to vector<64x16xbf16>
    %c112 = arith.constant 112 : index
    %c0_70 = arith.constant 0 : index
    %82 = vector.load %arg6[%c112, %c0_70] : memref<144x32xbf16, #tpu.memory_space<vmem>>, vector<16x32xbf16>
    %cst_71 = arith.constant dense<0.000000e+00> : vector<64x32xf32>
    %83 = tpu.matmul %81, %82, %cst_71 {dimension_numbers = #tpu.dot_dimension_numbers<[1], [0], [0], [1], [0, 0, 1, 1], [], []>} : vector<64x16xbf16>, vector<16x32xbf16>, vector<64x32xf32> -> vector<64x32xf32>
    %84 = arith.addf %79, %83 : vector<64x32xf32>
    %c2_72 = arith.constant 2 : index
    %c2_73 = arith.constant 2 : index
    %c0_74 = arith.constant 0 : index
    %85 = vector.load %arg15[%c2_72, %c2_73, %c0_74] : memref<10x16x16xbf16, #tpu.memory_space<vmem>>, vector<8x8x16xbf16>
    %86 = vector.shape_cast %85 : vector<8x8x16xbf16> to vector<64x16xbf16>
    %c128 = arith.constant 128 : index
    %c0_75 = arith.constant 0 : index
    %87 = vector.load %arg6[%c128, %c0_75] : memref<144x32xbf16, #tpu.memory_space<vmem>>, vector<16x32xbf16>
    %cst_76 = arith.constant dense<0.000000e+00> : vector<64x32xf32>
    %88 = tpu.matmul %86, %87, %cst_76 {dimension_numbers = #tpu.dot_dimension_numbers<[1], [0], [0], [1], [0, 0, 1, 1], [], []>} : vector<64x16xbf16>, vector<16x32xbf16>, vector<64x32xf32> -> vector<64x32xf32>
    %89 = arith.addf %84, %88 : vector<64x32xf32>
    %c0_77 = arith.constant 0 : index
    %c0_78 = arith.constant 0 : index
    %90 = vector.load %arg7[%c0_77, %c0_78] : memref<1x32xf32, #tpu.memory_space<vmem>>, vector<1x32xf32>
    %c0_79 = arith.constant 0 : index
    %c0_80 = arith.constant 0 : index
    %91 = vector.load %arg8[%c0_79, %c0_80] : memref<1x32xf32, #tpu.memory_space<vmem>>, vector<1x32xf32>
    %c0_81 = arith.constant 0 : index
    %c0_82 = arith.constant 0 : index
    %92 = vector.load %arg9[%c0_81, %c0_82] : memref<32x32xf32, #tpu.memory_space<vmem>>, vector<32x32xf32>
    %cst_83 = arith.constant dense<0.000000e+00> : vector<32xf32>
    %93 = vector.multi_reduction <add>, %89, %cst_83 [0] : vector<64x32xf32> to vector<32xf32>
    %94 = vector.shape_cast %93 : vector<32xf32> to vector<1x32xf32>
    %95 = arith.mulf %89, %89 : vector<64x32xf32>
    %cst_84 = arith.constant dense<0.000000e+00> : vector<32xf32>
    %96 = vector.multi_reduction <add>, %95, %cst_84 [0] : vector<64x32xf32> to vector<32xf32>
    %97 = vector.shape_cast %96 : vector<32xf32> to vector<1x32xf32>
    %cst_85 = arith.constant dense<0.000000e+00> : vector<1x32xf32>
    %98 = tpu.matmul %94, %92, %cst_85 {dimension_numbers = #tpu.dot_dimension_numbers<[1], [0], [0], [1], [0, 0, 1, 1], [], []>} : vector<1x32xf32>, vector<32x32xf32>, vector<1x32xf32> -> vector<1x32xf32>
    %cst_86 = arith.constant dense<0.000000e+00> : vector<1x32xf32>
    %99 = tpu.matmul %97, %92, %cst_86 {dimension_numbers = #tpu.dot_dimension_numbers<[1], [0], [0], [1], [0, 0, 1, 1], [], []>} : vector<1x32xf32>, vector<32x32xf32>, vector<1x32xf32> -> vector<1x32xf32>
    %100 = arith.mulf %98, %98 : vector<1x32xf32>
    %101 = arith.subf %99, %100 : vector<1x32xf32>
    %cst_87 = arith.constant 0.000000e+00 : f32
    %102 = vector.broadcast %cst_87 : f32 to vector<1x32xf32>
    %103 = arith.maximumf %101, %102 : vector<1x32xf32>
    %104 = vector.broadcast %98 : vector<1x32xf32> to vector<64x32xf32>
    %105 = arith.subf %89, %104 : vector<64x32xf32>
    %cst_88 = arith.constant 9.99999974E-6 : f32
    %106 = vector.broadcast %cst_88 : f32 to vector<1x32xf32>
    %107 = arith.addf %103, %106 : vector<1x32xf32>
    %108 = math.rsqrt %107 : vector<1x32xf32>
    %109 = vector.broadcast %108 : vector<1x32xf32> to vector<64x32xf32>
    %110 = arith.mulf %105, %109 : vector<64x32xf32>
    %111 = vector.broadcast %90 : vector<1x32xf32> to vector<64x32xf32>
    %112 = arith.mulf %110, %111 : vector<64x32xf32>
    %113 = vector.broadcast %91 : vector<1x32xf32> to vector<64x32xf32>
    %114 = arith.addf %112, %113 : vector<64x32xf32>
    %115 = arith.negf %114 : vector<64x32xf32>
    %116 = math.exp %115 : vector<64x32xf32>
    %cst_89 = arith.constant 1.000000e+00 : f32
    %117 = vector.broadcast %cst_89 : f32 to vector<64x32xf32>
    %118 = arith.addf %117, %116 : vector<64x32xf32>
    %119 = arith.divf %117, %118 : vector<64x32xf32>
    %120 = arith.mulf %114, %119 : vector<64x32xf32>
    %cst_90 = arith.constant 0.000000e+00 : bf16
    %121 = vector.broadcast %cst_90 : bf16 to vector<1x16x32xbf16>
    %c0_91 = arith.constant 0 : index
    %c0_92 = arith.constant 0 : index
    %c0_93 = arith.constant 0 : index
    %122 = vector.load %arg16[%c0_91, %c0_92, %c0_93] : memref<10x16x32xbf16, #tpu.memory_space<vmem>>, vector<1x16x32xbf16>
    tpu.vector_store %arg16[%c0_91, %c0_92, %c0_93], %121 {strides = array<i32>} : memref<10x16x32xbf16, #tpu.memory_space<vmem>>, vector<1x16x32xbf16>,
    %c9_94 = arith.constant 9 : index
    %c0_95 = arith.constant 0 : index
    %c0_96 = arith.constant 0 : index
    %123 = vector.load %arg16[%c9_94, %c0_95, %c0_96] : memref<10x16x32xbf16, #tpu.memory_space<vmem>>, vector<1x16x32xbf16>
    tpu.vector_store %arg16[%c9_94, %c0_95, %c0_96], %121 {strides = array<i32>} : memref<10x16x32xbf16, #tpu.memory_space<vmem>>, vector<1x16x32xbf16>,
    %cst_97 = arith.constant 0.000000e+00 : bf16
    %124 = vector.broadcast %cst_97 : bf16 to vector<10x1x32xbf16>
    %c0_98 = arith.constant 0 : index
    %c0_99 = arith.constant 0 : index
    %c0_100 = arith.constant 0 : index
    %125 = vector.load %arg16[%c0_98, %c0_99, %c0_100] : memref<10x16x32xbf16, #tpu.memory_space<vmem>>, vector<10x1x32xbf16>
    tpu.vector_store %arg16[%c0_98, %c0_99, %c0_100], %124 {strides = array<i32>} : memref<10x16x32xbf16, #tpu.memory_space<vmem>>, vector<10x1x32xbf16>,
    %c0_101 = arith.constant 0 : index
    %c9_102 = arith.constant 9 : index
    %c0_103 = arith.constant 0 : index
    %126 = vector.load %arg16[%c0_101, %c9_102, %c0_103] : memref<10x16x32xbf16, #tpu.memory_space<vmem>>, vector<10x1x32xbf16>
    tpu.vector_store %arg16[%c0_101, %c9_102, %c0_103], %124 {strides = array<i32>} : memref<10x16x32xbf16, #tpu.memory_space<vmem>>, vector<10x1x32xbf16>,
    %127 = vector.shape_cast %120 : vector<64x32xf32> to vector<8x8x32xf32>
    %128 = arith.truncf %127 : vector<8x8x32xf32> to vector<8x8x32xbf16>
    %c1_104 = arith.constant 1 : index
    %c1_105 = arith.constant 1 : index
    %c0_106 = arith.constant 0 : index
    %129 = vector.load %arg16[%c1_104, %c1_105, %c0_106] : memref<10x16x32xbf16, #tpu.memory_space<vmem>>, vector<8x8x32xbf16>
    tpu.vector_store %arg16[%c1_104, %c1_105, %c0_106], %128 {strides = array<i32>} : memref<10x16x32xbf16, #tpu.memory_space<vmem>>, vector<8x8x32xbf16>,
    %c0_107 = arith.constant 0 : index
    %c0_108 = arith.constant 0 : index
    %130 = vector.load %arg11[%c0_107, %c0_108] : memref<1x32xf32, #tpu.memory_space<vmem>>, vector<1x32xf32>
    %c0_109 = arith.constant 0 : index
    %c0_110 = arith.constant 0 : index
    %c0_111 = arith.constant 0 : index
    %131 = vector.load %arg16[%c0_109, %c0_110, %c0_111] : memref<10x16x32xbf16, #tpu.memory_space<vmem>>, vector<8x8x32xbf16>
    %132 = vector.shape_cast %131 : vector<8x8x32xbf16> to vector<64x32xbf16>
    %c0_112 = arith.constant 0 : index
    %c0_113 = arith.constant 0 : index
    %133 = vector.load %arg10[%c0_112, %c0_113] : memref<288x32xbf16, #tpu.memory_space<vmem>>, vector<32x32xbf16>
    %cst_114 = arith.constant dense<0.000000e+00> : vector<64x32xf32>
    %134 = tpu.matmul %132, %133, %cst_114 {dimension_numbers = #tpu.dot_dimension_numbers<[1], [0], [0], [1], [0, 0, 1, 1], [], []>} : vector<64x32xbf16>, vector<32x32xbf16>, vector<64x32xf32> -> vector<64x32xf32>
    %135 = vector.broadcast %130 : vector<1x32xf32> to vector<64x32xf32>
    %136 = arith.addf %135, %134 : vector<64x32xf32>
    %c0_115 = arith.constant 0 : index
    %c1_116 = arith.constant 1 : index
    %c0_117 = arith.constant 0 : index
    %137 = vector.load %arg16[%c0_115, %c1_116, %c0_117] : memref<10x16x32xbf16, #tpu.memory_space<vmem>>, vector<8x8x32xbf16>
    %138 = vector.shape_cast %137 : vector<8x8x32xbf16> to vector<64x32xbf16>
    %c32_118 = arith.constant 32 : index
    %c0_119 = arith.constant 0 : index
    %139 = vector.load %arg10[%c32_118, %c0_119] : memref<288x32xbf16, #tpu.memory_space<vmem>>, vector<32x32xbf16>
    %cst_120 = arith.constant dense<0.000000e+00> : vector<64x32xf32>
    %140 = tpu.matmul %138, %139, %cst_120 {dimension_numbers = #tpu.dot_dimension_numbers<[1], [0], [0], [1], [0, 0, 1, 1], [], []>} : vector<64x32xbf16>, vector<32x32xbf16>, vector<64x32xf32> -> vector<64x32xf32>
    %141 = arith.addf %136, %140 : vector<64x32xf32>
    %c0_121 = arith.constant 0 : index
    %c2_122 = arith.constant 2 : index
    %c0_123 = arith.constant 0 : index
    %142 = vector.load %arg16[%c0_121, %c2_122, %c0_123] : memref<10x16x32xbf16, #tpu.memory_space<vmem>>, vector<8x8x32xbf16>
    %143 = vector.shape_cast %142 : vector<8x8x32xbf16> to vector<64x32xbf16>
    %c64_124 = arith.constant 64 : index
    %c0_125 = arith.constant 0 : index
    %144 = vector.load %arg10[%c64_124, %c0_125] : memref<288x32xbf16, #tpu.memory_space<vmem>>, vector<32x32xbf16>
    %cst_126 = arith.constant dense<0.000000e+00> : vector<64x32xf32>
    %145 = tpu.matmul %143, %144, %cst_126 {dimension_numbers = #tpu.dot_dimension_numbers<[1], [0], [0], [1], [0, 0, 1, 1], [], []>} : vector<64x32xbf16>, vector<32x32xbf16>, vector<64x32xf32> -> vector<64x32xf32>
    %146 = arith.addf %141, %145 : vector<64x32xf32>
    %c1_127 = arith.constant 1 : index
    %c0_128 = arith.constant 0 : index
    %c0_129 = arith.constant 0 : index
    %147 = vector.load %arg16[%c1_127, %c0_128, %c0_129] : memref<10x16x32xbf16, #tpu.memory_space<vmem>>, vector<8x8x32xbf16>
    %148 = vector.shape_cast %147 : vector<8x8x32xbf16> to vector<64x32xbf16>
    %c96_130 = arith.constant 96 : index
    %c0_131 = arith.constant 0 : index
    %149 = vector.load %arg10[%c96_130, %c0_131] : memref<288x32xbf16, #tpu.memory_space<vmem>>, vector<32x32xbf16>
    %cst_132 = arith.constant dense<0.000000e+00> : vector<64x32xf32>
    %150 = tpu.matmul %148, %149, %cst_132 {dimension_numbers = #tpu.dot_dimension_numbers<[1], [0], [0], [1], [0, 0, 1, 1], [], []>} : vector<64x32xbf16>, vector<32x32xbf16>, vector<64x32xf32> -> vector<64x32xf32>
    %151 = arith.addf %146, %150 : vector<64x32xf32>
    %c1_133 = arith.constant 1 : index
    %c1_134 = arith.constant 1 : index
    %c0_135 = arith.constant 0 : index
    %152 = vector.load %arg16[%c1_133, %c1_134, %c0_135] : memref<10x16x32xbf16, #tpu.memory_space<vmem>>, vector<8x8x32xbf16>
    %153 = vector.shape_cast %152 : vector<8x8x32xbf16> to vector<64x32xbf16>
    %c128_136 = arith.constant 128 : index
    %c0_137 = arith.constant 0 : index
    %154 = vector.load %arg10[%c128_136, %c0_137] : memref<288x32xbf16, #tpu.memory_space<vmem>>, vector<32x32xbf16>
    %cst_138 = arith.constant dense<0.000000e+00> : vector<64x32xf32>
    %155 = tpu.matmul %153, %154, %cst_138 {dimension_numbers = #tpu.dot_dimension_numbers<[1], [0], [0], [1], [0, 0, 1, 1], [], []>} : vector<64x32xbf16>, vector<32x32xbf16>, vector<64x32xf32> -> vector<64x32xf32>
    %156 = arith.addf %151, %155 : vector<64x32xf32>
    %c1_139 = arith.constant 1 : index
    %c2_140 = arith.constant 2 : index
    %c0_141 = arith.constant 0 : index
    %157 = vector.load %arg16[%c1_139, %c2_140, %c0_141] : memref<10x16x32xbf16, #tpu.memory_space<vmem>>, vector<8x8x32xbf16>
    %158 = vector.shape_cast %157 : vector<8x8x32xbf16> to vector<64x32xbf16>
    %c160 = arith.constant 160 : index
    %c0_142 = arith.constant 0 : index
    %159 = vector.load %arg10[%c160, %c0_142] : memref<288x32xbf16, #tpu.memory_space<vmem>>, vector<32x32xbf16>
    %cst_143 = arith.constant dense<0.000000e+00> : vector<64x32xf32>
    %160 = tpu.matmul %158, %159, %cst_143 {dimension_numbers = #tpu.dot_dimension_numbers<[1], [0], [0], [1], [0, 0, 1, 1], [], []>} : vector<64x32xbf16>, vector<32x32xbf16>, vector<64x32xf32> -> vector<64x32xf32>
    %161 = arith.addf %156, %160 : vector<64x32xf32>
    %c2_144 = arith.constant 2 : index
    %c0_145 = arith.constant 0 : index
    %c0_146 = arith.constant 0 : index
    %162 = vector.load %arg16[%c2_144, %c0_145, %c0_146] : memref<10x16x32xbf16, #tpu.memory_space<vmem>>, vector<8x8x32xbf16>
    %163 = vector.shape_cast %162 : vector<8x8x32xbf16> to vector<64x32xbf16>
    %c192 = arith.constant 192 : index
    %c0_147 = arith.constant 0 : index
    %164 = vector.load %arg10[%c192, %c0_147] : memref<288x32xbf16, #tpu.memory_space<vmem>>, vector<32x32xbf16>
    %cst_148 = arith.constant dense<0.000000e+00> : vector<64x32xf32>
    %165 = tpu.matmul %163, %164, %cst_148 {dimension_numbers = #tpu.dot_dimension_numbers<[1], [0], [0], [1], [0, 0, 1, 1], [], []>} : vector<64x32xbf16>, vector<32x32xbf16>, vector<64x32xf32> -> vector<64x32xf32>
    %166 = arith.addf %161, %165 : vector<64x32xf32>
    %c2_149 = arith.constant 2 : index
    %c1_150 = arith.constant 1 : index
    %c0_151 = arith.constant 0 : index
    %167 = vector.load %arg16[%c2_149, %c1_150, %c0_151] : memref<10x16x32xbf16, #tpu.memory_space<vmem>>, vector<8x8x32xbf16>
    %168 = vector.shape_cast %167 : vector<8x8x32xbf16> to vector<64x32xbf16>
    %c224 = arith.constant 224 : index
    %c0_152 = arith.constant 0 : index
    %169 = vector.load %arg10[%c224, %c0_152] : memref<288x32xbf16, #tpu.memory_space<vmem>>, vector<32x32xbf16>
    %cst_153 = arith.constant dense<0.000000e+00> : vector<64x32xf32>
    %170 = tpu.matmul %168, %169, %cst_153 {dimension_numbers = #tpu.dot_dimension_numbers<[1], [0], [0], [1], [0, 0, 1, 1], [], []>} : vector<64x32xbf16>, vector<32x32xbf16>, vector<64x32xf32> -> vector<64x32xf32>
    %171 = arith.addf %166, %170 : vector<64x32xf32>
    %c2_154 = arith.constant 2 : index
    %c2_155 = arith.constant 2 : index
    %c0_156 = arith.constant 0 : index
    %172 = vector.load %arg16[%c2_154, %c2_155, %c0_156] : memref<10x16x32xbf16, #tpu.memory_space<vmem>>, vector<8x8x32xbf16>
    %173 = vector.shape_cast %172 : vector<8x8x32xbf16> to vector<64x32xbf16>
    %c256 = arith.constant 256 : index
    %c0_157 = arith.constant 0 : index
    %174 = vector.load %arg10[%c256, %c0_157] : memref<288x32xbf16, #tpu.memory_space<vmem>>, vector<32x32xbf16>
    %cst_158 = arith.constant dense<0.000000e+00> : vector<64x32xf32>
    %175 = tpu.matmul %173, %174, %cst_158 {dimension_numbers = #tpu.dot_dimension_numbers<[1], [0], [0], [1], [0, 0, 1, 1], [], []>} : vector<64x32xbf16>, vector<32x32xbf16>, vector<64x32xf32> -> vector<64x32xf32>
    %176 = arith.addf %171, %175 : vector<64x32xf32>
    %177 = arith.truncf %1 : vector<64x16xf32> to vector<64x16xbf16>
    %c0_159 = arith.constant 0 : index
    %c0_160 = arith.constant 0 : index
    %178 = vector.load %arg12[%c0_159, %c0_160] : memref<16x32xbf16, #tpu.memory_space<vmem>>, vector<16x32xbf16>
    %cst_161 = arith.constant dense<0.000000e+00> : vector<64x32xf32>
    %179 = tpu.matmul %177, %178, %cst_161 {dimension_numbers = #tpu.dot_dimension_numbers<[1], [0], [0], [1], [0, 0, 1, 1], [], []>} : vector<64x16xbf16>, vector<16x32xbf16>, vector<64x32xf32> -> vector<64x32xf32>
    %c0_162 = arith.constant 0 : index
    %c0_163 = arith.constant 0 : index
    %180 = vector.load %arg13[%c0_162, %c0_163] : memref<1x32xf32, #tpu.memory_space<vmem>>, vector<1x32xf32>
    %181 = vector.broadcast %180 : vector<1x32xf32> to vector<64x32xf32>
    %182 = arith.addf %179, %181 : vector<64x32xf32>
    %183 = arith.addf %176, %182 : vector<64x32xf32>
    %c0_164 = arith.constant 0 : index
    %c0_165 = arith.constant 0 : index
    %c0_166 = arith.constant 0 : index
    %184 = vector.load %arg14[%c0_164, %c0_165, %c0_166] : memref<1x64x32xf32, #tpu.memory_space<vmem>>, vector<1x64x32xf32>
    %185 = vector.shape_cast %184 : vector<1x64x32xf32> to vector<64x32xf32>
    %186 = vector.shape_cast %183 : vector<64x32xf32> to vector<1x64x32xf32>
    tpu.vector_store %arg14[%c0_164, %c0_165, %c0_166], %186 {strides = array<i32>} : memref<1x64x32xf32, #tpu.memory_space<vmem>>, vector<1x64x32xf32>,
    return
  }
  func.func @transform_0(%arg0: i32) -> (i32, i32, i32) {
    %c0_i32 = arith.constant 0 : i32
    %c0_i32_0 = arith.constant 0 : i32
    %c0_i32_1 = arith.constant 0 : i32
    return %arg0, %c0_i32, %c0_i32_0 : i32, i32, i32
  }
  func.func @transform_1(%arg0: i32) -> (i32, i32, i32) {
    %c0_i32 = arith.constant 0 : i32
    %c0_i32_0 = arith.constant 0 : i32
    %c0_i32_1 = arith.constant 0 : i32
    return %arg0, %c0_i32, %c0_i32_0 : i32, i32, i32
  }
  func.func @transform_2(%arg0: i32) -> (i32, i32) {
    %c0_i32 = arith.constant 0 : i32
    %c0_i32_0 = arith.constant 0 : i32
    %c0_i32_1 = arith.constant 0 : i32
    return %c0_i32, %c0_i32_0 : i32, i32
  }
  func.func @transform_3(%arg0: i32) -> (i32, i32) {
    %c0_i32 = arith.constant 0 : i32
    %c0_i32_0 = arith.constant 0 : i32
    %c0_i32_1 = arith.constant 0 : i32
    return %c0_i32, %c0_i32_0 : i32, i32
  }
  func.func @transform_4(%arg0: i32) -> (i32, i32) {
    %c0_i32 = arith.constant 0 : i32
    %c0_i32_0 = arith.constant 0 : i32
    %c0_i32_1 = arith.constant 0 : i32
    return %c0_i32, %c0_i32_0 : i32, i32
  }
  func.func @transform_5(%arg0: i32) -> (i32, i32) {
    %c0_i32 = arith.constant 0 : i32
    %c0_i32_0 = arith.constant 0 : i32
    %c0_i32_1 = arith.constant 0 : i32
    return %c0_i32, %c0_i32_0 : i32, i32
  }
  func.func @transform_6(%arg0: i32) -> (i32, i32) {
    %c0_i32 = arith.constant 0 : i32
    %c0_i32_0 = arith.constant 0 : i32
    %c0_i32_1 = arith.constant 0 : i32
    return %c0_i32, %c0_i32_0 : i32, i32
  }
  func.func @transform_7(%arg0: i32) -> (i32, i32) {
    %c0_i32 = arith.constant 0 : i32
    %c0_i32_0 = arith.constant 0 : i32
    %c0_i32_1 = arith.constant 0 : i32
    return %c0_i32, %c0_i32_0 : i32, i32
  }
  func.func @transform_8(%arg0: i32) -> (i32, i32) {
    %c0_i32 = arith.constant 0 : i32
    %c0_i32_0 = arith.constant 0 : i32
    %c0_i32_1 = arith.constant 0 : i32
    return %c0_i32, %c0_i32_0 : i32, i32
  }
  func.func @transform_9(%arg0: i32) -> (i32, i32) {
    %c0_i32 = arith.constant 0 : i32
    %c0_i32_0 = arith.constant 0 : i32
    %c0_i32_1 = arith.constant 0 : i32
    return %c0_i32, %c0_i32_0 : i32, i32
  }
  func.func @transform_10(%arg0: i32) -> (i32, i32) {
    %c0_i32 = arith.constant 0 : i32
    %c0_i32_0 = arith.constant 0 : i32
    %c0_i32_1 = arith.constant 0 : i32
    return %c0_i32, %c0_i32_0 : i32, i32
  }
  func.func @transform_11(%arg0: i32) -> (i32, i32) {
    %c0_i32 = arith.constant 0 : i32
    %c0_i32_0 = arith.constant 0 : i32
    %c0_i32_1 = arith.constant 0 : i32
    return %c0_i32, %c0_i32_0 : i32, i32
  }
  func.func @transform_12(%arg0: i32) -> (i32, i32) {
    %c0_i32 = arith.constant 0 : i32
    %c0_i32_0 = arith.constant 0 : i32
    %c0_i32_1 = arith.constant 0 : i32
    return %c0_i32, %c0_i32_0 : i32, i32
  }
  func.func @transform_13(%arg0: i32) -> (i32, i32, i32) {
    %c0_i32 = arith.constant 0 : i32
    %c0_i32_0 = arith.constant 0 : i32
    %c0_i32_1 = arith.constant 0 : i32
    return %arg0, %c0_i32, %c0_i32_0 : i32, i32, i32
  }
}

</mosaic_0001>

<bundles_post_ra>
// kernel: midblock_forward.4
= control target key start
LH: loop header
LB: loop body
LE: loop exit
PB: predicated region body
PF: predicated region fallthrough
CT: control target
= control target key end

     0   :  { %s2061_s27 = smov 0   ;;  %s2754_s0 = inlined_call_operand.vmem [shape: f32[2,64,32], index: 0, kind: input, shape index: {}]   ;;  %s2755_s1 = inlined_call_operand.vmem [shape: f32[1,32], index: 1, kind: input, shape index: {}]   ;;  %s2756_s2 = inlined_call_operand.vmem [shape: f32[1,32], index: 2, kind: input, shape index: {}]   ;;  %s2757_s3 = inlined_call_operand.vmem [shape: f32[32,32], index: 3, kind: input, shape index: {}]   ;;  %s2758_s4 = inlined_call_operand.vmem [shape: bf16[32,96], index: 4, kind: input, shape index: {}]   ;;  %s2759_s5 = inlined_call_operand.vmem [shape: f32[1,96], index: 5, kind: input, shape index: {}]   ;;  %s2760_s6 = inlined_call_operand.vmem [shape: bf16[32,32], index: 6, kind: input, shape index: {}]   ;;  %s2761_s7 = inlined_call_operand.vmem [shape: f32[1,32], index: 7, kind: input, shape index: {}]   ;;  %s2762_s8 = inlined_call_operand.vmem [shape: f32[2,64,32], index: 8, kind: output, shape index: {}]  }
   0x1 LB: > { %s1685_s28 = sadd.s32 4294967295, %s2000_s27   ;;  %p1689_p0 = scmp.ge.s32.totalorder %s2000_s27, 1  ;;  %s2000_s27 = sphi %s2061_s27, %s18_s27  }
   0x2   : > { %p262_p1 = scmp.lt.s32.totalorder %s2000_s27, 3 }
   0x4   : > { %p263_p2 = pnand %p1689_p0, %p262_p1 }
   0x5   : > { %p296_p3 = scmp.lt.s32.totalorder (!%p263_p2), %s1685_s28, 1  ;;  %s2002_s9 = smov (!%p263_p2), 88  }
   0x6   : > { %266 = sbr.rel (%p263_p2) target bundleno = 1920 (0x780), region = 52  ;;  %s2003_s10 = smov (!%p263_p2), 64  }
   0x7   : > { %s2004_s11 = smov (!%p263_p2), 96   ;;  %s2005_s12 = smov (!%p263_p2), 80  }
   0x8   : > { %s2006_s13 = smov (!%p263_p2), 120   ;;  %s2007_s14 = smov (!%p263_p2), 72  }
   0x9   : > { %s2008_s16 = smov (!%p263_p2), 112   ;;  %s2009_s17 = smov (!%p263_p2), 104  }
   0xa   : > { %s2010_s19 = smov (!%p263_p2), 56   ;;  %s2011_s20 = smov (!%p263_p2), 48  }
   0xb   : > { %v320_v0 = vld [vmem:[%s2757_s3 + $0x18] sm:$0xff]  ;;  %v319_v1 = vld [vmem:[%s2757_s3 + $0x10] sm:$0xff]  ;;  %v318_v2 = vld [vmem:[%s2757_s3 + $0x8] sm:$0xff]  ;;  %s2764_s28 = smov (!%p296_p3, %s1685_s28), 1  ;;  %vm321_vm0 = vcmask 261120   ;;  %vm553_vm4 = vcmask 64512  }
   0xc   : > { %387 = vmatpush.msra.mxu0 %v320_v0  ;;  %410 = vmatpush.msra.mxu1 %v320_v0  ;;  %v317_v3 = vld [vmem:[%s2757_s3] sm:$0xff]  ;;  %s1754_s15 = sshll.u32 %s2764_s28, 6  ;;  %v1757_v62 = vld [vmem:[%s2758_s4 + $0x8] sm:$0xff]  ;;  %vm615_vm5 = vcmask 523264   ;;  %s2012_s21 = smov 40   ;;  %vm1531_vm6 = vcmask 130048  }
   0xd   : > { %s2089_s18 = scalar_lea.vmem %s2754_s0, %s1754_s15  ;;  %1760 = vmatpush.bf16.msra.mxu2 %v1757_v62  ;;  %v1756_v63 = vld [vmem:[%s2758_s4] sm:$0xff]  ;;  %s2013_s22 = smov 8   ;;  %vm1540_vm7 = vcmask 195584  }
   0xe   : > { %388 = vmatpush.msra.mxu0 %v319_v1  ;;  %411 = vmatpush.msra.mxu1 %v319_v1  ;;  %v2092_v4 = vld [vmem:[%s2089_s18] sm:$0xff]  ;;  %v2095_v5 = vld [vmem:[%s2089_s18 + $0x8] sm:$0xff]  ;;  %v2098_v6 = vld [vmem:[%s2089_s18 + $0x10] sm:$0xff]  ;;  %s2014_s23 = smov 24   ;;  %s2015_s24 = smov 16  }
   0xf   : > { %v2101_v7 = vld [vmem:[%s2089_s18 + $0x18] sm:$0xff]  ;;  %v322_v8 = vsel %vm321_vm0, %v2092_v4, 0.0  ;;  %v323_v9 = vsel %vm321_vm0, %v2095_v5, 0.0  ;;  %v325_v10 = vsel %vm321_vm0, %v2098_v6, 0.0  ;;  %v343_v11 = vmul.f32 %v2092_v4, %v2092_v4  ;;  %v2112_v12 = vld [vmem:[%s2089_s18 + $0x20] sm:$0xff]  ;;  %v2121_v17 = vld [vmem:[%s2089_s18 + $0x28] sm:$0xff] }
  0x10   : > { %389 = vmatpush.msra.mxu0 %v318_v2  ;;  %412 = vmatpush.msra.mxu1 %v318_v2  ;;  %v324_v13 = vadd.f32 %v323_v9, %v322_v8  ;;  %v327_v14 = vsel %vm321_vm0, %v2101_v7, 0.0  ;;  %v344_v15 = vmul.f32 %v2095_v5, %v2095_v5  ;;  %v345_v16 = vmul.f32 %v2098_v6, %v2098_v6  ;;  %v2132_v24 = vld [vmem:[%s2089_s18 + $0x30] sm:$0xff]  ;;  %v2141_v31 = vld [vmem:[%s2089_s18 + $0x38] sm:$0xff] }
  0x11   : > { %v346_v19 = vmul.f32 %v2101_v7, %v2101_v7  ;;  %v329_v20 = vsel %vm321_vm0, %v2112_v12, 0.0  ;;  %v347_v21 = vmul.f32 %v2112_v12, %v2112_v12  ;;  %v351_v22 = vsel %vm321_vm0, %v343_v11, 0.0  ;;  %1761 = vmatpush.bf16.msra.mxu2 %v1756_v63 }
  0x12   : > { %390 = vmatpush.msra.mxu0 %v317_v3  ;;  %413 = vmatpush.msra.mxu1 %v317_v3  ;;  %v326_v18 = vadd.f32 %v325_v10, %v324_v13  ;;  %v352_v23 = vsel %vm321_vm0, %v344_v15, 0.0  ;;  %v354_v27 = vsel %vm321_vm0, %v345_v16, 0.0  ;;  %v331_v28 = vsel %vm321_vm0, %v2121_v17, 0.0 }
  0x13   : > { %v353_v26 = vadd.f32 %v352_v23, %v351_v22  ;;  %v348_v29 = vmul.f32 %v2121_v17, %v2121_v17  ;;  %v356_v30 = vsel %vm321_vm0, %v346_v19, 0.0  ;;  %v333_v34 = vsel %vm321_vm0, %v2132_v24, 0.0  ;;  %v1852_v23 = vld [vmem:[%s2755_s1] ss:$0 sm:$0xff] }
  0x14   : > { %v328_v25 = vadd.f32 %v327_v14, %v326_v18  ;;  %v349_v35 = vmul.f32 %v2132_v24, %v2132_v24  ;;  %v358_v36 = vsel %vm321_vm0, %v347_v21, 0.0  ;;  %v335_v39 = vsel %vm321_vm0, %v2141_v31, 0.0  ;;  %514 = vmatpush.bf16.msrb.mxu1 %v1757_v62 }
  0x15   : > { %v355_v33 = vadd.f32 %v354_v27, %v353_v26  ;;  %v350_v40 = vmul.f32 %v2141_v31, %v2141_v31  ;;  %v360_v41 = vsel %vm321_vm0, %v348_v29, 0.0  ;;  %v1853_v29 = vld [vmem:[%s2756_s2] ss:$0 sm:$0xff] }
  0x16   : > { %v330_v32 = vadd.f32 %v329_v20, %v328_v25  ;;  %v362_v44 = vsel %vm321_vm0, %v349_v35, 0.0 }
  0x17   : > { %v357_v38 = vadd.f32 %v356_v30, %v355_v33  ;;  %v364_v47 = vsel %vm321_vm0, %v350_v40, 0.0 }
  0x18   : > { %v332_v37 = vadd.f32 %v331_v28, %v330_v32  ;;  %515 = vmatpush.bf16.msrb.mxu1 %v1756_v63 }
  0x19   : > { %v359_v43 = vadd.f32 %v358_v36, %v357_v38 }
  0x1a   : > { %v334_v42 = vadd.f32 %v333_v34, %v332_v37 }
  0x1b   : > { %v361_v46 = vadd.f32 %v360_v41, %v359_v43 }
  0x1c   : > { %v336_v45 = vadd.f32 %v335_v39, %v334_v42 }
  0x1d   : > { %v363_v49 = vadd.f32 %v362_v44, %v361_v46 }
  0x1e   : > { %v337_v48 = vrot.slane %v336_v45, 4 }
  0x1f   : > { %v365_v51 = vadd.f32 %v364_v47, %v363_v49 }
  0x20   : > { %v338_v50 = vadd.f32 %v337_v48, %v336_v45 }
  0x21   : > { %v366_v53 = vrot.slane %v365_v51, 4 }
  0x22   : > { %v339_v52 = vrot.slane %v338_v50, 2 }
  0x23   : > { %v367_v55 = vadd.f32 %v366_v53, %v365_v51 }
  0x24   : > { %v340_v54 = vadd.f32 %v339_v52, %v338_v50 }
  0x25   : > { %v368_v57 = vrot.slane %v367_v55, 2 }
  0x26   : > { %v341_v56 = vrot.slane %v340_v54, 1 }
  0x27   : > { %v369_v59 = vadd.f32 %v368_v57, %v367_v55 }
  0x28   : > { %v342_v58 = vadd.f32 %v341_v56, %v340_v54 }
  0x29   : > { %v370_v60 = vrot.slane %v369_v59, 1 }
  0x2a   : > { %1694 = vmatmul.msk.f32.vlgmr.msra.gmra.mxu0 %vm321_vm0, %v342_v58 }
  0x2b   : > { %v371_v61 = vadd.f32 %v370_v60, %v369_v59 }
  0x2d   : > { %1695 = vmatmul.msk.f32.vlgmr.msra.gmra.mxu1 %vm321_vm0, %v371_v61 }
  0xa7   : > { %v392_v0 = vpop.f32.mrf.mxu0 }
  0xa8   : > { %v418_v1 = vmul.f32 %v392_v0, %v392_v0  ;;  %v421_v15 = vperm.slane %v392_v0, 0 }
  0xaa   : > { %v415_v2 = vpop.f32.mrf.mxu1  ;;  %v422_v20 = vsub.f32 %v2092_v4, %v421_v15  ;;  %v423_v22 = vsub.f32 %v2095_v5, %v421_v15  ;;  %v426_v25 = vsub.f32 %v2112_v12, %v421_v15  ;;  %v427_v26 = vsub.f32 %v2121_v17, %v421_v15 }
  0xab   : > { %v419_v3 = vsub.f32 %v415_v2, %v418_v1  ;;  %v424_v17 = vsub.f32 %v2098_v6, %v421_v15  ;;  %v425_v40 = vsub.f32 %v2101_v7, %v421_v15  ;;  %v428_v41 = vsub.f32 %v2132_v24, %v421_v15  ;;  %v1854_v24 = vld [vmem:[%s2759_s5] ss:$0 sm:$0xff] }
  0xac   : > { %v429_v42 = vsub.f32 %v2141_v31, %v421_v15 }
  0xad   : > { %v420_v8 = vmax.f32 %v419_v3, 0.0 }
  0xaf   : > { %v430_v9 = vadd.f32 1e-05, %v420_v8 }
  0xb1   : > { %1856 = vrsqrt.f32 %v430_v9  ;;  %vm437_vm2 = vweird.f32 %v430_v9 }
  0xb7   : > { %v1857_v10 = vpop.eup %1856 }
  0xb8   : > { %v432_v11 = vmul.f32 %v1857_v10, %v430_v9  ;;  %vm438_vm1 = vweird.f32 %v1857_v10 }
  0xb9   : > { %vm439_vm3 = vmor %vm437_vm2, %vm438_vm1 }
  0xba   : > { %v433_v13 = vmul.f32 %v1857_v10, %v432_v11 }
  0xbc   : > { %v434_v14 = vmul.f32 0.5, %v433_v13 }
  0xbe   : > { %v435_v16 = vsub.f32 1.5, %v434_v14 }
  0xc0   : > { %v436_v18 = vmul.f32 %v1857_v10, %v435_v16 }
  0xc2   : > { %v440_v19 = vsel %vm439_vm3, %v1857_v10, %v436_v18 }
  0xc3   : > { %v441_v21 = vperm.slane %v440_v19, 0 }
  0xc5   : > { %v442_v27 = vmul.f32 %v441_v21, %v422_v20  ;;  %v443_v28 = vmul.f32 %v441_v21, %v423_v22  ;;  %v446_v30 = vmul.f32 %v441_v21, %v426_v25  ;;  %v447_v32 = vmul.f32 %v441_v21, %v427_v26 }
  0xc6   : > { %v444_v43 = vmul.f32 %v441_v21, %v424_v17  ;;  %v445_v44 = vmul.f32 %v441_v21, %v425_v40  ;;  %v448_v45 = vmul.f32 %v441_v21, %v428_v41  ;;  %v449_v46 = vmul.f32 %v441_v21, %v429_v42 }
  0xc7   : > { %v453_v4 = vmul.f32 %v1852_v23, %v442_v27  ;;  %v454_v33 = vmul.f32 %v1852_v23, %v443_v28  ;;  %v457_v34 = vmul.f32 %v1852_v23, %v446_v30  ;;  %v458_v5 = vmul.f32 %v1852_v23, %v447_v32 }
  0xc8   : > { %v455_v47 = vmul.f32 %v1852_v23, %v444_v43  ;;  %v456_v48 = vmul.f32 %v1852_v23, %v445_v44  ;;  %v459_v49 = vmul.f32 %v1852_v23, %v448_v45  ;;  %v460_v50 = vmul.f32 %v1852_v23, %v449_v46 }
  0xc9   : > { %v464_v35 = vadd.f32 %v1853_v29, %v453_v4  ;;  %v465_v36 = vadd.f32 %v1853_v29, %v454_v33  ;;  %v468_v37 = vadd.f32 %v1853_v29, %v457_v34  ;;  %v469_v38 = vadd.f32 %v1853_v29, %v458_v5 }
  0xca   : > { %v466_v51 = vadd.f32 %v1853_v29, %v455_v47  ;;  %v467_v6 = vadd.f32 %v1853_v29, %v456_v48  ;;  %v470_v52 = vadd.f32 %v1853_v29, %v459_v49  ;;  %v471_v53 = vadd.f32 %v1853_v29, %v460_v50 }
  0xcb   : > { %v472_v39 = vpack.c.bf16 %v465_v36, %v464_v35  ;;  %v474_v12 = vpack.c.bf16 %v469_v38, %v468_v37 }
  0xcc   : > { %v473_v54 = vpack.c.bf16 %v467_v6, %v466_v51  ;;  %v475_v55 = vpack.c.bf16 %v471_v53, %v470_v52 }
  0xcd   : > { %1704 = vmatmul.msk.bf16.vlgmr.msrb.gmra.mxu1 %vm321_vm0, %v472_v39  ;;  %1706 = vmatmul.msk.bf16.vlgmr.msra.gmra.mxu2 %vm321_vm0, %v474_v12 }
  0xdd   : > { %1705 = vmatmul.msk.bf16.gmra.mxu1 %vm321_vm0, %v473_v54  ;;  %1707 = vmatmul.msk.bf16.gmra.mxu2 %vm321_vm0, %v475_v55 }
 0x14a   : > { %v517_v7 = vpop.f32.mrf.mxu1 }
 0x14b   : > { %v518_v57 = vadd.f32 %v1854_v24, %v517_v7 }
 0x150   : > { %v527_v31 = vpop.f32.mrf.mxu2 }
 0x151   : > { %v528_v13 = vadd.f32 %v1854_v24, %v527_v31 }
 0x152   : > { %v519_v56 = vpop.f32.mrf.mxu1 }
 0x153   : > { %v520_v58 = vadd.f32 %v1854_v24, %v519_v56 }
 0x155   : > { %v2184_v59 = vpack.c.bf16 %v520_v58, %v518_v57 }
 0x157   : > { %769 = vrot.lane.b32.xlu2 %v2184_v59, %s2002_s9 }
 0x158   : > { %v529_v60 = vpop.f32.mrf.mxu2 }
 0x159   : > { %v530_v11 = vadd.f32 %v1854_v24, %v529_v60 }
 0x15a   : > { %v522_v61 = vpop.f32.mrf.mxu1 }
 0x15b   : > { %v523_v0 = vadd.f32 %v1854_v24, %v522_v61  ;;  %v2198_v14 = vpack.c.bf16 %v530_v11, %v528_v13 }
 0x15f   : > { %708 = vrot.lane.b32.xlu2 %v2184_v59, %s2003_s10 }
 0x160   : > { %v532_v62 = vpop.f32.mrf.mxu2 }
 0x161   : > { %v533_v8 = vadd.f32 %v1854_v24, %v532_v62 }
 0x162   : > { %v524_v63 = vpop.f32.mrf.mxu1 }
 0x163   : > { %v525_v1 = vadd.f32 %v1854_v24, %v524_v63 }
 0x165   : > { %v2190_v2 = vpack.c.bf16 %v525_v1, %v523_v0 }
 0x167   : > { %547 = vrot.lane.b32.xlu1 %v2190_v2, %s2004_s11  ;;  %991 = vrot.lane.b32.xlu2 %v2184_v59, %s2005_s12 }
 0x168   : > { %v534_v3 = vpop.f32.mrf.mxu2 }
 0x169   : > { %v535_v9 = vadd.f32 %v1854_v24, %v534_v3 }
 0x16b   : > { %v2194_v10 = vpack.c.bf16 %v535_v9, %v533_v8 }
 0x16d   : > { %551 = vrot.lane.b32.xlu0 %v2194_v10, %s2004_s11 }
 0x16f   : > { %545 = vrot.lane.b32.xlu1 %v2184_v59, %s2004_s11 }
 0x175   : > { %549 = vrot.lane.b32.xlu0 %v2198_v14, %s2004_s11 }
 0x177   : > { %773 = vrot.lane.b32.xlu1 %v2198_v14, %s2002_s9 }
 0x17d   : > { %712 = vrot.lane.b32.xlu0 %v2198_v14, %s2003_s10 }
 0x17f   : > { %771 = vrot.lane.b32.xlu1 %v2190_v2, %s2002_s9 }
 0x185   : > { %710 = vrot.lane.b32.xlu0 %v2190_v2, %s2003_s10 }
 0x187   : > { %761 = vrot.lane.b32.xlu1 %v2184_v59, %s2006_s13 }
 0x18d   : > { %1215 = vrot.lane.b32.xlu0 %v2190_v2, %s2007_s14 }
 0x18f   : > { %763 = vrot.lane.b32.xlu1 %v2190_v2, %s2006_s13 }
 0x195   : > { %775 = vrot.lane.b32.xlu0 %v2194_v10, %s2002_s9 }
 0x197   : > { %765 = vrot.lane.b32.xlu1 %v2198_v14, %s2006_s13 }
 0x19d   : > { %997 = vrot.lane.b32.xlu0 %v2194_v10, %s2005_s12 }
 0x19f   : > { %995 = vrot.lane.b32.xlu1 %v2198_v14, %s2005_s12 }
 0x1a5   : > { %1219 = vrot.lane.b32.xlu0 %v2194_v10, %s2007_s14 }
 0x1a7   : > { %1217 = vrot.lane.b32.xlu1 %v2198_v14, %s2007_s14 }
 0x1af   : > { %993 = vrot.lane.b32.xlu1 %v2190_v2, %s2005_s12 }
 0x1b1   : > { %v770_v39 = vpop.permute.xlu2 %769 }
 0x1b2   : > { %v790_v17 = vsel %vm553_vm4, %v770_v39, 0 }
 0x1b7   : > { %1213 = vrot.lane.b32.xlu1 %v2184_v59, %s2007_s14 }
 0x1b9   : > { %v709_v49 = vpop.permute.xlu2 %708 }
 0x1bf   : > { %983 = vrot.lane.b32.xlu1 %v2184_v59, %s2008_s16 }
 0x1c1   : > { %v992_v53 = vpop.permute.xlu2 %991 }
 0x1c2   : > { %v1012_v54 = vsel %vm553_vm4, %v992_v53, 0 }
 0x1c7   : > { %1205 = vrot.lane.b32.xlu1 %v2184_v59, %s2009_s17 }
 0x1cf   : > { %714 = vrot.lane.b32.xlu1 %v2194_v10, %s2003_s10 }
 0x1d7   : > { %767 = vrot.lane.b32.xlu1 %v2194_v10, %s2006_s13  ;;  %s2725_s13 = scalar_lea.vmem %s2762_s8, %s1754_s15 }
 0x1d9   : > { %v548_v15 = vpop.permute.xlu1 %547 }
 0x1da   : > { %v570_v25 = vsel %vm553_vm4, %v548_v15, 0 }
 0x1df   : > { %v552_v16 = vpop.permute.xlu0 %551  ;;  %987 = vrot.lane.b32.xlu1 %v2198_v14, %s2008_s16 }
 0x1e0   : > { %v576_v18 = vsel %vm553_vm4, %v552_v16, 0 }
 0x1e1   : > { %582 = vmatpush.bf16.xpose.msra.mxu3 %v576_v18  ;;  %v546_v19 = vpop.permute.xlu1 %545 }
 0x1e2   : > { %v567_v28 = vsel %vm553_vm4, %v546_v19, 0 }
 0x1e7   : > { %v550_v20 = vpop.permute.xlu0 %549 }
 0x1e8   : > { %v573_v21 = vsel %vm553_vm4, %v550_v20, 0 }
 0x1e9   : > { %583 = vmatpush.bf16.xpose.msra.mxu3 %v573_v21  ;;  %v774_v22 = vpop.permute.xlu1 %773 }
 0x1ea   : > { %v796_v5 = vsel %vm553_vm4, %v774_v22, 0 }
 0x1ef   : > { %v713_v23 = vpop.permute.xlu0 %712 }
 0x1f1   : > { %584 = vmatpush.bf16.xpose.msra.mxu3 %v570_v25  ;;  %v772_v26 = vpop.permute.xlu1 %771 }
 0x1f2   : > { %v793_v37 = vsel %vm553_vm4, %v772_v26, 0 }
 0x1f7   : > { %v711_v27 = vpop.permute.xlu0 %710 }
 0x1f9   : > { %585 = vmatpush.bf16.xpose.msra.mxu3 %v567_v28  ;;  %v762_v29 = vpop.permute.xlu1 %761 }
 0x1ff   : > { %v1216_v30 = vpop.permute.xlu0 %1215 }
 0x200   : > { %1708 = vmatmul.msk.bf16.vlgmr.msra.gmra.mxu3 %vm553_vm4, %v2184_v59  ;;  %v1237_v44 = vsel %vm553_vm4, %v1216_v30, 0 }
 0x201   : > { %v764_v32 = vpop.permute.xlu1 %763 }
 0x207   : > { %v776_v4 = vpop.permute.xlu0 %775 }
 0x208   : > { %v799_v33 = vsel %vm553_vm4, %v776_v4, 0 }
 0x209   : > { %805 = vmatpush.bf16.xpose.msra.mxu1 %v799_v33  ;;  %v766_v34 = vpop.permute.xlu1 %765 }
 0x20f   : > { %v998_v36 = vpop.permute.xlu0 %997 }
 0x210   : > { %1709 = vmatmul.msk.bf16.gmra.mxu3 %vm553_vm4, %v2190_v2  ;;  %v1021_v50 = vsel %vm553_vm4, %v998_v36, 0 }
 0x211   : > { %806 = vmatpush.bf16.xpose.msra.mxu1 %v796_v5  ;;  %v996_v35 = vpop.permute.xlu1 %995 }
 0x212   : > { %v1018_v51 = vsel %vm553_vm4, %v996_v35, 0 }
 0x217   : > { %v1220_v12 = vpop.permute.xlu0 %1219 }
 0x218   : > { %v1243_v40 = vsel %vm553_vm4, %v1220_v12, 0 }
 0x219   : > { %807 = vmatpush.bf16.xpose.msra.mxu1 %v793_v37  ;;  %v1218_v38 = vpop.permute.xlu1 %1217 }
 0x21a   : > { %v1240_v42 = vsel %vm553_vm4, %v1218_v38, 0 }
 0x220   : > { %1710 = vmatmul.msk.bf16.gmra.mxu3 %vm553_vm4, %v2198_v14 }
 0x221   : > { %808 = vmatpush.bf16.xpose.msra.mxu1 %v790_v17  ;;  %v994_v41 = vpop.permute.xlu1 %993 }
 0x222   : > { %v1015_v52 = vsel %vm553_vm4, %v994_v41, 0 }
 0x228   : > { %1716 = vmatmul.msk.bf16.vlgmr.msra.gmra.mxu1 %vm553_vm4, %v762_v29 }
 0x229   : > { %1249 = vmatpush.bf16.xpose.msrb.mxu1 %v1243_v40  ;;  %v1214_v43 = vpop.permute.xlu1 %1213 }
 0x22a   : > { %v1234_v46 = vsel %vm553_vm4, %v1214_v43, 0 }
 0x230   : > { %1711 = vmatmul.msk.bf16.gmra.mxu3 %vm553_vm4, %v2194_v10 }
 0x231   : > { %1250 = vmatpush.bf16.xpose.msrb.mxu1 %v1240_v42  ;;  %v2250_v45 = vpop.permute.xlu1 %983 }
 0x238   : > { %1717 = vmatmul.msk.bf16.gmra.mxu1 %vm553_vm4, %v764_v32 }
 0x239   : > { %1251 = vmatpush.bf16.xpose.msrb.mxu1 %v1237_v44  ;;  %v1206_v47 = vpop.permute.xlu1 %1205 }
 0x241   : > { %1252 = vmatpush.bf16.xpose.msrb.mxu1 %v1234_v46  ;;  %v715_v48 = vpop.permute.xlu1 %714 }
 0x242   : > { %736 = vmatpush.bf16.msrb.mxu0 %v715_v48  ;;  %1762 = vmatpush.bf16.msrb.mxu2 %v715_v48 }
 0x243   : > { %1763 = vmatpush.bf16.msrb.mxu3 %v715_v48 }
 0x246   : > { %737 = vmatpush.bf16.msrb.mxu0 %v713_v23  ;;  %1764 = vmatpush.bf16.msrb.mxu2 %v713_v23 }
 0x247   : > { %1765 = vmatpush.bf16.msrb.mxu3 %v713_v23 }
 0x248   : > { %1718 = vmatmul.msk.bf16.gmra.mxu1 %vm553_vm4, %v766_v34 }
 0x249   : > { %v768_v6 = vpop.permute.xlu1 %767 }
 0x24a   : > { %738 = vmatpush.bf16.msrb.mxu0 %v711_v27  ;;  %1766 = vmatpush.bf16.msrb.mxu2 %v711_v27 }
 0x24b   : > { %1767 = vmatpush.bf16.msrb.mxu3 %v711_v27 }
 0x24e   : > { %739 = vmatpush.bf16.msrb.mxu0 %v709_v49  ;;  %1768 = vmatpush.bf16.msrb.mxu2 %v709_v49 }
 0x24f   : > { %1769 = vmatpush.bf16.msrb.mxu3 %v709_v49 }
 0x252   : > { %1027 = vmatpush.bf16.xpose.msra.mxu0 %v1021_v50 }
 0x258   : > { %1719 = vmatmul.msk.bf16.gmra.mxu1 %vm553_vm4, %v768_v6 }
 0x25a   : > { %1028 = vmatpush.bf16.xpose.msra.mxu0 %v1018_v51 }
 0x262   : > { %1029 = vmatpush.bf16.xpose.msra.mxu0 %v1015_v52 }
 0x268   : > { %1732 = vmatmul.msk.bf16.vlgmr.msrb.gmra.mxu1 %vm553_vm4, %v1206_v47 }
 0x26a   : > { %1030 = vmatpush.bf16.xpose.msra.mxu0 %v1012_v54 }
 0x283   : > { %v587_v55 = vpop.f32.mrf.mxu3 }
 0x284   : > { %v607_v7 = vmul.f32 0.35355338, %v587_v55 }
 0x286   : > { %v616_v24 = vsel %vm615_vm5, %v607_v7, -inf }
 0x287   : > { %617 = vmax.xlane.f32.xlu2 %v616_v24 }
 0x28b   : > { %v589_v31 = vpop.f32.mrf.mxu3 }
 0x28c   : > { %v608_v56 = vmul.f32 0.35355338, %v589_v31 }
 0x28e   : > { %v619_v57 = vsel %vm615_vm5, %v608_v56, -inf }
 0x28f   : > { %620 = vmax.xlane.f32.xlu2 %v619_v57 }
 0x293   : > { %v592_v58 = vpop.f32.mrf.mxu3 }
 0x294   : > { %v609_v60 = vmul.f32 0.35355338, %v592_v58 }
 0x296   : > { %v622_v61 = vsel %vm615_vm5, %v609_v60, -inf }
 0x297   : > { %623 = vmax.xlane.f32.xlu2 %v622_v61  ;;  %v988_v61 = vpop.permute.xlu1 %987 }
 0x29b   : > { %v594_v62 = vpop.f32.mrf.mxu3 }
 0x29c   : > { %v610_v63 = vmul.f32 0.35355338, %v594_v62 }
 0x29e   : > { %v625_v0 = vsel %vm615_vm5, %v610_v63, -inf }
 0x29f   : > { %626 = vmax.xlane.f32.xlu0 %v625_v0 }
 0x2a3   : > { %v597_v34 = vpop.f32.mrf.mxu3 }
 0x2a4   : > { %v2294_v38 = vmul.f32 0.35355338, %v597_v34 }
 0x2a5   : > { %v810_v4 = vpop.f32.mrf.mxu1 }
 0x2a6   : > { %v2292_v37 = vmul.f32 0.35355338, %v810_v4  ;;  %v628_v40 = vsel %vm615_vm5, %v2294_v38, -inf }
 0x2a8   : > { %v838_v17 = vsel %vm615_vm5, %v2292_v37, -inf }
 0x2ab   : > { %v599_v35 = vpop.f32.mrf.mxu3 }
 0x2ac   : > { %v2306_v46 = vmul.f32 0.35355338, %v599_v35 }
 0x2ad   : > { %v812_v33 = vpop.f32.mrf.mxu1 }
 0x2ae   : > { %v2302_v42 = vmul.f32 0.35355338, %v812_v33  ;;  %v631_v50 = vsel %vm615_vm5, %v2306_v46, -inf }
 0x2af   : > { %1207 = vrot.lane.b32.xlu2 %v2190_v2, %s2009_s17 }
 0x2b0   : > { %v841_v48 = vsel %vm615_vm5, %v2302_v42, -inf }
 0x2b3   : > { %985 = vrot.lane.b32.xlu0 %v2190_v2, %s2008_s16  ;;  %v602_v39 = vpop.f32.mrf.mxu3 }
 0x2b4   : > { %v2332_v57 = vmul.f32 0.35355338, %v602_v39 }
 0x2b5   : > { %v815_v5 = vpop.f32.mrf.mxu1 }
 0x2b6   : > { %v2318_v52 = vmul.f32 0.35355338, %v815_v5  ;;  %v634_v58 = vsel %vm615_vm5, %v2332_v57, -inf }
 0x2b8   : > { %v844_v55 = vsel %vm615_vm5, %v2318_v52, -inf }
 0x2bb   : > { %v604_v44 = vpop.f32.mrf.mxu3 }
 0x2bc   : > { %v2310_v49 = vmul.f32 0.35355338, %v604_v44 }
 0x2bd   : > { %v817_v36 = vpop.f32.mrf.mxu1 }
 0x2be   : > { %v2300_v41 = vmul.f32 0.35355338, %v817_v36  ;;  %v637_v6 = vsel %vm615_vm5, %v2310_v49, -inf }
 0x2c0   : > { %v847_v43 = vsel %vm615_vm5, %v2300_v41, -inf }
 0x2c5   : > { %v820_v12 = vpop.f32.mrf.mxu1 }
 0x2c6   : > { %v2314_v51 = vmul.f32 0.35355338, %v820_v12 }
 0x2c8   : > { %v850_v53 = vsel %vm615_vm5, %v2314_v51, -inf }
 0x2cd   : > { %v822_v47 = vpop.f32.mrf.mxu1 }
 0x2ce   : > { %v2326_v24 = vmul.f32 0.35355338, %v822_v47 }
 0x2d5   : > { %v825_v54 = vpop.f32.mrf.mxu1 }
 0x2fa   : > { %v618_v1 = vpop.xlane.xlu2 %617 }
 0x2fb   : > { %v640_v3 = vsub.f32 %v607_v7, %v618_v1  ;;  %v2324_v7 = vmul.f32 0.35355338, %v825_v54 }
 0x2fd   : > { %v648_v8 = vmul.f32 1.442695, %v640_v3  ;;  %v856_v31 = vsel %vm615_vm5, %v2324_v7, -inf }
 0x2ff   : > { %1858 = vpow2.f32 %v648_v8 }
 0x302   : > { %v621_v9 = vpop.xlane.xlu2 %620 }
 0x303   : > { %v641_v11 = vsub.f32 %v608_v56, %v621_v9  ;;  %v853_v56 = vsel %vm615_vm5, %v2326_v24, -inf }
 0x305   : > { %v2269_v13 = vpop.eup %1858  ;;  %v650_v15 = vmul.f32 1.442695, %v641_v11 }
 0x306   : > { %v664_v16 = vsel %vm615_vm5, %v2269_v13, 0.0 }
 0x307   : > { %1860 = vpow2.f32 %v650_v15  ;;  %665 = vadd.xlane.f32.xlu2 %v664_v16 }
 0x30a   : > { %v624_v18 = vpop.xlane.xlu2 %623 }
 0x30b   : > { %v642_v19 = vsub.f32 %v609_v60, %v624_v18  ;;  %v827_v60 = vpop.f32.mrf.mxu1 }
 0x30c   : > { %v2336_v62 = vmul.f32 0.35355338, %v827_v60 }
 0x30d   : > { %v2273_v20 = vpop.eup %1860  ;;  %v652_v21 = vmul.f32 1.442695, %v642_v19 }
 0x30e   : > { %v667_v22 = vsel %vm615_vm5, %v2273_v20, 0.0  ;;  %v859_v0 = vsel %vm615_vm5, %v2336_v62, -inf }
 0x30f   : > { %1862 = vpow2.f32 %v652_v21  ;;  %668 = vadd.xlane.f32.xlu1 %v667_v22 }
 0x312   : > { %v1208_v23 = vpop.permute.xlu2 %1207  ;;  %v627_v25 = vpop.xlane.xlu0 %626 }
 0x313   : > { %v643_v26 = vsub.f32 %v610_v63, %v627_v25  ;;  %1733 = vmatmul.msk.bf16.gmra.mxu1 %vm553_vm4, %v1208_v23 }
 0x315   : > { %v2278_v27 = vpop.eup %1862  ;;  %v654_v28 = vmul.f32 1.442695, %v643_v26 }
 0x316   : > { %v670_v29 = vsel %vm615_vm5, %v2278_v27, 0.0 }
 0x317   : > { %1864 = vpow2.f32 %v654_v28  ;;  %671 = vadd.xlane.f32.xlu0 %v670_v29 }
 0x31d   : > { %v2282_v30 = vpop.eup %1864 }
 0x31e   : > { %v673_v32 = vsel %vm615_vm5, %v2282_v30, 0.0 }
 0x31f   : > { %674 = vadd.xlane.f32.xlu2 %v673_v32 }
 0x325   : > { %v986_v3 = vpop.permute.xlu0 %985 }
 0x328   : > { %1211 = vrot.lane.b32.xlu1 %v2194_v10, %s2009_s17 }
 0x32b   : > { %1209 = vrot.lane.b32.xlu0 %v2198_v14, %s2009_s17 }
 0x337   : > { %989 = vrot.lane.b32.xlu2 %v2194_v10, %s2008_s16 }
 0x352   : > { %839 = vmax.xlane.f32.xlu1 %v838_v17 }
 0x355   : > { %629 = vmax.xlane.f32.xlu0 %v628_v40 }
 0x35a   : > { %848 = vmax.xlane.f32.xlu1 %v847_v43 }
 0x35d   : > { %842 = vmax.xlane.f32.xlu0 %v841_v48  ;;  %v1254_v48 = vpop.f32.mrf.mxu1 }
 0x360   : > { %632 = vmax.xlane.f32.xlu2 %v631_v50 }
 0x362   : > { %638 = vmax.xlane.f32.xlu1 %v637_v6 }
 0x365   : > { %851 = vmax.xlane.f32.xlu0 %v850_v53  ;;  %v1256_v50 = vpop.f32.mrf.mxu1 }
 0x366   : > { %v2383_v54 = vmul.f32 0.35355338, %v1256_v50 }
 0x368   : > { %845 = vmax.xlane.f32.xlu2 %v844_v55  ;;  %v1285_v55 = vsel %vm615_vm5, %v2383_v54, -inf }
 0x36d   : > { %857 = vmax.xlane.f32.xlu0 %v856_v31 }
 0x370   : > { %854 = vmax.xlane.f32.xlu2 %v853_v56 }
 0x378   : > { %635 = vmax.xlane.f32.xlu2 %v634_v58 }
 0x37a   : > { %v666_v63 = vpop.xlane.xlu2 %665 }
 0x37b   : > { %936 = vrot.lane.b32.xlu1 %v2194_v10, %s2010_s19  ;;  %1866 = vrcp.f32 %v666_v63 }
 0x380   : > { %860 = vmax.xlane.f32.xlu2 %v859_v0 }
 0x381   : > { %v1867_v8 = vpop.eup %1866 }
 0x382   : > { %v669_v1 = vpop.xlane.xlu1 %668  ;;  %v696_v11 = vmul.f32 %v1867_v8, %v2269_v13 }
 0x383   : > { %1868 = vrcp.f32 %v669_v1  ;;  %930 = vrot.lane.b32.xlu1 %v2184_v59, %s2010_s19 }
 0x389   : > { %v1869_v9 = vpop.eup %1868 }
 0x38a   : > { %v697_v15 = vmul.f32 %v1869_v9, %v2273_v20  ;;  %v672_v18 = vpop.xlane.xlu0 %671 }
 0x38b   : > { %1870 = vrcp.f32 %v672_v18 }
 0x38c   : > { %v704_v16 = vpack.c.bf16 %v697_v15, %v696_v11 }
 0x38e   : > { %1712 = vmatmul.msk.bf16.vlgmr.msrb.gmra.mxu0 %vm615_vm5, %v704_v16 }
 0x391   : > { %v1871_v21 = vpop.eup %1870 }
 0x392   : > { %v675_v19 = vpop.xlane.xlu2 %674  ;;  %v698_v23 = vmul.f32 %v1871_v21, %v2278_v27 }
 0x393   : > { %1872 = vrcp.f32 %v675_v19 }
 0x399   : > { %v1873_v22 = vpop.eup %1872 }
 0x39a   : > { %v699_v25 = vmul.f32 %v1873_v22, %v2282_v30  ;;  %v1212_v13 = vpop.permute.xlu1 %1211  ;;  %v990_v30 = vpop.permute.xlu2 %989 }
 0x39c   : > { %v705_v26 = vpack.c.bf16 %v699_v25, %v698_v23 }
 0x39d   : > { %v1210_v28 = vpop.permute.xlu0 %1209 }
 0x39e   : > { %1713 = vmatmul.msk.bf16.gmra.mxu0 %vm615_vm5, %v705_v26  ;;  %1734 = vmatmul.msk.bf16.gmra.mxu1 %vm553_vm4, %v1210_v28 }
 0x3ae   : > { %1724 = vmatmul.msk.bf16.vlgmr.msra.gmra.mxu0 %vm553_vm4, %v2250_v45  ;;  %1735 = vmatmul.msk.bf16.gmra.mxu1 %vm553_vm4, %v1212_v13 }
 0x3be   : > { %1725 = vmatmul.msk.bf16.gmra.mxu0 %vm553_vm4, %v986_v3 }
 0x3c5   : > { %v840_v20 = vpop.xlane.xlu1 %839 }
 0x3c6   : > { %v862_v29 = vsub.f32 %v2292_v37, %v840_v20 }
 0x3c8   : > { %v870_v27 = vmul.f32 1.442695, %v862_v29  ;;  %v630_v32 = vpop.xlane.xlu0 %629 }
 0x3c9   : > { %v644_v16 = vsub.f32 %v2294_v38, %v630_v32 }
 0x3ca   : > { %1874 = vpow2.f32 %v870_v27 }
 0x3cb   : > { %v656_v21 = vmul.f32 1.442695, %v644_v16 }
 0x3cd   : > { %v849_v37 = vpop.xlane.xlu1 %848 }
 0x3ce   : > { %1726 = vmatmul.msk.bf16.gmra.mxu0 %vm553_vm4, %v988_v61  ;;  %v865_v6 = vsub.f32 %v2300_v41, %v849_v37  ;;  %v2391_v61 = vmul.f32 0.35355338, %v1254_v48 }
 0x3d0   : > { %v2357_v4 = vpop.eup %1874  ;;  %v843_v33 = vpop.xlane.xlu0 %842  ;;  %v876_v53 = vmul.f32 1.442695, %v865_v6  ;;  %v1282_v8 = vsel %vm615_vm5, %v2391_v61, -inf }
 0x3d1   : > { %v863_v34 = vsub.f32 %v2302_v42, %v843_v33  ;;  %v886_v45 = vsel %vm615_vm5, %v2357_v4, 0.0 }
 0x3d2   : > { %887 = vadd.xlane.f32.xlu0 %v886_v45 }
 0x3d3   : > { %v872_v5 = vmul.f32 1.442695, %v863_v34  ;;  %v2362_v35 = vpop.xlane.xlu2 %632 }
 0x3d5   : > { %1876 = vpow2.f32 %v872_v5  ;;  %v2370_v42 = vpop.xlane.xlu1 %638 }
 0x3d6   : > { %v647_v48 = vsub.f32 %v2310_v49, %v2370_v42 }
 0x3d8   : > { %v852_v58 = vpop.xlane.xlu0 %851 }
 0x3d9   : > { %v866_v41 = vsub.f32 %v2314_v51, %v852_v58 }
 0x3db   : > { %v2364_v36 = vpop.eup %1876  ;;  %v846_v39 = vpop.xlane.xlu2 %845  ;;  %v878_v3 = vmul.f32 1.442695, %v866_v41 }
 0x3dc   : > { %v864_v12 = vsub.f32 %v2318_v52, %v846_v39  ;;  %v889_v17 = vsel %vm615_vm5, %v2364_v36, 0.0  ;;  %v1259_v52 = vpop.f32.mrf.mxu1 }
 0x3dd   : > { %890 = vadd.xlane.f32.xlu2 %v889_v17  ;;  %v2394_v0 = vmul.f32 0.35355338, %v1259_v52  ;;  %v662_v52 = vmul.f32 1.442695, %v647_v48 }
 0x3de   : > { %v874_v40 = vmul.f32 1.442695, %v864_v12  ;;  %1727 = vmatmul.msk.bf16.gmra.mxu0 %vm553_vm4, %v990_v30 }
 0x3df   : > { %v1288_v9 = vsel %vm615_vm5, %v2394_v0, -inf }
 0x3e0   : > { %1878 = vpow2.f32 %v874_v40  ;;  %v858_v13 = vpop.xlane.xlu0 %857 }
 0x3e1   : > { %1880 = vpow2.f32 %v876_v53  ;;  %v868_v30 = vsub.f32 %v2324_v7, %v858_v13 }
 0x3e2   : > { %1882 = vpow2.f32 %v878_v3 }
 0x3e3   : > { %v855_v63 = vpop.xlane.xlu2 %854  ;;  %1884 = vpow2.f32 %v656_v21  ;;  %v882_v39 = vmul.f32 1.442695, %v868_v30 }
 0x3e4   : > { %v1261_v31 = vpop.f32.mrf.mxu1  ;;  %v867_v23 = vsub.f32 %v2326_v24, %v855_v63 }
 0x3e5   : > { %v2402_v15 = vmul.f32 0.35355338, %v1261_v31 }
 0x3e6   : > { %v2372_v43 = vpop.eup %1878  ;;  %934 = vrot.lane.b32.xlu0 %v2198_v14, %s2010_s19  ;;  %v880_v20 = vmul.f32 1.442695, %v867_v23 }
 0x3e7   : > { %v892_v44 = vsel %vm615_vm5, %v2372_v43, 0.0  ;;  %v2387_v56 = vpop.eup %1880  ;;  %v1291_v22 = vsel %vm615_vm5, %v2402_v15, -inf }
 0x3e8   : > { %893 = vadd.xlane.f32.xlu1 %v892_v44  ;;  %v895_v60 = vsel %vm615_vm5, %v2387_v56, 0.0  ;;  %v2410_v25 = vpop.eup %1882  ;;  %1886 = vpow2.f32 %v880_v20 }
 0x3e9   : > { %v898_v27 = vsel %vm615_vm5, %v2410_v25, 0.0  ;;  %v2430_v37 = vpop.eup %1884 }
 0x3ea   : > { %v676_v17 = vsel %vm615_vm5, %v2430_v37, 0.0 }
 0x3eb   : > { %v636_v19 = vpop.xlane.xlu2 %635 }
 0x3ec   : > { %v646_v38 = vsub.f32 %v2332_v57, %v636_v19  ;;  %v645_v57 = vsub.f32 %v2306_v46, %v2362_v35 }
 0x3ed   : > { %v937_v47 = vpop.permute.xlu1 %936 }
 0x3ee   : > { %958 = vmatpush.bf16.msra.mxu2 %v937_v47  ;;  %v660_v33 = vmul.f32 1.442695, %v646_v38  ;;  %v658_v12 = vmul.f32 1.442695, %v645_v57  ;;  %v2435_v46 = vpop.eup %1886 }
 0x3ef   : > { %v901_v6 = vsel %vm615_vm5, %v2435_v46, 0.0 }
 0x3f0   : > { %1888 = vpow2.f32 %v660_v33 }
 0x3f1   : > { %1890 = vpow2.f32 %v882_v39 }
 0x3f2   : > { %1892 = vpow2.f32 %v658_v12 }
 0x3f3   : > { %v861_v45 = vpop.xlane.xlu2 %860 }
 0x3f4   : > { %v869_v7 = vsub.f32 %v2336_v62, %v861_v45 }
 0x3f5   : > { %932 = vrot.lane.b32.xlu2 %v2190_v2, %s2010_s19 }
 0x3f6   : > { %v884_v47 = vmul.f32 1.442695, %v869_v7  ;;  %v2445_v50 = vpop.eup %1888 }
 0x3f7   : > { %v682_v53 = vsel %vm615_vm5, %v2445_v50, 0.0 }
 0x3f8   : > { %1894 = vpow2.f32 %v884_v47 }
 0x3f9   : > { %1896 = vpow2.f32 %v662_v52 }
 0x401   : > { %1158 = vrot.lane.b32.xlu1 %v2194_v10, %s2011_s20 }
 0x40b   : > { %v2400_v11 = vpop.f32.mrf.mxu0 }
 0x410   : > { %1286 = vmax.xlane.f32.xlu0 %v1285_v55  ;;  %v2451_v55 = vpop.eup %1890 }
 0x411   : > { %v2453_v31 = vpop.eup %1892  ;;  %v904_v42 = vsel %vm615_vm5, %v2451_v55, 0.0 }
 0x412   : > { %v2459_v58 = vpop.eup %1894 }
 0x413   : > { %v2417_v29 = vpop.f32.mrf.mxu0  ;;  %v907_v41 = vsel %vm615_vm5, %v2459_v58, 0.0  ;;  %v2465_v63 = vpop.eup %1896 }
 0x418   : > { %896 = vadd.xlane.f32.xlu0 %v895_v60  ;;  %v679_v60 = vsel %vm615_vm5, %v2453_v31, 0.0 }
 0x41b   : > { %v1264_v1 = vpop.f32.mrf.mxu1  ;;  %v2437_v35 = vpop.f32.mrf.mxu0 }
 0x41c   : > { %v2405_v51 = vmul.f32 0.35355338, %v1264_v1  ;;  %v685_v1 = vsel %vm615_vm5, %v2465_v63, 0.0 }
 0x41e   : > { %1283 = vmax.xlane.f32.xlu2 %v1282_v8  ;;  %v1294_v26 = vsel %vm615_vm5, %v2405_v51, -inf }
 0x420   : > { %1289 = vmax.xlane.f32.xlu0 %v1288_v9 }
 0x423   : > { %v1266_v18 = vpop.f32.mrf.mxu1  ;;  %v2455_v49 = vpop.f32.mrf.mxu0 }
 0x424   : > { %v2415_v28 = vmul.f32 0.35355338, %v1266_v18 }
 0x426   : > { %1292 = vmax.xlane.f32.xlu2 %v1291_v22  ;;  %v1297_v34 = vsel %vm615_vm5, %v2415_v28, -inf }
 0x428   : > { %1295 = vmax.xlane.f32.xlu0 %v1294_v26 }
 0x42b   : > { %899 = vadd.xlane.f32.xlu1 %v898_v27  ;;  %v1269_v24 = vpop.f32.mrf.mxu1  ;;  %v1032_v3 = vpop.f32.mrf.mxu0 }
 0x42c   : > { %v2421_v32 = vmul.f32 0.35355338, %v1269_v24  ;;  %v2469_v8 = vmul.f32 0.35355338, %v1032_v3  ;;  %v931_v27 = vpop.permute.xlu1 %930 }
 0x42e   : > { %1298 = vmax.xlane.f32.xlu2 %v1297_v34  ;;  %v1300_v5 = vsel %vm615_vm5, %v2421_v32, -inf  ;;  %v1060_v16 = vsel %vm615_vm5, %v2469_v8, -inf }
 0x430   : > { %1301 = vmax.xlane.f32.xlu0 %v1300_v5 }
 0x433   : > { %677 = vadd.xlane.f32.xlu1 %v676_v17  ;;  %v1271_v40 = vpop.f32.mrf.mxu1  ;;  %v1034_v20 = vpop.f32.mrf.mxu0 }
 0x434   : > { %v2439_v44 = vmul.f32 0.35355338, %v1271_v40  ;;  %v2488_v39 = vmul.f32 0.35355338, %v1034_v20 }
 0x436   : > { %v1303_v62 = vsel %vm615_vm5, %v2439_v44, -inf }
 0x437   : > { %1304 = vmax.xlane.f32.xlu2 %v1303_v62 }
 0x438   : > { %902 = vadd.xlane.f32.xlu0 %v901_v6 }
 0x43b   : > { %683 = vadd.xlane.f32.xlu1 %v682_v53 }
 0x43f   : > { %905 = vadd.xlane.f32.xlu2 %v904_v42 }
 0x440   : > { %680 = vadd.xlane.f32.xlu0 %v679_v60 }
 0x443   : > { %908 = vadd.xlane.f32.xlu1 %v907_v41 }
 0x445   : > { %v888_v9 = vpop.xlane.xlu0 %887 }
 0x446   : > { %1898 = vrcp.f32 %v888_v9 }
 0x448   : > { %686 = vadd.xlane.f32.xlu0 %v685_v1 }
 0x44c   : > { %v1899_v19 = vpop.eup %1898 }
 0x44d   : > { %v2474_v22 = vmul.f32 %v1899_v19, %v2357_v4  ;;  %v1037_v4 = vpop.f32.mrf.mxu0 }
 0x450   : > { %v891_v18 = vpop.xlane.xlu2 %890  ;;  %1061 = vmax.xlane.f32.xlu0 %v1060_v16 }
 0x451   : > { %1900 = vrcp.f32 %v891_v18 }
 0x455   : > { %v1039_v24 = vpop.f32.mrf.mxu0 }
 0x457   : > { %v1901_v21 = vpop.eup %1900 }
 0x458   : > { %v2477_v23 = vmul.f32 %v1901_v21, %v2364_v36  ;;  %v935_v26 = vpop.permute.xlu0 %934  ;;  %v933_v13 = vpop.permute.xlu2 %932 }
 0x459   : > { %959 = vmatpush.bf16.msra.mxu2 %v935_v26 }
 0x45a   : > { %v926_v38 = vpack.c.bf16 %v2477_v23, %v2474_v22 }
 0x45b   : > { %v894_v36 = vpop.xlane.xlu1 %893 }
 0x45c   : > { %1156 = vrot.lane.b32.xlu1 %v2198_v14, %s2011_s20 }
 0x45d   : > { %960 = vmatpush.bf16.msra.mxu2 %v933_v13  ;;  %v1042_v33 = vpop.f32.mrf.mxu0 }
 0x461   : > { %961 = vmatpush.bf16.msra.mxu2 %v931_v27 }
 0x464   : > { %1378 = vrot.lane.b32.xlu1 %v2198_v14, %s2012_s21  ;;  %1380 = vrot.lane.b32.xlu0 %v2194_v10, %s2012_s21  ;;  %v1063_v10 = vsel %vm615_vm5, %v2488_v39, -inf }
 0x465   : > { %v1044_v45 = vpop.f32.mrf.mxu0 }
 0x46d   : > { %v1047_v40 = vpop.f32.mrf.mxu0 }
 0x46e   : > { %v2499_v6 = vmul.f32 0.35355338, %v1047_v40 }
 0x470   : > { %v1078_v9 = vsel %vm615_vm5, %v2499_v6, -inf }
 0x473   : > { %v1159_v30 = vpop.permute.xlu1 %1158 }
 0x474   : > { %1180 = vmatpush.bf16.msra.mxu3 %v1159_v30 }
 0x483   : > { %v1287_v34 = vpop.xlane.xlu0 %1286 }
 0x484   : > { %v1307_v57 = vsub.f32 %v2383_v54, %v1287_v34  ;;  %v2496_v54 = vmul.f32 0.35355338, %v1039_v24 }
 0x486   : > { %v1316_v5 = vmul.f32 1.442695, %v1307_v57  ;;  %v1069_v1 = vsel %vm615_vm5, %v2496_v54, -inf  ;;  %v2539_v57 = vmul.f32 0.35355338, %v1042_v33 }
 0x488   : > { %1902 = vpow2.f32 %v1316_v5 }
 0x489   : > { %1904 = vrcp.f32 %v894_v36 }
 0x48b   : > { %v897_v7 = vpop.xlane.xlu0 %896 }
 0x48c   : > { %1906 = vrcp.f32 %v897_v7  ;;  %v1049_v7 = vpop.f32.mrf.mxu0 }
 0x48e   : > { %v2492_v14 = vpop.eup %1902  ;;  %1064 = vmax.xlane.f32.xlu1 %v1063_v10  ;;  %v2543_v10 = vmul.f32 0.35355338, %v1049_v7 }
 0x48f   : > { %v1333_v12 = vsel %vm615_vm5, %v2492_v14, 0.0  ;;  %v1905_v17 = vpop.eup %1904 }
 0x490   : > { %1334 = vadd.xlane.f32.xlu0 %v1333_v12  ;;  %v2502_v53 = vmul.f32 %v1905_v17, %v2372_v43  ;;  %v2514_v43 = vmul.f32 0.35355338, %v1044_v45  ;;  %v1081_v17 = vsel %vm615_vm5, %v2543_v10, -inf }
 0x491   : > { %v1284_v47 = vpop.xlane.xlu2 %1283 }
 0x492   : > { %v1907_v48 = vpop.eup %1906  ;;  %v1306_v62 = vsub.f32 %v2391_v61, %v1284_v47  ;;  %v1075_v21 = vsel %vm615_vm5, %v2514_v43, -inf }
 0x493   : > { %v1290_v52 = vpop.xlane.xlu0 %1289  ;;  %v2505_v42 = vmul.f32 %v1907_v48, %v2387_v56 }
 0x494   : > { %v1314_v60 = vmul.f32 1.442695, %v1306_v62  ;;  %v1308_v41 = vsub.f32 %v2394_v0, %v1290_v52 }
 0x495   : > { %v927_v3 = vpack.c.bf16 %v2505_v42, %v2502_v53 }
 0x496   : > { %1908 = vpow2.f32 %v1314_v60  ;;  %v1318_v61 = vmul.f32 1.442695, %v1308_v41  ;;  %1070 = vmax.xlane.f32.xlu1 %v1069_v1 }
 0x498   : > { %1910 = vpow2.f32 %v1318_v61  ;;  %1079 = vmax.xlane.f32.xlu0 %v1078_v9 }
 0x499   : > { %v1293_v56 = vpop.xlane.xlu2 %1292 }
 0x49a   : > { %v1309_v16 = vsub.f32 %v2402_v15, %v1293_v56  ;;  %v2529_v15 = vmul.f32 0.35355338, %v1037_v4  ;;  %v1072_v4 = vsel %vm615_vm5, %v2539_v57, -inf }
 0x49b   : > { %v2517_v0 = vpop.xlane.xlu0 %1295 }
 0x49c   : > { %v2519_v18 = vpop.eup %1908  ;;  %v1320_v19 = vmul.f32 1.442695, %v1309_v16  ;;  %v1066_v30 = vsel %vm615_vm5, %v2529_v15, -inf }
 0x49d   : > { %v1330_v26 = vsel %vm615_vm5, %v2519_v18, 0.0 }
 0x49e   : > { %v2525_v13 = vpop.eup %1910  ;;  %1912 = vpow2.f32 %v1320_v19  ;;  %1076 = vmax.xlane.f32.xlu1 %v1075_v21  ;;  %1331 = vadd.xlane.f32.xlu2 %v1330_v26  ;;  %v900_v27 = vpop.xlane.xlu1 %899 }
 0x49f   : > { %v1336_v20 = vsel %vm615_vm5, %v2525_v13, 0.0 }
 0x4a0   : > { %1337 = vadd.xlane.f32.xlu0 %v1336_v20 }
 0x4a3   : > { %v2531_v36 = vpop.xlane.xlu0 %1301 }
 0x4a4   : > { %v2533_v24 = vpop.eup %1912 }
 0x4a5   : > { %v1339_v34 = vsel %vm615_vm5, %v2533_v24, 0.0 }
 0x4a6   : > { %1067 = vmax.xlane.f32.xlu2 %v1066_v30  ;;  %v678_v5 = vpop.xlane.xlu1 %677 }
 0x4a7   : > { %1914 = vrcp.f32 %v678_v5 }
 0x4a8   : > { %1340 = vadd.xlane.f32.xlu0 %v1339_v34 }
 0x4ab   : > { %v903_v45 = vpop.xlane.xlu0 %902 }
 0x4ad   : > { %v1915_v33 = vpop.eup %1914 }
 0x4ae   : > { %1073 = vmax.xlane.f32.xlu2 %v1072_v4  ;;  %v684_v40 = vpop.xlane.xlu1 %683  ;;  %v700_v48 = vmul.f32 %v1915_v33, %v2430_v37 }
 0x4b3   : > { %v681_v12 = vpop.xlane.xlu0 %680 }
 0x4b4   : > { %1916 = vrcp.f32 %v681_v12 }
 0x4b5   : > { %1918 = vrcp.f32 %v684_v40 }
 0x4b6   : > { %1082 = vmax.xlane.f32.xlu2 %v1081_v17  ;;  %v909_v19 = vpop.xlane.xlu1 %908 }
 0x4b7   : > { %1376 = vrot.lane.b32.xlu1 %v2190_v2, %s2012_s21 }
 0x4ba   : > { %v1917_v47 = vpop.eup %1916 }
 0x4bb   : > { %v701_v62 = vmul.f32 %v1917_v47, %v2453_v31  ;;  %v687_v52 = vpop.xlane.xlu0 %686  ;;  %v1919_v41 = vpop.eup %1918 }
 0x4bc   : > { %1920 = vrcp.f32 %v687_v52  ;;  %v702_v61 = vmul.f32 %v1919_v41, %v2445_v50 }
 0x4bd   : > { %v706_v60 = vpack.c.bf16 %v701_v62, %v700_v48 }
 0x4bf   : > { %1152 = vrot.lane.b32.xlu1 %v2184_v59, %s2011_s20  ;;  %1714 = vmatmul.msk.bf16.vlgmr.msrb.gmra.mxu2 %vm615_vm5, %v706_v60 }
 0x4c2   : > { %v1921_v1 = vpop.eup %1920 }
 0x4c3   : > { %v703_v9 = vmul.f32 %v1921_v1, %v2465_v63  ;;  %v1062_v56 = vpop.xlane.xlu0 %1061 }
 0x4c4   : > { %v1084_v16 = vsub.f32 %v2469_v8, %v1062_v56 }
 0x4c5   : > { %v707_v37 = vpack.c.bf16 %v703_v9, %v702_v61 }
 0x4c6   : > { %v1092_v31 = vmul.f32 1.442695, %v1084_v16 }
 0x4c7   : > { %1374 = vrot.lane.b32.xlu1 %v2184_v59, %s2012_s21  ;;  %1715 = vmatmul.msk.bf16.vlgmr.msrb.gmra.mxu3 %vm615_vm5, %v707_v37  ;;  %v2568_v59 = vpop.xlane.xlu2 %1298 }
 0x4c8   : > { %1922 = vpow2.f32 %v1092_v31 }
 0x4c9   : > { %1924 = vrcp.f32 %v903_v45 }
 0x4ca   : > { %1926 = vrcp.f32 %v900_v27 }
 0x4cb   : > { %1928 = vrcp.f32 %v909_v19 }
 0x4ce   : > { %v2560_v21 = vpop.eup %1922  ;;  %v1157_v26 = vpop.permute.xlu1 %1156 }
 0x4cf   : > { %1720 = vmatmul.msk.bf16.vlgmr.msra.gmra.mxu2 %vm615_vm5, %v926_v38  ;;  %1181 = vmatpush.bf16.msra.mxu3 %v1157_v26  ;;  %v1108_v50 = vsel %vm615_vm5, %v2560_v21, 0.0  ;;  %v1305_v22 = vpop.xlane.xlu2 %1304  ;;  %v1925_v23 = vpop.eup %1924 }
 0x4d0   : > { %1109 = vadd.xlane.f32.xlu2 %v1108_v50  ;;  %v1927_v38 = vpop.eup %1926  ;;  %v923_v20 = vmul.f32 %v1925_v23, %v2435_v46  ;;  %v1313_v52 = vsub.f32 %v2439_v44, %v1305_v22 }
 0x4d1   : > { %v922_v30 = vmul.f32 %v1927_v38, %v2410_v25  ;;  %v1929_v4 = vpop.eup %1928  ;;  %v1312_v38 = vsub.f32 %v2421_v32, %v2531_v36 }
 0x4d2   : > { %v925_v53 = vmul.f32 %v1929_v4, %v2459_v58  ;;  %v1328_v60 = vmul.f32 1.442695, %v1313_v52 }
 0x4d3   : > { %v928_v34 = vpack.c.bf16 %v923_v20, %v922_v30  ;;  %v1326_v30 = vmul.f32 1.442695, %v1312_v38 }
 0x4d6   : > { %v1381_v63 = vpop.permute.xlu0 %1380  ;;  %v1379_v8 = vpop.permute.xlu1 %1378 }
 0x4d7   : > { %1402 = vmatpush.bf16.msrb.mxu2 %v1381_v63  ;;  %v906_v5 = vpop.xlane.xlu2 %905  ;;  %v1311_v63 = vsub.f32 %v2415_v28, %v2568_v59 }
 0x4d8   : > { %1930 = vrcp.f32 %v906_v5 }
 0x4db   : > { %1403 = vmatpush.bf16.msrb.mxu2 %v1379_v8 }
 0x4de   : > { %v1931_v7 = vpop.eup %1930 }
 0x4df   : > { %1721 = vmatmul.msk.bf16.gmra.mxu2 %vm615_vm5, %v927_v3  ;;  %v924_v42 = vmul.f32 %v1931_v7, %v2451_v55 }
 0x4e1   : > { %v929_v3 = vpack.c.bf16 %v925_v53, %v924_v42 }
 0x4ef   : > { %1722 = vmatmul.msk.bf16.gmra.mxu2 %vm615_vm5, %v928_v34 }
 0x4ff   : > { %1723 = vmatmul.msk.bf16.gmra.mxu2 %vm615_vm5, %v929_v3 }
 0x501   : > { %v1065_v27 = vpop.xlane.xlu1 %1064 }
 0x502   : > { %v1085_v46 = vsub.f32 %v2488_v39, %v1065_v27  ;;  %v1310_v27 = vsub.f32 %v2405_v51, %v2517_v0 }
 0x503   : > { %v1335_v45 = vpop.xlane.xlu0 %1334 }
 0x504   : > { %v1094_v25 = vmul.f32 1.442695, %v1085_v46 }
 0x506   : > { %1932 = vpow2.f32 %v1094_v25  ;;  %v1322_v25 = vmul.f32 1.442695, %v1310_v27 }
 0x509   : > { %v1071_v12 = vpop.xlane.xlu1 %1070 }
 0x50a   : > { %v1087_v17 = vsub.f32 %v2496_v54, %v1071_v12 }
 0x50b   : > { %v1080_v40 = vpop.xlane.xlu0 %1079 }
 0x50c   : > { %v2582_v33 = vpop.eup %1932  ;;  %v1098_v47 = vmul.f32 1.442695, %v1087_v17  ;;  %v1090_v58 = vsub.f32 %v2499_v6, %v1080_v40 }
 0x50d   : > { %v1111_v55 = vsel %vm615_vm5, %v2582_v33, 0.0 }
 0x50e   : > { %1934 = vpow2.f32 %v1098_v47  ;;  %1112 = vadd.xlane.f32.xlu2 %v1111_v55  ;;  %v1104_v48 = vmul.f32 1.442695, %v1090_v58 }
 0x510   : > { %1936 = vpow2.f32 %v1104_v48 }
 0x511   : > { %v1332_v62 = vpop.xlane.xlu2 %1331  ;;  %1938 = vpow2.f32 %v1328_v60  ;;  %v1077_v61 = vpop.xlane.xlu1 %1076 }
 0x512   : > { %v1089_v16 = vsub.f32 %v2514_v43, %v1077_v61 }
 0x513   : > { %v1338_v8 = vpop.xlane.xlu0 %1337 }
 0x514   : > { %v2587_v39 = vpop.eup %1934  ;;  %v1102_v31 = vmul.f32 1.442695, %v1089_v16 }
 0x515   : > { %v1117_v54 = vsel %vm615_vm5, %v2587_v39, 0.0 }
 0x516   : > { %1118 = vadd.xlane.f32.xlu1 %v1117_v54  ;;  %v2592_v1 = vpop.eup %1936 }
 0x517   : > { %v1126_v6 = vsel %vm615_vm5, %v2592_v1, 0.0  ;;  %v2596_v56 = vpop.eup %1938 }
 0x518   : > { %v1351_v19 = vsel %vm615_vm5, %v2596_v56, 0.0 }
 0x519   : > { %v1068_v41 = vpop.xlane.xlu2 %1067 }
 0x51a   : > { %v1086_v42 = vsub.f32 %v2529_v15, %v1068_v41 }
 0x51b   : > { %v1341_v53 = vpop.xlane.xlu0 %1340 }
 0x51e   : > { %1127 = vadd.xlane.f32.xlu1 %v1126_v6 }
 0x521   : > { %v1074_v9 = vpop.xlane.xlu2 %1073 }
 0x522   : > { %v1088_v44 = vsub.f32 %v2539_v57, %v1074_v9  ;;  %v1324_v57 = vmul.f32 1.442695, %v1311_v63 }
 0x524   : > { %v1100_v37 = vmul.f32 1.442695, %v1088_v44 }
 0x526   : > { %1940 = vpow2.f32 %v1100_v37  ;;  %1154 = vrot.lane.b32.xlu2 %v2190_v2, %s2011_s20  ;;  %1352 = vadd.xlane.f32.xlu1 %v1351_v19 }
 0x527   : > { %1942 = vpow2.f32 %v1102_v31 }
 0x528   : > { %1944 = vrcp.f32 %v1332_v62 }
 0x529   : > { %v1377_v26 = vpop.permute.xlu1 %1376  ;;  %1946 = vrcp.f32 %v1335_v45  ;;  %v1083_v17 = vpop.xlane.xlu2 %1082 }
 0x52a   : > { %1404 = vmatpush.bf16.msrb.mxu2 %v1377_v26  ;;  %1948 = vpow2.f32 %v1324_v57  ;;  %v1091_v55 = vsub.f32 %v2543_v10, %v1083_v17 }
 0x52b   : > { %1950 = vpow2.f32 %v1326_v30 }
 0x52c   : > { %v2604_v50 = vpop.eup %1940  ;;  %1952 = vrcp.f32 %v1341_v53  ;;  %v1106_v0 = vmul.f32 1.442695, %v1091_v55 }
 0x52d   : > { %v1120_v43 = vsel %vm615_vm5, %v2604_v50, 0.0  ;;  %v2612_v2 = vpop.eup %1942  ;;  %1954 = vrcp.f32 %v1338_v8 }
 0x52e   : > { %1121 = vadd.xlane.f32.xlu0 %v1120_v43  ;;  %v1945_v23 = vpop.eup %1944  ;;  %v1123_v28 = vsel %vm615_vm5, %v2612_v2, 0.0 }
 0x52f   : > { %v1947_v59 = vpop.eup %1946  ;;  %v1362_v20 = vmul.f32 %v1945_v23, %v2519_v18  ;;  %v1096_v18 = vmul.f32 1.442695, %v1086_v42 }
 0x530   : > { %v1363_v34 = vmul.f32 %v1947_v59, %v2492_v14  ;;  %v2620_v4 = vpop.eup %1948 }
 0x531   : > { %v2610_v22 = vpop.permute.xlu1 %1152  ;;  %v1345_v32 = vsel %vm615_vm5, %v2620_v4, 0.0  ;;  %v2626_v36 = vpop.eup %1950  ;;  %1956 = vpow2.f32 %v1096_v18 }
 0x532   : > { %v1370_v7 = vpack.c.bf16 %v1363_v34, %v1362_v20  ;;  %v1953_v3 = vpop.eup %1952  ;;  %v1348_v15 = vsel %vm615_vm5, %v2626_v36, 0.0  ;;  %1958 = vpow2.f32 %v1322_v25 }
 0x533   : > { %v1955_v46 = vpop.eup %1954  ;;  %v1365_v45 = vmul.f32 %v1953_v3, %v2533_v24  ;;  %1960 = vpow2.f32 %v1106_v0 }
 0x534   : > { %v1364_v12 = vmul.f32 %v1955_v46, %v2525_v13 }
 0x536   : > { %1124 = vadd.xlane.f32.xlu0 %v1123_v28  ;;  %v1371_v58 = vpack.c.bf16 %v1365_v45, %v1364_v12 }
 0x537   : > { %v1957_v47 = vpop.eup %1956 }
 0x538   : > { %v1114_v51 = vsel %vm615_vm5, %v1957_v47, 0.0  ;;  %v2641_v62 = vpop.eup %1958 }
 0x539   : > { %v1375_v5 = vpop.permute.xlu1 %1374  ;;  %v1342_v13 = vsel %vm615_vm5, %v2641_v62, 0.0  ;;  %v2645_v52 = vpop.eup %1960 }
 0x53a   : > { %1405 = vmatpush.bf16.msrb.mxu2 %v1375_v5  ;;  %v1129_v10 = vsel %vm615_vm5, %v2645_v52, 0.0 }
 0x53d   : > { %1736 = vmatmul.msk.bf16.vlgmr.msrb.gmra.mxu2 %vm615_vm5, %v1370_v7 }
 0x53e   : > { %1346 = vadd.xlane.f32.xlu0 %v1345_v32 }
 0x542   : > { %v2628_v14 = vpop.f32.mrf.mxu2 }
 0x543   : > { %v1110_v61 = vpop.xlane.xlu2 %1109 }
 0x546   : > { %1349 = vadd.xlane.f32.xlu0 %v1348_v15 }
 0x54a   : > { %v2636_v40 = vpop.f32.mrf.mxu2 }
 0x54d   : > { %1737 = vmatmul.msk.bf16.gmra.mxu2 %vm615_vm5, %v1371_v58 }
 0x54f   : > { %1115 = vadd.xlane.f32.xlu2 %v1114_v51 }
 0x552   : > { %v963_v48 = vpop.f32.mrf.mxu2 }
 0x557   : > { %1343 = vadd.xlane.f32.xlu2 %v1342_v13 }
 0x55a   : > { %v965_v24 = vpop.f32.mrf.mxu2 }
 0x55b   : > { %v1792_v6 = vpack.i.bf16 %v965_v24, %v963_v48 }
 0x55f   : > { %1130 = vadd.xlane.f32.xlu2 %v1129_v10 }
 0x562   : > { %v968_v54 = vpop.f32.mrf.mxu2 }
 0x56a   : > { %v970_v60 = vpop.f32.mrf.mxu2 }
 0x56b   : > { %v1807_v44 = vpack.i.bf16 %v970_v60, %v968_v54 }
 0x572   : > { %v973_v41 = vpop.f32.mrf.mxu2 }
 0x577   : > { %1793 = vrot.lane.b32.xlu2 %v1792_v6, %s2013_s22 }
 0x57a   : > { %v975_v9 = vpop.f32.mrf.mxu2 }
 0x57b   : > { %v1822_v19 = vpack.i.bf16 %v975_v9, %v973_v41  ;;  %v2669_v9 = vpop.f32.mrf.mxu3 }
 0x57f   : > { %1808 = vrot.lane.b32.xlu2 %v1807_v44, %s2013_s22 }
 0x581   : > { %v1113_v16 = vpop.xlane.xlu2 %1112 }
 0x582   : > { %1962 = vrcp.f32 %v1113_v16  ;;  %v978_v37 = vpop.f32.mrf.mxu2 }
 0x583   : > { %1964 = vrcp.f32 %v1110_v61  ;;  %v2671_v44 = vpop.f32.mrf.mxu3 }
 0x587   : > { %1823 = vrot.lane.b32.xlu2 %v1822_v19, %s2013_s22 }
 0x588   : > { %v1963_v31 = vpop.eup %1962 }
 0x589   : > { %v1155_v26 = vpop.permute.xlu2 %1154  ;;  %v1965_v63 = vpop.eup %1964  ;;  %v1141_v57 = vmul.f32 %v1963_v31, %v2582_v33 }
 0x58a   : > { %v980_v43 = vpop.f32.mrf.mxu2  ;;  %1182 = vmatpush.bf16.msra.mxu3 %v1155_v26  ;;  %v1140_v8 = vmul.f32 %v1965_v63, %v2560_v21  ;;  %v1119_v20 = vpop.xlane.xlu1 %1118 }
 0x58b   : > { %v1837_v23 = vpack.i.bf16 %v980_v43, %v978_v37  ;;  %1966 = vrcp.f32 %v1119_v20  ;;  %v1758_v20 = vld [vmem:[%s2760_s6] sm:$0xff] }
 0x58c   : > { %v1148_v38 = vpack.c.bf16 %v1141_v57, %v1140_v8 }
 0x58e   : > { %1183 = vmatpush.bf16.msra.mxu3 %v2610_v22 }
 0x58f   : > { %1838 = vrot.lane.b32.xlu2 %v1837_v23, %s2013_s22 }
 0x591   : > { %1728 = vmatmul.msk.bf16.vlgmr.msra.gmra.mxu3 %vm615_vm5, %v1148_v38  ;;  %v1967_v7 = vpop.eup %1966 }
 0x592   : > { %v1143_v22 = vmul.f32 %v1967_v7, %v2587_v39  ;;  %v1128_v18 = vpop.xlane.xlu1 %1127 }
 0x5a1   : > { %v1122_v28 = vpop.xlane.xlu0 %1121 }
 0x5a9   : > { %v1125_v59 = vpop.xlane.xlu0 %1124 }
 0x5b1   : > { %v1347_v5 = vpop.xlane.xlu0 %1346 }
 0x5b9   : > { %v1350_v12 = vpop.xlane.xlu0 %1349 }
 0x5c0   : > { %v1407_v30 = vpop.f32.mrf.mxu2 }
 0x5c2   : > { %v1116_v34 = vpop.xlane.xlu2 %1115 }
 0x5c3   : > { %1968 = vrcp.f32 %v1116_v34 }
 0x5c4   : > { %1970 = vrcp.f32 %v1347_v5 }
 0x5c8   : > { %v1409_v53 = vpop.f32.mrf.mxu2 }
 0x5c9   : > { %v1969_v33 = vpop.eup %1968  ;;  %v1802_v21 = vpack.i.bf16 %v1409_v53, %v1407_v30 }
 0x5ca   : > { %v1344_v42 = vpop.xlane.xlu2 %1343  ;;  %v1142_v32 = vmul.f32 %v1969_v33, %v1957_v47  ;;  %v1971_v27 = vpop.eup %1970 }
 0x5cb   : > { %1972 = vrcp.f32 %v1344_v42  ;;  %1803 = vrot.lane.b32.xlu1 %v1802_v21, %s2014_s23  ;;  %v1367_v25 = vmul.f32 %v1971_v27, %v2620_v4  ;;  %v1353_v47 = vpop.xlane.xlu1 %1352 }
 0x5cc   : > { %v1149_v3 = vpack.c.bf16 %v1143_v22, %v1142_v32  ;;  %1974 = vrcp.f32 %v1125_v59 }
 0x5cd   : > { %1976 = vrcp.f32 %v1122_v28 }
 0x5ce   : > { %1729 = vmatmul.msk.bf16.gmra.mxu3 %vm615_vm5, %v1149_v3  ;;  %1978 = vrcp.f32 %v1350_v12 }
 0x5cf   : > { %1980 = vrcp.f32 %v1353_v47 }
 0x5d0   : > { %v1412_v15 = vpop.f32.mrf.mxu2 }
 0x5d1   : > { %v1973_v46 = vpop.eup %1972 }
 0x5d2   : > { %v1366_v45 = vmul.f32 %v1973_v46, %v2641_v62  ;;  %v1975_v39 = vpop.eup %1974  ;;  %v1131_v62 = vpop.xlane.xlu2 %1130 }
 0x5d3   : > { %v1977_v58 = vpop.eup %1976  ;;  %v1145_v51 = vmul.f32 %v1975_v39, %v2612_v2  ;;  %1982 = vrcp.f32 %v1131_v62 }
 0x5d4   : > { %v1372_v17 = vpack.c.bf16 %v1367_v25, %v1366_v45  ;;  %v1144_v48 = vmul.f32 %v1977_v58, %v2604_v50  ;;  %v1979_v4 = vpop.eup %1978  ;;  %1984 = vrcp.f32 %v1128_v18 }
 0x5d5   : > { %v1981_v24 = vpop.eup %1980  ;;  %v1368_v10 = vmul.f32 %v1979_v4, %v2626_v36 }
 0x5d6   : > { %1738 = vmatmul.msk.bf16.gmra.mxu2 %vm615_vm5, %v1372_v17  ;;  %v1150_v13 = vpack.c.bf16 %v1145_v51, %v1144_v48  ;;  %v1369_v54 = vmul.f32 %v1981_v24, %v2596_v56 }
 0x5d8   : > { %v1414_v55 = vpop.f32.mrf.mxu2  ;;  %v1373_v60 = vpack.c.bf16 %v1369_v54, %v1368_v10 }
 0x5d9   : > { %v1817_v0 = vpack.i.bf16 %v1414_v55, %v1412_v15  ;;  %v1983_v2 = vpop.eup %1982 }
 0x5da   : > { %v1985_v41 = vpop.eup %1984  ;;  %v1147_v50 = vmul.f32 %v1983_v2, %v2645_v52  ;;  %v1794_v5 = vpop.permute.xlu2 %1793 }
 0x5db   : > { %1818 = vrot.lane.b32.xlu1 %v1817_v0, %s2014_s23  ;;  %v1146_v6 = vmul.f32 %v1985_v41, %v2592_v1  ;;  %v1759_v1 = vld [vmem:[%s2760_s6 + $0x8] sm:$0xff]  ;;  %v1796_v7 = vunpack.i.h.bf16 %v1794_v5  ;;  %v1795_v53 = vunpack.i.l.bf16 %v1794_v5 }
 0x5dc   : > { %1591 = vmatpush.bf16.msrb.mxu0 %v1759_v1 }
 0x5dd   : > { %v1151_v61 = vpack.c.bf16 %v1147_v50, %v1146_v6  ;;  %v1524_v22 = vsel %vm553_vm4, %v2417_v29, %v1796_v7  ;;  %v1523_v18 = vsel %vm553_vm4, %v2400_v11, %v1795_v53 }
 0x5de   : > { %1730 = vmatmul.msk.bf16.gmra.mxu3 %vm615_vm5, %v1150_v13 }
 0x5e0   : > { %1592 = vmatpush.bf16.msrb.mxu0 %v1758_v20 }
 0x5e2   : > { %v1809_v17 = vpop.permute.xlu2 %1808 }
 0x5e3   : > { %v1811_v39 = vunpack.i.h.bf16 %v1809_v17  ;;  %v1810_v47 = vunpack.i.l.bf16 %v1809_v17 }
 0x5e5   : > { %v1526_v51 = vsel %vm553_vm4, %v2455_v49, %v1811_v39  ;;  %v1525_v0 = vsel %vm553_vm4, %v2437_v35, %v1810_v47 }
 0x5e6   : > { %1739 = vmatmul.msk.bf16.gmra.mxu2 %vm615_vm5, %v1373_v60 }
 0x5ea   : > { %v1824_v60 = vpop.permute.xlu2 %1823 }
 0x5eb   : > { %v1826_v2 = vunpack.i.h.bf16 %v1824_v60  ;;  %v1825_v41 = vunpack.i.l.bf16 %v1824_v60 }
 0x5ee   : > { %1731 = vmatmul.msk.bf16.gmra.mxu3 %vm615_vm5, %v1151_v61  ;;  %v1528_v61 = vsel %vm553_vm4, %v2636_v40, %v1826_v2 }
 0x614   : > { %v1185_v36 = vpop.f32.mrf.mxu3 }
 0x61c   : > { %v1187_v16 = vpop.f32.mrf.mxu3 }
 0x61d   : > { %v1797_v37 = vpack.i.bf16 %v1187_v16, %v1185_v36  ;;  %v1527_v36 = vsel %vm553_vm4, %v2628_v14, %v1825_v41 }
 0x61f   : > { %1798 = vrot.lane.b32.xlu0 %v1797_v37, %s2015_s24 }
 0x63d   : > { %v1804_v33 = vpop.permute.xlu1 %1803 }
 0x63e   : > { %v1806_v3 = vunpack.i.h.bf16 %v1804_v33  ;;  %v1805_v27 = vunpack.i.l.bf16 %v1804_v33  ;;  %v1986_v33 = vld [vmem:[%s2089_s18] sm:$0xff] }
 0x64d   : > { %v1819_v29 = vpop.permute.xlu1 %1818 }
 0x64e   : > { %v1821_v48 = vunpack.i.h.bf16 %v1819_v29  ;;  %v1820_v62 = vunpack.i.l.bf16 %v1819_v29  ;;  %v1990_v29 = vld [vmem:[%s2089_s18 + $0x20] sm:$0xff] }
 0x651   : > { %v1190_v56 = vpop.f32.mrf.mxu3 }
 0x659   : > { %v1192_v19 = vpop.f32.mrf.mxu3  ;;  %v1417_v31 = vpop.f32.mrf.mxu2 }
 0x65a   : > { %v1812_v26 = vpack.i.bf16 %v1192_v19, %v1190_v56 }
 0x65c   : > { %1813 = vrot.lane.b32.xlu0 %v1812_v26, %s2015_s24 }
 0x661   : > { %v1195_v52 = vpop.f32.mrf.mxu3  ;;  %v1419_v63 = vpop.f32.mrf.mxu2 }
 0x662   : > { %v1832_v43 = vpack.i.bf16 %v1419_v63, %v1417_v31 }
 0x664   : > { %1833 = vrot.lane.b32.xlu1 %v1832_v43, %s2014_s23 }
 0x669   : > { %v1197_v57 = vpop.f32.mrf.mxu3  ;;  %v1422_v8 = vpop.f32.mrf.mxu2 }
 0x66a   : > { %v1827_v23 = vpack.i.bf16 %v1197_v57, %v1195_v52  ;;  %v1839_v52 = vpop.permute.xlu2 %1838 }
 0x66b   : > { %v1841_v63 = vunpack.i.h.bf16 %v1839_v52  ;;  %v1840_v43 = vunpack.i.l.bf16 %v1839_v52 }
 0x66c   : > { %1828 = vrot.lane.b32.xlu0 %v1827_v23, %s2015_s24 }
 0x66d   : > { %v1530_v23 = vsel %vm553_vm4, %v2671_v44, %v1841_v63  ;;  %v1855_v44 = vld [vmem:[%s2761_s7] ss:$0 sm:$0xff] }
 0x671   : > { %v1200_v38 = vpop.f32.mrf.mxu3  ;;  %v1424_v28 = vpop.f32.mrf.mxu2 }
 0x672   : > { %v1847_v59 = vpack.i.bf16 %v1424_v28, %v1422_v8 }
 0x674   : > { %1848 = vrot.lane.b32.xlu1 %v1847_v59, %s2014_s23 }
 0x679   : > { %v1202_v30 = vpop.f32.mrf.mxu3 }
 0x67a   : > { %v1842_v34 = vpack.i.bf16 %v1202_v30, %v1200_v38  ;;  %v1529_v38 = vsel %vm553_vm4, %v2669_v9, %v1840_v43 }
 0x67c   : > { %1843 = vrot.lane.b32.xlu0 %v1842_v34, %s2015_s24 }
 0x691   : > { %v1799_v21 = vpop.permute.xlu0 %1798 }
 0x692   : > { %v1801_v42 = vunpack.i.h.bf16 %v1799_v21  ;;  %v1800_v32 = vunpack.i.l.bf16 %v1799_v21 }
 0x694   : > { %v1533_v15 = vsel %vm1531_vm6, %v1524_v22, %v1801_v42  ;;  %v1532_v46 = vsel %vm1531_vm6, %v1523_v18, %v1800_v32  ;;  %v1987_v22 = vld [vmem:[%s2089_s18 + $0x8] sm:$0xff] }
 0x695   : > { %v1541_v45 = vsel %vm1540_vm7, %v1532_v46, %v1805_v27  ;;  %v1542_v25 = vsel %vm1540_vm7, %v1533_v15, %v1806_v3  ;;  %v1988_v15 = vld [vmem:[%s2089_s18 + $0x10] sm:$0xff] }
 0x696   : > { %v1549_v12 = vpack.c.bf16 %v1542_v25, %v1541_v45 }
 0x698   : > { %1748 = vmatmul.msk.bf16.vlgmr.msrb.gmra.mxu0 %vm321_vm0, %v1549_v12  ;;  %v1989_v12 = vld [vmem:[%s2089_s18 + $0x18] sm:$0xff] }
 0x6ce   : > { %v1814_v58 = vpop.permute.xlu0 %1813 }
 0x6cf   : > { %v1816_v55 = vunpack.i.h.bf16 %v1814_v58  ;;  %v1815_v11 = vunpack.i.l.bf16 %v1814_v58 }
 0x6d1   : > { %v1535_v13 = vsel %vm1531_vm6, %v1526_v51, %v1816_v55  ;;  %v1534_v4 = vsel %vm1531_vm6, %v1525_v0, %v1815_v11  ;;  %v1991_v51 = vld [vmem:[%s2089_s18 + $0x28] sm:$0xff] }
 0x6d2   : > { %v1543_v24 = vsel %vm1540_vm7, %v1534_v4, %v1820_v62  ;;  %v1544_v10 = vsel %vm1540_vm7, %v1535_v13, %v1821_v48  ;;  %v1992_v13 = vld [vmem:[%s2089_s18 + $0x30] sm:$0xff] }
 0x6d3   : > { %v1550_v54 = vpack.c.bf16 %v1544_v10, %v1543_v24 }
 0x6d5   : > { %1749 = vmatmul.msk.bf16.gmra.mxu0 %vm321_vm0, %v1550_v54  ;;  %v1993_v54 = vld [vmem:[%s2089_s18 + $0x38] sm:$0xff] }
 0x6d6   : > { %v1834_v49 = vpop.permute.xlu1 %1833 }
 0x6d7   : > { %v1836_v16 = vunpack.i.h.bf16 %v1834_v49  ;;  %v1835_v37 = vunpack.i.l.bf16 %v1834_v49 }
 0x6de   : > { %v1829_v50 = vpop.permute.xlu0 %1828 }
 0x6df   : > { %v1831_v6 = vunpack.i.h.bf16 %v1829_v50  ;;  %v1830_v35 = vunpack.i.l.bf16 %v1829_v50 }
 0x6e1   : > { %v1537_v56 = vsel %vm1531_vm6, %v1528_v61, %v1831_v6  ;;  %v1536_v19 = vsel %vm1531_vm6, %v1527_v36, %v1830_v35 }
 0x6e2   : > { %v1545_v31 = vsel %vm1540_vm7, %v1536_v19, %v1835_v37  ;;  %v1546_v26 = vsel %vm1540_vm7, %v1537_v56, %v1836_v16 }
 0x6e3   : > { %v1551_v1 = vpack.c.bf16 %v1546_v26, %v1545_v31 }
 0x6e5   : > { %1750 = vmatmul.msk.bf16.gmra.mxu0 %vm321_vm0, %v1551_v1 }
 0x6e6   : > { %v1849_v40 = vpop.permute.xlu1 %1848 }
 0x6e7   : > { %v1851_v28 = vunpack.i.h.bf16 %v1849_v40  ;;  %v1850_v59 = vunpack.i.l.bf16 %v1849_v40 }
 0x6ee   : > { %v1844_v57 = vpop.permute.xlu0 %1843 }
 0x6ef   : > { %v1846_v14 = vunpack.i.h.bf16 %v1844_v57  ;;  %v1845_v8 = vunpack.i.l.bf16 %v1844_v57 }
 0x6f1   : > { %v1539_v20 = vsel %vm1531_vm6, %v1530_v23, %v1846_v14  ;;  %v1538_v30 = vsel %vm1531_vm6, %v1529_v38, %v1845_v8 }
 0x6f2   : > { %v1547_v34 = vsel %vm1540_vm7, %v1538_v30, %v1850_v59  ;;  %v1548_v5 = vsel %vm1540_vm7, %v1539_v20, %v1851_v28 }
 0x6f3   : > { %v1552_v7 = vpack.c.bf16 %v1548_v5, %v1547_v34 }
 0x6f5   : > { %1751 = vmatmul.msk.bf16.gmra.mxu0 %vm321_vm0, %v1552_v7 }
 0x715   : > { %v1594_v9 = vpop.f32.mrf.mxu0 }
 0x716   : > { %v1595_v53 = vadd.f32 %v1855_v44, %v1594_v9 }
 0x718   : > { %v1614_v21 = vadd.f32 %v1986_v33, %v1595_v53 }
 0x71a   : > { %1622 = vst.msk [vmem:[%s2725_s13] sm:$0xff] %vm321_vm0, %v1614_v21 }
 0x71d   : > { %v1596_v42 = vpop.f32.mrf.mxu0 }
 0x71e   : > { %v1597_v32 = vadd.f32 %v1855_v44, %v1596_v42 }
 0x720   : > { %v1615_v18 = vadd.f32 %v1987_v22, %v1597_v32 }
 0x722   : > { %1623 = vst.msk [vmem:[%s2725_s13 + $0x8] sm:$0xff] %vm321_vm0, %v1615_v18 }
 0x752   : > { %v1599_v3 = vpop.f32.mrf.mxu0 }
 0x753   : > { %v1600_v27 = vadd.f32 %v1855_v44, %v1599_v3 }
 0x755   : > { %v1616_v46 = vadd.f32 %v1988_v15, %v1600_v27 }
 0x757   : > { %1624 = vst.msk [vmem:[%s2725_s13 + $0x10] sm:$0xff] %vm321_vm0, %v1616_v46 }
 0x75a   : > { %v1601_v45 = vpop.f32.mrf.mxu0 }
 0x75b   : > { %v1602_v25 = vadd.f32 %v1855_v44, %v1601_v45 }
 0x75d   : > { %v1617_v17 = vadd.f32 %v1989_v12, %v1602_v25 }
 0x75f   : > { %1625 = vst.msk [vmem:[%s2725_s13 + $0x18] sm:$0xff] %vm321_vm0, %v1617_v17 }
 0x762   : > { %v1604_v39 = vpop.f32.mrf.mxu0 }
 0x763   : > { %v1605_v47 = vadd.f32 %v1855_v44, %v1604_v39 }
 0x765   : > { %v1618_v58 = vadd.f32 %v1990_v29, %v1605_v47 }
 0x767   : > { %1626 = vst.msk [vmem:[%s2725_s13 + $0x20] sm:$0xff] %vm321_vm0, %v1618_v58 }
 0x76a   : > { %v1606_v55 = vpop.f32.mrf.mxu0 }
 0x76b   : > { %v1607_v11 = vadd.f32 %v1855_v44, %v1606_v55 }
 0x76d   : > { %v1619_v0 = vadd.f32 %v1991_v51, %v1607_v11 }
 0x76f   : > { %1627 = vst.msk [vmem:[%s2725_s13 + $0x28] sm:$0xff] %vm321_vm0, %v1619_v0 }
 0x772   : > { %v1609_v48 = vpop.f32.mrf.mxu0 }
 0x773   : > { %v1610_v62 = vadd.f32 %v1855_v44, %v1609_v48 }
 0x775   : > { %v1620_v4 = vadd.f32 %v1992_v13, %v1610_v62 }
 0x777   : > { %1628 = vst.msk [vmem:[%s2725_s13 + $0x30] sm:$0xff] %vm321_vm0, %v1620_v4 }
 0x77a   : > { %v1611_v24 = vpop.f32.mrf.mxu0 }
 0x77b   : > { %v1612_v10 = vadd.f32 %v1855_v44, %v1611_v24 }
 0x77d   : > { %v1621_v60 = vadd.f32 %v1993_v54, %v1612_v10 }
 0x77f   : > { %1629 = vst.msk [vmem:[%s2725_s13 + $0x38] sm:$0xff] %vm321_vm0, %v1621_v60 }
 0x780 PF: > { %s18_s27 = sadd.s32 1, %s2000_s27  }
 0x781   : > { %p15_p4 = scmp.ge.s32.totalorder %s18_s27, 4  }
 0x783   :  { %17 = sbr.rel (!%p15_p4) target bundleno = 1 (0x1), region = 82 }

// kernel: midblock_forward.3
= control target key start
LH: loop header
LB: loop body
LE: loop exit
PB: predicated region body
PF: predicated region fallthrough
CT: control target
= control target key end

     0   :  { %s4771_s25 = smov 0   ;;  %s6422_s0 = inlined_call_operand.vmem [shape: f32[2,64,16], index: 0, kind: input, shape index: {}]   ;;  %s6423_s1 = inlined_call_operand.vmem [shape: f32[2,1,32], index: 1, kind: input, shape index: {}]   ;;  %s6424_s2 = inlined_call_operand.vmem [shape: f32[1,16], index: 2, kind: input, shape index: {}]   ;;  %s6425_s3 = inlined_call_operand.vmem [shape: f32[1,16], index: 3, kind: input, shape index: {}]   ;;  %s6426_s4 = inlined_call_operand.vmem [shape: f32[16,16], index: 4, kind: input, shape index: {}]   ;;  %s6427_s5 = inlined_call_operand.vmem [shape: bf16[144,32], index: 5, kind: input, shape index: {}]   ;;  %s6428_s6 = inlined_call_operand.vmem [shape: f32[1,32], index: 6, kind: input, shape index: {}]   ;;  %s6429_s7 = inlined_call_operand.vmem [shape: f32[1,32], index: 7, kind: input, shape index: {}]   ;;  %s6430_s8 = inlined_call_operand.vmem [shape: f32[32,32], index: 8, kind: input, shape index: {}]   ;;  %s6431_s9 = inlined_call_operand.vmem [shape: bf16[288,32], index: 9, kind: input, shape index: {}]   ;;  %s6432_s10 = inlined_call_operand.vmem [shape: f32[1,32], index: 10, kind: input, shape index: {}]   ;;  %s6433_s11 = inlined_call_operand.vmem [shape: bf16[16,32], index: 11, kind: input, shape index: {}]   ;;  %s6434_s12 = inlined_call_operand.vmem [shape: f32[1,32], index: 12, kind: input, shape index: {}]   ;;  %s6435_s13 = inlined_call_operand.vmem [shape: f32[2,64,32], index: 13, kind: output, shape index: {}]  }
   0x1 LB: > { %s4181_s26 = sadd.s32 4294967295, %s4698_s25   ;;  %p4185_p0 = scmp.ge.s32.totalorder %s4698_s25, 1  ;;  %s4698_s25 = sphi %s4771_s25, %s23_s25  }
   0x2   : > { %p395_p1 = scmp.lt.s32.totalorder %s4698_s25, 3 }
   0x4   : > { %p396_p2 = pnand %p4185_p0, %p395_p1 }
   0x5   : > { %p442_p3 = scmp.lt.s32.totalorder (!%p396_p2), %s4181_s26, 1 }
   0x6   : > { %399 = sbr.rel (%p396_p2) target bundleno = 1156 (0x484), region = 72 }
   0xb   : > { %v467_v0 = vld [vmem:[%s6426_s4 + $0x8] sm:$0xff]  ;;  %v466_v1 = vld [vmem:[%s6426_s4] sm:$0xff]  ;;  %s6499_s26 = smov (!%p442_p3, %s4181_s26), 1  ;;  %vm468_vm0 = vcmask 130048  }
   0xc   : > { %536 = vmatpush.msra.mxu0 %v467_v0  ;;  %559 = vmatpush.msra.mxu1 %v467_v0  ;;  %s4544_s14 = sshll.u32 %s6499_s26, 6  ;;  %s449_s29 = scalar_lea.vmem %s6423_s1, %s6499_s26 }
   0xd   : > { %s4793_s17 = scalar_lea.vmem %s6422_s0, %s4544_s14  ;;  %s6373_s22 = scalar_lea.vmem %s6435_s13, %s4544_s14 }
   0xe   : > { %537 = vmatpush.msra.mxu0 %v466_v1  ;;  %560 = vmatpush.msra.mxu1 %v466_v1  ;;  %v4796_v2 = vld [vmem:[%s4793_s17] sm:$0xff]  ;;  %v4799_v3 = vld [vmem:[%s4793_s17 + $0x8] sm:$0xff]  ;;  %v4802_v4 = vld [vmem:[%s4793_s17 + $0x10] sm:$0xff] }
   0xf   : > { %v4805_v5 = vld [vmem:[%s4793_s17 + $0x18] sm:$0xff]  ;;  %v469_v6 = vsel %vm468_vm0, %v4796_v2, 0.0  ;;  %v470_v7 = vsel %vm468_vm0, %v4799_v3, 0.0  ;;  %v472_v8 = vsel %vm468_vm0, %v4802_v4, 0.0  ;;  %v490_v9 = vmul.f32 %v4796_v2, %v4796_v2  ;;  %v4816_v10 = vld [vmem:[%s4793_s17 + $0x20] sm:$0xff]  ;;  %v4825_v15 = vld [vmem:[%s4793_s17 + $0x28] sm:$0xff] }
  0x10   : > { %v471_v11 = vadd.f32 %v470_v7, %v469_v6  ;;  %v474_v12 = vsel %vm468_vm0, %v4805_v5, 0.0  ;;  %v491_v13 = vmul.f32 %v4799_v3, %v4799_v3  ;;  %v492_v14 = vmul.f32 %v4802_v4, %v4802_v4  ;;  %v4836_v22 = vld [vmem:[%s4793_s17 + $0x30] sm:$0xff]  ;;  %v4845_v29 = vld [vmem:[%s4793_s17 + $0x38] sm:$0xff] }
  0x11   : > { %v493_v17 = vmul.f32 %v4805_v5, %v4805_v5  ;;  %v476_v18 = vsel %vm468_vm0, %v4816_v10, 0.0  ;;  %v494_v19 = vmul.f32 %v4816_v10, %v4816_v10  ;;  %v498_v20 = vsel %vm468_vm0, %v490_v9, 0.0 }
  0x12   : > { %v473_v16 = vadd.f32 %v472_v8, %v471_v11  ;;  %v499_v21 = vsel %vm468_vm0, %v491_v13, 0.0  ;;  %v501_v25 = vsel %vm468_vm0, %v492_v14, 0.0  ;;  %v478_v26 = vsel %vm468_vm0, %v4825_v15, 0.0 }
  0x13   : > { %v500_v24 = vadd.f32 %v499_v21, %v498_v20  ;;  %v495_v27 = vmul.f32 %v4825_v15, %v4825_v15  ;;  %v503_v28 = vsel %vm468_vm0, %v493_v17, 0.0  ;;  %v480_v32 = vsel %vm468_vm0, %v4836_v22, 0.0  ;;  %v4609_v21 = vld [vmem:[%s6424_s2] ss:$0 sm:$0xff] }
  0x14   : > { %v475_v23 = vadd.f32 %v474_v12, %v473_v16  ;;  %v496_v33 = vmul.f32 %v4836_v22, %v4836_v22  ;;  %v505_v34 = vsel %vm468_vm0, %v494_v19, 0.0  ;;  %v482_v37 = vsel %vm468_vm0, %v4845_v29, 0.0 }
  0x15   : > { %v502_v31 = vadd.f32 %v501_v25, %v500_v24  ;;  %v497_v38 = vmul.f32 %v4845_v29, %v4845_v29  ;;  %v507_v39 = vsel %vm468_vm0, %v495_v27, 0.0 }
  0x16   : > { %v477_v30 = vadd.f32 %v476_v18, %v475_v23  ;;  %v509_v42 = vsel %vm468_vm0, %v496_v33, 0.0 }
  0x17   : > { %v504_v36 = vadd.f32 %v503_v28, %v502_v31  ;;  %v511_v45 = vsel %vm468_vm0, %v497_v38, 0.0 }
  0x18   : > { %v479_v35 = vadd.f32 %v478_v26, %v477_v30 }
  0x19   : > { %v506_v41 = vadd.f32 %v505_v34, %v504_v36 }
  0x1a   : > { %v481_v40 = vadd.f32 %v480_v32, %v479_v35 }
  0x1b   : > { %v508_v44 = vadd.f32 %v507_v39, %v506_v41 }
  0x1c   : > { %v483_v43 = vadd.f32 %v482_v37, %v481_v40 }
  0x1d   : > { %v510_v47 = vadd.f32 %v509_v42, %v508_v44 }
  0x1e   : > { %v484_v46 = vrot.slane %v483_v43, 4 }
  0x1f   : > { %v512_v49 = vadd.f32 %v511_v45, %v510_v47 }
  0x20   : > { %v485_v48 = vadd.f32 %v484_v46, %v483_v43 }
  0x21   : > { %v513_v51 = vrot.slane %v512_v49, 4 }
  0x22   : > { %v486_v50 = vrot.slane %v485_v48, 2 }
  0x23   : > { %v514_v53 = vadd.f32 %v513_v51, %v512_v49 }
  0x24   : > { %v487_v52 = vadd.f32 %v486_v50, %v485_v48 }
  0x25   : > { %v515_v55 = vrot.slane %v514_v53, 2 }
  0x26   : > { %v488_v54 = vrot.slane %v487_v52, 1 }
  0x27   : > { %v516_v57 = vadd.f32 %v515_v55, %v514_v53 }
  0x28   : > { %v489_v56 = vadd.f32 %v488_v54, %v487_v52 }
  0x29   : > { %v517_v58 = vrot.slane %v516_v57, 1 }
  0x2a   : > { %4190 = vmatmul.msk.f32.vlgmr.msra.gmra.mxu0 %vm468_vm0, %v489_v56 }
  0x2b   : > { %v518_v59 = vadd.f32 %v517_v58, %v516_v57 }
  0x2d   : > { %4191 = vmatmul.msk.f32.vlgmr.msra.gmra.mxu1 %vm468_vm0, %v518_v59 }
  0xa7   : > { %v539_v60 = vpop.f32.mrf.mxu0 }
  0xa8   : > { %v565_v61 = vmul.f32 %v539_v60, %v539_v60  ;;  %v568_v11 = vperm.slane %v539_v60, 0 }
  0xaa   : > { %v562_v62 = vpop.f32.mrf.mxu1  ;;  %v569_v14 = vsub.f32 %v4796_v2, %v568_v11  ;;  %v570_v17 = vsub.f32 %v4799_v3, %v568_v11  ;;  %v571_v18 = vsub.f32 %v4802_v4, %v568_v11  ;;  %v572_v19 = vsub.f32 %v4805_v5, %v568_v11  ;;  %v4610_v3 = vld [vmem:[%s6425_s3] ss:$0 sm:$0xff] }
  0xab   : > { %v566_v63 = vsub.f32 %v562_v62, %v565_v61  ;;  %v573_v23 = vsub.f32 %v4816_v10, %v568_v11  ;;  %v574_v24 = vsub.f32 %v4825_v15, %v568_v11  ;;  %v575_v33 = vsub.f32 %v4836_v22, %v568_v11 }
  0xac   : > { %v576_v45 = vsub.f32 %v4845_v29, %v568_v11 }
  0xad   : > { %v567_v0 = vmax.f32 %v566_v63, 0.0 }
  0xaf   : > { %v577_v1 = vadd.f32 1e-05, %v567_v0 }
  0xb1   : > { %4616 = vrsqrt.f32 %v577_v1  ;;  %vm584_vm2 = vweird.f32 %v577_v1 }
  0xb7   : > { %v4617_v6 = vpop.eup %4616 }
  0xb8   : > { %v579_v7 = vmul.f32 %v4617_v6, %v577_v1  ;;  %vm585_vm1 = vweird.f32 %v4617_v6 }
  0xb9   : > { %vm586_vm3 = vmor %vm584_vm2, %vm585_vm1 }
  0xba   : > { %v580_v8 = vmul.f32 %v4617_v6, %v579_v7 }
  0xbc   : > { %v581_v9 = vmul.f32 0.5, %v580_v8  ;;  %v4550_v8 = vld [vmem:[%s6427_s5] sm:$0xff] }
  0xbd   : > { %1045 = vmatpush.bf16.msra.mxu2 %v4550_v8 }
  0xbe   : > { %v582_v12 = vsub.f32 1.5, %v581_v9  ;;  %v4924_v9 = vld [vmem:[%s6427_s5 + $0x18] sm:$0xff] }
  0xbf   : > { %4599 = vmatpush.bf16.msrb.mxu1 %v4924_v9 }
  0xc0   : > { %v583_v13 = vmul.f32 %v4617_v6, %v582_v12 }
  0xc2   : > { %v587_v16 = vsel %vm586_vm3, %v4617_v6, %v583_v13 }
  0xc3   : > { %v588_v20 = vperm.slane %v587_v16, 0 }
  0xc5   : > { %v589_v25 = vmul.f32 %v588_v20, %v569_v14  ;;  %v590_v26 = vmul.f32 %v588_v20, %v570_v17  ;;  %v591_v27 = vmul.f32 %v588_v20, %v571_v18  ;;  %v592_v2 = vmul.f32 %v588_v20, %v572_v19 }
  0xc6   : > { %v593_v4 = vmul.f32 %v588_v20, %v573_v23  ;;  %v594_v28 = vmul.f32 %v588_v20, %v574_v24  ;;  %v595_v38 = vmul.f32 %v588_v20, %v575_v33  ;;  %v596_v48 = vmul.f32 %v588_v20, %v576_v45 }
  0xc7   : > { %v600_v5 = vmul.f32 %v4609_v21, %v589_v25  ;;  %v601_v30 = vmul.f32 %v4609_v21, %v590_v26  ;;  %v602_v31 = vmul.f32 %v4609_v21, %v591_v27  ;;  %v603_v32 = vmul.f32 %v4609_v21, %v592_v2 }
  0xc8   : > { %v604_v34 = vmul.f32 %v4609_v21, %v593_v4  ;;  %v605_v10 = vmul.f32 %v4609_v21, %v594_v28  ;;  %v606_v46 = vmul.f32 %v4609_v21, %v595_v38  ;;  %v607_v52 = vmul.f32 %v4609_v21, %v596_v48 }
  0xc9   : > { %v4874_v35 = vadd.f32 %v4610_v3, %v600_v5  ;;  %v4876_v15 = vadd.f32 %v4610_v3, %v601_v30  ;;  %v4878_v36 = vadd.f32 %v4610_v3, %v602_v31  ;;  %v4880_v37 = vadd.f32 %v4610_v3, %v603_v32 }
  0xca   : > { %v4882_v39 = vadd.f32 %v4610_v3, %v604_v34  ;;  %v4884_v40 = vadd.f32 %v4610_v3, %v605_v10  ;;  %v4893_v49 = vadd.f32 %v4610_v3, %v606_v46  ;;  %v4903_v61 = vadd.f32 %v4610_v3, %v607_v52  ;;  %v2580_v46 = vld [vmem:[#allocation3 + $0xc] sm:$0x1] }
  0xcb   : > { %v4192_v41 = vmul.f32 -1.442695, %v4874_v35  ;;  %v4193_v42 = vmul.f32 -1.442695, %v4876_v15  ;;  %v4194_v22 = vmul.f32 -1.442695, %v4878_v36 }
  0xcc   : > { %v4195_v43 = vmul.f32 -1.442695, %v4880_v37  ;;  %v4196_v44 = vmul.f32 -1.442695, %v4882_v39  ;;  %v4197_v47 = vmul.f32 -1.442695, %v4884_v40 }
  0xcd   : > { %4618 = vpow2.f32 %v4192_v41  ;;  %v4198_v29 = vmul.f32 -1.442695, %v4893_v49  ;;  %v4199_v1 = vmul.f32 -1.442695, %v4903_v61 }
  0xce   : > { %4620 = vpow2.f32 %v4193_v42 }
  0xcf   : > { %4622 = vpow2.f32 %v4194_v22 }
  0xd0   : > { %4624 = vpow2.f32 %v4195_v43 }
  0xd1   : > { %4626 = vpow2.f32 %v4196_v44 }
  0xd2   : > { %4628 = vpow2.f32 %v4197_v47 }
  0xd3   : > { %v4619_v50 = vpop.eup %4618 }
  0xd4   : > { %v4621_v51 = vpop.eup %4620  ;;  %v643_v53 = vadd.f32 1.0, %v4619_v50 }
  0xd5   : > { %v4623_v54 = vpop.eup %4622  ;;  %v4895_v55 = vadd.f32 1.0, %v4621_v51 }
  0xd6   : > { %v4625_v56 = vpop.eup %4624  ;;  %v4898_v57 = vadd.f32 1.0, %v4623_v54  ;;  %4630 = vrcp.f32 %v643_v53  ;;  %v660_v11 = vand.u32 2147483647, %v643_v53  ;;  %v662_v12 = vand.u32 2147483648, %v643_v53 }
  0xd7   : > { %v4627_v58 = vpop.eup %4626  ;;  %v4900_v59 = vadd.f32 1.0, %v4625_v56  ;;  %4632 = vrcp.f32 %v4895_v55  ;;  %vm656_vm4 = vweird.f32 %v643_v53  ;;  %vm671_vm5 = vweird.f32 %v4895_v55 }
  0xd8   : > { %v4629_v60 = vpop.eup %4628  ;;  %v4905_v62 = vadd.f32 1.0, %v4627_v58  ;;  %4634 = vrcp.f32 %v4898_v57  ;;  %v675_v23 = vand.u32 2147483647, %v4895_v55  ;;  %vm4936_vm6 = vcmp.eq.f32.partialorder %v660_v11, 8.507059e+37 }
  0xd9   : > { %4636 = vpow2.f32 %v4198_v29  ;;  %v4908_v63 = vadd.f32 1.0, %v4629_v60  ;;  %v663_v26 = vor.u32 1.1754944e-38, %v662_v12  ;;  %v677_v27 = vand.u32 2147483648, %v4895_v55 }
  0xda   : > { %4638 = vrcp.f32 %v4900_v59  ;;  %vm686_vm8 = vweird.f32 %v4898_v57  ;;  %v690_v34 = vand.u32 2147483647, %v4898_v57  ;;  %v692_v10 = vand.u32 2147483648, %v4898_v57 }
  0xdb   : > { %4640 = vrcp.f32 %v4905_v62  ;;  %v705_v38 = vand.u32 2147483647, %v4900_v59  ;;  %v707_v44 = vand.u32 2147483648, %v4900_v59  ;;  %vm701_vm14 = vweird.f32 %v4900_v59 }
  0xdc   : > { %v4911_v0 = vpop.eup %4630  ;;  %4642 = vrcp.f32 %v4908_v63  ;;  %vm691_vm15 = vcmp.eq.f32.partialorder %v690_v34, 8.507059e+37  ;;  %v693_v54 = vor.u32 1.1754944e-38, %v692_v10  ;;  %v720_v8 = vand.u32 2147483647, %v4905_v62  ;;  %v797_v34 = vld [vmem:[#allocation2 + $0x18] sm:$0x1] }
  0xdd   : > { %v4915_v6 = vpop.eup %4632  ;;  %v652_v7 = vmul.f32 %v4911_v0, %v643_v53  ;;  %4644 = vpow2.f32 %v4199_v1  ;;  %vm657_vm7 = vweird.f32 %v4911_v0  ;;  %vm706_vm3 = vcmp.eq.f32.partialorder %v705_v38, 8.507059e+37 }
  0xde   : > { %v667_v13 = vmul.f32 %v4915_v6, %v4895_v55  ;;  %v4635_v14 = vpop.eup %4634  ;;  %vm4956_vm10 = vmor %vm656_vm4, %vm657_vm7  ;;  %vm672_vm12 = vweird.f32 %v4915_v6  ;;  %v708_v58 = vor.u32 1.1754944e-38, %v707_v44  ;;  %vm676_vm4 = vcmp.eq.f32.partialorder %v675_v23, 8.507059e+37 }
  0xdf   : > { %v653_v16 = vsub.f32 1.0, %v652_v7  ;;  %v4637_v17 = vpop.eup %4636  ;;  %v682_v19 = vmul.f32 %v4635_v14, %v4898_v57  ;;  %vm687_vm9 = vweird.f32 %v4635_v14  ;;  %vm4982_vm2 = vmor %vm671_vm5, %vm672_vm12  ;;  %v678_v55 = vor.u32 1.1754944e-38, %v677_v27 }
  0xe0   : > { %v668_v18 = vsub.f32 1.0, %v667_v13  ;;  %v4639_v20 = vpop.eup %4638  ;;  %v4950_v33 = vadd.f32 1.0, %v4637_v17  ;;  %vm4966_vm13 = vmor %vm686_vm8, %vm687_vm9  ;;  %v722_v11 = vand.u32 2147483648, %v4905_v62  ;;  %v735_v13 = vand.u32 2147483647, %v4908_v63 }
  0xe1   : > { %v654_v21 = vmul.f32 %v4911_v0, %v653_v16  ;;  %v4934_v24 = vpop.eup %4640  ;;  %v683_v2 = vsub.f32 1.0, %v682_v19  ;;  %v697_v3 = vmul.f32 %v4639_v20, %v4900_v59  ;;  %vm702_vm11 = vweird.f32 %v4639_v20  ;;  %v4551_v19 = vld [vmem:[%s6427_s5 + $0x8] sm:$0xff] }
  0xe2   : > { %v669_v4 = vmul.f32 %v4915_v6, %v668_v18  ;;  %v712_v28 = vmul.f32 %v4934_v24, %v4905_v62  ;;  %v4948_v32 = vpop.eup %4642  ;;  %vm703_vm1 = vmor %vm701_vm14, %vm702_vm11  ;;  %4646 = vrcp.f32 %v4950_v33  ;;  %v737_v16 = vand.u32 2147483648, %v4908_v63  ;;  %v4558_v18 = vld [vmem:[%s6427_s5 + $0x20] sm:$0xff]  ;;  %1248 = vmatpush.bf16.msrb.mxu0 %v4551_v19  ;;  %4598 = vmatpush.bf16.msra.mxu3 %v4551_v19 }
  0xe3   : > { %v655_v5 = vadd.f32 %v4911_v0, %v654_v21  ;;  %v684_v30 = vmul.f32 %v4635_v14, %v683_v2  ;;  %v698_v31 = vsub.f32 1.0, %v697_v3  ;;  %v4645_v41 = vpop.eup %4644  ;;  %v727_v48 = vmul.f32 %v4948_v32, %v4908_v63  ;;  %1658 = vmatpush.bf16.msrb.mxu2 %v4558_v18 }
  0xe4   : > { %v670_v45 = vadd.f32 %v4915_v6, %v669_v4  ;;  %v713_v47 = vsub.f32 1.0, %v712_v28  ;;  %v4978_v53 = vadd.f32 1.0, %v4645_v41  ;;  %vm717_vm5 = vweird.f32 %v4934_v24  ;;  %v791_v4 = vld [vmem:[#allocation2 + $0x8] sm:$0x1]  ;;  %v800_v41 = vld [vmem:[#allocation2 + $0x20] sm:$0x1] }
  0xe5   : > { %v685_v22 = vadd.f32 %v4635_v14, %v684_v30  ;;  %v699_v43 = vmul.f32 %v4639_v20, %v698_v31  ;;  %v659_v50 = vsel %vm4956_vm10, %v4911_v0, %v655_v5  ;;  %v728_v56 = vsub.f32 1.0, %v727_v48 }
  0xe6   : > { %v664_v59 = vsel %vm4936_vm6, %v663_v26, %v659_v50  ;;  %v674_v60 = vsel %vm4982_vm2, %v4915_v6, %v670_v45  ;;  %v714_v1 = vmul.f32 %v4934_v24, %v713_v47  ;;  %4648 = vrcp.f32 %v4978_v53  ;;  %v823_v47 = vld [vmem:[#allocation2 + $0xc] sm:$0x1] }
  0xe7   : > { %v689_v51 = vsel %vm4966_vm13, %v4635_v14, %v685_v22  ;;  %v700_v52 = vadd.f32 %v4639_v20, %v699_v43  ;;  %v729_v12 = vmul.f32 %v4948_v32, %v728_v56  ;;  %v679_v14 = vsel %vm676_vm4, %v678_v55, %v674_v60 }
  0xe8   : > { %v694_v0 = vsel %vm691_vm15, %v693_v54, %v689_v51  ;;  %v771_v6 = vmul.f32 %v664_v59, %v4874_v35  ;;  %v5010_v23 = vpop.eup %4646  ;;  %vm716_vm6 = vweird.f32 %v4905_v62  ;;  %vm5013_vm7 = vcmp.eq.f32.partialorder %v720_v8, 8.507059e+37 }
  0xe9   : > { %v704_v57 = vsel %vm703_vm1, %v4639_v20, %v700_v52  ;;  %v773_v17 = vmul.f32 %v694_v0, %v4878_v36  ;;  %v715_v20 = vadd.f32 %v4934_v24, %v714_v1  ;;  %vm731_vm8 = vweird.f32 %v4908_v63  ;;  %vm5021_vm10 = vmor %vm716_vm6, %vm717_vm5 }
  0xea   : > { %v709_v7 = vsel %vm706_vm3, %v708_v58, %v704_v57  ;;  %v723_v36 = vor.u32 1.1754944e-38, %v722_v11  ;;  %v730_v25 = vadd.f32 %v4948_v32, %v729_v12  ;;  %vm732_vm9 = vweird.f32 %v4948_v32  ;;  %v794_v58 = vld [vmem:[#allocation2 + $0x10] sm:$0x1] }
  0xeb   : > { %v774_v21 = vmul.f32 %v709_v7, %v4880_v37  ;;  %v772_v26 = vmul.f32 %v679_v14, %v4876_v15  ;;  %vm5025_vm11 = vcmp.eq.f32.partialorder %v735_v13, 8.507059e+37  ;;  %v738_v27 = vor.u32 1.1754944e-38, %v737_v16  ;;  %vm5044_vm12 = vmor %vm731_vm8, %vm732_vm9  ;;  %v826_v14 = vld [vmem:[#allocation2 + $0x14] sm:$0x1] }
  0xec   : > { %v850_v2 = vpack.c.bf16 %v771_v6, %v771_v6  ;;  %v5029_v3 = vpack.c.bf16 %v773_v17, %v773_v17  ;;  %v5031_v28 = vpop.eup %4648  ;;  %v719_v15 = vsel %vm5021_vm10, %v4934_v24, %v715_v20  ;;  %v750_v5 = vand.u32 2147483647, %v4950_v33 }
  0xed   : > { %v752_v30 = vand.u32 2147483648, %v4950_v33  ;;  %v5038_v31 = vpack.c.bf16 %v774_v21, %v774_v21  ;;  %v742_v38 = vmul.f32 %v5010_v23, %v4950_v33  ;;  %v767_v24 = vand.u32 2147483648, %v4978_v53 }
  0xee   : > { %vm779_vm13 = vcmask 125952   ;;  %v734_v42 = vsel %vm5044_vm12, %v4948_v32, %v730_v25  ;;  %v5054_v22 = vpack.c.bf16 %v772_v26, %v772_v26  ;;  %v4700_v43 = vmov 0  }
  0xef   : > { %780 = vst.msk [vmem:[#allocation2] sm:$0xf] %vm779_vm13, %v4700_v43  ;;  %vm785_vm14 = vcmask 122880   ;;  %vm786_vm15 = vsmask.f32 256  ;;  %v757_v63 = vmul.f32 %v5031_v28, %v4978_v53  ;;  %v875_v44 = vshrl.u32 %v5029_v3, 16 }
  0xf0   : > { %781 = vst.msk [vmem:[#allocation2 + $0x4] sm:$0xf] %vm779_vm13, %v4700_v43  ;;  %vm5065_vm1 = vmand %vm785_vm14, %vm786_vm15  ;;  %vm6436_vm2 = vsmask.f32 7938  ;;  %v859_v45 = vshrl.u32 %v850_v2, 16  ;;  %v5069_v48 = vor.u32 1.1754944e-38, %v752_v30  ;;  %v724_v52 = vsel %vm5013_vm7, %v723_v36, %v719_v15 }
  0xf1   : > { %v883_v50 = vshrl.u32 %v5038_v31, 16  ;;  %v792_v51 = vsel %vm5065_vm1, 0, %v791_v4  ;;  %vm2544_vm3 = vcmask 253952   ;;  %783 = vst.msk [vmem:[#allocation2 + $0x48] sm:$0xf] %vm779_vm13, %v4700_v43  ;;  %vm5080_vm4 = vmand %vm785_vm14, %vm6436_vm2  ;;  %v798_v29 = vsel %vm5065_vm1, 0, %v797_v34 }
  0xf2   : > { %793 = vst [vmem:[#allocation2 + $0x8] sm:$0x1] %v792_v51  ;;  %v5084_v56 = vrot.slane %v859_v45, 7  ;;  %v801_v57 = vsel %vm5065_vm1, 0, %v800_v41  ;;  %v739_v59 = vsel %vm5025_vm11, %v738_v27, %v734_v42  ;;  %v743_v60 = vsub.f32 1.0, %v742_v38  ;;  %vm5097_vm5 = vmand %vm2544_vm3, %vm786_vm15 }
  0xf3   : > { %v765_v0 = vand.u32 2147483647, %v4978_v53  ;;  %v5093_v1 = vor.u32 1.1754944e-38, %v767_v24  ;;  %784 = vst.msk [vmem:[#allocation2 + $0x4c] sm:$0xf] %vm779_vm13, %v4700_v43  ;;  %v758_v7 = vsub.f32 1.0, %v757_v63  ;;  %vm5106_vm6 = vmand %vm2544_vm3, %vm6436_vm2  ;;  %v775_v16 = vmul.f32 %v724_v52, %v4882_v39 }
  0xf4   : > { %v867_v8 = vshrl.u32 %v5054_v22, 16  ;;  %v862_v11 = vshll.u32 %v850_v2, 16  ;;  %799 = vst [vmem:[#allocation2 + $0x18] sm:$0x1] %v798_v29  ;;  %v5110_v13 = vrot.slane %v875_v44, 7  ;;  %v2581_v6 = vsel %vm5106_vm6, 0, %v2580_v46  ;;  %vm5129_vm8 = vmand %vm779_vm13, %vm6436_vm2 }
  0xf5   : > { %802 = vst [vmem:[#allocation2 + $0x20] sm:$0x1] %v801_v57  ;;  %v5115_v17 = vrot.slane %v883_v50, 7  ;;  %v824_v18 = vsel %vm5080_vm4, 0, %v823_v47  ;;  %v776_v19 = vmul.f32 %v739_v59, %v4884_v40  ;;  %v878_v35 = vshll.u32 %v5029_v3, 16 }
  0xf6   : > { %v788_v20 = vld [vmem:[#allocation2] sm:$0x1]  ;;  %v864_v21 = vor.u32 %v862_v11, %v5084_v56  ;;  %2582 = vst [vmem:[#allocation3 + $0xc] sm:$0x1] %v2581_v6  ;;  %v886_v36 = vshll.u32 %v5038_v31, 16  ;;  %v744_v25 = vmul.f32 %v5010_v23, %v743_v60  ;;  %vm747_vm7 = vweird.f32 %v5010_v23  ;;  %v4552_v60 = vld [vmem:[%s6427_s5 + $0x10] sm:$0xff] }
  0xf7   : > { %v829_v39 = vld [vmem:[#allocation2 + $0x1c] sm:$0x1]  ;;  %v789_v26 = vsel %vm5065_vm1, 0, %v788_v20  ;;  %v820_v37 = vld [vmem:[#allocation2 + $0x4] sm:$0x1]  ;;  %v795_v62 = vsel %vm5065_vm1, 0, %v794_v58  ;;  %v759_v27 = vmul.f32 %v5031_v28, %v758_v7  ;;  %v880_v3 = vor.u32 %v878_v35, %v5110_v13  ;;  %1376 = vmatpush.bf16.msra.mxu0 %v4552_v60 }
  0xf8   : > { %825 = vst [vmem:[#allocation2 + $0xc] sm:$0x1] %v824_v18  ;;  %v5136_v2 = vrot.slane %v867_v8, 7  ;;  %v821_v4 = vsel %vm5080_vm4, 0, %v820_v37  ;;  %v803_v15 = vld [vmem:[#allocation2 + $0x28] sm:$0x1]  ;;  %v5143_v31 = vpack.c.bf16 %v775_v16, %v775_v16  ;;  %v888_v38 = vor.u32 %v886_v36, %v5115_v17 }
  0xf9   : > { %790 = vst [vmem:[#allocation2] sm:$0x1] %v789_v26  ;;  %v5141_v30 = vld [vmem:[#allocation2 + $0x30] sm:$0x1]  ;;  %v870_v34 = vshll.u32 %v5054_v22, 16  ;;  %v827_v24 = vsel %vm5080_vm4, 0, %v826_v14  ;;  %v5149_v41 = vpack.c.bf16 %v776_v19, %v776_v19  ;;  %v745_v63 = vadd.f32 %v5010_v23, %v744_v25 }
  0xfa   : > { %v941_v10 = vld [vmem:[#allocation2 + $0x8] sm:$0xf]  ;;  %822 = vst [vmem:[#allocation2 + $0x4] sm:$0x1] %v821_v4  ;;  %vm1094_vm9 = vsmask.f32 3328  ;;  %vm762_vm12 = vweird.f32 %v5031_v28  ;;  %v760_v50 = vadd.f32 %v5031_v28, %v759_v27  ;;  %vm746_vm14 = vweird.f32 %v4950_v33 }
  0xfb   : > { %v942_v42 = vsel %vm5129_vm8, %v864_v21, %v941_v10  ;;  %vm1095_vm10 = vsmask.f32 7440  ;;  %796 = vst [vmem:[#allocation2 + $0x10] sm:$0x1] %v795_v62  ;;  %vm5156_vm11 = vcmp.eq.f32.partialorder %v750_v5, 8.507059e+37  ;;  %vm5161_vm13 = vcmp.eq.f32.partialorder %v765_v0, 8.507059e+37  ;;  %vm5190_vm15 = vmor %vm746_vm14, %vm747_vm7 }
  0xfc   : > { %v865_v45 = vrot.slane %v5084_v56, 4  ;;  %943 = vst [vmem:[#allocation2 + $0x8] sm:$0xf] %v942_v42  ;;  %v953_v46 = vld [vmem:[#allocation2 + $0x18] sm:$0xf]  ;;  %v830_v47 = vsel %vm5080_vm4, 0, %v829_v39  ;;  %v872_v0 = vor.u32 %v870_v34, %v5136_v2  ;;  %vm761_vm3 = vweird.f32 %v4978_v53 }
  0xfd   : > { %v954_v5 = vsel %vm5129_vm8, %v880_v3, %v953_v46  ;;  %v959_v51 = vld [vmem:[#allocation2 + $0x20] sm:$0xf]  ;;  %828 = vst [vmem:[#allocation2 + $0x14] sm:$0x1] %v827_v24  ;;  %v873_v52 = vrot.slane %v5136_v2, 4  ;;  %v881_v29 = vrot.slane %v5110_v13, 4  ;;  %vm5199_vm2 = vmor %vm761_vm3, %vm762_vm12  ;;  %v749_v53 = vsel %vm5190_vm15, %v5010_v23, %v745_v63 }
  0xfe   : > { %955 = vst [vmem:[#allocation2 + $0x18] sm:$0xf] %v954_v5  ;;  %v960_v56 = vsel %vm5129_vm8, %v888_v38, %v959_v51  ;;  %v804_v57 = vsel %vm5065_vm1, 0, %v803_v15  ;;  %v807_v58 = vsel %vm5065_vm1, 0, %v5141_v30  ;;  %v891_v59 = vshrl.u32 %v5143_v31, 16 }
  0xff   : > { %961 = vst [vmem:[#allocation2 + $0x20] sm:$0xf] %v960_v56  ;;  %v944_v7 = vld [vmem:[#allocation2 + $0xc] sm:$0x1]  ;;  %v894_v8 = vshll.u32 %v5143_v31, 16  ;;  %v899_v11 = vshrl.u32 %v5149_v41, 16  ;;  %v764_v35 = vsel %vm5199_vm2, %v5031_v28, %v760_v50  ;;  %v754_v28 = vsel %vm5156_vm11, %v5069_v48, %v749_v53  ;;  %vm5225_vm2 = vmor %vm1094_vm9, %vm1095_vm10 }
 0x100   : > { %v4202_v16 = vld [vmem:[#allocation2] sm:$0xf]  ;;  %v945_v33 = vsel %vm5065_vm1, %v865_v45, %v944_v7  ;;  %831 = vst [vmem:[#allocation2 + $0x1c] sm:$0x1] %v830_v47  ;;  %v5212_v25 = vrot.slane %v891_v59, 7  ;;  %v769_v34 = vsel %vm5161_vm13, %v5093_v1, %v764_v35  ;;  %vm1302_vm7 = vcmask 1042432  }
 0x101   : > { %v1078_v6 = vld [vmem:[#allocation2] sm:$0xf]  ;;  %946 = vst [vmem:[#allocation2 + $0xc] sm:$0x1] %v945_v33  ;;  %v5203_v19 = vld [vmem:[#allocation2 + $0x4] sm:$0x1]  ;;  %v778_v13 = vmul.f32 %v769_v34, %v4903_v61 }
 0x102   : > { %v1098_v20 = vshrl.u32 %v1078_v6, 16  ;;  %v1101_v21 = vshll.u32 %v1078_v6, 16  ;;  %v1107_v36 = vshll.u32 %v5203_v19, 16  ;;  %v947_v39 = vld [vmem:[#allocation2 + $0x10] sm:$0xf]  ;;  %v896_v51 = vor.u32 %v894_v8, %v5212_v25 }
 0x103   : > { %805 = vst [vmem:[#allocation2 + $0x28] sm:$0x1] %v804_v57  ;;  %v4546_v26 = vld [vmem:[#allocation2 + $0x4] sm:$0xf0]  ;;  %v948_v2 = vsel %vm5129_vm8, %v872_v0, %v947_v39  ;;  %v832_v31 = vld [vmem:[#allocation2 + $0x24] sm:$0x1] }
 0x104   : > { %v1080_v37 = vld [vmem:[#allocation2 + $0x8] sm:$0xf]  ;;  %v1100_v62 = vrot.slane %v1098_v20, 4  ;;  %v1103_v27 = vrot.slane %v1101_v21, 5  ;;  %v4203_v3 = vor.u32 %v4546_v26, %v4202_v16  ;;  %v1109_v4 = vrot.slane %v1107_v36, 5 }
 0x105   : > { %v1112_v23 = vshrl.u32 %v1080_v37, 16  ;;  %v1115_v15 = vshll.u32 %v1080_v37, 16  ;;  %949 = vst [vmem:[#allocation2 + $0x10] sm:$0xf] %v948_v2  ;;  %v4254_v10 = vld [vmem:[#allocation2 + $0x18] sm:$0xf]  ;;  %v777_v16 = vmul.f32 %v754_v28, %v4893_v49 }
 0x106   : > { %v1104_v38 = vor.u32 %v1103_v27, %v1100_v62  ;;  %v950_v24 = vld [vmem:[#allocation2 + $0x14] sm:$0x1]  ;;  %v1084_v42 = vld [vmem:[#allocation2 + $0x18] sm:$0xf]  ;;  %4220 = vmatmul.msk.bf16.vlgmr.msra.gmra.mxu2 %vm468_vm0, %v4203_v3  ;;  %v4554_v63 = vld [vmem:[#allocation2 + $0x1c] sm:$0xf0] }
 0x107   : > { %v1114_v46 = vrot.slane %v1112_v23, 4  ;;  %v1117_v22 = vrot.slane %v1115_v15, 5  ;;  %v951_v48 = vsel %vm5065_vm1, %v873_v52, %v950_v24  ;;  %v1140_v44 = vshrl.u32 %v1084_v42, 16  ;;  %v956_v50 = vld [vmem:[#allocation2 + $0x1c] sm:$0x1] }
 0x108   : > { %v4255_v1 = vor.u32 %v4554_v63, %v4254_v10  ;;  %v1105_v47 = vrot.slane %v1104_v38, 4  ;;  %952 = vst [vmem:[#allocation2 + $0x14] sm:$0x1] %v951_v48  ;;  %v1143_v5 = vshll.u32 %v1084_v42, 16  ;;  %v5232_v56 = vld [vmem:[#allocation2 + $0xc] sm:$0x1]  ;;  %v957_v59 = vsel %vm5065_vm1, %v881_v29, %v956_v50 }
 0x109   : > { %v1118_v57 = vor.u32 %v1117_v22, %v1114_v46  ;;  %v1142_v60 = vrot.slane %v1140_v44, 4  ;;  %v835_v0 = vld [vmem:[#allocation2 + $0x2c] sm:$0x1]  ;;  %v1121_v7 = vshll.u32 %v5232_v56, 16  ;;  %958 = vst [vmem:[#allocation2 + $0x1c] sm:$0x1] %v957_v59  ;;  %v856_v46 = vpack.c.bf16 %v777_v16, %v777_v16 }
 0x10a   : > { %4269 = vmatmul.msk.bf16.vlgmr.msrb.gmra.mxu1 %vm468_vm0, %v4255_v1  ;;  %v1110_v52 = vsel %vm5225_vm2, %v1105_v47, %v1109_v4  ;;  %v1145_v14 = vrot.slane %v1143_v5, 5  ;;  %v833_v8 = vsel %vm5080_vm4, 0, %v832_v31  ;;  %808 = vst [vmem:[#allocation2 + $0x30] sm:$0x1] %v807_v58  ;;  %v5252_v29 = vrot.slane %v899_v11, 7 }
 0x10b   : > { %v1119_v33 = vrot.slane %v1118_v57, 4  ;;  %v965_v6 = vld [vmem:[#allocation2 + $0x28] sm:$0xf]  ;;  %v1123_v18 = vrot.slane %v1121_v7, 5  ;;  %v902_v21 = vshll.u32 %v5149_v41, 16  ;;  %v836_v61 = vsel %vm5080_vm4, 0, %v835_v0 }
 0x10c   : > { %v1082_v20 = vld [vmem:[#allocation2 + $0x10] sm:$0xf]  ;;  %v966_v49 = vsel %vm5129_vm8, %v896_v51, %v965_v6  ;;  %v809_v53 = vld [vmem:[#allocation2 + $0x38] sm:$0x1]  ;;  %v1211_v35 = vunpack.c.l.b16 %v1110_v52  ;;  %v1146_v58 = vor.u32 %v1145_v14, %v1142_v60  ;;  %v1086_v39 = vld [vmem:[#allocation2 + $0x20] sm:$0xf]  ;;  %v5272_v22 = vpack.c.bf16 %v778_v13, %v778_v13 }
 0x10d   : > { %v1126_v36 = vshrl.u32 %v1082_v20, 16  ;;  %v1129_v30 = vshll.u32 %v1082_v20, 16  ;;  %967 = vst [vmem:[#allocation2 + $0x28] sm:$0xf] %v966_v49  ;;  %v1124_v11 = vsel %vm5225_vm2, %v1119_v33, %v1123_v18  ;;  %v1307_v26 = vrot.slane %v5203_v19, 5 }
 0x10e   : > { %v897_v41 = vrot.slane %v5212_v25, 4  ;;  %834 = vst [vmem:[#allocation2 + $0x24] sm:$0x1] %v833_v8  ;;  %v889_v37 = vrot.slane %v5115_v17, 4  ;;  %v812_v62 = vld [vmem:[#allocation2 + $0x40] sm:$0x1]  ;;  %v1212_v27 = vunpack.c.l.b16 %v1124_v11  ;;  %v904_v23 = vor.u32 %v902_v21, %v5252_v29 }
 0x10f   : > { %v5264_v2 = vld [vmem:[#allocation2 + $0x14] sm:$0x1]  ;;  %v1128_v3 = vrot.slane %v1126_v36, 4  ;;  %v1131_v4 = vrot.slane %v1129_v30, 5  ;;  %837 = vst [vmem:[#allocation2 + $0x2c] sm:$0x1] %v836_v61 }
 0x110   : > { %v1135_v15 = vshll.u32 %v5264_v2, 16  ;;  %v4206_v31 = vld [vmem:[#allocation2 + $0x10] sm:$0xf]  ;;  %v4547_v28 = vld [vmem:[#allocation2 + $0x14] sm:$0xf0]  ;;  %v1154_v34 = vshrl.u32 %v1086_v39, 16  ;;  %v1219_v25 = vpack.c.b16 %v1212_v27, %v1211_v35 }
 0x111   : > { %v1157_v10 = vshll.u32 %v1086_v39, 16  ;;  %v5268_v38 = vld [vmem:[#allocation2 + $0x1c] sm:$0x1]  ;;  %v1132_v17 = vor.u32 %v1131_v4, %v1128_v3  ;;  %v1147_v24 = vrot.slane %v1146_v58, 4  ;;  %v1278_v42 = vld [vmem:[#allocation2] sm:$0xe]  ;;  %v4207_v14 = vor.u32 %v4547_v28, %v4206_v31 }
 0x112   : > { %v810_v63 = vsel %vm5065_vm1, 0, %v809_v53  ;;  %v1149_v48 = vshll.u32 %v5268_v38, 16  ;;  %v971_v44 = vld [vmem:[#allocation2 + $0x30] sm:$0xf]  ;;  %v1279_v1 = vld [vmem:[#allocation2 + $0x8] sm:$0xe]  ;;  %4228 = vmatmul.msk.bf16.vlgmr.msrb.gmra.mxu0 %vm468_vm0, %v1219_v25 }
 0x113   : > { %vm1303_vm9 = vcmask 1046532   ;;  %v1133_v47 = vrot.slane %v1132_v17, 4  ;;  %v1137_v50 = vrot.slane %v1135_v15, 5  ;;  %v972_v5 = vsel %vm5129_vm8, %v904_v23, %v971_v44  ;;  %811 = vst [vmem:[#allocation2 + $0x38] sm:$0x1] %v810_v63  ;;  %1461 = vmatpush.bf16.msrb.mxu0 %v4924_v9 }
 0x114   : > { %v813_v51 = vsel %vm5065_vm1, 0, %v812_v62  ;;  %v1151_v57 = vrot.slane %v1149_v48, 5  ;;  %973 = vst [vmem:[#allocation2 + $0x30] sm:$0xf] %v972_v5  ;;  %v1156_v59 = vrot.slane %v1154_v34, 4  ;;  %v1159_v60 = vrot.slane %v1157_v10, 5  ;;  %vm5286_vm10 = vmor %vm1302_vm7, %vm1303_vm9 }
 0x115   : > { %v4232_v0 = vrot.slane %v1278_v42, 9  ;;  %v1311_v52 = vrot.slane %v5232_v56, 5  ;;  %v1138_v7 = vsel %vm5225_vm2, %v1133_v47, %v1137_v50  ;;  %v962_v8 = vld [vmem:[#allocation2 + $0x24] sm:$0x1]  ;;  %v1088_v16 = vld [vmem:[#allocation2 + $0x28] sm:$0xf] }
 0x116   : > { %v4233_v33 = vrot.slane %v1279_v1, 9  ;;  %v838_v6 = vld [vmem:[#allocation2 + $0x34] sm:$0x1]  ;;  %v1152_v18 = vsel %vm5225_vm2, %v1147_v24, %v1151_v57  ;;  %v1213_v9 = vunpack.c.l.b16 %v1138_v7  ;;  %v963_v56 = vsel %vm5065_vm1, %v889_v37, %v962_v8  ;;  %v968_v20 = vld [vmem:[#allocation2 + $0x2c] sm:$0x1]  ;;  %4221 = vmatmul.msk.bf16.gmra.mxu2 %vm468_vm0, %v4207_v14  ;;  %v4565_v1 = vld [vmem:[%s6427_s5 + $0x38] sm:$0xff] }
 0x117   : > { %v1168_v21 = vshrl.u32 %v1088_v16, 16  ;;  %814 = vst [vmem:[#allocation2 + $0x40] sm:$0x1] %v813_v51  ;;  %v1214_v49 = vunpack.c.l.b16 %v1152_v18  ;;  %v969_v61 = vsel %vm5065_vm1, %v897_v41, %v968_v20  ;;  %v1171_v53 = vshll.u32 %v1088_v16, 16  ;;  %v841_v35 = vld [vmem:[#allocation2 + $0x3c] sm:$0x1]  ;;  %2066 = vmatpush.bf16.msra.mxu1 %v4565_v1 }
 0x118   : > { %964 = vst [vmem:[#allocation2 + $0x24] sm:$0x1] %v963_v56  ;;  %v1160_v36 = vor.u32 %v1159_v60, %v1156_v59  ;;  %v1308_v58 = vsel %vm5286_vm10, %v4232_v0, %v1307_v26  ;;  %v907_v39 = vshrl.u32 %v856_v46, 16  ;;  %v4258_v37 = vld [vmem:[#allocation2 + $0x28] sm:$0xf]  ;;  %v1312_v27 = vsel %vm5286_vm10, %v4233_v33, %v1311_v52 }
 0x119   : > { %970 = vst [vmem:[#allocation2 + $0x2c] sm:$0x1] %v969_v61  ;;  %v1170_v30 = vrot.slane %v1168_v21, 4  ;;  %v1220_v11 = vpack.c.b16 %v1214_v49, %v1213_v9  ;;  %v1173_v62 = vrot.slane %v1171_v53, 5  ;;  %v915_v3 = vshrl.u32 %v5272_v22, 16  ;;  %v4559_v51 = vld [vmem:[%s6427_s5 + $0x28] sm:$0xff] }
 0x11a   : > { %v1280_v41 = vld [vmem:[#allocation2 + $0x10] sm:$0xe]  ;;  %v909_v4 = vrot.slane %v907_v39, 7  ;;  %v910_v23 = vshll.u32 %v856_v46, 16  ;;  %v977_v15 = vld [vmem:[#allocation2 + $0x38] sm:$0xf]  ;;  %v1339_v63 = vunpack.c.l.b16 %v1308_v58  ;;  %v1340_v46 = vunpack.c.l.b16 %v1312_v27  ;;  %1783 = vmatpush.bf16.msrb.mxu3 %v4559_v51 }
 0x11b   : > { %v839_v31 = vsel %vm5080_vm4, 0, %v838_v6  ;;  %v842_v19 = vsel %vm5080_vm4, 0, %v841_v35  ;;  %4229 = vmatmul.msk.bf16.vlgmr.msra.gmra.mxu3 %vm468_vm0, %v1220_v11  ;;  %v4555_v26 = vld [vmem:[#allocation2 + $0x2c] sm:$0xf0]  ;;  %v5309_v28 = vrot.slane %v915_v3, 7  ;;  %v918_v34 = vshll.u32 %v5272_v22, 16 }
 0x11c   : > { %840 = vst [vmem:[#allocation2 + $0x34] sm:$0x1] %v839_v31  ;;  %v4259_v10 = vor.u32 %v4555_v26, %v4258_v37  ;;  %v1174_v25 = vor.u32 %v1173_v62, %v1170_v30  ;;  %v912_v17 = vor.u32 %v910_v23, %v909_v4  ;;  %v1090_v24 = vld [vmem:[#allocation2 + $0x30] sm:$0xf]  ;;  %v905_v42 = vrot.slane %v5252_v29, 4 }
 0x11d   : > { %843 = vst [vmem:[#allocation2 + $0x3c] sm:$0x1] %v842_v19  ;;  %v920_v48 = vor.u32 %v918_v34, %v5309_v28  ;;  %v1161_v47 = vrot.slane %v1160_v36, 4  ;;  %v4234_v5 = vrot.slane %v1280_v41, 9  ;;  %v1315_v29 = vrot.slane %v5264_v2, 5 }
 0x11e   : > { %v983_v44 = vld [vmem:[#allocation2 + $0x40] sm:$0xf]  ;;  %4270 = vmatmul.msk.bf16.gmra.mxu1 %vm468_vm0, %v4259_v10  ;;  %v978_v50 = vsel %vm5129_vm8, %v912_v17, %v977_v15  ;;  %v1182_v0 = vshrl.u32 %v1090_v24, 16  ;;  %v1175_v52 = vrot.slane %v1174_v25, 4  ;;  %v4548_v8 = vld [vmem:[#allocation2 + $0x24] sm:$0xf0]  ;;  %v1347_v6 = vpack.c.b16 %v1340_v46, %v1339_v63 }
 0x11f   : > { %v5318_v22 = vld [vmem:[#allocation2 + $0x24] sm:$0x1]  ;;  %979 = vst [vmem:[#allocation2 + $0x38] sm:$0xf] %v978_v50  ;;  %v984_v60 = vsel %vm5129_vm8, %v920_v48, %v983_v44  ;;  %v4210_v14 = vld [vmem:[#allocation2 + $0x20] sm:$0xf]  ;;  %v5340_v36 = vsel %vm5286_vm10, %v4234_v5, %v1315_v29 }
 0x120   : > { %v5326_v57 = vld [vmem:[#allocation2 + $0x2c] sm:$0x1]  ;;  %v1163_v59 = vshll.u32 %v5318_v22, 16  ;;  %v913_v2 = vrot.slane %v909_v4, 4  ;;  %985 = vst [vmem:[#allocation2 + $0x40] sm:$0xf] %v984_v60  ;;  %v4211_v62 = vor.u32 %v4548_v8, %v4210_v14  ;;  %v1341_v19 = vunpack.c.l.b16 %v5340_v36 }
 0x121   : > { %v1177_v7 = vshll.u32 %v5326_v57, 16  ;;  %v1185_v16 = vshll.u32 %v1090_v24, 16  ;;  %v1281_v18 = vld [vmem:[#allocation2 + $0x18] sm:$0xe]  ;;  %v1899_v9 = vld [vmem:[#allocation2 + $0x10] sm:$0xf] }
 0x122   : > { %v1165_v33 = vrot.slane %v1163_v59, 5  ;;  %v1319_v40 = vrot.slane %v5268_v38, 5  ;;  %v1916_v21 = vshrl.u32 %v1899_v9, 16  ;;  %4244 = vmatmul.msk.bf16.vlgmr.msra.gmra.mxu0 %vm468_vm0, %v1347_v6  ;;  %v1184_v35 = vrot.slane %v1182_v0, 4  ;;  %v1901_v27 = vld [vmem:[#allocation2 + $0x18] sm:$0xf] }
 0x123   : > { %v1179_v56 = vrot.slane %v1177_v7, 5  ;;  %v974_v20 = vld [vmem:[#allocation2 + $0x34] sm:$0x1]  ;;  %v1187_v58 = vrot.slane %v1185_v16, 5  ;;  %v4235_v39 = vrot.slane %v1281_v18, 9  ;;  %v1919_v3 = vshll.u32 %v1899_v9, 16 }
 0x124   : > { %v1166_v49 = vsel %vm5225_vm2, %v1161_v47, %v1165_v33  ;;  %v975_v61 = vsel %vm5065_vm1, %v905_v42, %v974_v20  ;;  %v980_v53 = vld [vmem:[#allocation2 + $0x3c] sm:$0x1]  ;;  %v1918_v4 = vrot.slane %v1916_v21, 4  ;;  %v1323_v23 = vrot.slane %v5318_v22, 5  ;;  %v5349_v26 = vld [vmem:[#allocation2 + $0x14] sm:$0x1] }
 0x125   : > { %v1180_v30 = vsel %vm5225_vm2, %v1175_v52, %v1179_v56  ;;  %976 = vst [vmem:[#allocation2 + $0x34] sm:$0x1] %v975_v61  ;;  %v981_v38 = vsel %vm5065_vm1, %v913_v2, %v980_v53  ;;  %v1215_v11 = vunpack.c.l.b16 %v1166_v49  ;;  %v1282_v34 = vld [vmem:[#allocation2 + $0x20] sm:$0xe]  ;;  %v1188_v25 = vor.u32 %v1187_v58, %v1184_v35  ;;  %v1283_v63 = vld [vmem:[#allocation2 + $0x28] sm:$0xe] }
 0x126   : > { %v1216_v37 = vunpack.c.l.b16 %v1180_v30  ;;  %982 = vst [vmem:[#allocation2 + $0x3c] sm:$0x1] %v981_v38  ;;  %v1092_v41 = vld [vmem:[#allocation2 + $0x38] sm:$0xf]  ;;  %4222 = vmatmul.msk.bf16.gmra.mxu2 %vm468_vm0, %v4211_v62  ;;  %v1320_v17 = vsel %vm5286_vm10, %v4235_v39, %v1319_v40  ;;  %v1921_v24 = vrot.slane %v1919_v3, 5  ;;  %v1930_v42 = vshrl.u32 %v1901_v27, 16 }
 0x127   : > { %v1196_v15 = vshrl.u32 %v1092_v41, 16  ;;  %v1199_v31 = vshll.u32 %v1092_v41, 16  ;;  %v4262_v10 = vld [vmem:[#allocation2 + $0x38] sm:$0xf]  ;;  %v4556_v48 = vld [vmem:[#allocation2 + $0x3c] sm:$0xf0]  ;;  %v1342_v16 = vunpack.c.l.b16 %v1320_v17 }
 0x128   : > { %v1221_v46 = vpack.c.b16 %v1216_v37, %v1215_v11  ;;  %v1933_v22 = vshll.u32 %v1901_v27, 16  ;;  %v5353_v47 = vld [vmem:[#allocation2 + $0x1c] sm:$0x1]  ;;  %v1922_v50 = vor.u32 %v1921_v24, %v1918_v4  ;;  %v1925_v5 = vshll.u32 %v5349_v26, 16  ;;  %v4214_v9 = vld [vmem:[#allocation2 + $0x30] sm:$0xf] }
 0x129   : > { %v1198_v44 = vrot.slane %v1196_v15, 4  ;;  %v1201_v1 = vrot.slane %v1199_v31, 5  ;;  %v1932_v29 = vrot.slane %v1930_v42, 4  ;;  %v1327_v51 = vrot.slane %v5326_v57, 5  ;;  %v4549_v40 = vld [vmem:[#allocation2 + $0x34] sm:$0xf0] }
 0x12a   : > { %v1935_v0 = vrot.slane %v1933_v22, 5  ;;  %v4236_v52 = vrot.slane %v1282_v34, 9  ;;  %v4237_v7 = vrot.slane %v1283_v63, 9  ;;  %v4263_v14 = vor.u32 %v4556_v48, %v4262_v10  ;;  %v4566_v49 = vld [vmem:[%s6427_s5 + $0x40] sm:$0xff]  ;;  %v5377_v36 = vld [vmem:[#allocation2 + $0x8] sm:$0xe] }
 0x12b   : > { %4230 = vmatmul.msk.bf16.gmra.mxu3 %vm468_vm0, %v1221_v46  ;;  %v1202_v60 = vor.u32 %v1201_v1, %v1198_v44  ;;  %v1923_v33 = vrot.slane %v1922_v50, 4  ;;  %v1189_v6 = vrot.slane %v1188_v25, 4  ;;  %v1939_v56 = vshll.u32 %v5353_v47, 16  ;;  %v1492_v39 = vld [vmem:[#allocation2 + $0xc] sm:$0x1]  ;;  %2191 = vmatpush.bf16.msra.mxu2 %v4566_v49 }
 0x12c   : > { %v5358_v59 = vld [vmem:[#allocation2 + $0x34] sm:$0x1]  ;;  %v1936_v57 = vor.u32 %v1935_v0, %v1932_v29  ;;  %v1927_v21 = vrot.slane %v1925_v5, 5  ;;  %v5371_v53 = vsel %vm5286_vm10, %v4236_v52, %v1323_v23  ;;  %v5375_v35 = vsel %vm5286_vm10, %v4237_v7, %v1327_v51  ;;  %v1491_v11 = vld [vmem:[#allocation2 + $0x8] sm:$0xf] }
 0x12d   : > { %v5360_v8 = vld [vmem:[#allocation2 + $0x3c] sm:$0x1]  ;;  %v1191_v2 = vshll.u32 %v5358_v59, 16  ;;  %v1203_v20 = vrot.slane %v1202_v60, 4  ;;  %v1348_v38 = vpack.c.b16 %v1342_v16, %v1341_v19  ;;  %v4215_v62 = vor.u32 %v4549_v40, %v4214_v9  ;;  %v1689_v41 = vld [vmem:[#allocation2 + $0x10] sm:$0xe] }
 0x12e   : > { %v1205_v18 = vshll.u32 %v5360_v8, 16  ;;  %4271 = vmatmul.msk.bf16.gmra.mxu1 %vm468_vm0, %v4263_v14  ;;  %v1928_v58 = vsel %vm5225_vm2, %v1923_v33, %v1927_v21  ;;  %v1937_v27 = vrot.slane %v1936_v57, 4  ;;  %v1941_v3 = vrot.slane %v1939_v56, 5  ;;  %v1493_v4 = vld [vmem:[#allocation2 + $0x10] sm:$0xf] }
 0x12f   : > { %v1193_v61 = vrot.slane %v1191_v2, 5  ;;  %v1343_v15 = vunpack.c.l.b16 %v5371_v53  ;;  %v1344_v31 = vunpack.c.l.b16 %v5375_v35  ;;  %v1494_v19 = vld [vmem:[#allocation2 + $0x14] sm:$0x1]  ;;  %v4280_v34 = vrot.slane %v5377_v36, 9  ;;  %v1903_v42 = vld [vmem:[#allocation2 + $0x20] sm:$0xf] }
 0x130   : > { %v1207_v30 = vrot.slane %v1205_v18, 5  ;;  %v2029_v10 = vunpack.c.l.b16 %v1928_v58  ;;  %v1714_v25 = vrot.slane %v1492_v39, 5  ;;  %v1508_v17 = vshrl.u32 %v1491_v11, 16  ;;  %v1905_v1 = vld [vmem:[#allocation2 + $0x28] sm:$0xf] }
 0x131   : > { %v1194_v37 = vsel %vm5225_vm2, %v1189_v6, %v1193_v61  ;;  %v1511_v24 = vshll.u32 %v1491_v11, 16  ;;  %v4281_v46 = vrot.slane %v1689_v41, 9  ;;  %v1522_v48 = vshrl.u32 %v1493_v4, 16  ;;  %v1284_v33 = vld [vmem:[#allocation2 + $0x30] sm:$0xe] }
 0x132   : > { %v1208_v23 = vsel %vm5225_vm2, %v1203_v20, %v1207_v30  ;;  %4245 = vmatmul.msk.bf16.gmra.mxu0 %vm468_vm0, %v1348_v38  ;;  %v1217_v63 = vunpack.c.l.b16 %v1194_v37  ;;  %v1525_v44 = vshll.u32 %v1493_v4, 16  ;;  %v1942_v50 = vsel %vm5225_vm2, %v1937_v27, %v1941_v3  ;;  %v5392_v40 = vld [vmem:[#allocation2 + $0x24] sm:$0x1]  ;;  %v5394_v36 = vld [vmem:[#allocation2 + $0x2c] sm:$0x1] }
 0x133   : > { %v1218_v22 = vunpack.c.l.b16 %v1208_v23  ;;  %v1510_v5 = vrot.slane %v1508_v17, 4  ;;  %v1513_v29 = vrot.slane %v1511_v24, 5  ;;  %v1517_v51 = vshll.u32 %v1492_v39, 16  ;;  %v1285_v4 = vld [vmem:[#allocation2 + $0x38] sm:$0xe] }
 0x134   : > { %v1524_v60 = vrot.slane %v1522_v48, 4  ;;  %v1527_v0 = vrot.slane %v1525_v44, 5  ;;  %v1944_v52 = vshrl.u32 %v1903_v42, 16  ;;  %v1531_v14 = vshll.u32 %v1494_v19, 16  ;;  %v1495_v24 = vld [vmem:[#allocation2 + $0x18] sm:$0xf] }
 0x135   : > { %v1514_v7 = vor.u32 %v1513_v29, %v1510_v5  ;;  %v1947_v2 = vshll.u32 %v1903_v42, 16  ;;  %v1958_v16 = vshrl.u32 %v1905_v1, 16  ;;  %v2030_v6 = vunpack.c.l.b16 %v1942_v50  ;;  %v1496_v29 = vld [vmem:[#allocation2 + $0x1c] sm:$0x1]  ;;  %v2098_v32 = vld [vmem:[#allocation2 + $0x20] sm:$0xe] }
 0x136   : > { %4223 = vmatmul.msk.bf16.gmra.mxu2 %vm468_vm0, %v4215_v62  ;;  %v1528_v18 = vor.u32 %v1527_v0, %v1524_v60  ;;  %v1946_v9 = vrot.slane %v1944_v52, 4  ;;  %v1961_v57 = vshll.u32 %v1905_v1, 16  ;;  %v1222_v56 = vpack.c.b16 %v1218_v22, %v1217_v63 }
 0x137   : > { %v1515_v20 = vrot.slane %v1514_v7, 4  ;;  %v1949_v21 = vrot.slane %v1947_v2, 5  ;;  %v1960_v49 = vrot.slane %v1958_v16, 4  ;;  %v1718_v61 = vrot.slane %v1494_v19, 5 }
 0x138   : > { %v1529_v35 = vrot.slane %v1528_v18, 4  ;;  %v1963_v30 = vrot.slane %v1961_v57, 5  ;;  %v4238_v38 = vrot.slane %v1284_v33, 9  ;;  %v1519_v58 = vrot.slane %v1517_v51, 5  ;;  %v1498_v57 = vld [vmem:[#allocation2 + $0x24] sm:$0x1] }
 0x139   : > { %v1533_v39 = vrot.slane %v1531_v14, 5  ;;  %v1950_v11 = vor.u32 %v1949_v21, %v1946_v9  ;;  %v1331_v37 = vrot.slane %v5358_v59, 5  ;;  %v2037_v62 = vpack.c.b16 %v2030_v6, %v2029_v10  ;;  %v1907_v14 = vld [vmem:[#allocation2 + $0x30] sm:$0xf]  ;;  %v1909_v6 = vld [vmem:[#allocation2 + $0x38] sm:$0xf] }
 0x13a   : > { %v5400_v27 = vsel %vm5286_vm10, %v4280_v34, %v1714_v25  ;;  %v1953_v3 = vshll.u32 %v5392_v40, 16  ;;  %v1964_v41 = vor.u32 %v1963_v30, %v1960_v49  ;;  %v1520_v23 = vsel %vm5225_vm2, %v1515_v20, %v1519_v58  ;;  %v1690_v25 = vld [vmem:[#allocation2 + $0x18] sm:$0xe] }
 0x13b   : > { %4231 = vmatmul.msk.bf16.gmra.mxu3 %vm468_vm0, %v1222_v56  ;;  %v1534_v19 = vsel %vm5225_vm2, %v1529_v35, %v1533_v39  ;;  %v1967_v17 = vshll.u32 %v5394_v36, 16  ;;  %v1719_v59 = vsel %vm5286_vm10, %v4281_v46, %v1718_v61  ;;  %v1951_v10 = vrot.slane %v1950_v11, 4  ;;  %v1497_v46 = vld [vmem:[#allocation2 + $0x20] sm:$0xf] }
 0x13c   : > { %v5413_v34 = vsel %vm5286_vm10, %v4238_v38, %v1331_v37  ;;  %v1349_v42 = vpack.c.b16 %v1344_v31, %v1343_v15  ;;  %v1746_v63 = vunpack.c.l.b16 %v5400_v27  ;;  %v4239_v48 = vrot.slane %v1285_v4, 9  ;;  %v1691_v38 = vld [vmem:[#allocation2 + $0x20] sm:$0xe]  ;;  %v5432_v27 = vld [vmem:[#allocation2 + $0x34] sm:$0x1] }
 0x13d   : > { %v1335_v44 = vrot.slane %v5360_v8, 5  ;;  %v1621_v1 = vunpack.c.l.b16 %v1520_v23  ;;  %v1622_v22 = vunpack.c.l.b16 %v1534_v19  ;;  %v1955_v50 = vrot.slane %v1953_v3, 5 }
 0x13e   : > { %4324 = vmatmul.msk.bf16.vlgmr.msra.gmra.mxu1 %vm468_vm0, %v2037_v62  ;;  %v1965_v5 = vrot.slane %v1964_v41, 4  ;;  %v1747_v51 = vunpack.c.l.b16 %v1719_v59  ;;  %v1969_v60 = vrot.slane %v1967_v17, 5  ;;  %v1345_v0 = vunpack.c.l.b16 %v5413_v34 }
 0x13f   : > { %v1536_v52 = vshrl.u32 %v1495_v24, 16  ;;  %v1956_v53 = vsel %vm5225_vm2, %v1951_v10, %v1955_v50  ;;  %v4282_v15 = vrot.slane %v1690_v25, 9  ;;  %v1539_v31 = vshll.u32 %v1495_v24, 16  ;;  %v5438_v25 = vld [vmem:[#allocation2 + $0x3c] sm:$0x1] }
 0x140   : > { %v1550_v7 = vshrl.u32 %v1497_v46, 16  ;;  %v1336_v8 = vsel %vm5286_vm10, %v4239_v48, %v1335_v44  ;;  %v1722_v2 = vrot.slane %v1496_v29, 5  ;;  %v1553_v33 = vshll.u32 %v1497_v46, 16 }
 0x141   : > { %v1538_v16 = vrot.slane %v1536_v52, 4  ;;  %v1629_v18 = vpack.c.b16 %v1622_v22, %v1621_v1  ;;  %v1970_v9 = vsel %vm5225_vm2, %v1965_v5, %v1969_v60  ;;  %v1541_v56 = vrot.slane %v1539_v31, 5  ;;  %v1499_v1 = vld [vmem:[#allocation2 + $0x28] sm:$0xf] }
 0x142   : > { %4246 = vmatmul.msk.bf16.gmra.mxu0 %vm468_vm0, %v1349_v42  ;;  %v1552_v20 = vrot.slane %v1550_v7, 4  ;;  %v2031_v21 = vunpack.c.l.b16 %v1956_v53  ;;  %v1555_v49 = vrot.slane %v1553_v33, 5  ;;  %v1972_v61 = vshrl.u32 %v1907_v14, 16  ;;  %v1500_v53 = vld [vmem:[#allocation2 + $0x2c] sm:$0x1] }
 0x143   : > { %v1975_v35 = vshll.u32 %v1907_v14, 16  ;;  %v1346_v30 = vunpack.c.l.b16 %v1336_v8  ;;  %v1542_v58 = vor.u32 %v1541_v56, %v1538_v16  ;;  %v1545_v39 = vshll.u32 %v1496_v29, 16  ;;  %v1692_v29 = vld [vmem:[#allocation2 + $0x28] sm:$0xe]  ;;  %v1502_v8 = vld [vmem:[#allocation2 + $0x34] sm:$0x1] }
 0x144   : > { %v1986_v11 = vshrl.u32 %v1909_v6, 16  ;;  %v1556_v37 = vor.u32 %v1555_v49, %v1552_v20  ;;  %v1559_v62 = vshll.u32 %v1498_v57, 16  ;;  %v1974_v3 = vrot.slane %v1972_v61, 4  ;;  %v1693_v33 = vld [vmem:[#allocation2 + $0x30] sm:$0xe] }
 0x145   : > { %v1977_v41 = vrot.slane %v1975_v35, 5  ;;  %v2032_v4 = vunpack.c.l.b16 %v1970_v9  ;;  %v5436_v23 = vsel %vm5286_vm10, %v4282_v15, %v1722_v2  ;;  %v1989_v17 = vshll.u32 %v1909_v6, 16  ;;  %v1501_v15 = vld [vmem:[#allocation2 + $0x30] sm:$0xf]  ;;  %v815_v49 = vld [vmem:[#allocation2 + $0x48] sm:$0x1] }
 0x146   : > { %4276 = vmatmul.msk.bf16.vlgmr.msrb.gmra.mxu2 %vm468_vm0, %v1629_v18  ;;  %v1988_v19 = vrot.slane %v1986_v11, 4  ;;  %v1754_v59 = vpack.c.b16 %v1747_v51, %v1746_v63  ;;  %v1543_v10 = vrot.slane %v1542_v58, 4  ;;  %v1557_v34 = vrot.slane %v1556_v37, 4  ;;  %v4564_v9 = vld [vmem:[%s6427_s5 + $0x30] sm:$0xff]  ;;  %v844_v58 = vld [vmem:[#allocation2 + $0x44] sm:$0x1] }
 0x147   : > { %v1978_v24 = vor.u32 %v1977_v41, %v1974_v3  ;;  %v4283_v42 = vrot.slane %v1691_v38, 9  ;;  %v1726_v48 = vrot.slane %v1498_v57, 5  ;;  %v1981_v44 = vshll.u32 %v5432_v27, 16  ;;  %1869 = vmatpush.bf16.msra.mxu0 %v4564_v9 }
 0x148   : > { %v1991_v46 = vrot.slane %v1989_v17, 5  ;;  %v1748_v22 = vunpack.c.l.b16 %v5436_v23  ;;  %v1547_v50 = vrot.slane %v1545_v39, 5  ;;  %v1561_v5 = vrot.slane %v1559_v62, 5  ;;  %v847_v39 = vld [vmem:[#allocation2 + $0x4c] sm:$0x1] }
 0x149   : > { %v2038_v60 = vpack.c.b16 %v2032_v4, %v2031_v21  ;;  %v1350_v63 = vpack.c.b16 %v1346_v30, %v1345_v0  ;;  %v1995_v52 = vshll.u32 %v5438_v25, 16  ;;  %v1979_v14 = vrot.slane %v1978_v24, 4 }
 0x14a   : > { %v1992_v51 = vor.u32 %v1991_v46, %v1988_v19  ;;  %v1548_v31 = vsel %vm5225_vm2, %v1543_v10, %v1547_v50  ;;  %v1562_v7 = vsel %vm5225_vm2, %v1557_v34, %v1561_v5  ;;  %v1564_v2 = vshrl.u32 %v1499_v1, 16  ;;  %v5465_v46 = vld [vmem:[#allocation2 + $0x8] sm:$0xf] }
 0x14b   : > { %4292 = vmatmul.msk.bf16.vlgmr.msrb.gmra.mxu3 %vm468_vm0, %v1754_v59  ;;  %v1727_v16 = vsel %vm5286_vm10, %v4283_v42, %v1726_v48  ;;  %v1983_v0 = vrot.slane %v1981_v44, 5  ;;  %v4284_v6 = vrot.slane %v1692_v29, 9  ;;  %v1567_v18 = vshll.u32 %v1499_v1, 16  ;;  %v1911_v59 = vld [vmem:[#allocation2 + $0x40] sm:$0xf] }
 0x14c   : > { %v1993_v57 = vrot.slane %v1992_v51, 4  ;;  %v1730_v56 = vrot.slane %v1500_v53, 5  ;;  %v1566_v20 = vrot.slane %v1564_v2, 4  ;;  %v1578_v21 = vshrl.u32 %v1501_v15, 16  ;;  %v5467_v1 = vld [vmem:[#allocation2 + $0xc] sm:$0xf0] }
 0x14d   : > { %v1623_v61 = vunpack.c.l.b16 %v1548_v31  ;;  %v1624_v35 = vunpack.c.l.b16 %v1562_v7  ;;  %v1569_v30 = vrot.slane %v1567_v18, 5  ;;  %v1581_v38 = vshll.u32 %v1501_v15, 16  ;;  %v1503_v7 = vld [vmem:[#allocation2 + $0x38] sm:$0xf] }
 0x14e   : > { %4325 = vmatmul.msk.bf16.gmra.mxu1 %vm468_vm0, %v2038_v60  ;;  %v1984_v11 = vsel %vm5225_vm2, %v1979_v14, %v1983_v0  ;;  %v1997_v37 = vrot.slane %v1995_v52, 5  ;;  %v4285_v62 = vrot.slane %v1693_v33, 9  ;;  %v1580_v3 = vrot.slane %v1578_v21, 4  ;;  %v1505_v0 = vld [vmem:[#allocation2 + $0x40] sm:$0xf] }
 0x14f   : > { %v1734_v41 = vrot.slane %v1502_v8, 5  ;;  %v1570_v4 = vor.u32 %v1569_v30, %v1566_v20  ;;  %v1583_v19 = vrot.slane %v1581_v38, 5  ;;  %v816_v17 = vsel %vm5065_vm1, 0, %v815_v49 }
 0x150   : > { %v1998_v10 = vsel %vm5225_vm2, %v1993_v57, %v1997_v37  ;;  %v1573_v34 = vshll.u32 %v1500_v53, 16  ;;  %817 = vst [vmem:[#allocation2 + $0x48] sm:$0x1] %v816_v17  ;;  %v845_v24 = vsel %vm5080_vm4, 0, %v844_v58  ;;  %v848_v42 = vsel %vm5080_vm4, 0, %v847_v39 }
 0x151   : > { %v1749_v48 = vunpack.c.l.b16 %v1727_v16  ;;  %v1630_v44 = vpack.c.b16 %v1624_v35, %v1623_v61  ;;  %v5471_v50 = vsel %vm5286_vm10, %v4284_v6, %v1730_v56  ;;  %v1584_v5 = vor.u32 %v1583_v19, %v1580_v3  ;;  %846 = vst [vmem:[#allocation2 + $0x44] sm:$0x1] %v845_v24  ;;  %v2096_v57 = vld [vmem:[#allocation2 + $0x10] sm:$0xe] }
 0x152   : > { %4247 = vmatmul.msk.bf16.gmra.mxu0 %vm468_vm0, %v1350_v63  ;;  %v1571_v29 = vrot.slane %v1570_v4, 4  ;;  %v1587_v60 = vshll.u32 %v1502_v8, 16  ;;  %849 = vst [vmem:[#allocation2 + $0x4c] sm:$0x1] %v848_v42  ;;  %v2000_v63 = vshrl.u32 %v1911_v59, 16  ;;  %v2003_v51 = vshll.u32 %v1911_v59, 16 }
 0x153   : > { %v2033_v52 = vunpack.c.l.b16 %v1984_v11  ;;  %v2034_v54 = vunpack.c.l.b16 %v1998_v10  ;;  %v5476_v53 = vsel %vm5286_vm10, %v4285_v62, %v1734_v41  ;;  %v1575_v15 = vrot.slane %v1573_v34, 5 }
 0x154   : > { %v1585_v31 = vrot.slane %v1584_v5, 4  ;;  %v921_v14 = vrot.slane %v5309_v28, 4  ;;  %v1755_v2 = vpack.c.b16 %v1749_v48, %v1748_v22  ;;  %v4251_v8 = vor.u32 %v5467_v1, %v5465_v46  ;;  %v2097_v22 = vld [vmem:[#allocation2 + $0x18] sm:$0xe]  ;;  %v2099_v46 = vld [vmem:[#allocation2 + $0x28] sm:$0xe] }
 0x155   : > { %v1750_v16 = vunpack.c.l.b16 %v5471_v50  ;;  %v1576_v33 = vsel %vm5225_vm2, %v1571_v29, %v1575_v15  ;;  %v1589_v6 = vrot.slane %v1587_v60, 5  ;;  %v2002_v18 = vrot.slane %v2000_v63, 4  ;;  %v2100_v63 = vld [vmem:[#allocation2 + $0x30] sm:$0xe] }
 0x156   : > { %4277 = vmatmul.msk.bf16.gmra.mxu2 %vm468_vm0, %v1630_v44  ;;  %v2005_v9 = vrot.slane %v2003_v51, 5  ;;  %v2039_v56 = vpack.c.b16 %v2034_v54, %v2033_v52  ;;  %v1751_v20 = vunpack.c.l.b16 %v5476_v53  ;;  %v1592_v21 = vshrl.u32 %v1503_v7, 16 }
 0x157   : > { %v1913_v28 = vld [vmem:[#allocation2 + $0x48] sm:$0xf]  ;;  %v1595_v23 = vshll.u32 %v1503_v7, 16  ;;  %v1590_v49 = vsel %vm5225_vm2, %v1585_v31, %v1589_v6  ;;  %v1606_v38 = vshrl.u32 %v1505_v0, 16  ;;  %v1625_v58 = vunpack.c.l.b16 %v1576_v33 }
 0x158   : > { %v986_v61 = vld [vmem:[#allocation2 + $0x44] sm:$0x1]  ;;  %v2014_v35 = vshrl.u32 %v1913_v28, 16  ;;  %v2017_v30 = vshll.u32 %v1913_v28, 16  ;;  %v1609_v37 = vshll.u32 %v1505_v0, 16  ;;  %v4328_v62 = vrot.slane %v2096_v57, 9 }
 0x159   : > { %v987_v39 = vsel %vm5065_vm1, %v921_v14, %v986_v61  ;;  %v5492_v11 = vld [vmem:[#allocation2 + $0x4c] sm:$0x1]  ;;  %v2006_v3 = vor.u32 %v2005_v9, %v2002_v18  ;;  %v1626_v17 = vunpack.c.l.b16 %v1590_v49  ;;  %v2122_v59 = vrot.slane %v5349_v26, 5  ;;  %v2102_v18 = vld [vmem:[#allocation2 + $0x40] sm:$0xe] }
 0x15a   : > { %988 = vst [vmem:[#allocation2 + $0x44] sm:$0x1] %v987_v39  ;;  %v2016_v41 = vrot.slane %v2014_v35, 4  ;;  %v2019_v4 = vrot.slane %v2017_v30, 5  ;;  %v2023_v19 = vshll.u32 %v5492_v11, 16  ;;  %v4329_v10 = vrot.slane %v2097_v22, 9 }
 0x15b   : > { %4293 = vmatmul.msk.bf16.gmra.mxu3 %vm468_vm0, %v1755_v2  ;;  %v2126_v34 = vrot.slane %v5353_v47, 5  ;;  %v1594_v42 = vrot.slane %v1592_v21, 4  ;;  %v1597_v48 = vrot.slane %v1595_v23, 5  ;;  %v1608_v44 = vrot.slane %v1606_v38, 4  ;;  %v2101_v47 = vld [vmem:[#allocation2 + $0x38] sm:$0xe] }
 0x15c   : > { %v2020_v24 = vor.u32 %v2019_v4, %v2016_v41  ;;  %v2025_v1 = vrot.slane %v2023_v19, 5  ;;  %v1611_v5 = vrot.slane %v1609_v37, 5  ;;  %v2123_v29 = vsel %vm5286_vm10, %v4328_v62, %v2122_v59  ;;  %v2103_v30 = vld [vmem:[#allocation2 + $0x48] sm:$0xe] }
 0x15d   : > { %v2127_v60 = vsel %vm5286_vm10, %v4329_v10, %v2126_v34  ;;  %v2154_v26 = vunpack.c.l.b16 %v2123_v29  ;;  %v4330_v54 = vrot.slane %v2098_v32, 9  ;;  %v2007_v15 = vrot.slane %v2006_v3, 4  ;;  %v1694_v32 = vld [vmem:[#allocation2 + $0x38] sm:$0xe] }
 0x15e   : > { %4326 = vmatmul.msk.bf16.gmra.mxu1 %vm468_vm0, %v2039_v56  ;;  %v2021_v51 = vrot.slane %v2020_v24, 4  ;;  %v2155_v52 = vunpack.c.l.b16 %v2127_v60  ;;  %v2130_v31 = vrot.slane %v5392_v40, 5  ;;  %v4331_v7 = vrot.slane %v2099_v46, 9  ;;  %v1504_v56 = vld [vmem:[#allocation2 + $0x3c] sm:$0x1] }
 0x15f   : > { %v2134_v14 = vrot.slane %v5394_v36, 5  ;;  %v1631_v2 = vpack.c.b16 %v1626_v17, %v1625_v58  ;;  %v4332_v33 = vrot.slane %v2100_v63, 9  ;;  %v2138_v6 = vrot.slane %v5432_v27, 5  ;;  %v1695_v24 = vld [vmem:[#allocation2 + $0x40] sm:$0xe] }
 0x160   : > { %v5505_v0 = vpack.c.b16 %v2155_v52, %v2154_v26  ;;  %v2026_v57 = vsel %vm5225_vm2, %v2021_v51, %v2025_v1  ;;  %v2131_v40 = vsel %vm5286_vm10, %v4330_v54, %v2130_v31  ;;  %v4333_v28 = vrot.slane %v2101_v47, 9  ;;  %v4298_v26 = vld [vmem:[#allocation2 + $0x10] sm:$0xf]  ;;  %v4560_v52 = vld [vmem:[#allocation2 + $0x14] sm:$0xf0] }
 0x161   : > { %v1912_v9 = vld [vmem:[#allocation2 + $0x44] sm:$0x1]  ;;  %v2135_v36 = vsel %vm5286_vm10, %v4331_v7, %v2134_v14  ;;  %v1598_v23 = vor.u32 %v1597_v48, %v1594_v42  ;;  %v1612_v22 = vor.u32 %v1611_v5, %v1608_v44  ;;  %v2156_v49 = vunpack.c.l.b16 %v2131_v40  ;;  %v4561_v40 = vld [vmem:[#allocation2 + $0x24] sm:$0xf0] }
 0x162   : > { %4268 = vmatmul.msk.bf16.vlgmr.msrb.gmra.mxu0 %vm468_vm0, %v4251_v8  ;;  %v2009_v8 = vshll.u32 %v1912_v9, 16  ;;  %v1506_v21 = vld [vmem:[#allocation2 + $0x44] sm:$0x1]  ;;  %v2157_v61 = vunpack.c.l.b16 %v2135_v36  ;;  %v2139_v27 = vsel %vm5286_vm10, %v4332_v33, %v2138_v6  ;;  %v2142_v35 = vrot.slane %v5438_v25, 5 }
 0x163   : > { %v4334_v38 = vrot.slane %v2102_v18, 9  ;;  %v2036_v39 = vunpack.c.l.b16 %v2026_v57  ;;  %v1601_v37 = vshll.u32 %v1504_v56, 16  ;;  %v2158_v62 = vunpack.c.l.b16 %v2139_v27 }
 0x164   : > { %v2011_v58 = vrot.slane %v2009_v8, 5  ;;  %v1615_v3 = vshll.u32 %v1506_v21, 16  ;;  %v2163_v41 = vpack.c.b16 %v2157_v61, %v2156_v49  ;;  %v2143_v4 = vsel %vm5286_vm10, %v4333_v28, %v2142_v35  ;;  %v4611_v28 = vld [vmem:[%s449_s29] ss:$0 sm:$0xff] }
 0x165   : > { %v2146_v19 = vrot.slane %v1912_v9, 5  ;;  %v1756_v17 = vpack.c.b16 %v1751_v20, %v1750_v16  ;;  %v2159_v59 = vunpack.c.l.b16 %v2143_v4  ;;  %v4335_v10 = vrot.slane %v2103_v30, 9 }
 0x166   : > { %4278 = vmatmul.msk.bf16.gmra.mxu2 %vm468_vm0, %v1631_v2  ;;  %v2012_v25 = vsel %vm5225_vm2, %v2007_v15, %v2011_v58  ;;  %v1599_v42 = vrot.slane %v1598_v23, 4  ;;  %v1613_v48 = vrot.slane %v1612_v22, 4  ;;  %v2150_v50 = vrot.slane %v5492_v11, 5  ;;  %v4306_v23 = vld [vmem:[#allocation2 + $0x30] sm:$0xf] }
 0x167   : > { %v2035_v34 = vunpack.c.l.b16 %v2012_v25  ;;  %v2147_v44 = vsel %vm5286_vm10, %v4334_v38, %v2146_v19  ;;  %v2164_v46 = vpack.c.b16 %v2159_v59, %v2158_v62  ;;  %v1603_v16 = vrot.slane %v1601_v37, 5  ;;  %v4562_v22 = vld [vmem:[#allocation2 + $0x34] sm:$0xf0]  ;;  %v4310_v37 = vld [vmem:[#allocation2 + $0x40] sm:$0xf] }
 0x168   : > { %v1617_v20 = vrot.slane %v1615_v3, 5  ;;  %v2160_v1 = vunpack.c.l.b16 %v2147_v44  ;;  %v4286_v5 = vrot.slane %v1694_v32, 9  ;;  %v1738_v29 = vrot.slane %v1504_v56, 5  ;;  %v4302_v56 = vld [vmem:[#allocation2 + $0x20] sm:$0xf] }
 0x169   : > { %v2040_v53 = vpack.c.b16 %v2036_v39, %v2035_v34  ;;  %v4287_v60 = vrot.slane %v1695_v24, 9  ;;  %v2151_v63 = vsel %vm5286_vm10, %v4335_v10, %v2150_v50  ;;  %v1742_v51 = vrot.slane %v1506_v21, 5  ;;  %v4563_v62 = vld [vmem:[#allocation2 + $0x44] sm:$0xf0] }
 0x16a   : > { %v1604_v54 = vsel %vm5225_vm2, %v1599_v42, %v1603_v16  ;;  %v1618_v11 = vsel %vm5225_vm2, %v1613_v48, %v1617_v20  ;;  %v2161_v47 = vunpack.c.l.b16 %v2151_v63  ;;  %v4299_v31 = vor.u32 %v4560_v52, %v4298_v26 }
 0x16b   : > { %4294 = vmatmul.msk.bf16.gmra.mxu3 %vm468_vm0, %v1756_v17  ;;  %v1627_v7 = vunpack.c.l.b16 %v1604_v54  ;;  %v1628_v14 = vunpack.c.l.b16 %v1618_v11  ;;  %v1739_v2 = vsel %vm5286_vm10, %v4286_v5, %v1738_v29  ;;  %v1743_v33 = vsel %vm5286_vm10, %v4287_v60, %v1742_v51 }
 0x16c   : > { %v2165_v15 = vpack.c.b16 %v2161_v47, %v2160_v1  ;;  %v1752_v6 = vunpack.c.l.b16 %v1739_v2  ;;  %v1753_v18 = vunpack.c.l.b16 %v1743_v33  ;;  %v4303_v36 = vor.u32 %v4561_v40, %v4302_v56 }
 0x16d   : > { %v1632_v9 = vpack.c.b16 %v1628_v14, %v1627_v7  ;;  %v4307_v61 = vor.u32 %v4562_v22, %v4306_v23  ;;  %v4311_v4 = vor.u32 %v4563_v62, %v4310_v37  ;;  %vm2227_vm1 = vcmask 261120  }
 0x16e   : > { %4327 = vmatmul.msk.bf16.gmra.mxu1 %vm468_vm0, %v2040_v53  ;;  %v1757_v57 = vpack.c.b16 %v1753_v18, %v1752_v6 }
 0x172   : > { %4316 = vmatmul.msk.bf16.vlgmr.msra.gmra.mxu0 %vm468_vm0, %v4299_v31 }
 0x176   : > { %4279 = vmatmul.msk.bf16.gmra.mxu2 %vm468_vm0, %v1632_v9 }
 0x17b   : > { %4295 = vmatmul.msk.bf16.gmra.mxu3 %vm468_vm0, %v1757_v57 }
 0x182   : > { %4317 = vmatmul.msk.bf16.gmra.mxu0 %vm468_vm0, %v4303_v36 }
 0x186   : > { %4340 = vmatmul.msk.bf16.vlgmr.msra.gmra.mxu2 %vm468_vm0, %v5505_v0 }
 0x187   : > { %v1468_v1 = vpop.f32.mrf.mxu1 }
 0x189   : > { %v1047_v8 = vpop.f32.mrf.mxu2 }
 0x18a   : > { %v5552_v21 = vadd.f32 %v4611_v28, %v1047_v8 }
 0x18f   : > { %v1250_v49 = vpop.f32.mrf.mxu0  ;;  %v5565_v52 = vpop.f32.mrf.mxu1 }
 0x190   : > { %v1270_v22 = vadd.f32 %v1250_v49, %v5552_v21 }
 0x191   : > { %v1049_v27 = vpop.f32.mrf.mxu2 }
 0x192   : > { %4318 = vmatmul.msk.bf16.gmra.mxu0 %vm468_vm0, %v4307_v61  ;;  %v1071_v35 = vadd.f32 %v4611_v28, %v1049_v27 }
 0x196   : > { %4341 = vmatmul.msk.bf16.gmra.mxu2 %vm468_vm0, %v2163_v41 }
 0x197   : > { %v1252_v30 = vpop.f32.mrf.mxu0 }
 0x198   : > { %v1271_v0 = vadd.f32 %v1252_v30, %v1071_v35 }
 0x199   : > { %v1052_v38 = vpop.f32.mrf.mxu2 }
 0x19a   : > { %v1072_v58 = vadd.f32 %v4611_v28, %v1052_v38 }
 0x19b   : > { %v1473_v14 = vpop.f32.mrf.mxu1 }
 0x19e   : > { %v1255_v39 = vpop.f32.mrf.mxu3 }
 0x19f   : > { %v1378_v3 = vpop.f32.mrf.mxu0  ;;  %v1272_v16 = vadd.f32 %v1255_v39, %v1072_v58 }
 0x1a0   : > { %v1398_v61 = vadd.f32 %v1378_v3, %v1270_v22 }
 0x1a1   : > { %v1054_v19 = vpop.f32.mrf.mxu2 }
 0x1a2   : > { %v1073_v17 = vadd.f32 %v4611_v28, %v1054_v19  ;;  %4319 = vmatmul.msk.bf16.gmra.mxu0 %vm468_vm0, %v4311_v4 }
 0x1a3   : > { %v1475_v23 = vpop.f32.mrf.mxu1 }
 0x1a6   : > { %v1257_v25 = vpop.f32.mrf.mxu3  ;;  %4342 = vmatmul.msk.bf16.gmra.mxu2 %vm468_vm0, %v2164_v46 }
 0x1a7   : > { %v1273_v59 = vadd.f32 %v1257_v25, %v1073_v17  ;;  %v1380_v10 = vpop.f32.mrf.mxu0  ;;  %v2226_v17 = vld [vmem:[%s6430_s8 + $0x18] sm:$0xff] }
 0x1a8   : > { %v5558_v34 = vadd.f32 %v1380_v10, %v1271_v0  ;;  %2293 = vmatpush.msra.mxu3 %v2226_v17  ;;  %2316 = vmatpush.msrb.mxu0 %v2226_v17 }
 0x1a9   : > { %v1057_v41 = vpop.f32.mrf.mxu2 }
 0x1aa   : > { %v1074_v32 = vadd.f32 %v4611_v28, %v1057_v41 }
 0x1ab   : > { %v1478_v38 = vpop.f32.mrf.mxu1 }
 0x1ae   : > { %v1260_v24 = vpop.f32.mrf.mxu3 }
 0x1af   : > { %v1383_v42 = vpop.f32.mrf.mxu0  ;;  %v1274_v54 = vadd.f32 %v1260_v24, %v1074_v32  ;;  %v2225_v24 = vld [vmem:[%s6430_s8 + $0x10] sm:$0xff] }
 0x1b0   : > { %v1400_v46 = vadd.f32 %v1383_v42, %v1272_v16  ;;  %2294 = vmatpush.msra.mxu3 %v2225_v24  ;;  %2317 = vmatpush.msrb.mxu0 %v2225_v24 }
 0x1b1   : > { %v1059_v48 = vpop.f32.mrf.mxu2 }
 0x1b2   : > { %v1075_v44 = vadd.f32 %v4611_v28, %v1059_v48  ;;  %v1485_v63 = vadd.f32 %v1468_v1, %v1400_v46 }
 0x1b6   : > { %v1262_v50 = vpop.f32.mrf.mxu3  ;;  %4343 = vmatmul.msk.bf16.gmra.mxu2 %vm468_vm0, %v2165_v15 }
 0x1b7   : > { %v1275_v53 = vadd.f32 %v1262_v50, %v1075_v44  ;;  %v1385_v20 = vpop.f32.mrf.mxu0 }
 0x1b8   : > { %v5561_v5 = vadd.f32 %v1385_v20, %v1273_v59  ;;  %v2224_v20 = vld [vmem:[%s6430_s8 + $0x8] sm:$0xff] }
 0x1b9   : > { %v1062_v29 = vpop.f32.mrf.mxu2  ;;  %2295 = vmatpush.msra.mxu3 %v2224_v20  ;;  %2318 = vmatpush.msrb.mxu0 %v2224_v20 }
 0x1ba   : > { %v5563_v60 = vadd.f32 %v4611_v28, %v1062_v29 }
 0x1be   : > { %v1265_v7 = vpop.f32.mrf.mxu3 }
 0x1bf   : > { %v1388_v51 = vpop.f32.mrf.mxu0 }
 0x1c0   : > { %v1402_v15 = vadd.f32 %v1388_v51, %v1274_v54 }
 0x1c1   : > { %v1064_v26 = vpop.f32.mrf.mxu2 }
 0x1c2   : > { %v1487_v2 = vadd.f32 %v1473_v14, %v1402_v15  ;;  %v1077_v18 = vadd.f32 %v4611_v28, %v1064_v26  ;;  %v5572_v28 = vpop.f32.mrf.mxu1  ;;  %v1276_v14 = vadd.f32 %v1265_v7, %v5563_v60 }
 0x1c6   : > { %v1267_v9 = vpop.f32.mrf.mxu3 }
 0x1c7   : > { %v1390_v11 = vpop.f32.mrf.mxu0  ;;  %v1277_v57 = vadd.f32 %v1267_v9, %v1077_v18 }
 0x1c8   : > { %v5567_v47 = vadd.f32 %v1390_v11, %v1275_v53 }
 0x1c9   : > { %v1660_v31 = vpop.f32.mrf.mxu2 }
 0x1ca   : > { %v2068_v21 = vpop.f32.mrf.mxu1  ;;  %v1488_v22 = vadd.f32 %v1475_v23, %v5567_v47  ;;  %v2223_v47 = vld [vmem:[%s6430_s8] sm:$0xff] }
 0x1cb   : > { %2296 = vmatpush.msra.mxu3 %v2223_v47  ;;  %2319 = vmatpush.msrb.mxu0 %v2223_v47 }
 0x1ce   : > { %v1785_v4 = vpop.f32.mrf.mxu3 }
 0x1cf   : > { %v1393_v33 = vpop.f32.mrf.mxu0 }
 0x1d0   : > { %v1404_v18 = vadd.f32 %v1393_v33, %v1276_v14 }
 0x1d1   : > { %v1662_v6 = vpop.f32.mrf.mxu2 }
 0x1d2   : > { %v2070_v10 = vpop.f32.mrf.mxu1 }
 0x1d6   : > { %v1787_v3 = vpop.f32.mrf.mxu3 }
 0x1d7   : > { %v1395_v56 = vpop.f32.mrf.mxu0 }
 0x1d8   : > { %v5569_v40 = vadd.f32 %v1395_v56, %v1277_v57 }
 0x1d9   : > { %v1665_v36 = vpop.f32.mrf.mxu2 }
 0x1da   : > { %v1682_v8 = vadd.f32 %v1665_v36, %v1485_v63  ;;  %v2073_v48 = vpop.f32.mrf.mxu1 }
 0x1de   : > { %v1790_v41 = vpop.f32.mrf.mxu3 }
 0x1df   : > { %v1463_v27 = vpop.f32.mrf.mxu0 }
 0x1e0   : > { %v1483_v35 = vadd.f32 %v1463_v27, %v1398_v61  ;;  %v1807_v61 = vadd.f32 %v1790_v41, %v1682_v8 }
 0x1e1   : > { %v1667_v30 = vpop.f32.mrf.mxu2 }
 0x1e2   : > { %v1680_v0 = vadd.f32 %v1660_v31, %v1483_v35  ;;  %v2075_v16 = vpop.f32.mrf.mxu1  ;;  %v1486_v31 = vadd.f32 %v5565_v52, %v5561_v5 }
 0x1e4   : > { %v1683_v9 = vadd.f32 %v1667_v30, %v1486_v31  ;;  %v1805_v57 = vadd.f32 %v1785_v4, %v1680_v0 }
 0x1e6   : > { %v1792_v44 = vpop.f32.mrf.mxu3 }
 0x1e7   : > { %v1465_v58 = vpop.f32.mrf.mxu0 }
 0x1e8   : > { %v1484_v63 = vadd.f32 %v1465_v58, %v5558_v34 }
 0x1e9   : > { %v1670_v39 = vpop.f32.mrf.mxu2 }
 0x1ea   : > { %v1684_v37 = vadd.f32 %v1670_v39, %v1487_v2  ;;  %v2078_v51 = vpop.f32.mrf.mxu1  ;;  %v1681_v54 = vadd.f32 %v1662_v6, %v1484_v63  ;;  %v1489_v6 = vadd.f32 %v1478_v38, %v1404_v18  ;;  %v1808_v39 = vadd.f32 %v1792_v44, %v1683_v9 }
 0x1ec   : > { %v1806_v2 = vadd.f32 %v1787_v3, %v1681_v54 }
 0x1ee   : > { %v1795_v46 = vpop.f32.mrf.mxu3 }
 0x1ef   : > { %v1871_v19 = vpop.f32.mrf.mxu0  ;;  %v1809_v60 = vadd.f32 %v1795_v46, %v1684_v37 }
 0x1f0   : > { %v1891_v27 = vadd.f32 %v1871_v19, %v1805_v57 }
 0x1f1   : > { %v1672_v62 = vpop.f32.mrf.mxu2 }
 0x1f2   : > { %v2080_v34 = vpop.f32.mrf.mxu1  ;;  %v1685_v35 = vadd.f32 %v1672_v62, %v1488_v22  ;;  %v2088_v7 = vadd.f32 %v2068_v21, %v1891_v27 }
 0x1f6   : > { %v1797_v11 = vpop.f32.mrf.mxu3 }
 0x1f7   : > { %v1873_v25 = vpop.f32.mrf.mxu0  ;;  %v1810_v23 = vadd.f32 %v1797_v11, %v1685_v35 }
 0x1f8   : > { %v1892_v56 = vadd.f32 %v1873_v25, %v1806_v2 }
 0x1f9   : > { %v1675_v49 = vpop.f32.mrf.mxu2 }
 0x1fa   : > { %v2089_v17 = vadd.f32 %v2070_v10, %v1892_v56  ;;  %v1686_v5 = vadd.f32 %v1675_v49, %v1489_v6  ;;  %v1490_v49 = vadd.f32 %v5572_v28, %v5569_v40 }
 0x1fe   : > { %v1800_v24 = vpop.f32.mrf.mxu3 }
 0x1ff   : > { %v1876_v32 = vpop.f32.mrf.mxu0  ;;  %v1811_v37 = vadd.f32 %v1800_v24, %v1686_v5 }
 0x200   : > { %v1893_v58 = vadd.f32 %v1876_v32, %v1807_v61  ;;  %v2083_v32 = vpop.f32.mrf.mxu1 }
 0x201   : > { %v5577_v59 = vpop.f32.mrf.mxu2 }
 0x202   : > { %v2090_v0 = vadd.f32 %v2073_v48, %v1893_v58 }
 0x206   : > { %v1802_v20 = vpop.f32.mrf.mxu3 }
 0x207   : > { %v1878_v50 = vpop.f32.mrf.mxu0 }
 0x208   : > { %v1894_v52 = vadd.f32 %v1878_v50, %v1808_v39  ;;  %v2085_v58 = vpop.f32.mrf.mxu1 }
 0x209   : > { %v2193_v42 = vpop.f32.mrf.mxu2 }
 0x20a   : > { %v5595_v38 = vadd.f32 %v2193_v42, %v2088_v7  ;;  %v2091_v21 = vadd.f32 %v2075_v16, %v1894_v52  ;;  %v1687_v42 = vadd.f32 %v5577_v59, %v1490_v49 }
 0x20c   : > { %v2249_v48 = vmul.f32 %v5595_v38, %v5595_v38 }
 0x20e   : > { %v2257_v63 = vsel %vm2227_vm1, %v2249_v48, 0.0 }
 0x20f   : > { %v1881_v29 = vpop.f32.mrf.mxu0 }
 0x210   : > { %v1895_v8 = vadd.f32 %v1881_v29, %v1809_v60 }
 0x211   : > { %v2195_v53 = vpop.f32.mrf.mxu2 }
 0x212   : > { %v5590_v33 = vadd.f32 %v2195_v53, %v2089_v17  ;;  %v2092_v41 = vadd.f32 %v2078_v51, %v1895_v8  ;;  %v2228_v53 = vsel %vm2227_vm1, %v5595_v38, 0.0 }
 0x214   : > { %v2250_v3 = vmul.f32 %v5590_v33, %v5590_v33  ;;  %v2229_v44 = vsel %vm2227_vm1, %v5590_v33, 0.0 }
 0x215   : > { %v2230_v51 = vadd.f32 %v2229_v44, %v2228_v53 }
 0x216   : > { %v2258_v16 = vsel %vm2227_vm1, %v2250_v3, 0.0 }
 0x217   : > { %v1883_v15 = vpop.f32.mrf.mxu0  ;;  %v2259_v18 = vadd.f32 %v2258_v16, %v2257_v63 }
 0x218   : > { %v1896_v4 = vadd.f32 %v1883_v15, %v1810_v23 }
 0x219   : > { %v2198_v1 = vpop.f32.mrf.mxu2 }
 0x21a   : > { %v5597_v19 = vadd.f32 %v2198_v1, %v2090_v0  ;;  %v2093_v50 = vadd.f32 %v2080_v34, %v1896_v4 }
 0x21c   : > { %v2251_v40 = vmul.f32 %v5597_v19, %v5597_v19  ;;  %v2231_v59 = vsel %vm2227_vm1, %v5597_v19, 0.0 }
 0x21d   : > { %v2232_v9 = vadd.f32 %v2231_v59, %v2230_v51 }
 0x21e   : > { %v2260_v15 = vsel %vm2227_vm1, %v2251_v40, 0.0 }
 0x21f   : > { %v1886_v30 = vpop.f32.mrf.mxu0  ;;  %v2261_v61 = vadd.f32 %v2260_v15, %v2259_v18 }
 0x220   : > { %v1897_v25 = vadd.f32 %v1886_v30, %v1811_v37 }
 0x221   : > { %v2200_v26 = vpop.f32.mrf.mxu2 }
 0x222   : > { %v5603_v10 = vadd.f32 %v2200_v26, %v2091_v21  ;;  %v2094_v29 = vadd.f32 %v2083_v32, %v1897_v25  ;;  %v1812_v26 = vadd.f32 %v1802_v20, %v1687_v42 }
 0x224   : > { %v2252_v1 = vmul.f32 %v5603_v10, %v5603_v10  ;;  %v2233_v31 = vsel %vm2227_vm1, %v5603_v10, 0.0 }
 0x225   : > { %v2234_v34 = vadd.f32 %v2233_v31, %v2232_v9 }
 0x226   : > { %v2262_v57 = vsel %vm2227_vm1, %v2252_v1, 0.0 }
 0x227   : > { %v1888_v54 = vpop.f32.mrf.mxu0  ;;  %v2263_v39 = vadd.f32 %v2262_v57, %v2261_v61 }
 0x228   : > { %v1898_v56 = vadd.f32 %v1888_v54, %v1812_v26 }
 0x229   : > { %v2203_v36 = vpop.f32.mrf.mxu2 }
 0x22a   : > { %v5612_v28 = vadd.f32 %v2203_v36, %v2092_v41  ;;  %v2095_v52 = vadd.f32 %v2085_v58, %v1898_v56 }
 0x22c   : > { %v2253_v14 = vmul.f32 %v5612_v28, %v5612_v28  ;;  %v2235_v36 = vsel %vm2227_vm1, %v5612_v28, 0.0 }
 0x22d   : > { %v2236_v17 = vadd.f32 %v2235_v36, %v2234_v34 }
 0x22e   : > { %v2264_v27 = vsel %vm2227_vm1, %v2253_v14, 0.0 }
 0x22f   : > { %v2265_v60 = vadd.f32 %v2264_v27, %v2263_v39 }
 0x231   : > { %v2205_v62 = vpop.f32.mrf.mxu2 }
 0x232   : > { %v5621_v46 = vadd.f32 %v2205_v62, %v2093_v50 }
 0x234   : > { %v2254_v22 = vmul.f32 %v5621_v46, %v5621_v46  ;;  %v2237_v35 = vsel %vm2227_vm1, %v5621_v46, 0.0 }
 0x235   : > { %v2238_v7 = vadd.f32 %v2237_v35, %v2236_v17  ;;  %v4612_v35 = vld [vmem:[%s6428_s6] ss:$0 sm:$0xff] }
 0x236   : > { %v2266_v24 = vsel %vm2227_vm1, %v2254_v22, 0.0 }
 0x237   : > { %v2267_v23 = vadd.f32 %v2266_v24, %v2265_v60 }
 0x239   : > { %v2208_v11 = vpop.f32.mrf.mxu2 }
 0x23a   : > { %v5629_v2 = vadd.f32 %v2208_v11, %v2094_v29 }
 0x23c   : > { %v2255_v6 = vmul.f32 %v5629_v2, %v5629_v2  ;;  %v2239_v5 = vsel %vm2227_vm1, %v5629_v2, 0.0 }
 0x23d   : > { %v2240_v0 = vadd.f32 %v2239_v5, %v2238_v7 }
 0x23e   : > { %v2268_v47 = vsel %vm2227_vm1, %v2255_v6, 0.0 }
 0x23f   : > { %v2269_v37 = vadd.f32 %v2268_v47, %v2267_v23 }
 0x241   : > { %v2210_v30 = vpop.f32.mrf.mxu2 }
 0x242   : > { %v5645_v8 = vadd.f32 %v2210_v30, %v2095_v52 }
 0x244   : > { %v2241_v62 = vsel %vm2227_vm1, %v5645_v8, 0.0  ;;  %v2256_v4 = vmul.f32 %v5645_v8, %v5645_v8 }
 0x245   : > { %v2242_v21 = vadd.f32 %v2241_v62, %v2240_v0 }
 0x246   : > { %v2270_v49 = vsel %vm2227_vm1, %v2256_v4, 0.0 }
 0x247   : > { %v2243_v3 = vrot.slane %v2242_v21, 4  ;;  %v2271_v25 = vadd.f32 %v2270_v49, %v2269_v37 }
 0x249   : > { %v2244_v41 = vadd.f32 %v2243_v3, %v2242_v21  ;;  %v2272_v32 = vrot.slane %v2271_v25, 4 }
 0x24b   : > { %v2245_v42 = vrot.slane %v2244_v41, 2  ;;  %v2273_v48 = vadd.f32 %v2272_v32, %v2271_v25 }
 0x24d   : > { %v2246_v44 = vadd.f32 %v2245_v42, %v2244_v41  ;;  %v2274_v40 = vrot.slane %v2273_v48, 2 }
 0x24f   : > { %v2247_v50 = vrot.slane %v2246_v44, 1  ;;  %v2275_v53 = vadd.f32 %v2274_v40, %v2273_v48 }
 0x251   : > { %v2248_v16 = vadd.f32 %v2247_v50, %v2246_v44  ;;  %v2276_v20 = vrot.slane %v2275_v53, 1 }
 0x253   : > { %4344 = vmatmul.msk.f32.vlgmr.msra.gmra.mxu3 %vm2227_vm1, %v2248_v16  ;;  %v2277_v59 = vadd.f32 %v2276_v20, %v2275_v53 }
 0x255   : > { %4345 = vmatmul.msk.f32.vlgmr.msrb.gmra.mxu0 %vm2227_vm1, %v2277_v59 }
 0x2d2   : > { %v2321_v63 = vpop.f32.mrf.mxu0 }
 0x2d6   : > { %v2298_v1 = vpop.f32.mrf.mxu3 }
 0x2d7   : > { %v2324_v29 = vmul.f32 %v2298_v1, %v2298_v1  ;;  %v2327_v18 = vperm.slane %v2298_v1, 0 }
 0x2d9   : > { %v2325_v51 = vsub.f32 %v2321_v63, %v2324_v29  ;;  %v2328_v56 = vsub.f32 %v5595_v38, %v2327_v18  ;;  %v2329_v22 = vsub.f32 %v5590_v33, %v2327_v18  ;;  %v2330_v61 = vsub.f32 %v5597_v19, %v2327_v18  ;;  %v4613_v33 = vld [vmem:[%s6429_s7] ss:$0 sm:$0xff] }
 0x2da   : > { %v2331_v34 = vsub.f32 %v5603_v10, %v2327_v18  ;;  %v2332_v6 = vsub.f32 %v5612_v28, %v2327_v18  ;;  %v2333_v58 = vsub.f32 %v5621_v46, %v2327_v18  ;;  %v2334_v41 = vsub.f32 %v5629_v2, %v2327_v18 }
 0x2db   : > { %v2326_v26 = vmax.f32 %v2325_v51, 0.0  ;;  %v2335_v53 = vsub.f32 %v5645_v8, %v2327_v18 }
 0x2dd   : > { %v2336_v54 = vadd.f32 1e-05, %v2326_v26 }
 0x2df   : > { %4650 = vrsqrt.f32 %v2336_v54  ;;  %vm2343_vm8 = vweird.f32 %v2336_v54 }
 0x2e5   : > { %v4651_v11 = vpop.eup %4650 }
 0x2e6   : > { %v2338_v15 = vmul.f32 %v4651_v11, %v2336_v54  ;;  %vm2344_vm4 = vweird.f32 %v4651_v11 }
 0x2e7   : > { %vm2345_vm11 = vmor %vm2343_vm8, %vm2344_vm4 }
 0x2e8   : > { %v2339_v31 = vmul.f32 %v4651_v11, %v2338_v15 }
 0x2ea   : > { %v2340_v14 = vmul.f32 0.5, %v2339_v31 }
 0x2ec   : > { %v2341_v9 = vsub.f32 1.5, %v2340_v14 }
 0x2ee   : > { %v2342_v57 = vmul.f32 %v4651_v11, %v2341_v9 }
 0x2f0   : > { %v2346_v36 = vsel %vm2345_vm11, %v4651_v11, %v2342_v57 }
 0x2f1   : > { %v2347_v27 = vperm.slane %v2346_v36, 0 }
 0x2f3   : > { %v2348_v39 = vmul.f32 %v2347_v27, %v2328_v56  ;;  %v2349_v17 = vmul.f32 %v2347_v27, %v2329_v22  ;;  %v2350_v24 = vmul.f32 %v2347_v27, %v2330_v61  ;;  %v2351_v38 = vmul.f32 %v2347_v27, %v2331_v34 }
 0x2f4   : > { %v2352_v19 = vmul.f32 %v2347_v27, %v2332_v6  ;;  %v2353_v5 = vmul.f32 %v2347_v27, %v2333_v58  ;;  %v2354_v32 = vmul.f32 %v2347_v27, %v2334_v41  ;;  %v2355_v2 = vmul.f32 %v2347_v27, %v2335_v53  ;;  %v4572_v58 = vld [vmem:[%s6431_s9 + $0x8] sm:$0xff] }
 0x2f5   : > { %v2359_v10 = vmul.f32 %v4612_v35, %v2348_v39  ;;  %v2360_v52 = vmul.f32 %v4612_v35, %v2349_v17  ;;  %v2361_v60 = vmul.f32 %v4612_v35, %v2350_v24  ;;  %v2362_v7 = vmul.f32 %v4612_v35, %v2351_v38  ;;  %v4582_v24 = vld [vmem:[%s6431_s9 + $0x38] sm:$0xff]  ;;  %2809 = vmatpush.bf16.msrb.mxu1 %v4572_v58 }
 0x2f6   : > { %v2363_v30 = vmul.f32 %v4612_v35, %v2352_v19  ;;  %v2364_v47 = vmul.f32 %v4612_v35, %v2353_v5  ;;  %v2365_v16 = vmul.f32 %v4612_v35, %v2354_v32  ;;  %v2366_v8 = vmul.f32 %v4612_v35, %v2355_v2  ;;  %v4571_v19 = vld [vmem:[%s6431_s9] sm:$0xff]  ;;  %v4576_v5 = vld [vmem:[%s6431_s9 + $0x28] sm:$0xff]  ;;  %3243 = vmatpush.bf16.msrb.mxu2 %v4582_v24 }
 0x2f7   : > { %v5666_v23 = vadd.f32 %v4613_v33, %v2359_v10  ;;  %v5668_v28 = vadd.f32 %v4613_v33, %v2360_v52  ;;  %v5670_v46 = vadd.f32 %v4613_v33, %v2361_v60  ;;  %v5672_v0 = vadd.f32 %v4613_v33, %v2362_v7  ;;  %v4581_v60 = vld [vmem:[%s6431_s9 + $0x30] sm:$0xff]  ;;  %3150 = vmatpush.bf16.msra.mxu0 %v4576_v5 }
 0x2f8   : > { %v5674_v62 = vadd.f32 %v4613_v33, %v2363_v30  ;;  %v5680_v3 = vadd.f32 %v4613_v33, %v2364_v47  ;;  %v5693_v51 = vadd.f32 %v4613_v33, %v2365_v16  ;;  %v5704_v9 = vadd.f32 %v4613_v33, %v2366_v8 }
 0x2f9   : > { %v4346_v4 = vmul.f32 -1.442695, %v5666_v23  ;;  %v4347_v37 = vmul.f32 -1.442695, %v5668_v28  ;;  %v4348_v21 = vmul.f32 -1.442695, %v5670_v46  ;;  %2810 = vmatpush.bf16.msrb.mxu1 %v4571_v19 }
 0x2fa   : > { %v4349_v49 = vmul.f32 -1.442695, %v5672_v0  ;;  %v4350_v25 = vmul.f32 -1.442695, %v5674_v62  ;;  %v4351_v42 = vmul.f32 -1.442695, %v5680_v3  ;;  %3244 = vmatpush.bf16.msrb.mxu2 %v4581_v60 }
 0x2fb   : > { %4652 = vpow2.f32 %v4346_v4  ;;  %v4352_v31 = vmul.f32 -1.442695, %v5693_v51  ;;  %v4353_v27 = vmul.f32 -1.442695, %v5704_v9  ;;  %v4574_v60 = vld [vmem:[%s6431_s9 + $0x18] sm:$0xff] }
 0x2fc   : > { %4654 = vpow2.f32 %v4347_v37  ;;  %3017 = vmatpush.bf16.msrb.mxu3 %v4574_v60 }
 0x2fd   : > { %4656 = vpow2.f32 %v4348_v21 }
 0x2fe   : > { %4658 = vpow2.f32 %v4349_v49 }
 0x2ff   : > { %4660 = vpow2.f32 %v4350_v25 }
 0x300   : > { %4662 = vpow2.f32 %v4351_v42 }
 0x301   : > { %v4653_v48 = vpop.eup %4652 }
 0x302   : > { %v4655_v44 = vpop.eup %4654  ;;  %v2402_v40 = vadd.f32 1.0, %v4653_v48 }
 0x303   : > { %v4657_v50 = vpop.eup %4656  ;;  %v5686_v20 = vadd.f32 1.0, %v4655_v44 }
 0x304   : > { %v4659_v59 = vpop.eup %4658  ;;  %v5688_v1 = vadd.f32 1.0, %v4657_v50  ;;  %4664 = vrcp.f32 %v2402_v40  ;;  %v2421_v39 = vand.u32 2147483648, %v2402_v40  ;;  %vm2415_vm13 = vweird.f32 %v2402_v40 }
 0x305   : > { %v5690_v29 = vadd.f32 1.0, %v4659_v59  ;;  %4666 = vrcp.f32 %v5686_v20  ;;  %v4661_v63 = vpop.eup %4660  ;;  %v2419_v33 = vand.u32 2147483647, %v2402_v40  ;;  %v2436_v49 = vand.u32 2147483648, %v5686_v20 }
 0x306   : > { %4668 = vrcp.f32 %v5688_v1  ;;  %v4663_v26 = vpop.eup %4662  ;;  %v5696_v54 = vadd.f32 1.0, %v4661_v63  ;;  %v2422_v4 = vor.u32 1.1754944e-38, %v2421_v39  ;;  %vm2430_vm7 = vweird.f32 %v5686_v20 }
 0x307   : > { %4670 = vrcp.f32 %v5690_v29  ;;  %v5709_v36 = vadd.f32 1.0, %v4663_v26  ;;  %vm2420_vm15 = vcmp.eq.f32.partialorder %v2419_v33, 8.507059e+37  ;;  %v2434_v44 = vand.u32 2147483647, %v5686_v20 }
 0x308   : > { %4672 = vrcp.f32 %v5696_v54  ;;  %v2437_v16 = vor.u32 1.1754944e-38, %v2436_v49  ;;  %vm2445_vm9 = vweird.f32 %v5688_v1  ;;  %v2481_v19 = vand.u32 2147483648, %v5696_v54 }
 0x309   : > { %4674 = vpow2.f32 %v4352_v31 }
 0x30a   : > { %v4665_v11 = vpop.eup %4664  ;;  %4676 = vrcp.f32 %v5709_v36 }
 0x30b   : > { %v5699_v15 = vpop.eup %4666  ;;  %v2411_v14 = vmul.f32 %v4665_v11, %v2402_v40  ;;  %vm2416_vm12 = vweird.f32 %v4665_v11  ;;  %4678 = vpow2.f32 %v4353_v27 }
 0x30c   : > { %v5702_v18 = vpop.eup %4668  ;;  %v2426_v56 = vmul.f32 %v5699_v15, %v5686_v20  ;;  %vm5733_vm14 = vmor %vm2415_vm13, %vm2416_vm12  ;;  %vm2431_vm3 = vweird.f32 %v5699_v15  ;;  %v2449_v20 = vand.u32 2147483647, %v5688_v1  ;;  %vm2435_vm12 = vcmp.eq.f32.partialorder %v2434_v44, 8.507059e+37 }
 0x30d   : > { %v2412_v57 = vsub.f32 1.0, %v2411_v14  ;;  %v5711_v22 = vpop.eup %4670  ;;  %v2441_v34 = vmul.f32 %v5702_v18, %v5688_v1  ;;  %vm5760_vm4 = vmor %vm2430_vm7, %vm2431_vm3  ;;  %vm2446_vm8 = vweird.f32 %v5702_v18 }
 0x30e   : > { %v2427_v6 = vsub.f32 1.0, %v2426_v56  ;;  %v2456_v17 = vmul.f32 %v5711_v22, %v5690_v29  ;;  %v5725_v38 = vpop.eup %4672  ;;  %vm2461_vm11 = vweird.f32 %v5711_v22  ;;  %vm5782_vm13 = vmor %vm2445_vm9, %vm2446_vm8 }
 0x30f   : > { %v2413_v61 = vmul.f32 %v4665_v11, %v2412_v57  ;;  %v2442_v52 = vsub.f32 1.0, %v2441_v34  ;;  %v4675_v7 = vpop.eup %4674  ;;  %v2471_v21 = vmul.f32 %v5725_v38, %v5696_v54  ;;  %vm2476_vm7 = vweird.f32 %v5725_v38 }
 0x310   : > { %v2428_v47 = vmul.f32 %v5699_v15, %v2427_v6  ;;  %v2457_v37 = vsub.f32 1.0, %v2456_v17  ;;  %v5746_v25 = vpop.eup %4676  ;;  %v5748_v41 = vadd.f32 1.0, %v4675_v7 }
 0x311   : > { %v2414_v35 = vadd.f32 %v4665_v11, %v2413_v61  ;;  %v2443_v42 = vmul.f32 %v5702_v18, %v2442_v52  ;;  %v2472_v50 = vsub.f32 1.0, %v2471_v21  ;;  %v4679_v53 = vpop.eup %4678  ;;  %v2486_v59 = vmul.f32 %v5746_v25, %v5709_v36  ;;  %v4586_v61 = vld [vmem:[%s6431_s9 + $0x58] sm:$0xff] }
 0x312   : > { %v2429_v48 = vadd.f32 %v5699_v15, %v2428_v47  ;;  %v2458_v40 = vmul.f32 %v5711_v22, %v2457_v37  ;;  %4680 = vrcp.f32 %v5748_v41  ;;  %v5775_v14 = vadd.f32 1.0, %v4679_v53  ;;  %v4573_v37 = vld [vmem:[%s6431_s9 + $0x10] sm:$0xff] }
 0x313   : > { %v2418_v30 = vsel %vm5733_vm14, %v4665_v11, %v2414_v35  ;;  %v2444_v26 = vadd.f32 %v5702_v18, %v2443_v42  ;;  %v2451_v11 = vand.u32 2147483648, %v5688_v1  ;;  %v2473_v56 = vmul.f32 %v5725_v38, %v2472_v50  ;;  %v2701_v42 = vld [vmem:[#allocation3 + $0xc] sm:$0x1]  ;;  %3018 = vmatpush.bf16.msrb.mxu3 %v4573_v37 }
 0x314   : > { %v2423_v32 = vsel %vm2420_vm15, %v2422_v4, %v2418_v30  ;;  %v2433_v8 = vsel %vm5760_vm4, %v5699_v15, %v2429_v48  ;;  %v2459_v57 = vadd.f32 %v5711_v22, %v2458_v40  ;;  %vm2460_vm14 = vweird.f32 %v5690_v29  ;;  %v2549_v48 = vld [vmem:[#allocation3 + $0x8] sm:$0x1] }
 0x315   : > { %v2530_v2 = vmul.f32 %v2423_v32, %v5666_v23  ;;  %v2466_v23 = vand.u32 2147483648, %v5690_v29  ;;  %v2487_v15 = vsub.f32 1.0, %v2486_v59  ;;  %v2438_v34 = vsel %vm2435_vm12, %v2437_v16, %v2433_v8  ;;  %vm5792_vm3 = vmor %vm2460_vm14, %vm2461_vm11 }
 0x316   : > { %v2448_v27 = vsel %vm5782_vm13, %v5702_v18, %v2444_v26  ;;  %v2464_v35 = vand.u32 2147483647, %v5690_v29  ;;  %vm2450_vm15 = vcmp.eq.f32.partialorder %v2449_v20, 8.507059e+37  ;;  %v2452_v58 = vor.u32 1.1754944e-38, %v2451_v11  ;;  %v2552_v20 = vld [vmem:[#allocation3 + $0x10] sm:$0x1] }
 0x317   : > { %v5773_v31 = vpack.c.bf16 %v2530_v2, %v2530_v2  ;;  %v2467_v39 = vor.u32 1.1754944e-38, %v2466_v23  ;;  %v2463_v24 = vsel %vm5792_vm3, %v5711_v22, %v2459_v57  ;;  %v2474_v18 = vadd.f32 %v5725_v38, %v2473_v56  ;;  %v4575_v22 = vld [vmem:[%s6431_s9 + $0x20] sm:$0xff]  ;;  %3581 = vmatpush.bf16.msra.mxu3 %v4586_v61 }
 0x318   : > { %v5797_v17 = vpop.eup %4680  ;;  %4682 = vrcp.f32 %v5775_v14  ;;  %v2453_v33 = vsel %vm2450_vm15, %v2452_v58, %v2448_v27  ;;  %v2488_v5 = vmul.f32 %v5746_v25, %v2487_v15  ;;  %v2531_v10 = vmul.f32 %v2438_v34, %v5668_v28  ;;  %3151 = vmatpush.bf16.msra.mxu0 %v4575_v22 }
 0x319   : > { %v2616_v6 = vshrl.u32 %v5773_v31, 16  ;;  %vm2465_vm9 = vcmp.eq.f32.partialorder %v2464_v35, 8.507059e+37  ;;  %vm2475_vm4 = vweird.f32 %v5696_v54  ;;  %v2479_v52 = vand.u32 2147483647, %v5696_v54 }
 0x31a   : > { %v2468_v7 = vsel %vm2465_vm9, %v2467_v39, %v2463_v24  ;;  %vm5819_vm8 = vmor %vm2475_vm4, %vm2476_vm7  ;;  %v2501_v28 = vmul.f32 %v5797_v17, %v5748_v41  ;;  %v2532_v47 = vmul.f32 %v2453_v33, %v5670_v46  ;;  %v2482_v21 = vor.u32 1.1754944e-38, %v2481_v19 }
 0x31b   : > { %v5804_v29 = vrot.slane %v2616_v6, 7  ;;  %v2478_v54 = vsel %vm5819_vm8, %v5725_v38, %v2474_v18  ;;  %v2489_v49 = vadd.f32 %v5746_v25, %v2488_v5  ;;  %vm2491_vm11 = vweird.f32 %v5746_v25  ;;  %v2555_v6 = vld [vmem:[#allocation3 + $0x18] sm:$0x1] }
 0x31c   : > { %v5835_v32 = vpack.c.bf16 %v2531_v10, %v2531_v10  ;;  %vm2480_vm12 = vcmp.eq.f32.partialorder %v2479_v52, 8.507059e+37  ;;  %v2496_v46 = vand.u32 2147483648, %v5709_v36  ;;  %v2533_v44 = vmul.f32 %v2468_v7, %v5672_v0 }
 0x31d   : > { %v2622_v4 = vrot.slane %v5804_v29, 4  ;;  %v2483_v40 = vsel %vm2480_vm12, %v2482_v21, %v2478_v54  ;;  %vm2490_vm13 = vweird.f32 %v5709_v36  ;;  %v2494_v50 = vand.u32 2147483647, %v5709_v36 }
 0x31e   : > { %v5837_v38 = vpop.eup %4682  ;;  %v2502_v53 = vsub.f32 1.0, %v2501_v28  ;;  %vm5843_vm14 = vmor %vm2490_vm13, %vm2491_vm11  ;;  %v5847_v59 = vpack.c.bf16 %v2532_v47, %v2532_v47  ;;  %vm2538_vm15 = vcmask 257024   ;;  %v2550_v63 = vsel %vm5097_vm5, 0, %v2549_v48 }
 0x31f   : > { %v2702_v2 = vsel %vm5097_vm5, %v2622_v4, %v2701_v42  ;;  %v2493_v0 = vsel %vm5843_vm14, %v5746_v25, %v2489_v49  ;;  %v2516_v36 = vmul.f32 %v5837_v38, %v5775_v14  ;;  %v2624_v26 = vshrl.u32 %v5835_v32, 16  ;;  %2539 = vst.msk [vmem:[#allocation3] sm:$0xf] %vm2538_vm15, %v4700_v43 }
 0x320   : > { %2703 = vst [vmem:[#allocation3 + $0xc] sm:$0x1] %v2702_v2  ;;  %v2497_v8 = vor.u32 1.1754944e-38, %v2496_v46  ;;  %v2509_v11 = vand.u32 2147483647, %v5748_v41  ;;  %v2511_v23 = vand.u32 2147483648, %v5748_v41  ;;  %v5861_v57 = vpack.c.bf16 %v2533_v44, %v2533_v44 }
 0x321   : > { %vm2495_vm3 = vcmp.eq.f32.partialorder %v2494_v50, 8.507059e+37  ;;  %v2526_v25 = vand.u32 2147483648, %v5775_v14  ;;  %v2534_v56 = vmul.f32 %v2483_v40, %v5674_v62  ;;  %2551 = vst [vmem:[#allocation3 + $0x8] sm:$0x1] %v2550_v63  ;;  %v2503_v34 = vmul.f32 %v5797_v17, %v2502_v53  ;;  %v4584_v40 = vld [vmem:[%s6431_s9 + $0x48] sm:$0xff] }
 0x322   : > { %v2498_v15 = vsel %vm2495_vm3, %v2497_v8, %v2493_v0  ;;  %v2632_v27 = vshrl.u32 %v5847_v59, 16  ;;  %2540 = vst.msk [vmem:[#allocation3 + $0x4] sm:$0xf] %vm2538_vm15, %v4700_v43  ;;  %v2553_v35 = vsel %vm5097_vm5, 0, %v2552_v20  ;;  %v2517_v58 = vsub.f32 1.0, %v2516_v36  ;;  %3448 = vmatpush.bf16.msra.mxu1 %v4584_v40 }
 0x323   : > { %v2619_v62 = vshll.u32 %v5773_v31, 16  ;;  %v5877_v1 = vrot.slane %v2624_v26, 7  ;;  %2542 = vst.msk [vmem:[#allocation3 + $0x48] sm:$0xf] %vm2538_vm15, %v4700_v43  ;;  %v2556_v39 = vsel %vm5097_vm5, 0, %v2555_v6  ;;  %vm2506_vm7 = vweird.f32 %v5797_v17 }
 0x324   : > { %vm5884_vm9 = vcmp.eq.f32.partialorder %v2509_v11, 8.507059e+37  ;;  %v2512_v18 = vor.u32 1.1754944e-38, %v2511_v23  ;;  %v2640_v33 = vshrl.u32 %v5861_v57, 16  ;;  %2543 = vst.msk [vmem:[#allocation3 + $0x4c] sm:$0xf] %vm2538_vm15, %v4700_v43  ;;  %v2535_v5 = vmul.f32 %v2498_v15, %v5680_v3 }
 0x325   : > { %v2558_v31 = vld [vmem:[#allocation3 + $0x20] sm:$0x1]  ;;  %v2524_v19 = vand.u32 2147483647, %v5775_v14  ;;  %v2621_v10 = vor.u32 %v2619_v62, %v5804_v29  ;;  %2554 = vst [vmem:[#allocation3 + $0x10] sm:$0x1] %v2553_v35  ;;  %v2504_v22 = vadd.f32 %v5797_v17, %v2503_v34  ;;  %v5899_v7 = vpack.c.bf16 %v2534_v56, %v2534_v56 }
 0x326   : > { %v2559_v52 = vsel %vm5097_vm5, 0, %v2558_v31  ;;  %v5897_v60 = vor.u32 1.1754944e-38, %v2526_v25  ;;  %v5901_v30 = vrot.slane %v2632_v27, 7  ;;  %vm6489_vm4 = vsmask.f32 7938 }
 0x327   : > { %vm5905_vm8 = vmand %vm2538_vm15, %vm6489_vm4  ;;  %2557 = vst [vmem:[#allocation3 + $0x18] sm:$0x1] %v2556_v39  ;;  %v2518_v3 = vmul.f32 %v5837_v38, %v2517_v58  ;;  %v2627_v29 = vshll.u32 %v5835_v32, 16  ;;  %v2630_v28 = vrot.slane %v5877_v1, 4  ;;  %v2635_v54 = vshll.u32 %v5847_v59, 16 }
 0x328   : > { %v2546_v47 = vld [vmem:[#allocation3] sm:$0x1]  ;;  %vm2505_vm11 = vweird.f32 %v5748_v41  ;;  %v5914_v4 = vrot.slane %v2640_v33, 7  ;;  %v2698_v21 = vld [vmem:[#allocation3 + $0x8] sm:$0xf]  ;;  %vm5924_vm13 = vcmp.eq.f32.partialorder %v2524_v19, 8.507059e+37  ;;  %v5928_v42 = vpack.c.bf16 %v2535_v5, %v2535_v5 }
 0x329   : > { %v2547_v37 = vsel %vm5097_vm5, 0, %v2546_v47  ;;  %2560 = vst [vmem:[#allocation3 + $0x20] sm:$0x1] %v2559_v52  ;;  %vm5920_vm12 = vmor %vm2505_vm11, %vm2506_vm7  ;;  %v2629_v41 = vor.u32 %v2627_v29, %v5877_v1  ;;  %v2643_v48 = vshll.u32 %v5861_v57, 16  ;;  %v2699_v46 = vsel %vm5905_vm8, %v2621_v10, %v2698_v21  ;;  %v2577_v44 = vld [vmem:[#allocation3 + $0x4] sm:$0x1] }
 0x32a   : > { %2548 = vst [vmem:[#allocation3] sm:$0x1] %v2547_v37  ;;  %v2508_v50 = vsel %vm5920_vm12, %v5797_v17, %v2504_v22  ;;  %v2648_v53 = vshrl.u32 %v5899_v7, 16  ;;  %v2578_v16 = vsel %vm5106_vm6, 0, %v2577_v44  ;;  %v5943_v59 = vld [vmem:[#allocation3 + $0xc] sm:$0x1]  ;;  %v2637_v2 = vor.u32 %v2635_v54, %v5901_v30 }
 0x32b   : > { %2700 = vst [vmem:[#allocation3 + $0x8] sm:$0xf] %v2699_v46  ;;  %v2583_v63 = vld [vmem:[#allocation3 + $0x14] sm:$0x1]  ;;  %v2519_v0 = vadd.f32 %v5837_v38, %v2518_v3  ;;  %vm2521_vm14 = vweird.f32 %v5837_v38  ;;  %v2638_v36 = vrot.slane %v5901_v30, 4  ;;  %v2645_v20 = vor.u32 %v2643_v48, %v5914_v4 }
 0x32c   : > { %2579 = vst [vmem:[#allocation3 + $0x4] sm:$0x1] %v2578_v16  ;;  %v2584_v17 = vsel %vm5106_vm6, 0, %v2583_v63  ;;  %v2586_v26 = vld [vmem:[#allocation3 + $0x1c] sm:$0x1]  ;;  %v2646_v8 = vrot.slane %v5914_v4, 4  ;;  %v2513_v57 = vsel %vm5884_vm9, %v2512_v18, %v2508_v50  ;;  %vm2520_vm15 = vweird.f32 %v5775_v14 }
 0x32d   : > { %v2704_v11 = vld [vmem:[#allocation3 + $0x10] sm:$0xf]  ;;  %2585 = vst [vmem:[#allocation3 + $0x14] sm:$0x1] %v2584_v17  ;;  %v2587_v23 = vsel %vm5106_vm6, 0, %v2586_v26  ;;  %vm5962_vm3 = vmor %vm2520_vm15, %vm2521_vm14  ;;  %v5966_v34 = vrot.slane %v2648_v53, 7  ;;  %v2536_v24 = vmul.f32 %v2513_v57, %v5693_v51 }
 0x32e   : > { %v2705_v25 = vsel %vm5905_vm8, %v2629_v41, %v2704_v11  ;;  %v3048_v56 = vld [vmem:[#allocation3] sm:$0xe]  ;;  %v2710_v61 = vld [vmem:[#allocation3 + $0x18] sm:$0xf]  ;;  %2588 = vst [vmem:[#allocation3 + $0x1c] sm:$0x1] %v2587_v23  ;;  %v2523_v6 = vsel %vm5962_vm3, %v5837_v38, %v2519_v0 }
 0x32f   : > { %v2651_v27 = vshll.u32 %v5899_v7, 16  ;;  %v2656_v35 = vshrl.u32 %v5928_v42, 16  ;;  %2706 = vst [vmem:[#allocation3 + $0x10] sm:$0xf] %v2705_v25  ;;  %v2711_v14 = vsel %vm5905_vm8, %v2637_v2, %v2710_v61  ;;  %v2659_v58 = vshll.u32 %v5928_v42, 16  ;;  %v4594_v4 = vld [vmem:[%s6431_s9 + $0x78] sm:$0xff] }
 0x330   : > { %v3078_v62 = vrot.slane %v5943_v59, 5  ;;  %2712 = vst [vmem:[#allocation3 + $0x18] sm:$0xf] %v2711_v14  ;;  %v2716_v39 = vld [vmem:[#allocation3 + $0x20] sm:$0xf]  ;;  %v4394_v33 = vrot.slane %v3048_v56, 9  ;;  %v2528_v38 = vsel %vm5924_vm13, %v5897_v60, %v2523_v6  ;;  %v5984_v48 = vpack.c.bf16 %v2536_v24, %v2536_v24  ;;  %3880 = vmatpush.bf16.msra.mxu2 %v4594_v4 }
 0x331   : > { %v4356_v18 = vld [vmem:[#allocation3] sm:$0xf]  ;;  %v2883_v19 = vshll.u32 %v5943_v59, 16  ;;  %v2717_v5 = vsel %vm5905_vm8, %v2645_v20, %v2716_v39  ;;  %v2537_v50 = vmul.f32 %v2528_v38, %v5704_v9  ;;  %v6000_v25 = vrot.slane %v2656_v35, 7  ;;  %v2561_v24 = vld [vmem:[#allocation3 + $0x28] sm:$0x1] }
 0x332   : > { %v2843_v31 = vld [vmem:[#allocation3] sm:$0xf]  ;;  %v4567_v10 = vld [vmem:[#allocation3 + $0x4] sm:$0xf0]  ;;  %2718 = vst [vmem:[#allocation3 + $0x20] sm:$0xf] %v2717_v5 }
 0x333   : > { %v4416_v52 = vld [vmem:[#allocation3 + $0x8] sm:$0xf]  ;;  %v4357_v3 = vor.u32 %v4567_v10, %v4356_v18  ;;  %v2844_v29 = vld [vmem:[#allocation3 + $0x4] sm:$0x1]  ;;  %v2860_v51 = vshrl.u32 %v2843_v31, 16  ;;  %v2863_v21 = vshll.u32 %v2843_v31, 16  ;;  %v6004_v35 = vpack.c.bf16 %v2537_v50, %v2537_v50 }
 0x334   : > { %v3049_v22 = vld [vmem:[#allocation3 + $0x8] sm:$0xe]  ;;  %v3074_v37 = vrot.slane %v2844_v29, 5  ;;  %v2869_v49 = vshll.u32 %v2844_v29, 16  ;;  %v2707_v60 = vld [vmem:[#allocation3 + $0x14] sm:$0x1] }
 0x335   : > { %v4395_v54 = vrot.slane %v3049_v22, 9  ;;  %v2845_v47 = vld [vmem:[#allocation3 + $0x8] sm:$0xf]  ;;  %4378 = vmatmul.msk.bf16.vlgmr.msrb.gmra.mxu1 %vm2227_vm1, %v4357_v3  ;;  %v2862_v44 = vrot.slane %v2860_v51, 4  ;;  %v2713_v40 = vld [vmem:[#allocation3 + $0x1c] sm:$0x1]  ;;  %v2708_v23 = vsel %vm5097_vm5, %v2630_v28, %v2707_v60 }
 0x336   : > { %v2874_v41 = vshrl.u32 %v2845_v47, 16  ;;  %v2877_v32 = vshll.u32 %v2845_v47, 16  ;;  %v4577_v53 = vld [vmem:[#allocation3 + $0xc] sm:$0xf0]  ;;  %v3075_v16 = vsel %vm5286_vm10, %v4394_v33, %v3074_v37  ;;  %v2865_v2 = vrot.slane %v2863_v21, 5 }
 0x337   : > { %v3079_v46 = vsel %vm5286_vm10, %v4395_v54, %v3078_v62  ;;  %v4417_v63 = vor.u32 %v4577_v53, %v4416_v52  ;;  %v3108_v0 = vunpack.c.l.b16 %v3075_v16  ;;  %v2871_v11 = vrot.slane %v2869_v49, 5  ;;  %v2847_v57 = vld [vmem:[#allocation3 + $0x10] sm:$0xf]  ;;  %2709 = vst [vmem:[#allocation3 + $0x14] sm:$0x1] %v2708_v23 }
 0x338   : > { %v3109_v59 = vunpack.c.l.b16 %v3079_v46  ;;  %v2876_v17 = vrot.slane %v2874_v41, 4  ;;  %v2879_v26 = vrot.slane %v2877_v32, 5  ;;  %v2866_v20 = vor.u32 %v2865_v2, %v2862_v44  ;;  %v2849_v14 = vld [vmem:[#allocation3 + $0x18] sm:$0xf]  ;;  %v3050_v39 = vld [vmem:[#allocation3 + $0x10] sm:$0xe] }
 0x339   : > { %v2714_v9 = vsel %vm5097_vm5, %v2638_v36, %v2713_v40  ;;  %4438 = vmatmul.msk.bf16.vlgmr.msrb.gmra.mxu2 %vm2227_vm1, %v4417_v63  ;;  %v2885_v15 = vrot.slane %v2883_v19, 5  ;;  %v2888_v1 = vshrl.u32 %v2847_v57, 16  ;;  %v2891_v62 = vshll.u32 %v2847_v57, 16  ;;  %v3051_v33 = vld [vmem:[#allocation3 + $0x18] sm:$0xe] }
 0x33a   : > { %v3116_v56 = vpack.c.b16 %v3109_v59, %v3108_v0  ;;  %v2880_v61 = vor.u32 %v2879_v26, %v2876_v17  ;;  %v2867_v6 = vrot.slane %v2866_v20, 4  ;;  %2715 = vst [vmem:[#allocation3 + $0x1c] sm:$0x1] %v2714_v9  ;;  %v2902_v28 = vshrl.u32 %v2849_v14, 16  ;;  %v2564_v5 = vld [vmem:[#allocation3 + $0x30] sm:$0x1] }
 0x33b   : > { %v2905_v36 = vshll.u32 %v2849_v14, 16  ;;  %v2890_v31 = vrot.slane %v2888_v1, 4  ;;  %v2893_v19 = vrot.slane %v2891_v62, 5  ;;  %v2589_v3 = vld [vmem:[#allocation3 + $0x24] sm:$0x1]  ;;  %v2664_v54 = vshrl.u32 %v5984_v48, 16 }
 0x33c   : > { %4410 = vmatmul.msk.bf16.vlgmr.msra.gmra.mxu0 %vm2227_vm1, %v3116_v56  ;;  %v2881_v30 = vrot.slane %v2880_v61, 4  ;;  %v2872_v18 = vsel %vm5225_vm2, %v2867_v6, %v2871_v11  ;;  %v2904_v22 = vrot.slane %v2902_v28, 4  ;;  %v2592_v29 = vld [vmem:[#allocation3 + $0x2c] sm:$0x1]  ;;  %v4360_v51 = vld [vmem:[#allocation3 + $0x10] sm:$0xf]  ;;  %v2653_v17 = vor.u32 %v2651_v27, %v5966_v34 }
 0x33d   : > { %v2975_v52 = vunpack.c.l.b16 %v2872_v18  ;;  %v2907_v38 = vrot.slane %v2905_v36, 5  ;;  %v2562_v37 = vsel %vm5097_vm5, 0, %v2561_v24  ;;  %v2565_v21 = vsel %vm5097_vm5, 0, %v2564_v5  ;;  %v4568_v49 = vld [vmem:[#allocation3 + $0x14] sm:$0xf0]  ;;  %v4585_v26 = vld [vmem:[%s6431_s9 + $0x50] sm:$0xff] }
 0x33e   : > { %v2886_v10 = vsel %vm5225_vm2, %v2881_v30, %v2885_v15  ;;  %v4396_v41 = vrot.slane %v3050_v39, 9  ;;  %2563 = vst [vmem:[#allocation3 + $0x28] sm:$0x1] %v2562_v37  ;;  %v2590_v46 = vsel %vm5106_vm6, 0, %v2589_v3  ;;  %v2848_v32 = vld [vmem:[#allocation3 + $0x14] sm:$0x1]  ;;  %v2894_v59 = vor.u32 %v2893_v19, %v2890_v31  ;;  %3582 = vmatpush.bf16.msra.mxu3 %v4585_v26 }
 0x33f   : > { %v2976_v47 = vunpack.c.l.b16 %v2886_v10  ;;  %v4397_v60 = vrot.slane %v3051_v33, 9  ;;  %2566 = vst [vmem:[#allocation3 + $0x30] sm:$0x1] %v2565_v21  ;;  %v2593_v40 = vsel %vm5106_vm6, 0, %v2592_v29  ;;  %v2672_v50 = vshrl.u32 %v6004_v35, 16 }
 0x340   : > { %v3082_v16 = vrot.slane %v2848_v32, 5  ;;  %v2908_v2 = vor.u32 %v2907_v38, %v2904_v22  ;;  %v4420_v63 = vld [vmem:[#allocation3 + $0x18] sm:$0xf]  ;;  %2591 = vst [vmem:[#allocation3 + $0x24] sm:$0x1] %v2590_v46  ;;  %v4361_v20 = vor.u32 %v4568_v49, %v4360_v51  ;;  %v2897_v23 = vshll.u32 %v2848_v32, 16 }
 0x341   : > { %v2983_v44 = vpack.c.b16 %v2976_v47, %v2975_v52  ;;  %v2850_v53 = vld [vmem:[#allocation3 + $0x1c] sm:$0x1]  ;;  %2594 = vst [vmem:[#allocation3 + $0x2c] sm:$0x1] %v2593_v40  ;;  %v2567_v57 = vld [vmem:[#allocation3 + $0x38] sm:$0x1]  ;;  %v2661_v56 = vor.u32 %v2659_v58, %v6000_v25 }
 0x342   : > { %v3086_v0 = vrot.slane %v2850_v53, 5  ;;  %v3083_v11 = vsel %vm5286_vm10, %v4396_v41, %v3082_v16  ;;  %v2911_v9 = vshll.u32 %v2850_v53, 16  ;;  %v6032_v61 = vrot.slane %v2664_v54, 7  ;;  %v4578_v7 = vld [vmem:[#allocation3 + $0x1c] sm:$0xf0] }
 0x343   : > { %4390 = vmatmul.msk.bf16.vlgmr.msrb.gmra.mxu3 %vm2227_vm1, %v2983_v44  ;;  %v2851_v15 = vld [vmem:[#allocation3 + $0x20] sm:$0xf]  ;;  %v2568_v14 = vsel %vm5097_vm5, 0, %v2567_v57  ;;  %v3110_v6 = vunpack.c.l.b16 %v3083_v11  ;;  %v2895_v62 = vrot.slane %v2894_v59, 4  ;;  %v2909_v28 = vrot.slane %v2908_v2, 4 }
 0x344   : > { %v3087_v27 = vsel %vm5286_vm10, %v4397_v60, %v3086_v0  ;;  %2569 = vst [vmem:[#allocation3 + $0x38] sm:$0x1] %v2568_v14  ;;  %v2570_v42 = vld [vmem:[#allocation3 + $0x40] sm:$0x1]  ;;  %v2654_v58 = vrot.slane %v5966_v34, 4  ;;  %v2667_v30 = vshll.u32 %v5984_v48, 16  ;;  %v4421_v18 = vor.u32 %v4578_v7, %v4420_v63 }
 0x345   : > { %4379 = vmatmul.msk.bf16.gmra.mxu1 %vm2227_vm1, %v4361_v20  ;;  %v3111_v1 = vunpack.c.l.b16 %v3087_v27  ;;  %v6041_v39 = vrot.slane %v2672_v50, 7  ;;  %v2722_v36 = vld [vmem:[#allocation3 + $0x28] sm:$0xf]  ;;  %v2571_v24 = vsel %vm5097_vm5, 0, %v2570_v42  ;;  %v2899_v33 = vrot.slane %v2897_v23, 5 }
 0x346   : > { %v2913_v31 = vrot.slane %v2911_v9, 5  ;;  %v2723_v19 = vsel %vm5905_vm8, %v2653_v17, %v2722_v36  ;;  %v2728_v5 = vld [vmem:[#allocation3 + $0x30] sm:$0xf]  ;;  %2572 = vst [vmem:[#allocation3 + $0x40] sm:$0x1] %v2571_v24  ;;  %v2675_v10 = vshll.u32 %v6004_v35, 16  ;;  %v2669_v52 = vor.u32 %v2667_v30, %v6032_v61 }
 0x347   : > { %2724 = vst [vmem:[#allocation3 + $0x28] sm:$0xf] %v2723_v19  ;;  %v2729_v34 = vsel %vm5905_vm8, %v2661_v56, %v2728_v5  ;;  %v2916_v48 = vshrl.u32 %v2851_v15, 16  ;;  %v3117_v22 = vpack.c.b16 %v3111_v1, %v3110_v6  ;;  %v2900_v38 = vsel %vm5225_vm2, %v2895_v62, %v2899_v33  ;;  %v2719_v29 = vld [vmem:[#allocation3 + $0x24] sm:$0x1]  ;;  %v4583_v35 = vld [vmem:[%s6431_s9 + $0x40] sm:$0xff] }
 0x348   : > { %v2914_v3 = vsel %vm5225_vm2, %v2909_v28, %v2913_v31  ;;  %2730 = vst [vmem:[#allocation3 + $0x30] sm:$0xf] %v2729_v34  ;;  %v2919_v54 = vshll.u32 %v2851_v15, 16  ;;  %v2720_v47 = vsel %vm5097_vm5, %v2646_v8, %v2719_v29  ;;  %v2725_v51 = vld [vmem:[#allocation3 + $0x2c] sm:$0x1]  ;;  %v2677_v21 = vor.u32 %v2675_v10, %v6041_v39  ;;  %3449 = vmatpush.bf16.msra.mxu1 %v4583_v35  ;;  %v4593_v36 = vld [vmem:[%s6431_s9 + $0x70] sm:$0xff] }
 0x349   : > { %4439 = vmatmul.msk.bf16.gmra.mxu2 %vm2227_vm1, %v4421_v18  ;;  %v2595_v37 = vld [vmem:[#allocation3 + $0x34] sm:$0x1]  ;;  %2721 = vst [vmem:[#allocation3 + $0x24] sm:$0x1] %v2720_v47  ;;  %v2726_v49 = vsel %vm5097_vm5, %v2654_v58, %v2725_v51  ;;  %v2977_v46 = vunpack.c.l.b16 %v2900_v38  ;;  %v2978_v8 = vunpack.c.l.b16 %v2914_v3  ;;  %v2598_v32 = vld [vmem:[#allocation3 + $0x3c] sm:$0x1] }
 0x34a   : > { %v2596_v41 = vsel %vm5106_vm6, 0, %v2595_v37  ;;  %2727 = vst [vmem:[#allocation3 + $0x2c] sm:$0x1] %v2726_v49  ;;  %v4364_v60 = vld [vmem:[#allocation3 + $0x20] sm:$0xf]  ;;  %v2918_v40 = vrot.slane %v2916_v48, 4  ;;  %3881 = vmatpush.bf16.msra.mxu2 %v4593_v36 }
 0x34b   : > { %v2734_v44 = vld [vmem:[#allocation3 + $0x38] sm:$0xf]  ;;  %v2921_v50 = vrot.slane %v2919_v54, 5  ;;  %2597 = vst [vmem:[#allocation3 + $0x34] sm:$0x1] %v2596_v41  ;;  %v2599_v17 = vsel %vm5106_vm6, 0, %v2598_v32  ;;  %v2984_v20 = vpack.c.b16 %v2978_v8, %v2977_v46 }
 0x34c   : > { %4411 = vmatmul.msk.bf16.gmra.mxu0 %vm2227_vm1, %v3117_v22  ;;  %v2735_v53 = vsel %vm5905_vm8, %v2669_v52, %v2734_v44  ;;  %v3052_v16 = vld [vmem:[#allocation3 + $0x20] sm:$0xe]  ;;  %v2662_v26 = vrot.slane %v6000_v25, 4  ;;  %2600 = vst [vmem:[#allocation3 + $0x3c] sm:$0x1] %v2599_v17  ;;  %v4592_v19 = vld [vmem:[%s6431_s9 + $0x68] sm:$0xff] }
 0x34d   : > { %2736 = vst [vmem:[#allocation3 + $0x38] sm:$0xf] %v2735_v53  ;;  %v2740_v59 = vld [vmem:[#allocation3 + $0x40] sm:$0xf]  ;;  %v4398_v23 = vrot.slane %v3052_v16, 9  ;;  %v2922_v9 = vor.u32 %v2921_v50, %v2918_v40  ;;  %v2670_v5 = vrot.slane %v6032_v61, 4  ;;  %3675 = vmatpush.bf16.msrb.mxu0 %v4592_v19 }
 0x34e   : > { %v4569_v2 = vld [vmem:[#allocation3 + $0x24] sm:$0xf0]  ;;  %v2741_v0 = vsel %vm5905_vm8, %v2677_v21, %v2740_v59  ;;  %v4591_v44 = vld [vmem:[%s6431_s9 + $0x60] sm:$0xff] }
 0x34f   : > { %v3053_v63 = vld [vmem:[#allocation3 + $0x28] sm:$0xe]  ;;  %2742 = vst [vmem:[#allocation3 + $0x40] sm:$0xf] %v2741_v0  ;;  %v4365_v7 = vor.u32 %v4569_v2, %v4364_v60  ;;  %v4579_v15 = vld [vmem:[#allocation3 + $0x2c] sm:$0xf0] }
 0x350   : > { %v2853_v11 = vld [vmem:[#allocation3 + $0x28] sm:$0xf]  ;;  %v2852_v14 = vld [vmem:[#allocation3 + $0x24] sm:$0x1]  ;;  %v4399_v43 = vrot.slane %v3053_v63, 9  ;;  %v2923_v18 = vrot.slane %v2922_v9, 4 }
 0x351   : > { %v2930_v57 = vshrl.u32 %v2853_v11, 16  ;;  %v2933_v56 = vshll.u32 %v2853_v11, 16  ;;  %v4424_v27 = vld [vmem:[#allocation3 + $0x28] sm:$0xf]  ;;  %v2854_v6 = vld [vmem:[#allocation3 + $0x2c] sm:$0x1]  ;;  %3676 = vmatpush.bf16.msrb.mxu0 %v4591_v44 }
 0x352   : > { %v3090_v1 = vrot.slane %v2852_v14, 5  ;;  %v2925_v62 = vshll.u32 %v2852_v14, 16  ;;  %v3094_v42 = vrot.slane %v2854_v6, 5  ;;  %v2939_v58 = vshll.u32 %v2854_v6, 16  ;;  %v2731_v30 = vld [vmem:[#allocation3 + $0x34] sm:$0x1] }
 0x353   : > { %4391 = vmatmul.msk.bf16.gmra.mxu3 %vm2227_vm1, %v2984_v20  ;;  %v2932_v28 = vrot.slane %v2930_v57, 4  ;;  %v2935_v25 = vrot.slane %v2933_v56, 5  ;;  %v2732_v31 = vsel %vm5097_vm5, %v2662_v26, %v2731_v30  ;;  %v6094_v52 = vld [vmem:[#allocation3 + $0x30] sm:$0xe]  ;;  %v4425_v22 = vor.u32 %v4579_v15, %v4424_v27  ;;  %v2737_v4 = vld [vmem:[#allocation3 + $0x3c] sm:$0x1] }
 0x354   : > { %v3091_v24 = vsel %vm5286_vm10, %v4398_v23, %v3090_v1  ;;  %v3095_v10 = vsel %vm5286_vm10, %v4399_v43, %v3094_v42  ;;  %v2927_v48 = vrot.slane %v2925_v62, 5  ;;  %2733 = vst [vmem:[#allocation3 + $0x34] sm:$0x1] %v2732_v31  ;;  %v2941_v29 = vrot.slane %v2939_v58, 5  ;;  %v2855_v54 = vld [vmem:[#allocation3 + $0x30] sm:$0xf] }
 0x355   : > { %4380 = vmatmul.msk.bf16.gmra.mxu1 %vm2227_vm1, %v4365_v7  ;;  %v2936_v33 = vor.u32 %v2935_v25, %v2932_v28  ;;  %v3112_v34 = vunpack.c.l.b16 %v3091_v24  ;;  %v3113_v38 = vunpack.c.l.b16 %v3095_v10  ;;  %v2857_v35 = vld [vmem:[#allocation3 + $0x38] sm:$0xf]  ;;  %v2944_v47 = vshrl.u32 %v2855_v54, 16  ;;  %v4368_v41 = vld [vmem:[#allocation3 + $0x30] sm:$0xf] }
 0x356   : > { %v2947_v51 = vshll.u32 %v2855_v54, 16  ;;  %v2958_v37 = vshrl.u32 %v2857_v35, 16  ;;  %v2928_v21 = vsel %vm5225_vm2, %v2923_v18, %v2927_v48  ;;  %v2961_v46 = vshll.u32 %v2857_v35, 16  ;;  %v3274_v8 = vld [vmem:[#allocation3 + $0x8] sm:$0xf]  ;;  %v4597_v54 = vld [vmem:[%s6433_s11] sm:$0xff] }
 0x357   : > { %v2937_v3 = vrot.slane %v2936_v33, 4  ;;  %v3118_v61 = vpack.c.b16 %v3113_v38, %v3112_v34  ;;  %v4570_v32 = vld [vmem:[#allocation3 + $0x34] sm:$0xf0]  ;;  %v2738_v60 = vsel %vm5097_vm5, %v2670_v5, %v2737_v4  ;;  %v4400_v40 = vrot.slane %v6094_v52, 9  ;;  %v3276_v50 = vld [vmem:[#allocation3 + $0x10] sm:$0xf]  ;;  %4079 = vmatpush.bf16.msrb.mxu3 %v4597_v54 }
 0x358   : > { %2739 = vst [vmem:[#allocation3 + $0x3c] sm:$0x1] %v2738_v60  ;;  %v2946_v53 = vrot.slane %v2944_v47, 4  ;;  %v2949_v16 = vrot.slane %v2947_v51, 5  ;;  %v2960_v59 = vrot.slane %v2958_v37, 4  ;;  %v2963_v2 = vrot.slane %v2961_v46, 5 }
 0x359   : > { %4440 = vmatmul.msk.bf16.gmra.mxu2 %vm2227_vm1, %v4425_v22  ;;  %v2942_v49 = vsel %vm5225_vm2, %v2937_v3, %v2941_v29  ;;  %v2979_v63 = vunpack.c.l.b16 %v2928_v21  ;;  %v6108_v17 = vld [vmem:[#allocation3 + $0x38] sm:$0xf]  ;;  %v3291_v20 = vshrl.u32 %v3274_v8, 16  ;;  %v3294_v11 = vshll.u32 %v3274_v8, 16  ;;  %v4580_v23 = vld [vmem:[#allocation3 + $0x3c] sm:$0xf0] }
 0x35a   : > { %v2980_v0 = vunpack.c.l.b16 %v2942_v49  ;;  %v3055_v26 = vld [vmem:[#allocation3 + $0x38] sm:$0xe]  ;;  %v3305_v57 = vshrl.u32 %v3276_v50, 16  ;;  %v3308_v56 = vshll.u32 %v3276_v50, 16  ;;  %v4369_v7 = vor.u32 %v4570_v32, %v4368_v41  ;;  %v6110_v15 = vld [vmem:[#allocation3 + $0xc] sm:$0x1] }
 0x35b   : > { %v2856_v9 = vld [vmem:[#allocation3 + $0x34] sm:$0x1]  ;;  %v3293_v14 = vrot.slane %v3291_v20, 4  ;;  %v3706_v43 = vld [vmem:[#allocation3 + $0x10] sm:$0xf]  ;;  %v2950_v6 = vor.u32 %v2949_v16, %v2946_v53  ;;  %v2964_v1 = vor.u32 %v2963_v2, %v2960_v59  ;;  %v3296_v28 = vrot.slane %v3294_v11, 5 }
 0x35c   : > { %4412 = vmatmul.msk.bf16.gmra.mxu0 %vm2227_vm1, %v3118_v61  ;;  %v3098_v27 = vrot.slane %v2856_v9, 5  ;;  %v6112_v62 = vld [vmem:[#allocation3 + $0x14] sm:$0x1]  ;;  %v3307_v25 = vrot.slane %v3305_v57, 4  ;;  %v2985_v42 = vpack.c.b16 %v2980_v0, %v2979_v63  ;;  %v4429_v58 = vor.u32 %v4580_v23, %v6108_v17  ;;  %v3708_v52 = vld [vmem:[#allocation3 + $0x18] sm:$0xf] }
 0x35d   : > { %v4401_v30 = vrot.slane %v3055_v26, 9  ;;  %v3310_v36 = vrot.slane %v3308_v56, 5  ;;  %v3297_v24 = vor.u32 %v3296_v28, %v3293_v14  ;;  %v3300_v18 = vshll.u32 %v6110_v15, 16  ;;  %v6123_v51 = vld [vmem:[#allocation3 + $0x14] sm:$0x1]  ;;  %v4596_v23 = vld [vmem:[%s6431_s9 + $0x88] sm:$0xff] }
 0x35e   : > { %v3723_v33 = vshrl.u32 %v3706_v43, 16  ;;  %v3726_v31 = vshll.u32 %v3706_v43, 16  ;;  %v3099_v5 = vsel %vm5286_vm10, %v4400_v40, %v3098_v27  ;;  %v2953_v10 = vshll.u32 %v2856_v9, 16  ;;  %v6128_v32 = vld [vmem:[#allocation3 + $0x1c] sm:$0x1]  ;;  %4013 = vmatpush.bf16.msrb.mxu1 %v4596_v23 }
 0x35f   : > { %v2858_v19 = vld [vmem:[#allocation3 + $0x3c] sm:$0x1]  ;;  %v3311_v34 = vor.u32 %v3310_v36, %v3307_v25  ;;  %v3314_v48 = vshll.u32 %v6112_v62, 16  ;;  %v2951_v38 = vrot.slane %v2950_v6, 4  ;;  %v2965_v3 = vrot.slane %v2964_v1, 4 }
 0x360   : > { %v3102_v22 = vrot.slane %v2858_v19, 5  ;;  %v2967_v29 = vshll.u32 %v2858_v19, 16  ;;  %v3298_v35 = vrot.slane %v3297_v24, 4  ;;  %v3725_v37 = vrot.slane %v3723_v33, 4  ;;  %v3278_v11 = vld [vmem:[#allocation3 + $0x18] sm:$0xf] }
 0x361   : > { %v3312_v47 = vrot.slane %v3311_v34, 4  ;;  %v3728_v61 = vrot.slane %v3726_v31, 5  ;;  %v3114_v49 = vunpack.c.l.b16 %v3099_v5  ;;  %v3302_v41 = vrot.slane %v3300_v18, 5  ;;  %v3280_v57 = vld [vmem:[#allocation3 + $0x20] sm:$0xf] }
 0x362   : > { %v3103_v21 = vsel %vm5286_vm10, %v4401_v30, %v3102_v22  ;;  %v3737_v4 = vshrl.u32 %v3708_v52, 16  ;;  %v2955_v8 = vrot.slane %v2953_v10, 5  ;;  %v3316_v44 = vrot.slane %v3314_v48, 5  ;;  %v3479_v1 = vld [vmem:[#allocation3 + $0x8] sm:$0xe] }
 0x363   : > { %4392 = vmatmul.msk.bf16.gmra.mxu3 %vm2227_vm1, %v2985_v42  ;;  %v3115_v46 = vunpack.c.l.b16 %v3103_v21  ;;  %v3729_v60 = vor.u32 %v3728_v61, %v3725_v37  ;;  %v2969_v40 = vrot.slane %v2967_v29, 5  ;;  %v3732_v50 = vshll.u32 %v6123_v51, 16  ;;  %v3710_v36 = vld [vmem:[#allocation3 + $0x20] sm:$0xf]  ;;  %v3480_v19 = vld [vmem:[#allocation3 + $0x10] sm:$0xe] }
 0x364   : > { %v3739_v53 = vrot.slane %v3737_v4, 4  ;;  %v3740_v16 = vshll.u32 %v3708_v52, 16  ;;  %v2956_v59 = vsel %vm5225_vm2, %v2951_v38, %v2955_v8  ;;  %v3303_v2 = vsel %vm5225_vm2, %v3298_v35, %v3302_v41  ;;  %v3712_v34 = vld [vmem:[#allocation3 + $0x28] sm:$0xf]  ;;  %v6149_v38 = vld [vmem:[#allocation3 + $0x1c] sm:$0x1] }
 0x365   : > { %4381 = vmatmul.msk.bf16.gmra.mxu1 %vm2227_vm1, %v4369_v7  ;;  %v3317_v63 = vsel %vm5225_vm2, %v3312_v47, %v3316_v44  ;;  %v3119_v0 = vpack.c.b16 %v3115_v46, %v3114_v49  ;;  %v2970_v17 = vsel %vm5225_vm2, %v2965_v3, %v2969_v40  ;;  %v3746_v20 = vshll.u32 %v6128_v32, 16  ;;  %v6152_v35 = vld [vmem:[#allocation3 + $0x24] sm:$0x1]  ;;  %v3282_v23 = vld [vmem:[#allocation3 + $0x28] sm:$0xf] }
 0x366   : > { %v3742_v26 = vrot.slane %v3740_v16, 5  ;;  %v3730_v9 = vrot.slane %v3729_v60, 4  ;;  %v2981_v56 = vunpack.c.l.b16 %v2956_v59  ;;  %v3406_v7 = vunpack.c.l.b16 %v3303_v2  ;;  %v4587_v16 = vld [vmem:[#allocation3 + $0x14] sm:$0xf0]  ;;  %v3484_v12 = vld [vmem:[#allocation3 + $0x30] sm:$0xe] }
 0x367   : > { %v3734_v27 = vrot.slane %v3732_v50, 5  ;;  %v2982_v43 = vunpack.c.l.b16 %v2970_v17  ;;  %v3407_v6 = vunpack.c.l.b16 %v3317_v63  ;;  %v3319_v28 = vshrl.u32 %v3278_v11, 16  ;;  %v6161_v17 = vld [vmem:[#allocation3 + $0x24] sm:$0x1] }
 0x368   : > { %v3743_v14 = vor.u32 %v3742_v26, %v3739_v53  ;;  %v3322_v25 = vshll.u32 %v3278_v11, 16  ;;  %v3333_v30 = vshrl.u32 %v3280_v57, 16  ;;  %v3336_v10 = vshll.u32 %v3280_v57, 16  ;;  %v4476_v53 = vld [vmem:[#allocation3 + $0x10] sm:$0xf] }
 0x369   : > { %4441 = vmatmul.msk.bf16.gmra.mxu2 %vm2227_vm1, %v4429_v58  ;;  %v3748_v58 = vrot.slane %v3746_v20, 5  ;;  %v3735_v24 = vsel %vm5225_vm2, %v3730_v9, %v3734_v27  ;;  %v3321_v18 = vrot.slane %v3319_v28, 4  ;;  %v2986_v48 = vpack.c.b16 %v2982_v43, %v2981_v56  ;;  %v6163_v26 = vld [vmem:[#allocation3 + $0x2c] sm:$0x1] }
 0x36a   : > { %v3744_v42 = vrot.slane %v3743_v14, 4  ;;  %v3324_v33 = vrot.slane %v3322_v25, 5  ;;  %v3335_v5 = vrot.slane %v3333_v30, 4  ;;  %v3414_v52 = vpack.c.b16 %v3407_v6, %v3406_v7  ;;  %v3284_v7 = vld [vmem:[#allocation3 + $0x30] sm:$0xf] }
 0x36b   : > { %v4454_v22 = vrot.slane %v3479_v1, 9  ;;  %v3751_v3 = vshrl.u32 %v3710_v36, 16  ;;  %v3838_v29 = vunpack.c.l.b16 %v3735_v24  ;;  %v3505_v54 = vrot.slane %v6110_v15, 5 }
 0x36c   : > { %4413 = vmatmul.msk.bf16.gmra.mxu0 %vm2227_vm1, %v3119_v0  ;;  %v3749_v31 = vsel %vm5225_vm2, %v3744_v42, %v3748_v58  ;;  %v3338_v47 = vrot.slane %v3336_v10, 5  ;;  %v3754_v37 = vshll.u32 %v3710_v36, 16  ;;  %v4455_v21 = vrot.slane %v3480_v19, 9 }
 0x36d   : > { %v3839_v61 = vunpack.c.l.b16 %v3749_v31  ;;  %v3325_v49 = vor.u32 %v3324_v33, %v3321_v18  ;;  %v3765_v41 = vshrl.u32 %v3712_v34, 16  ;;  %v3753_v46 = vrot.slane %v3751_v3, 4  ;;  %v3481_v18 = vld [vmem:[#allocation3 + $0x18] sm:$0xe] }
 0x36e   : > { %v3339_v4 = vor.u32 %v3338_v47, %v3335_v5  ;;  %v3756_v8 = vrot.slane %v3754_v37, 5  ;;  %v3768_v44 = vshll.u32 %v3712_v34, 16  ;;  %v3509_v60 = vrot.slane %v6112_v62, 5  ;;  %v3714_v34 = vld [vmem:[#allocation3 + $0x30] sm:$0xf] }
 0x36f   : > { %v3328_v40 = vshll.u32 %v6149_v38, 16  ;;  %v3342_v15 = vshll.u32 %v6152_v35, 16  ;;  %v3767_v50 = vrot.slane %v3765_v41, 4  ;;  %v3506_v2 = vsel %vm5286_vm10, %v4454_v22, %v3505_v54 }
 0x370   : > { %v3770_v59 = vrot.slane %v3768_v44, 5  ;;  %v3326_v63 = vrot.slane %v3325_v49, 4  ;;  %v3340_v0 = vrot.slane %v3339_v4, 4  ;;  %v3846_v62 = vpack.c.b16 %v3839_v61, %v3838_v29  ;;  %v6181_v49 = vld [vmem:[#allocation3 + $0x34] sm:$0x1] }
 0x371   : > { %v3757_v20 = vor.u32 %v3756_v8, %v3753_v46  ;;  %v3510_v9 = vsel %vm5286_vm10, %v4455_v21, %v3509_v60  ;;  %v3330_v57 = vrot.slane %v3328_v40, 5  ;;  %v3344_v56 = vrot.slane %v3342_v15, 5  ;;  %v6179_v21 = vld [vmem:[#allocation3 + $0x2c] sm:$0x1] }
 0x372   : > { %v3771_v11 = vor.u32 %v3770_v59, %v3767_v50  ;;  %v4477_v27 = vor.u32 %v4587_v16, %v4476_v53  ;;  %v3539_v14 = vunpack.c.l.b16 %v3506_v2  ;;  %v3760_v43 = vshll.u32 %v6161_v17, 16  ;;  %v2601_v59 = vld [vmem:[#allocation3 + $0x44] sm:$0x1] }
 0x373   : > { %4393 = vmatmul.msk.bf16.gmra.mxu3 %vm2227_vm1, %v2986_v48  ;;  %v3774_v6 = vshll.u32 %v6163_v26, 16  ;;  %v3331_v1 = vsel %vm5225_vm2, %v3326_v63, %v3330_v57  ;;  %v3345_v28 = vsel %vm5225_vm2, %v3340_v0, %v3344_v56  ;;  %v3347_v25 = vshrl.u32 %v3282_v23, 16  ;;  %v3716_v48 = vld [vmem:[#allocation3 + $0x38] sm:$0xf]  ;;  %v4480_v0 = vld [vmem:[#allocation3 + $0x20] sm:$0xf] }
 0x374   : > { %v3350_v42 = vshll.u32 %v3282_v23, 16  ;;  %v3540_v58 = vunpack.c.l.b16 %v3510_v9  ;;  %v3758_v30 = vrot.slane %v3757_v20, 4  ;;  %v3772_v36 = vrot.slane %v3771_v11, 4  ;;  %v4588_v11 = vld [vmem:[#allocation3 + $0x24] sm:$0xf0] }
 0x375   : > { %4450 = vmatmul.msk.bf16.vlgmr.msra.gmra.mxu1 %vm2227_vm1, %v3414_v52  ;;  %v3361_v24 = vshrl.u32 %v3284_v7, 16  ;;  %v3364_v33 = vshll.u32 %v3284_v7, 16  ;;  %v3408_v31 = vunpack.c.l.b16 %v3331_v1  ;;  %v3409_v19 = vunpack.c.l.b16 %v3345_v28  ;;  %v3482_v52 = vld [vmem:[#allocation3 + $0x20] sm:$0xe]  ;;  %v6189_v56 = vld [vmem:[#allocation3 + $0x34] sm:$0x1] }
 0x376   : > { %v3762_v5 = vrot.slane %v3760_v43, 5  ;;  %v3776_v10 = vrot.slane %v3774_v6, 5  ;;  %v3349_v22 = vrot.slane %v3347_v25, 4  ;;  %v3352_v3 = vrot.slane %v3350_v42, 5  ;;  %v2573_v6 = vld [vmem:[#allocation3 + $0x48] sm:$0x1] }
 0x377   : > { %v3363_v29 = vrot.slane %v3361_v24, 4  ;;  %v3366_v54 = vrot.slane %v3364_v33, 5  ;;  %v3547_v47 = vpack.c.b16 %v3540_v58, %v3539_v14  ;;  %v3779_v41 = vshrl.u32 %v3714_v34, 16  ;;  %v6198_v42 = vld [vmem:[#allocation3 + $0x3c] sm:$0x1] }
 0x378   : > { %v3763_v37 = vsel %vm5225_vm2, %v3758_v30, %v3762_v5  ;;  %v3777_v61 = vsel %vm5225_vm2, %v3772_v36, %v3776_v10  ;;  %v3782_v4 = vshll.u32 %v3714_v34, 16  ;;  %v3793_v46 = vshrl.u32 %v3716_v48, 16  ;;  %v2604_v58 = vld [vmem:[#allocation3 + $0x4c] sm:$0x1]  ;;  %v3286_v33 = vld [vmem:[#allocation3 + $0x38] sm:$0xf] }
 0x379   : > { %4510 = vmatmul.msk.bf16.vlgmr.msra.gmra.mxu2 %vm2227_vm1, %v3846_v62  ;;  %v3796_v8 = vshll.u32 %v3716_v48, 16  ;;  %v4456_v44 = vrot.slane %v3481_v18, 9  ;;  %v3513_v60 = vrot.slane %v6149_v38, 5  ;;  %v4457_v40 = vrot.slane %v3482_v52, 9  ;;  %v4595_v34 = vld [vmem:[%s6431_s9 + $0x80] sm:$0xff] }
 0x37a   : > { %v3415_v15 = vpack.c.b16 %v3409_v19, %v3408_v31  ;;  %v3517_v50 = vrot.slane %v6152_v35, 5  ;;  %v3353_v53 = vor.u32 %v3352_v3, %v3349_v22  ;;  %v3367_v16 = vor.u32 %v3366_v54, %v3363_v29  ;;  %v3288_v31 = vld [vmem:[#allocation3 + $0x40] sm:$0xf]  ;;  %4014 = vmatpush.bf16.msrb.mxu1 %v4595_v34 }
 0x37b   : > { %v3840_v2 = vunpack.c.l.b16 %v3763_v37  ;;  %v3841_v63 = vunpack.c.l.b16 %v3777_v61  ;;  %v3356_v62 = vshll.u32 %v6179_v21, 16  ;;  %v3370_v20 = vshll.u32 %v6181_v49, 16 }
 0x37c   : > { %4498 = vmatmul.msk.bf16.vlgmr.msrb.gmra.mxu0 %vm2227_vm1, %v4477_v27  ;;  %v3781_v23 = vrot.slane %v3779_v41, 4  ;;  %v3784_v9 = vrot.slane %v3782_v4, 5  ;;  %v3795_v38 = vrot.slane %v3793_v46, 4  ;;  %v3798_v57 = vrot.slane %v3796_v8, 5 }
 0x37d   : > { %v2602_v35 = vsel %vm5106_vm6, 0, %v2601_v59  ;;  %v3514_v7 = vsel %vm5286_vm10, %v4456_v44, %v3513_v60  ;;  %v3518_v27 = vsel %vm5286_vm10, %v4457_v40, %v3517_v50  ;;  %v3354_v14 = vrot.slane %v3353_v53, 4  ;;  %v3718_v44 = vld [vmem:[#allocation3 + $0x40] sm:$0xf]  ;;  %v3483_v50 = vld [vmem:[#allocation3 + $0x28] sm:$0xe] }
 0x37e   : > { %v3368_v43 = vrot.slane %v3367_v16, 4  ;;  %2603 = vst [vmem:[#allocation3 + $0x44] sm:$0x1] %v2602_v35  ;;  %v2678_v1 = vrot.slane %v6041_v39, 4  ;;  %v3847_v28 = vpack.c.b16 %v3841_v63, %v3840_v2  ;;  %v4481_v25 = vor.u32 %v4588_v11, %v4480_v0 }
 0x37f   : > { %v3358_v30 = vrot.slane %v3356_v62, 5  ;;  %v3372_v36 = vrot.slane %v3370_v20, 5  ;;  %v3785_v24 = vor.u32 %v3784_v9, %v3781_v23  ;;  %v3799_v18 = vor.u32 %v3798_v57, %v3795_v38 }
 0x380   : > { %v3541_v19 = vunpack.c.l.b16 %v3514_v7  ;;  %v3542_v5 = vunpack.c.l.b16 %v3518_v27  ;;  %v3788_v10 = vshll.u32 %v6189_v56, 16  ;;  %v2574_v39 = vsel %vm5097_vm5, 0, %v2573_v6  ;;  %v6224_v7 = vld [vmem:[#allocation3 + $0x3c] sm:$0x1] }
 0x381   : > { %v3359_v48 = vsel %vm5225_vm2, %v3354_v14, %v3358_v30  ;;  %v3373_v52 = vsel %vm5225_vm2, %v3368_v43, %v3372_v36  ;;  %v3802_v22 = vshll.u32 %v6198_v42, 16  ;;  %2575 = vst [vmem:[#allocation3 + $0x48] sm:$0x1] %v2574_v39  ;;  %v2605_v3 = vsel %vm5106_vm6, 0, %v2604_v58 }
 0x382   : > { %v3375_v29 = vshrl.u32 %v3286_v33, 16  ;;  %v3378_v54 = vshll.u32 %v3286_v33, 16  ;;  %v3392_v37 = vshll.u32 %v3288_v31, 16  ;;  %2606 = vst [vmem:[#allocation3 + $0x4c] sm:$0x1] %v2605_v3  ;;  %v3786_v61 = vrot.slane %v3785_v24, 4 }
 0x383   : > { %4470 = vmatmul.msk.bf16.vlgmr.msra.gmra.mxu3 %vm2227_vm1, %v3547_v47  ;;  %v3389_v47 = vshrl.u32 %v3288_v31, 16  ;;  %v3800_v41 = vrot.slane %v3799_v18, 4  ;;  %v3548_v4 = vpack.c.b16 %v3542_v5, %v3541_v19  ;;  %v3790_v46 = vrot.slane %v3788_v10, 5  ;;  %v4484_v24 = vld [vmem:[#allocation3 + $0x30] sm:$0xf] }
 0x384   : > { %v3410_v60 = vunpack.c.l.b16 %v3359_v48  ;;  %v3411_v40 = vunpack.c.l.b16 %v3373_v52  ;;  %v3377_v16 = vrot.slane %v3375_v29, 4  ;;  %v3380_v59 = vrot.slane %v3378_v54, 5  ;;  %v4589_v18 = vld [vmem:[#allocation3 + $0x34] sm:$0xf0] }
 0x385   : > { %4451 = vmatmul.msk.bf16.gmra.mxu1 %vm2227_vm1, %v3415_v15  ;;  %v2743_v8 = vld [vmem:[#allocation3 + $0x44] sm:$0x1]  ;;  %v3804_v15 = vrot.slane %v3802_v22, 5  ;;  %v3391_v2 = vrot.slane %v3389_v47, 4  ;;  %v3394_v63 = vrot.slane %v3392_v37, 5  ;;  %v3791_v0 = vsel %vm5225_vm2, %v3786_v61, %v3790_v46 }
 0x386   : > { %v2744_v53 = vsel %vm5097_vm5, %v2678_v1, %v2743_v8  ;;  %v3807_v20 = vshrl.u32 %v3718_v44, 16  ;;  %v3810_v11 = vshll.u32 %v3718_v44, 16  ;;  %v4458_v23 = vrot.slane %v3483_v50, 9 }
 0x387   : > { %2745 = vst [vmem:[#allocation3 + $0x44] sm:$0x1] %v2744_v53  ;;  %v3805_v62 = vsel %vm5225_vm2, %v3800_v41, %v3804_v15  ;;  %v3521_v9 = vrot.slane %v6179_v21, 5  ;;  %v4459_v38 = vrot.slane %v3484_v12, 9  ;;  %v3416_v55 = vpack.c.b16 %v3411_v40, %v3410_v60 }
 0x388   : > { %v3720_v57 = vld [vmem:[#allocation3 + $0x48] sm:$0xf]  ;;  %v3525_v35 = vrot.slane %v6181_v49, 5  ;;  %v3842_v43 = vunpack.c.l.b16 %v3791_v0  ;;  %v3843_v6 = vunpack.c.l.b16 %v3805_v62  ;;  %v3381_v1 = vor.u32 %v3380_v59, %v3377_v16  ;;  %v3485_v59 = vld [vmem:[#allocation3 + $0x38] sm:$0xe] }
 0x389   : > { %4511 = vmatmul.msk.bf16.gmra.mxu2 %vm2227_vm1, %v3847_v28  ;;  %v3821_v27 = vshrl.u32 %v3720_v57, 16  ;;  %v3824_v14 = vshll.u32 %v3720_v57, 16  ;;  %v3395_v28 = vor.u32 %v3394_v63, %v3391_v2  ;;  %v3812_v58 = vrot.slane %v3810_v11, 5  ;;  %v6234_v34 = vld [vmem:[#allocation3 + $0x4c] sm:$0x1] }
 0x38a   : > { %v3384_v21 = vshll.u32 %v6224_v7, 16  ;;  %v3522_v49 = vsel %vm5286_vm10, %v4458_v23, %v3521_v9  ;;  %v3848_v31 = vpack.c.b16 %v3843_v6, %v3842_v43  ;;  %v3526_v19 = vsel %vm5286_vm10, %v4459_v38, %v3525_v35  ;;  %v3486_v2 = vld [vmem:[#allocation3 + $0x40] sm:$0xe]  ;;  %v3912_v57 = vld [vmem:[#allocation3 + $0x18] sm:$0xe] }
 0x38b   : > { %v3823_v30 = vrot.slane %v3821_v27, 4  ;;  %v3826_v36 = vrot.slane %v3824_v14, 5  ;;  %v3382_v5 = vrot.slane %v3381_v1, 4  ;;  %v3396_v48 = vrot.slane %v3395_v28, 4  ;;  %v4590_v35 = vld [vmem:[#allocation3 + $0x44] sm:$0xf0] }
 0x38c   : > { %4499 = vmatmul.msk.bf16.gmra.mxu0 %vm2227_vm1, %v4481_v25  ;;  %v3809_v25 = vrot.slane %v3807_v20, 4  ;;  %v3830_v3 = vshll.u32 %v6234_v34, 16  ;;  %v4485_v29 = vor.u32 %v4589_v18, %v4484_v24  ;;  %v3386_v54 = vrot.slane %v3384_v21, 5  ;;  %v3911_v20 = vld [vmem:[#allocation3 + $0x10] sm:$0xe] }
 0x38d   : > { %v3827_v22 = vor.u32 %v3826_v36, %v3823_v30  ;;  %v3543_v61 = vunpack.c.l.b16 %v3522_v49  ;;  %v3544_v41 = vunpack.c.l.b16 %v3526_v19  ;;  %v4460_v11 = vrot.slane %v3485_v59, 9  ;;  %v3913_v49 = vld [vmem:[#allocation3 + $0x20] sm:$0xe] }
 0x38e   : > { %v3289_v33 = vld [vmem:[#allocation3 + $0x44] sm:$0x1]  ;;  %v3813_v52 = vor.u32 %v3812_v58, %v3809_v25  ;;  %v3832_v60 = vrot.slane %v3830_v3, 5  ;;  %v3529_v23 = vrot.slane %v6224_v7, 5  ;;  %v4461_v9 = vrot.slane %v3486_v2, 9  ;;  %v4684_v3 = vld [vmem:[%s4793_s17] sm:$0xff] }
 0x38f   : > { %v3398_v10 = vshll.u32 %v3289_v33, 16  ;;  %v6232_v39 = vld [vmem:[#allocation3 + $0x44] sm:$0x1]  ;;  %v3828_v44 = vrot.slane %v3827_v22, 4  ;;  %v3549_v12 = vpack.c.b16 %v3544_v41, %v3543_v61  ;;  %v3533_v38 = vrot.slane %v3289_v33, 5 }
 0x390   : > { %v3816_v37 = vshll.u32 %v6232_v39, 16  ;;  %v3814_v8 = vrot.slane %v3813_v52, 4  ;;  %v4514_v27 = vrot.slane %v3911_v20, 9  ;;  %v3937_v14 = vrot.slane %v6123_v51, 5  ;;  %v3914_v33 = vld [vmem:[#allocation3 + $0x28] sm:$0xe] }
 0x391   : > { %v3400_v47 = vrot.slane %v3398_v10, 5  ;;  %v3833_v16 = vsel %vm5225_vm2, %v3828_v44, %v3832_v60  ;;  %v4515_v43 = vrot.slane %v3912_v57, 9  ;;  %v3941_v6 = vrot.slane %v6128_v32, 5  ;;  %v6276_v61 = vld [vmem:[%s6432_s10] ss:$0 sm:$0xff] }
 0x392   : > { %v3818_v40 = vrot.slane %v3816_v37, 5  ;;  %v3845_v62 = vunpack.c.l.b16 %v3833_v16  ;;  %v3530_v28 = vsel %vm5286_vm10, %v4460_v11, %v3529_v23  ;;  %v3534_v7 = vsel %vm5286_vm10, %v4461_v9, %v3533_v38  ;;  %v3917_v57 = vld [vmem:[#allocation3 + $0x40] sm:$0xe] }
 0x393   : > { %4471 = vmatmul.msk.bf16.gmra.mxu3 %vm2227_vm1, %v3548_v4  ;;  %v3387_v4 = vsel %vm5225_vm2, %v3382_v5, %v3386_v54  ;;  %v3401_v46 = vsel %vm5225_vm2, %v3396_v48, %v3400_v47  ;;  %v3545_v25 = vunpack.c.l.b16 %v3530_v28  ;;  %v3546_v58 = vunpack.c.l.b16 %v3534_v7 }
 0x394   : > { %v3412_v15 = vunpack.c.l.b16 %v3387_v4  ;;  %v3413_v50 = vunpack.c.l.b16 %v3401_v46  ;;  %v3819_v53 = vsel %vm5225_vm2, %v3814_v8, %v3818_v40  ;;  %v3938_v30 = vsel %vm5286_vm10, %v4514_v27, %v3937_v14  ;;  %v3915_v46 = vld [vmem:[#allocation3 + $0x30] sm:$0xe]  ;;  %v3916_v8 = vld [vmem:[#allocation3 + $0x38] sm:$0xe] }
 0x395   : > { %4452 = vmatmul.msk.bf16.gmra.mxu1 %vm2227_vm1, %v3416_v55  ;;  %v3844_v0 = vunpack.c.l.b16 %v3819_v53  ;;  %v4488_v55 = vld [vmem:[#allocation3 + $0x40] sm:$0xf]  ;;  %v3942_v51 = vsel %vm5286_vm10, %v4515_v43, %v3941_v6  ;;  %v3971_v32 = vunpack.c.l.b16 %v3938_v30  ;;  %v3550_v21 = vpack.c.b16 %v3546_v58, %v3545_v25  ;;  %v4688_v30 = vld [vmem:[%s4793_s17 + $0x20] sm:$0xff] }
 0x396   : > { %v3417_v63 = vpack.c.b16 %v3413_v50, %v3412_v15  ;;  %v4489_v1 = vor.u32 %v4590_v35, %v4488_v55  ;;  %v3972_v36 = vunpack.c.l.b16 %v3942_v51  ;;  %v3945_v19 = vrot.slane %v6161_v17, 5  ;;  %v3918_v55 = vld [vmem:[#allocation3 + $0x48] sm:$0xe]  ;;  %v4689_v51 = vld [vmem:[%s4793_s17 + $0x28] sm:$0xff] }
 0x397   : > { %v3849_v45 = vpack.c.b16 %v3845_v62, %v3844_v0  ;;  %v4517_v5 = vrot.slane %v3914_v33, 9  ;;  %v3949_v10 = vrot.slane %v6163_v26, 5  ;;  %v4518_v60 = vrot.slane %v3915_v46, 9  ;;  %v4686_v0 = vld [vmem:[%s4793_s17 + $0x10] sm:$0xff]  ;;  %v4687_v62 = vld [vmem:[%s4793_s17 + $0x18] sm:$0xff] }
 0x398   : > { %v3979_v18 = vpack.c.b16 %v3972_v36, %v3971_v32  ;;  %v3953_v40 = vrot.slane %v6189_v56, 5  ;;  %v4519_v15 = vrot.slane %v3916_v8, 9  ;;  %v3957_v50 = vrot.slane %v6198_v42, 5 }
 0x399   : > { %4512 = vmatmul.msk.bf16.gmra.mxu2 %vm2227_vm1, %v3848_v31  ;;  %v4516_v31 = vrot.slane %v3913_v49, 9  ;;  %v3950_v22 = vsel %vm5286_vm10, %v4517_v5, %v3949_v10  ;;  %v4045_v20 = vpack.c.bf16 %v4687_v62, %v4686_v0  ;;  %v3961_v27 = vrot.slane %v6232_v39, 5 }
 0x39a   : > { %v3974_v37 = vunpack.c.l.b16 %v3950_v22  ;;  %v3954_v16 = vsel %vm5286_vm10, %v4518_v60, %v3953_v40  ;;  %v3958_v59 = vsel %vm5286_vm10, %v4519_v15, %v3957_v50  ;;  %v4521_v14 = vrot.slane %v3918_v55, 9  ;;  %v4690_v22 = vld [vmem:[%s4793_s17 + $0x30] sm:$0xff] }
 0x39b   : > { %v3946_v52 = vsel %vm5286_vm10, %v4516_v31, %v3945_v19  ;;  %v3975_v11 = vunpack.c.l.b16 %v3954_v16  ;;  %v3976_v56 = vunpack.c.l.b16 %v3958_v59  ;;  %v3965_v43 = vrot.slane %v6234_v34, 5 }
 0x39c   : > { %4500 = vmatmul.msk.bf16.gmra.mxu0 %vm2227_vm1, %v4485_v29  ;;  %v4685_v29 = vld [vmem:[%s4793_s17 + $0x8] sm:$0xff]  ;;  %v3973_v47 = vunpack.c.l.b16 %v3946_v52  ;;  %v4046_v32 = vpack.c.bf16 %v4689_v51, %v4688_v30 }
 0x39d   : > { %v4044_v54 = vpack.c.bf16 %v4685_v29, %v4684_v3  ;;  %v3981_v23 = vpack.c.b16 %v3976_v56, %v3975_v11  ;;  %v3966_v7 = vsel %vm5286_vm10, %v4521_v14, %v3965_v43  ;;  %v4691_v3 = vld [vmem:[%s4793_s17 + $0x38] sm:$0xff] }
 0x39e   : > { %v3980_v26 = vpack.c.b16 %v3974_v37, %v3973_v47  ;;  %v3978_v39 = vunpack.c.l.b16 %v3966_v7  ;;  %v4047_v29 = vpack.c.bf16 %v4691_v3, %v4690_v22 }
 0x3a3   : > { %4472 = vmatmul.msk.bf16.gmra.mxu3 %vm2227_vm1, %v3549_v12 }
 0x3a5   : > { %4453 = vmatmul.msk.bf16.gmra.mxu1 %vm2227_vm1, %v3417_v63 }
 0x3a9   : > { %4513 = vmatmul.msk.bf16.gmra.mxu2 %vm2227_vm1, %v3849_v45  ;;  %v4520_v45 = vrot.slane %v3917_v57, 9 }
 0x3ab   : > { %v3962_v28 = vsel %vm5286_vm10, %v4520_v45, %v3961_v27 }
 0x3ac   : > { %4501 = vmatmul.msk.bf16.gmra.mxu0 %vm2227_vm1, %v4489_v1  ;;  %v3977_v36 = vunpack.c.l.b16 %v3962_v28 }
 0x3b2   : > { %v2812_v24 = vpop.f32.mrf.mxu1 }
 0x3b3   : > { %4473 = vmatmul.msk.bf16.gmra.mxu3 %vm2227_vm1, %v3550_v21  ;;  %v2835_v41 = vadd.f32 %v6276_v61, %v2812_v24  ;;  %v3982_v24 = vpack.c.b16 %v3978_v39, %v3977_v36 }
 0x3b5   : > { %4530 = vmatmul.msk.bf16.vlgmr.msrb.gmra.mxu1 %vm2227_vm1, %v3979_v18 }
 0x3b9   : > { %v3153_v21 = vpop.f32.mrf.mxu0 }
 0x3ba   : > { %v2814_v48 = vpop.f32.mrf.mxu1 }
 0x3bb   : > { %v2836_v53 = vadd.f32 %v6276_v61, %v2814_v48 }
 0x3bc   : > { %v3246_v18 = vpop.f32.mrf.mxu2 }
 0x3c1   : > { %v3155_v19 = vpop.f32.mrf.mxu0 }
 0x3c2   : > { %v2817_v17 = vpop.f32.mrf.mxu1 }
 0x3c3   : > { %4538 = vmatmul.msk.bf16.vlgmr.msrb.gmra.mxu3 %vm468_vm0, %v4044_v54  ;;  %v2837_v9 = vadd.f32 %v6276_v61, %v2817_v17 }
 0x3c4   : > { %v3248_v48 = vpop.f32.mrf.mxu2 }
 0x3c5   : > { %4531 = vmatmul.msk.bf16.gmra.mxu1 %vm2227_vm1, %v3980_v26 }
 0x3c6   : > { %v3020_v4 = vpop.f32.mrf.mxu3 }
 0x3c7   : > { %v6281_v44 = vadd.f32 %v3020_v4, %v2835_v41 }
 0x3c9   : > { %v3158_v37 = vpop.f32.mrf.mxu0  ;;  %v3173_v43 = vadd.f32 %v3153_v21, %v6281_v44  ;;  %v6364_v44 = vld [vmem:[%s6434_s12] ss:$0 sm:$0xff] }
 0x3ca   : > { %v2819_v12 = vpop.f32.mrf.mxu1 }
 0x3cb   : > { %v2838_v1 = vadd.f32 %v6276_v61, %v2819_v12  ;;  %v3266_v7 = vadd.f32 %v3246_v18, %v3173_v43 }
 0x3cc   : > { %v3251_v41 = vpop.f32.mrf.mxu2 }
 0x3ce   : > { %v3022_v2 = vpop.f32.mrf.mxu3 }
 0x3cf   : > { %v6290_v63 = vadd.f32 %v3022_v2, %v2836_v53 }
 0x3d1   : > { %v3160_v40 = vpop.f32.mrf.mxu0  ;;  %v3174_v51 = vadd.f32 %v3155_v19, %v6290_v63 }
 0x3d2   : > { %v2822_v42 = vpop.f32.mrf.mxu1 }
 0x3d3   : > { %4539 = vmatmul.msk.bf16.gmra.mxu3 %vm468_vm0, %v4045_v20  ;;  %v2839_v49 = vadd.f32 %v6276_v61, %v2822_v42 }
 0x3d4   : > { %v3253_v15 = vpop.f32.mrf.mxu2 }
 0x3d5   : > { %4532 = vmatmul.msk.bf16.gmra.mxu1 %vm2227_vm1, %v3981_v23 }
 0x3d6   : > { %v3025_v38 = vpop.f32.mrf.mxu3 }
 0x3d7   : > { %v6297_v35 = vadd.f32 %v3025_v38, %v2837_v9 }
 0x3d9   : > { %v6327_v53 = vpop.f32.mrf.mxu0  ;;  %v3175_v21 = vadd.f32 %v3158_v37, %v6297_v35 }
 0x3da   : > { %v2824_v6 = vpop.f32.mrf.mxu1 }
 0x3db   : > { %v2840_v5 = vadd.f32 %v6276_v61, %v2824_v6 }
 0x3dc   : > { %v6329_v59 = vpop.f32.mrf.mxu2 }
 0x3de   : > { %v3027_v25 = vpop.f32.mrf.mxu3 }
 0x3df   : > { %v6306_v58 = vadd.f32 %v3027_v25, %v2838_v1 }
 0x3e1   : > { %v6333_v62 = vpop.f32.mrf.mxu0 }
 0x3e2   : > { %v2827_v34 = vpop.f32.mrf.mxu1 }
 0x3e3   : > { %4540 = vmatmul.msk.bf16.gmra.mxu3 %vm468_vm0, %v4046_v32  ;;  %v2841_v47 = vadd.f32 %v6276_v61, %v2827_v34 }
 0x3e4   : > { %v6335_v11 = vpop.f32.mrf.mxu2 }
 0x3e5   : > { %4533 = vmatmul.msk.bf16.gmra.mxu1 %vm2227_vm1, %v3982_v24  ;;  %v3267_v24 = vadd.f32 %v3248_v48, %v3174_v51  ;;  %v3268_v48 = vadd.f32 %v3251_v41, %v3175_v21 }
 0x3e6   : > { %v3030_v13 = vpop.f32.mrf.mxu3 }
 0x3e7   : > { %v6313_v33 = vadd.f32 %v3030_v13, %v2839_v49 }
 0x3e9   : > { %v6339_v56 = vpop.f32.mrf.mxu0 }
 0x3ea   : > { %v2829_v31 = vpop.f32.mrf.mxu1 }
 0x3eb   : > { %v2842_v46 = vadd.f32 %v6276_v61, %v2829_v31 }
 0x3ec   : > { %v6341_v23 = vpop.f32.mrf.mxu2 }
 0x3ee   : > { %v3032_v10 = vpop.f32.mrf.mxu3 }
 0x3ef   : > { %v6316_v52 = vadd.f32 %v3032_v10, %v2840_v5 }
 0x3f1   : > { %v6347_v57 = vpop.f32.mrf.mxu0 }
 0x3f2   : > { %v3451_v54 = vpop.f32.mrf.mxu1 }
 0x3f3   : > { %4541 = vmatmul.msk.bf16.gmra.mxu3 %vm468_vm0, %v4047_v29  ;;  %v3471_v25 = vadd.f32 %v3451_v54, %v3266_v7 }
 0x3f4   : > { %v6349_v55 = vpop.f32.mrf.mxu2 }
 0x3f6   : > { %v3035_v17 = vpop.f32.mrf.mxu3 }
 0x3f7   : > { %v6322_v26 = vadd.f32 %v3035_v17, %v2841_v47  ;;  %v3176_v47 = vadd.f32 %v3160_v40, %v6306_v58 }
 0x3f9   : > { %v3678_v14 = vpop.f32.mrf.mxu0 }
 0x3fa   : > { %v3453_v4 = vpop.f32.mrf.mxu1 }
 0x3fb   : > { %v3472_v13 = vadd.f32 %v3453_v4, %v3267_v24 }
 0x3fc   : > { %v3883_v6 = vpop.f32.mrf.mxu2 }
 0x3fe   : > { %v3037_v8 = vpop.f32.mrf.mxu3 }
 0x3ff   : > { %v6325_v60 = vadd.f32 %v3037_v8, %v2842_v46 }
 0x401   : > { %v3680_v30 = vpop.f32.mrf.mxu0 }
 0x402   : > { %v3456_v50 = vpop.f32.mrf.mxu1 }
 0x403   : > { %v3473_v54 = vadd.f32 %v3456_v50, %v3268_v48 }
 0x404   : > { %v3885_v39 = vpop.f32.mrf.mxu2 }
 0x406   : > { %v3584_v12 = vpop.f32.mrf.mxu3 }
 0x407   : > { %v3604_v32 = vadd.f32 %v3584_v12, %v3471_v25 }
 0x409   : > { %v3698_v49 = vadd.f32 %v3678_v14, %v3604_v32  ;;  %v3683_v5 = vpop.f32.mrf.mxu0 }
 0x40a   : > { %v3458_v16 = vpop.f32.mrf.mxu1 }
 0x40b   : > { %v3903_v31 = vadd.f32 %v3883_v6, %v3698_v49 }
 0x40c   : > { %v3888_v22 = vpop.f32.mrf.mxu2 }
 0x40e   : > { %v3586_v2 = vpop.f32.mrf.mxu3 }
 0x40f   : > { %v3605_v18 = vadd.f32 %v3586_v2, %v3472_v13  ;;  %v3269_v2 = vadd.f32 %v3253_v15, %v3176_v47 }
 0x411   : > { %v3699_v3 = vadd.f32 %v3680_v30, %v3605_v18  ;;  %v3685_v12 = vpop.f32.mrf.mxu0  ;;  %v3474_v43 = vadd.f32 %v3458_v16, %v3269_v2 }
 0x412   : > { %v6331_v0 = vpop.f32.mrf.mxu1 }
 0x413   : > { %v3904_v17 = vadd.f32 %v3885_v39, %v3699_v3  ;;  %v3178_v39 = vadd.f32 %v6333_v62, %v6316_v52  ;;  %v3179_v52 = vadd.f32 %v6339_v56, %v6322_v26  ;;  %v3180_v26 = vadd.f32 %v6347_v57, %v6325_v60 }
 0x414   : > { %v3890_v6 = vpop.f32.mrf.mxu2 }
 0x415   : > { %v3271_v13 = vadd.f32 %v6335_v11, %v3178_v39  ;;  %v3272_v48 = vadd.f32 %v6341_v23, %v3179_v52  ;;  %v3273_v23 = vadd.f32 %v6349_v55, %v3180_v26 }
 0x416   : > { %v3589_v20 = vpop.f32.mrf.mxu3 }
 0x417   : > { %v3606_v37 = vadd.f32 %v3589_v20, %v3473_v54 }
 0x419   : > { %v3700_v14 = vadd.f32 %v3683_v5, %v3606_v37  ;;  %v3688_v32 = vpop.f32.mrf.mxu0 }
 0x41a   : > { %v6337_v61 = vpop.f32.mrf.mxu1 }
 0x41b   : > { %v3905_v40 = vadd.f32 %v3888_v22, %v3700_v14 }
 0x41e   : > { %v3591_v42 = vpop.f32.mrf.mxu3 }
 0x41f   : > { %v3607_v58 = vadd.f32 %v3591_v42, %v3474_v43 }
 0x421   : > { %v3701_v15 = vadd.f32 %v3685_v12, %v3607_v58 }
 0x422   : > { %v6343_v9 = vpop.f32.mrf.mxu1 }
 0x423   : > { %v3906_v42 = vadd.f32 %v3890_v6, %v3701_v15 }
 0x426   : > { %v6345_v38 = vpop.f32.mrf.mxu3 }
 0x42a   : > { %v6351_v45 = vpop.f32.mrf.mxu1 }
 0x42e   : > { %v6353_v27 = vpop.f32.mrf.mxu3 }
 0x432   : > { %v4016_v1 = vpop.f32.mrf.mxu1 }
 0x433   : > { %v4036_v19 = vadd.f32 %v4016_v1, %v3903_v31  ;;  %v3177_v1 = vadd.f32 %v6327_v53, %v6313_v33  ;;  %v3893_v33 = vpop.f32.mrf.mxu2  ;;  %v3690_v31 = vpop.f32.mrf.mxu0 }
 0x435   : > { %v3270_v30 = vadd.f32 %v6329_v59, %v3177_v1 }
 0x436   : > { %v6356_v28 = vpop.f32.mrf.mxu3 }
 0x437   : > { %v3475_v16 = vadd.f32 %v6331_v0, %v3270_v30  ;;  %v3476_v0 = vadd.f32 %v6337_v61, %v3271_v13  ;;  %v3477_v61 = vadd.f32 %v6343_v9, %v3272_v48 }
 0x439   : > { %v3608_v53 = vadd.f32 %v6345_v38, %v3475_v16  ;;  %v3609_v62 = vadd.f32 %v6353_v27, %v3476_v0  ;;  %v3610_v56 = vadd.f32 %v6356_v28, %v3477_v61 }
 0x43a   : > { %v4018_v34 = vpop.f32.mrf.mxu1 }
 0x43b   : > { %v4037_v46 = vadd.f32 %v4018_v34, %v3904_v17  ;;  %v3702_v21 = vadd.f32 %v3688_v32, %v3608_v53  ;;  %v3703_v22 = vadd.f32 %v3690_v31, %v3609_v62 }
 0x43d   : > { %v3907_v38 = vadd.f32 %v3893_v33, %v3702_v21 }
 0x43e   : > { %v6359_v36 = vpop.f32.mrf.mxu3 }
 0x442   : > { %v4021_v35 = vpop.f32.mrf.mxu1 }
 0x443   : > { %v4038_v7 = vadd.f32 %v4021_v35, %v3905_v40 }
 0x446   : > { %v4081_v63 = vpop.f32.mrf.mxu3 }
 0x447   : > { %v4082_v10 = vadd.f32 %v6364_v44, %v4081_v63 }
 0x449   : > { %v4101_v29 = vadd.f32 %v4082_v10, %v4036_v19  ;;  %v3895_v10 = vpop.f32.mrf.mxu2 }
 0x44a   : > { %v4023_v50 = vpop.f32.mrf.mxu1  ;;  %v3908_v27 = vadd.f32 %v3895_v10, %v3703_v22 }
 0x44b   : > { %4109 = vst.msk [vmem:[%s6373_s22] sm:$0xff] %vm2227_vm1, %v4101_v29  ;;  %v4039_v49 = vadd.f32 %v4023_v50, %v3906_v42  ;;  %v3693_v29 = vpop.f32.mrf.mxu0 }
 0x44c   : > { %v3704_v37 = vadd.f32 %v3693_v29, %v3610_v56 }
 0x44e   : > { %v4083_v4 = vpop.f32.mrf.mxu3 }
 0x44f   : > { %v4084_v8 = vadd.f32 %v6364_v44, %v4083_v4 }
 0x451   : > { %v4102_v41 = vadd.f32 %v4084_v8, %v4037_v46  ;;  %v3898_v4 = vpop.f32.mrf.mxu2  ;;  %v3478_v46 = vadd.f32 %v6351_v45, %v3273_v23 }
 0x452   : > { %v4026_v34 = vpop.f32.mrf.mxu1  ;;  %v3909_v57 = vadd.f32 %v3898_v4, %v3704_v37 }
 0x453   : > { %4110 = vst.msk [vmem:[%s6373_s22 + $0x8] sm:$0xff] %vm2227_vm1, %v4102_v41  ;;  %v4040_v63 = vadd.f32 %v4026_v34, %v3907_v38  ;;  %v3611_v60 = vadd.f32 %v6359_v36, %v3478_v46  ;;  %v3695_v2 = vpop.f32.mrf.mxu0 }
 0x455   : > { %v3705_v14 = vadd.f32 %v3695_v2, %v3611_v60 }
 0x456   : > { %v4086_v20 = vpop.f32.mrf.mxu3 }
 0x457   : > { %v4087_v25 = vadd.f32 %v6364_v44, %v4086_v20 }
 0x459   : > { %v4103_v51 = vadd.f32 %v4087_v25, %v4038_v7  ;;  %v3900_v55 = vpop.f32.mrf.mxu2 }
 0x45a   : > { %v4028_v11 = vpop.f32.mrf.mxu1  ;;  %v3910_v6 = vadd.f32 %v3900_v55, %v3705_v14 }
 0x45b   : > { %4111 = vst.msk [vmem:[%s6373_s22 + $0x10] sm:$0xff] %vm2227_vm1, %v4103_v51  ;;  %v4041_v54 = vadd.f32 %v4028_v11, %v3908_v27 }
 0x45e   : > { %v4088_v24 = vpop.f32.mrf.mxu3 }
 0x45f   : > { %v4089_v59 = vadd.f32 %v6364_v44, %v4088_v24 }
 0x461   : > { %v4104_v18 = vadd.f32 %v4089_v59, %v4039_v49 }
 0x462   : > { %v4031_v9 = vpop.f32.mrf.mxu1 }
 0x463   : > { %4112 = vst.msk [vmem:[%s6373_s22 + $0x18] sm:$0xff] %vm2227_vm1, %v4104_v18  ;;  %v4042_v8 = vadd.f32 %v4031_v9, %v3909_v57 }
 0x466   : > { %v4091_v5 = vpop.f32.mrf.mxu3 }
 0x467   : > { %v4092_v19 = vadd.f32 %v6364_v44, %v4091_v5 }
 0x469   : > { %v4105_v3 = vadd.f32 %v4092_v19, %v4040_v63 }
 0x46a   : > { %v4033_v43 = vpop.f32.mrf.mxu1 }
 0x46b   : > { %4113 = vst.msk [vmem:[%s6373_s22 + $0x20] sm:$0xff] %vm2227_vm1, %v4105_v3  ;;  %v4043_v45 = vadd.f32 %v4033_v43, %v3910_v6 }
 0x46e   : > { %v4093_v35 = vpop.f32.mrf.mxu3 }
 0x46f   : > { %v4094_v47 = vadd.f32 %v6364_v44, %v4093_v35 }
 0x471   : > { %v4106_v17 = vadd.f32 %v4094_v47, %v4041_v54 }
 0x473   : > { %4114 = vst.msk [vmem:[%s6373_s22 + $0x28] sm:$0xff] %vm2227_vm1, %v4106_v17 }
 0x476   : > { %v4096_v28 = vpop.f32.mrf.mxu3 }
 0x477   : > { %v4097_v12 = vadd.f32 %v6364_v44, %v4096_v28 }
 0x479   : > { %v4107_v41 = vadd.f32 %v4097_v12, %v4042_v8 }
 0x47b   : > { %4115 = vst.msk [vmem:[%s6373_s22 + $0x30] sm:$0xff] %vm2227_vm1, %v4107_v41 }
 0x47e   : > { %v4098_v50 = vpop.f32.mrf.mxu3 }
 0x47f   : > { %v4099_v1 = vadd.f32 %v6364_v44, %v4098_v50 }
 0x481   : > { %v4108_v58 = vadd.f32 %v4099_v1, %v4043_v45 }
 0x483   : > { %4116 = vst.msk [vmem:[%s6373_s22 + $0x38] sm:$0xff] %vm2227_vm1, %v4108_v58 }
 0x484 PF: > { %s23_s25 = sadd.s32 1, %s4698_s25  }
 0x485   : > { %p20_p4 = scmp.ge.s32.totalorder %s23_s25, 4  }
 0x487   :  { %22 = sbr.rel (!%p20_p4) target bundleno = 1 (0x1), region = 111 }

// kernel: midblock_forward.5
= control target key start
LH: loop header
LB: loop body
LE: loop exit
PB: predicated region body
PF: predicated region fallthrough
CT: control target
= control target key end

     0   :  { %s6861_s0 = inlined_call_operand.vmem [shape: f32[2,64,32], index: 0, kind: input, shape index: {}]   ;;  %s6862_s1 = inlined_call_operand.vmem [shape: f32[2,1,32], index: 1, kind: input, shape index: {}]   ;;  %s6863_s2 = inlined_call_operand.vmem [shape: f32[1,32], index: 2, kind: input, shape index: {}]   ;;  %s6864_s3 = inlined_call_operand.vmem [shape: f32[1,32], index: 3, kind: input, shape index: {}]   ;;  %s6865_s4 = inlined_call_operand.vmem [shape: f32[32,32], index: 4, kind: input, shape index: {}]   ;;  %s6866_s5 = inlined_call_operand.vmem [shape: bf16[288,32], index: 5, kind: input, shape index: {}]   ;;  %s6867_s6 = inlined_call_operand.vmem [shape: f32[1,32], index: 6, kind: input, shape index: {}]   ;;  %s6868_s7 = inlined_call_operand.vmem [shape: f32[1,32], index: 7, kind: input, shape index: {}]   ;;  %s6869_s8 = inlined_call_operand.vmem [shape: f32[32,32], index: 8, kind: input, shape index: {}]   ;;  %s6870_s9 = inlined_call_operand.vmem [shape: bf16[288,32], index: 9, kind: input, shape index: {}]   ;;  %s6871_s10 = inlined_call_operand.vmem [shape: f32[1,32], index: 10, kind: input, shape index: {}]   ;;  %s6872_s11 = inlined_call_operand.vmem [shape: bf16[32,32], index: 11, kind: input, shape index: {}]   ;;  %s6873_s12 = inlined_call_operand.vmem [shape: f32[1,32], index: 12, kind: input, shape index: {}]   ;;  %s6874_s13 = inlined_call_operand.hbm [shape: f32[2,64,32], index: 13, kind: output, shape index: {}]  }
   0x1   :  { %6875 = sst [smem:[#allocation8_spill]] %s6861_s0 }
   0x2   :  { %6876 = sst [smem:[#allocation9_spill]] %s6862_s1 }
   0x3   :  { %18 = vsyncpa [#allocation5], 0 }
   0x4   :  { %20 = vsyncpa [#allocation5 + $0x1], 0  ;;  %s5011_s25 = smov 0   ;;  %s5013_s26 = smov 0  }
   0x5   :  { %s5015_s27 = smov 0   ;;  %s5017_s28 = smov 0  }
   0x6 LB: > { %s5032_s29 = sadd.s32 4294967295, %s4936_s28   ;;  %s4277_s30 = sadd.s32 4294967294, %s4936_s28   ;;  %s4936_s28 = sphi %s5017_s28, %s6948_s28   ;;  %s4932_s27 = sphi %s5015_s27, %s6947_s27   ;;  %s4928_s26 = sphi %s5013_s26, %s6946_s26   ;;  %s4924_s25 = sphi %s5011_s25, %s6945_s25  }
   0x7   : > { %s5036_s14 = sadd.s32 1, %s4936_s28   ;;  %s316_s15 = sadd.s32 1, %s4932_s27 }
   0x8   : > { %s313_s16 = ssub.s32 %s4936_s28, %s5036_s14  ;;  %p326_p0 = scmp.ne.s32.totalorder %s4932_s27, %s4928_s26 }
   0x9   : > { %p314_p1 = scmp.eq.s32.totalorder %s313_s16, 0  ;;  %p327_p2 = scmp.eq.s32.totalorder %s5032_s29, 1 }
   0xa   : > { %p332_p3 = scmp.ne.s32.totalorder %s4928_s26, %s4924_s25  ;;  %p333_p4 = scmp.eq.s32.totalorder %s4277_s30, 1 }
   0xb   : > { %s5047_s17 = scalar_select %p314_p1, %s4932_s27, %s316_s15  }
   0xc   : > { %p5049_p5 = por %p327_p2, %p326_p0  ;;  %p5053_p6 = por %p333_p4, %p332_p3 }
   0xd   : > { %6877 = sst [smem:[#allocation7_spill]] %s5047_s17  ;;  %p4280_p7 = scmp.ge.s32.totalorder %s4936_s28, 1 }
   0xe   : > { %p398_p8 = scmp.lt.s32.totalorder %s4936_s28, 3 }
  0x10   : > { %p399_p9 = pnand %p4280_p7, %p398_p8 }
  0x11   : > { %p445_p10 = scmp.lt.s32.totalorder (!%p399_p9), %s5032_s29, 1  ;;  %s6880_s0 = sld [smem:[#allocation8_spill]] (!%p399_p9) }
  0x12   : > { %402 = sbr.rel (%p399_p9) target bundleno = 1175 (0x497), region = 72  ;;  %s6919_s1 = sld [smem:[#allocation9_spill]] (!%p399_p9) }
  0x17   : > { %v467_v0 = vld [vmem:[%s6865_s4 + $0x18] sm:$0xff]  ;;  %v466_v1 = vld [vmem:[%s6865_s4 + $0x10] sm:$0xff]  ;;  %v465_v2 = vld [vmem:[%s6865_s4 + $0x8] sm:$0xff]  ;;  %s5070_s15 = scalar_select %p445_p10, %s5032_s29, 1  ;;  %vm468_vm0 = vcmask 261120  }
  0x18   : > { %534 = vmatpush.msra.mxu0 %v467_v0  ;;  %557 = vmatpush.msra.mxu1 %v467_v0  ;;  %v464_v3 = vld [vmem:[%s6865_s4] sm:$0xff] }
  0x19   : > { %s4681_s21 = sshll.u32 %s5070_s15, 6  ;;  %s452_s30 = scalar_lea.vmem %s6919_s1, %s5070_s15 }
  0x1a   : > { %535 = vmatpush.msra.mxu0 %v466_v1  ;;  %558 = vmatpush.msra.mxu1 %v466_v1  ;;  %s5079_s17 = scalar_lea.vmem %s6880_s0, %s4681_s21  ;;  %s4744_s21 = sshll.u32 %s5032_s29, 6 }
  0x1b   : > { %v5082_v4 = vld [vmem:[%s5079_s17] sm:$0xff]  ;;  %v5085_v5 = vld [vmem:[%s5079_s17 + $0x8] sm:$0xff]  ;;  %v5088_v6 = vld [vmem:[%s5079_s17 + $0x10] sm:$0xff]  ;;  %s4202_s24 = scalar_lea.hbm %s6874_s13, %s4744_s21 }
  0x1c   : > { %536 = vmatpush.msra.mxu0 %v465_v2  ;;  %559 = vmatpush.msra.mxu1 %v465_v2  ;;  %v5091_v7 = vld [vmem:[%s5079_s17 + $0x18] sm:$0xff]  ;;  %v469_v8 = vsel %vm468_vm0, %v5082_v4, 0.0  ;;  %v470_v9 = vsel %vm468_vm0, %v5085_v5, 0.0  ;;  %v472_v10 = vsel %vm468_vm0, %v5088_v6, 0.0  ;;  %v490_v11 = vmul.f32 %v5082_v4, %v5082_v4  ;;  %v5102_v12 = vld [vmem:[%s5079_s17 + $0x20] sm:$0xff]  ;;  %v5111_v17 = vld [vmem:[%s5079_s17 + $0x28] sm:$0xff] }
  0x1d   : > { %v471_v13 = vadd.f32 %v470_v9, %v469_v8  ;;  %v474_v14 = vsel %vm468_vm0, %v5091_v7, 0.0  ;;  %v491_v15 = vmul.f32 %v5085_v5, %v5085_v5  ;;  %v492_v16 = vmul.f32 %v5088_v6, %v5088_v6  ;;  %v5122_v24 = vld [vmem:[%s5079_s17 + $0x30] sm:$0xff]  ;;  %v5131_v31 = vld [vmem:[%s5079_s17 + $0x38] sm:$0xff]  ;;  %s4205_s20 = sshll.u32 %s4202_s24, 4  ;;  %s4894_s24 = scalar_lea.hbm %s6874_s13, 128  ;;  %s4206_s20 = int_to_ptr.hbm [resolvable:$true] %s4205_s20 }
  0x1e   : > { %537 = vmatpush.msra.mxu0 %v464_v3  ;;  %560 = vmatpush.msra.mxu1 %v464_v3  ;;  %v493_v19 = vmul.f32 %v5091_v7, %v5091_v7  ;;  %v476_v20 = vsel %vm468_vm0, %v5102_v12, 0.0  ;;  %v494_v21 = vmul.f32 %v5102_v12, %v5102_v12  ;;  %v498_v22 = vsel %vm468_vm0, %v490_v11, 0.0 }
  0x1f   : > { %v473_v18 = vadd.f32 %v472_v10, %v471_v13  ;;  %v499_v23 = vsel %vm468_vm0, %v491_v15, 0.0  ;;  %v501_v27 = vsel %vm468_vm0, %v492_v16, 0.0  ;;  %v478_v28 = vsel %vm468_vm0, %v5111_v17, 0.0 }
  0x20   : > { %v500_v26 = vadd.f32 %v499_v23, %v498_v22  ;;  %v495_v29 = vmul.f32 %v5111_v17, %v5111_v17  ;;  %v503_v30 = vsel %vm468_vm0, %v493_v19, 0.0  ;;  %v480_v34 = vsel %vm468_vm0, %v5122_v24, 0.0  ;;  %v4791_v23 = vld [vmem:[%s6863_s2] ss:$0 sm:$0xff] }
  0x21   : > { %v475_v25 = vadd.f32 %v474_v14, %v473_v18  ;;  %v496_v35 = vmul.f32 %v5122_v24, %v5122_v24  ;;  %v505_v36 = vsel %vm468_vm0, %v494_v21, 0.0  ;;  %v482_v39 = vsel %vm468_vm0, %v5131_v31, 0.0 }
  0x22   : > { %v502_v33 = vadd.f32 %v501_v27, %v500_v26  ;;  %v497_v40 = vmul.f32 %v5131_v31, %v5131_v31  ;;  %v507_v41 = vsel %vm468_vm0, %v495_v29, 0.0 }
  0x23   : > { %v477_v32 = vadd.f32 %v476_v20, %v475_v25  ;;  %v509_v44 = vsel %vm468_vm0, %v496_v35, 0.0 }
  0x24   : > { %v504_v38 = vadd.f32 %v503_v30, %v502_v33  ;;  %v511_v47 = vsel %vm468_vm0, %v497_v40, 0.0 }
  0x25   : > { %v479_v37 = vadd.f32 %v478_v28, %v477_v32 }
  0x26   : > { %v506_v43 = vadd.f32 %v505_v36, %v504_v38 }
  0x27   : > { %v481_v42 = vadd.f32 %v480_v34, %v479_v37 }
  0x28   : > { %v508_v46 = vadd.f32 %v507_v41, %v506_v43 }
  0x29   : > { %v483_v45 = vadd.f32 %v482_v39, %v481_v42 }
  0x2a   : > { %v510_v49 = vadd.f32 %v509_v44, %v508_v46 }
  0x2b   : > { %v484_v48 = vrot.slane %v483_v45, 4 }
  0x2c   : > { %v512_v51 = vadd.f32 %v511_v47, %v510_v49 }
  0x2d   : > { %v485_v50 = vadd.f32 %v484_v48, %v483_v45 }
  0x2e   : > { %v513_v53 = vrot.slane %v512_v51, 4 }
  0x2f   : > { %v486_v52 = vrot.slane %v485_v50, 2 }
  0x30   : > { %v514_v55 = vadd.f32 %v513_v53, %v512_v51 }
  0x31   : > { %v487_v54 = vadd.f32 %v486_v52, %v485_v50 }
  0x32   : > { %v515_v57 = vrot.slane %v514_v55, 2 }
  0x33   : > { %v488_v56 = vrot.slane %v487_v54, 1 }
  0x34   : > { %v516_v59 = vadd.f32 %v515_v57, %v514_v55 }
  0x35   : > { %v489_v58 = vadd.f32 %v488_v56, %v487_v54 }
  0x36   : > { %v517_v60 = vrot.slane %v516_v59, 1 }
  0x37   : > { %4284 = vmatmul.msk.f32.vlgmr.msra.gmra.mxu0 %vm468_vm0, %v489_v58 }
  0x38   : > { %v518_v61 = vadd.f32 %v517_v60, %v516_v59 }
  0x3a   : > { %4285 = vmatmul.msk.f32.vlgmr.msra.gmra.mxu1 %vm468_vm0, %v518_v61 }
  0xb4   : > { %v539_v62 = vpop.f32.mrf.mxu0 }
  0xb5   : > { %v565_v63 = vmul.f32 %v539_v62, %v539_v62  ;;  %v568_v13 = vperm.slane %v539_v62, 0 }
  0xb7   : > { %v562_v0 = vpop.f32.mrf.mxu1  ;;  %v569_v16 = vsub.f32 %v5082_v4, %v568_v13  ;;  %v570_v19 = vsub.f32 %v5085_v5, %v568_v13  ;;  %v571_v20 = vsub.f32 %v5088_v6, %v568_v13  ;;  %v572_v21 = vsub.f32 %v5091_v7, %v568_v13  ;;  %v4792_v5 = vld [vmem:[%s6864_s3] ss:$0 sm:$0xff] }
  0xb8   : > { %v566_v1 = vsub.f32 %v562_v0, %v565_v63  ;;  %v573_v25 = vsub.f32 %v5102_v12, %v568_v13  ;;  %v574_v26 = vsub.f32 %v5111_v17, %v568_v13  ;;  %v575_v35 = vsub.f32 %v5122_v24, %v568_v13 }
  0xb9   : > { %v576_v49 = vsub.f32 %v5131_v31, %v568_v13 }
  0xba   : > { %v567_v2 = vmax.f32 %v566_v1, 0.0 }
  0xbc   : > { %v577_v3 = vadd.f32 1e-05, %v567_v2 }
  0xbe   : > { %4798 = vrsqrt.f32 %v577_v3  ;;  %vm584_vm2 = vweird.f32 %v577_v3 }
  0xc4   : > { %v4799_v8 = vpop.eup %4798 }
  0xc5   : > { %v579_v9 = vmul.f32 %v4799_v8, %v577_v3  ;;  %vm585_vm1 = vweird.f32 %v4799_v8 }
  0xc6   : > { %vm586_vm3 = vmor %vm584_vm2, %vm585_vm1 }
  0xc7   : > { %v580_v10 = vmul.f32 %v4799_v8, %v579_v9 }
  0xc9   : > { %v581_v11 = vmul.f32 0.5, %v580_v10  ;;  %v4687_v10 = vld [vmem:[%s6866_s5 + $0x8] sm:$0xff] }
  0xca   : > { %1052 = vmatpush.bf16.msra.mxu2 %v4687_v10 }
  0xcb   : > { %v582_v14 = vsub.f32 1.5, %v581_v11  ;;  %v5214_v11 = vld [vmem:[%s6866_s5 + $0x38] sm:$0xff] }
  0xcc   : > { %4747 = vmatpush.bf16.msrb.mxu1 %v5214_v11 }
  0xcd   : > { %v583_v15 = vmul.f32 %v4799_v8, %v582_v14 }
  0xcf   : > { %v587_v18 = vsel %vm586_vm3, %v4799_v8, %v583_v15 }
  0xd0   : > { %v588_v22 = vperm.slane %v587_v18, 0  ;;  %v5228_v18 = vld [vmem:[%s6866_s5 + $0x30] sm:$0xff] }
  0xd1   : > { %4748 = vmatpush.bf16.msrb.mxu1 %v5228_v18 }
  0xd2   : > { %v589_v27 = vmul.f32 %v588_v22, %v569_v16  ;;  %v590_v28 = vmul.f32 %v588_v22, %v570_v19  ;;  %v591_v29 = vmul.f32 %v588_v22, %v571_v20  ;;  %v592_v4 = vmul.f32 %v588_v22, %v572_v21  ;;  %v4686_v16 = vld [vmem:[%s6866_s5] sm:$0xff] }
  0xd3   : > { %v593_v6 = vmul.f32 %v588_v22, %v573_v25  ;;  %v594_v30 = vmul.f32 %v588_v22, %v574_v26  ;;  %v595_v40 = vmul.f32 %v588_v22, %v575_v35  ;;  %v596_v50 = vmul.f32 %v588_v22, %v576_v49  ;;  %1053 = vmatpush.bf16.msra.mxu2 %v4686_v16 }
  0xd4   : > { %v600_v7 = vmul.f32 %v4791_v23, %v589_v27  ;;  %v601_v32 = vmul.f32 %v4791_v23, %v590_v28  ;;  %v602_v33 = vmul.f32 %v4791_v23, %v591_v29  ;;  %v603_v34 = vmul.f32 %v4791_v23, %v592_v4 }
  0xd5   : > { %v604_v36 = vmul.f32 %v4791_v23, %v593_v6  ;;  %v605_v12 = vmul.f32 %v4791_v23, %v594_v30  ;;  %v606_v47 = vmul.f32 %v4791_v23, %v595_v40  ;;  %v607_v56 = vmul.f32 %v4791_v23, %v596_v50 }
  0xd6   : > { %v5160_v37 = vadd.f32 %v4792_v5, %v600_v7  ;;  %v5162_v17 = vadd.f32 %v4792_v5, %v601_v32  ;;  %v5164_v38 = vadd.f32 %v4792_v5, %v602_v33  ;;  %v5166_v39 = vadd.f32 %v4792_v5, %v603_v34 }
  0xd7   : > { %v5168_v41 = vadd.f32 %v4792_v5, %v604_v36  ;;  %v5170_v42 = vadd.f32 %v4792_v5, %v605_v12  ;;  %v5179_v51 = vadd.f32 %v4792_v5, %v606_v47  ;;  %v5194_v0 = vadd.f32 %v4792_v5, %v607_v56 }
  0xd8   : > { %v4286_v43 = vmul.f32 -1.442695, %v5160_v37  ;;  %v4287_v44 = vmul.f32 -1.442695, %v5162_v17  ;;  %v4288_v24 = vmul.f32 -1.442695, %v5164_v38 }
  0xd9   : > { %v4289_v45 = vmul.f32 -1.442695, %v5166_v39  ;;  %v4290_v46 = vmul.f32 -1.442695, %v5168_v41  ;;  %v4291_v48 = vmul.f32 -1.442695, %v5170_v42 }
  0xda   : > { %4800 = vpow2.f32 %v4286_v43  ;;  %v4292_v59 = vmul.f32 -1.442695, %v5179_v51  ;;  %v4293_v8 = vmul.f32 -1.442695, %v5194_v0 }
  0xdb   : > { %4802 = vpow2.f32 %v4287_v44 }
  0xdc   : > { %4804 = vpow2.f32 %v4288_v24 }
  0xdd   : > { %4806 = vpow2.f32 %v4289_v45 }
  0xde   : > { %4808 = vpow2.f32 %v4290_v46 }
  0xdf   : > { %4810 = vpow2.f32 %v4291_v48 }
  0xe0   : > { %v4801_v52 = vpop.eup %4800 }
  0xe1   : > { %v4803_v53 = vpop.eup %4802  ;;  %v5181_v54 = vadd.f32 1.0, %v4801_v52 }
  0xe2   : > { %v4805_v55 = vpop.eup %4804  ;;  %v5183_v57 = vadd.f32 1.0, %v4803_v53 }
  0xe3   : > { %v4807_v58 = vpop.eup %4806  ;;  %v5186_v60 = vadd.f32 1.0, %v4805_v55  ;;  %4812 = vrcp.f32 %v5181_v54  ;;  %v660_v25 = vand.u32 2147483647, %v5181_v54  ;;  %v662_v27 = vand.u32 2147483648, %v5181_v54 }
  0xe4   : > { %v4809_v31 = vpop.eup %4808  ;;  %v5189_v61 = vadd.f32 1.0, %v4807_v58  ;;  %4814 = vrcp.f32 %v5183_v57  ;;  %v675_v28 = vand.u32 2147483647, %v5183_v57  ;;  %vm656_vm4 = vweird.f32 %v5181_v54 }
  0xe5   : > { %v4811_v62 = vpop.eup %4810  ;;  %v5192_v63 = vadd.f32 1.0, %v4809_v31  ;;  %4816 = vrcp.f32 %v5186_v60  ;;  %vm671_vm6 = vweird.f32 %v5183_v57  ;;  %vm5255_vm7 = vcmp.eq.f32.partialorder %v660_v25, 8.507059e+37 }
  0xe6   : > { %4818 = vpow2.f32 %v4292_v59  ;;  %v5197_v1 = vadd.f32 1.0, %v4811_v62  ;;  %v677_v36 = vand.u32 2147483648, %v5183_v57  ;;  %v663_v40 = vor.u32 1.1754944e-38, %v662_v27 }
  0xe7   : > { %4820 = vrcp.f32 %v5189_v61  ;;  %vm5260_vm8 = vcmp.eq.f32.partialorder %v675_v28, 8.507059e+37  ;;  %vm686_vm9 = vweird.f32 %v5186_v60  ;;  %v690_v46 = vand.u32 2147483647, %v5186_v60 }
  0xe8   : > { %4822 = vrcp.f32 %v5192_v63  ;;  %v692_v47 = vand.u32 2147483648, %v5186_v60  ;;  %v678_v53 = vor.u32 1.1754944e-38, %v677_v36  ;;  %v707_v31 = vand.u32 2147483648, %v5189_v61  ;;  %v4689_v36 = vld [vmem:[%s6866_s5 + $0x18] sm:$0xff] }
  0xe9   : > { %v5200_v2 = vpop.eup %4812  ;;  %4824 = vrcp.f32 %v5197_v1  ;;  %vm5306_vm1 = vcmp.eq.f32.partialorder %v690_v46, 8.507059e+37  ;;  %vm701_vm2 = vweird.f32 %v5189_v61  ;;  %v722_v25 = vand.u32 2147483648, %v5192_v63  ;;  %1263 = vmatpush.bf16.msrb.mxu0 %v4689_v36  ;;  %4745 = vmatpush.bf16.msra.mxu3 %v4689_v36 }
  0xea   : > { %v5203_v3 = vpop.eup %4814  ;;  %v652_v9 = vmul.f32 %v5200_v2, %v5181_v54  ;;  %4826 = vpow2.f32 %v4293_v8  ;;  %vm657_vm5 = vweird.f32 %v5200_v2  ;;  %v705_v8 = vand.u32 2147483647, %v5189_v61 }
  0xeb   : > { %v667_v13 = vmul.f32 %v5203_v3, %v5183_v57  ;;  %v5218_v14 = vpop.eup %4816  ;;  %vm5270_vm10 = vmor %vm656_vm4, %vm657_vm5  ;;  %vm672_vm11 = vweird.f32 %v5203_v3  ;;  %v693_v10 = vor.u32 1.1754944e-38, %v692_v47  ;;  %vm716_vm4 = vweird.f32 %v5192_v63 }
  0xec   : > { %v653_v15 = vsub.f32 1.0, %v652_v9  ;;  %v4819_v19 = vpop.eup %4818  ;;  %v682_v21 = vmul.f32 %v5218_v14, %v5186_v60  ;;  %vm687_vm12 = vweird.f32 %v5218_v14  ;;  %vm5291_vm13 = vmor %vm671_vm6, %vm672_vm11  ;;  %v737_v27 = vand.u32 2147483648, %v5197_v1 }
  0xed   : > { %v668_v20 = vsub.f32 1.0, %v667_v13  ;;  %v5232_v22 = vpop.eup %4820  ;;  %v5253_v34 = vadd.f32 1.0, %v4819_v19  ;;  %vm5302_vm15 = vmor %vm686_vm9, %vm687_vm12  ;;  %v720_v13 = vand.u32 2147483647, %v5192_v63  ;;  %vm706_vm6 = vcmp.eq.f32.partialorder %v705_v8, 8.507059e+37 }
  0xee   : > { %v654_v23 = vmul.f32 %v5200_v2, %v653_v15  ;;  %v5236_v26 = vpop.eup %4822  ;;  %v683_v29 = vsub.f32 1.0, %v682_v21  ;;  %v697_v4 = vmul.f32 %v5232_v22, %v5189_v61  ;;  %vm702_vm14 = vweird.f32 %v5232_v22 }
  0xef   : > { %v712_v5 = vmul.f32 %v5236_v26, %v5192_v63  ;;  %v669_v30 = vmul.f32 %v5203_v3, %v668_v20  ;;  %v5251_v33 = vpop.eup %4824  ;;  %4828 = vrcp.f32 %v5253_v34  ;;  %vm5319_vm3 = vmor %vm701_vm2, %vm702_vm14  ;;  %vm717_vm5 = vweird.f32 %v5236_v26 }
  0xf0   : > { %v655_v6 = vadd.f32 %v5200_v2, %v654_v23  ;;  %v684_v7 = vmul.f32 %v5218_v14, %v683_v29  ;;  %v698_v32 = vsub.f32 1.0, %v697_v4  ;;  %v4827_v24 = vpop.eup %4826  ;;  %v727_v48 = vmul.f32 %v5251_v33, %v5197_v1 }
  0xf1   : > { %v713_v12 = vsub.f32 1.0, %v712_v5  ;;  %v670_v50 = vadd.f32 %v5203_v3, %v669_v30  ;;  %v5287_v56 = vadd.f32 1.0, %v4827_v24  ;;  %vm5344_vm9 = vcmp.eq.f32.partialorder %v720_v13, 8.507059e+37 }
  0xf2   : > { %v699_v44 = vmul.f32 %v5232_v22, %v698_v32  ;;  %v659_v49 = vsel %vm5270_vm10, %v5200_v2, %v655_v6  ;;  %v685_v52 = vadd.f32 %v5218_v14, %v684_v7  ;;  %v728_v55 = vsub.f32 1.0, %v727_v48 }
  0xf3   : > { %v714_v54 = vmul.f32 %v5236_v26, %v713_v12  ;;  %v664_v62 = vsel %vm5255_vm7, %v663_v40, %v659_v49  ;;  %v674_v9 = vsel %vm5291_vm13, %v5203_v3, %v670_v50  ;;  %4830 = vrcp.f32 %v5287_v56  ;;  %vm5340_vm7 = vmor %vm716_vm4, %vm717_vm5 }
  0xf4   : > { %v700_v59 = vadd.f32 %v5232_v22, %v699_v44  ;;  %v689_v60 = vsel %vm5302_vm15, %v5218_v14, %v685_v52  ;;  %v729_v61 = vmul.f32 %v5251_v33, %v728_v55  ;;  %v708_v14 = vor.u32 1.1754944e-38, %v707_v31  ;;  %v800_v31 = vld [vmem:[#allocation2 + $0x20] sm:$0x1] }
  0xf5   : > { %v715_v16 = vadd.f32 %v5236_v26, %v714_v54  ;;  %v771_v19 = vmul.f32 %v664_v62, %v5160_v37  ;;  %v5332_v20 = vpop.eup %4828  ;;  %v679_v21 = vsel %vm5260_vm8, %v678_v53, %v674_v9  ;;  %v694_v23 = vsel %vm5306_vm1, %v693_v10, %v689_v60  ;;  %v797_v53 = vld [vmem:[#allocation2 + $0x18] sm:$0x1] }
  0xf6   : > { %v704_v3 = vsel %vm5319_vm3, %v5232_v22, %v700_v59  ;;  %v730_v4 = vadd.f32 %v5251_v33, %v729_v61  ;;  %vm732_vm8 = vweird.f32 %v5251_v33  ;;  %v742_v63 = vmul.f32 %v5332_v20, %v5253_v34 }
  0xf7   : > { %v709_v37 = vsel %vm706_vm6, %v708_v14, %v704_v3  ;;  %v719_v29 = vsel %vm5340_vm7, %v5236_v26, %v715_v16  ;;  %v772_v5 = vmul.f32 %v679_v21, %v5162_v17  ;;  %v773_v6 = vmul.f32 %v694_v23, %v5164_v38  ;;  %v4699_v26 = vld [vmem:[%s6866_s5 + $0x48] sm:$0xff]  ;;  %v826_v23 = vld [vmem:[#allocation2 + $0x14] sm:$0x1] }
  0xf8   : > { %v850_v30 = vpack.c.bf16 %v771_v19, %v771_v19  ;;  %v723_v7 = vor.u32 1.1754944e-38, %v722_v25  ;;  %vm731_vm10 = vweird.f32 %v5197_v1  ;;  %v735_v32 = vand.u32 2147483647, %v5197_v1  ;;  %v791_v1 = vld [vmem:[#allocation2 + $0x8] sm:$0x1]  ;;  %1697 = vmatpush.bf16.msrb.mxu2 %v4699_v26 }
  0xf9   : > { %v738_v35 = vor.u32 1.1754944e-38, %v737_v27  ;;  %v5365_v12 = vpop.eup %4830  ;;  %vm5367_vm11 = vmor %vm731_vm10, %vm732_vm8  ;;  %v752_v38 = vand.u32 2147483648, %v5253_v34  ;;  %v774_v40 = vmul.f32 %v709_v37, %v5166_v39  ;;  %vm779_vm12 = vcmask 257024   ;;  %v4688_v39 = vld [vmem:[%s6866_s5 + $0x10] sm:$0xff]  ;;  %v823_v16 = vld [vmem:[#allocation2 + $0xc] sm:$0x1] }
  0xfa   : > { %v724_v43 = vsel %vm5344_vm9, %v723_v7, %v719_v29  ;;  %v734_v44 = vsel %vm5367_vm11, %v5251_v33, %v730_v4  ;;  %v4938_v24 = vmov 0   ;;  %vm785_vm13 = vcmask 253952   ;;  %1264 = vmatpush.bf16.msrb.mxu0 %v4688_v39  ;;  %4746 = vmatpush.bf16.msra.mxu3 %v4688_v39  ;;  %v829_v37 = vld [vmem:[#allocation2 + $0x1c] sm:$0x1]  ;;  %v803_v29 = vld [vmem:[#allocation2 + $0x28] sm:$0x1] }
  0xfb   : > { %780 = vst.msk [vmem:[#allocation2] sm:$0xf] %vm779_vm12, %v4938_v24  ;;  %vm786_vm14 = vsmask.f32 256  ;;  %v743_v45 = vsub.f32 1.0, %v742_v63  ;;  %v5382_v46 = vpack.c.bf16 %v772_v5, %v772_v5  ;;  %v5384_v47 = vpack.c.bf16 %v773_v6, %v773_v6  ;;  %v4737_v27 = vld [vmem:[%s6870_s9 + $0x68] sm:$0xff] }
  0xfc   : > { %vm5387_vm15 = vmand %vm785_vm13, %vm786_vm14  ;;  %v859_v33 = vshrl.u32 %v850_v30, 16  ;;  %781 = vst.msk [vmem:[#allocation2 + $0x4] sm:$0xf] %vm779_vm12, %v4938_v24  ;;  %vm736_vm1 = vcmp.eq.f32.partialorder %v735_v32, 8.507059e+37  ;;  %v757_v49 = vmul.f32 %v5365_v12, %v5287_v56  ;;  %v767_v50 = vand.u32 2147483648, %v5287_v56 }
  0xfd   : > { %v792_v52 = vsel %vm5387_vm15, 0, %v791_v1  ;;  %783 = vst.msk [vmem:[#allocation2 + $0x48] sm:$0xf] %vm779_vm12, %v4938_v24  ;;  %v739_v54 = vsel %vm736_vm1, %v738_v35, %v734_v44  ;;  %v750_v55 = vand.u32 2147483647, %v5253_v34  ;;  %v5399_v58 = vpack.c.bf16 %v774_v40, %v774_v40 }
  0xfe   : > { %793 = vst [vmem:[#allocation2 + $0x8] sm:$0x1] %v792_v52  ;;  %v5401_v59 = vrot.slane %v859_v33, 7  ;;  %v5403_v62 = vor.u32 1.1754944e-38, %v752_v38  ;;  %v775_v2 = vmul.f32 %v724_v43, %v5168_v41  ;;  %vm818_vm2 = vsmask.f32 7938 }
  0xff   : > { %784 = vst.msk [vmem:[#allocation2 + $0x4c] sm:$0xf] %vm779_vm12, %v4938_v24  ;;  %v744_v57 = vmul.f32 %v5332_v20, %v743_v45  ;;  %v867_v8 = vshrl.u32 %v5382_v46, 16  ;;  %v875_v9 = vshrl.u32 %v5384_v47, 16  ;;  %v862_v60 = vshll.u32 %v850_v30, 16  ;;  %vm5419_vm3 = vmand %vm785_vm13, %vm818_vm2 }
 0x100   : > { %2609 = vst.msk [vmem:[#allocation3] sm:$0xf] %vm779_vm12, %v4938_v24  ;;  %v758_v10 = vsub.f32 1.0, %v757_v49  ;;  %v765_v13 = vand.u32 2147483647, %v5287_v56  ;;  %v5412_v15 = vor.u32 1.1754944e-38, %v767_v50  ;;  %v776_v41 = vmul.f32 %v739_v54, %v5170_v42  ;;  %vm5433_vm6 = vmand %vm779_vm12, %vm818_vm2 }
 0x101   : > { %2610 = vst.msk [vmem:[#allocation3 + $0x4] sm:$0xf] %vm779_vm12, %v4938_v24  ;;  %v883_v61 = vshrl.u32 %v5399_v58, 16  ;;  %v864_v19 = vor.u32 %v862_v60, %v5401_v59  ;;  %v798_v21 = vsel %vm5387_vm15, 0, %v797_v53  ;;  %v794_v42 = vld [vmem:[#allocation2 + $0x10] sm:$0x1]  ;;  %vm746_vm4 = vweird.f32 %v5253_v34 }
 0x102   : > { %v788_v3 = vld [vmem:[#allocation2] sm:$0x1]  ;;  %2612 = vst.msk [vmem:[#allocation3 + $0x48] sm:$0xf] %vm779_vm12, %v4938_v24  ;;  %vm747_vm5 = vweird.f32 %v5332_v20  ;;  %v801_v22 = vsel %vm5387_vm15, 0, %v800_v31  ;;  %v5441_v4 = vadd.f32 %v5332_v20, %v744_v57  ;;  %v5443_v63 = vpack.c.bf16 %v775_v2, %v775_v2  ;;  %v4691_v31 = vld [vmem:[%s6866_s5 + $0x28] sm:$0xff] }
 0x103   : > { %v789_v25 = vsel %vm5387_vm15, 0, %v788_v3  ;;  %2613 = vst.msk [vmem:[#allocation3 + $0x4c] sm:$0xf] %vm779_vm12, %v4938_v24  ;;  %v820_v28 = vld [vmem:[#allocation2 + $0x4] sm:$0x1]  ;;  %v5445_v5 = vrot.slane %v867_v8, 7  ;;  %v759_v32 = vmul.f32 %v5365_v12, %v758_v10  ;;  %v5456_v35 = vpack.c.bf16 %v776_v41, %v776_v41  ;;  %vm5497_vm9 = vmor %vm746_vm4, %vm747_vm5  ;;  %1399 = vmatpush.bf16.msra.mxu0 %v4691_v31 }
 0x104   : > { %790 = vst [vmem:[#allocation2] sm:$0x1] %v789_v25  ;;  %v5447_v6 = vrot.slane %v875_v9, 7  ;;  %v5449_v30 = vld [vmem:[#allocation2 + $0x30] sm:$0x1]  ;;  %vm5451_vm7 = vcmp.eq.f32.partialorder %v750_v55, 8.507059e+37  ;;  %vm762_vm12 = vweird.f32 %v5365_v12  ;;  %vm761_vm13 = vweird.f32 %v5287_v56 }
 0x105   : > { %v870_v26 = vshll.u32 %v5382_v46, 16  ;;  %v941_v36 = vld [vmem:[#allocation2 + $0x8] sm:$0xf]  ;;  %799 = vst [vmem:[#allocation2 + $0x18] sm:$0x1] %v798_v21  ;;  %v821_v17 = vsel %vm5419_vm3, 0, %v820_v28  ;;  %v760_v41 = vadd.f32 %v5365_v12, %v759_v32  ;;  %vm5533_vm14 = vmor %vm761_vm13, %vm762_vm12 }
 0x106   : > { %v5461_v38 = vld [vmem:[#allocation2 + $0x24] sm:$0x1]  ;;  %v942_v40 = vsel %vm5433_vm6, %v864_v19, %v941_v36  ;;  %802 = vst [vmem:[#allocation2 + $0x20] sm:$0x1] %v801_v22  ;;  %v878_v1 = vshll.u32 %v5384_v47, 16  ;;  %v5466_v43 = vrot.slane %v883_v61, 7 }
 0x107   : > { %v824_v44 = vsel %vm5419_vm3, 0, %v823_v16  ;;  %v865_v24 = vrot.slane %v5401_v59, 4  ;;  %943 = vst [vmem:[#allocation2 + $0x8] sm:$0xf] %v942_v40  ;;  %v886_v39 = vshll.u32 %v5399_v58, 16  ;;  %v795_v45 = vsel %vm5387_vm15, 0, %v794_v42 }
 0x108   : > { %v827_v46 = vsel %vm5419_vm3, 0, %v826_v23  ;;  %822 = vst [vmem:[#allocation2 + $0x4] sm:$0x1] %v821_v17  ;;  %v830_v47 = vsel %vm5419_vm3, 0, %v829_v37  ;;  %v873_v33 = vrot.slane %v5445_v5, 4  ;;  %v881_v49 = vrot.slane %v5447_v6, 4 }
 0x109   : > { %v804_v50 = vsel %vm5387_vm15, 0, %v803_v29  ;;  %v5482_v52 = vld [vmem:[#allocation2 + $0x2c] sm:$0x1]  ;;  %v880_v53 = vor.u32 %v878_v1, %v5447_v6  ;;  %825 = vst [vmem:[#allocation2 + $0xc] sm:$0x1] %v824_v44  ;;  %v807_v54 = vsel %vm5387_vm15, 0, %v5449_v30  ;;  %v888_v8 = vor.u32 %v886_v39, %v5466_v43 }
 0x10a   : > { %v891_v55 = vshrl.u32 %v5443_v63, 16  ;;  %v894_v58 = vshll.u32 %v5443_v63, 16  ;;  %vm5501_vm8 = vcmp.eq.f32.partialorder %v765_v13, 8.507059e+37  ;;  %vm1102_vm10 = vsmask.f32 3328  ;;  %v4690_v34 = vld [vmem:[%s6866_s5 + $0x20] sm:$0xff] }
 0x10b   : > { %vm1103_vm11 = vsmask.f32 7440  ;;  %796 = vst [vmem:[#allocation2 + $0x10] sm:$0x1] %v795_v45  ;;  %v899_v9 = vshrl.u32 %v5456_v35, 16  ;;  %v902_v60 = vshll.u32 %v5456_v35, 16  ;;  %v749_v13 = vsel %vm5497_vm9, %v5332_v20, %v5441_v4  ;;  %1400 = vmatpush.bf16.msra.mxu0 %v4690_v34 }
 0x10c   : > { %v833_v10 = vsel %vm5419_vm3, 0, %v5461_v38  ;;  %v4296_v16 = vld [vmem:[#allocation2] sm:$0xf]  ;;  %828 = vst [vmem:[#allocation2 + $0x14] sm:$0x1] %v827_v46  ;;  %v5523_v20 = vrot.slane %v891_v55, 7  ;;  %v754_v22 = vsel %vm5451_vm7, %v5403_v62, %v749_v13  ;;  %v872_v56 = vor.u32 %v870_v26, %v5445_v5  ;;  %vm5571_vm1 = vmor %vm1102_vm10, %vm1103_vm11 }
 0x10d   : > { %v1086_v61 = vld [vmem:[#allocation2] sm:$0xf]  ;;  %v953_v3 = vld [vmem:[#allocation2 + $0x18] sm:$0xf]  ;;  %831 = vst [vmem:[#allocation2 + $0x1c] sm:$0x1] %v830_v47  ;;  %v764_v63 = vsel %vm5533_vm14, %v5365_v12, %v760_v41 }
 0x10e   : > { %v1106_v19 = vshrl.u32 %v1086_v61, 16  ;;  %v1109_v21 = vshll.u32 %v1086_v61, 16  ;;  %v954_v42 = vsel %vm5433_vm6, %v880_v53, %v953_v3  ;;  %v959_v23 = vld [vmem:[#allocation2 + $0x20] sm:$0xf]  ;;  %805 = vst [vmem:[#allocation2 + $0x28] sm:$0x1] %v804_v50  ;;  %v896_v39 = vor.u32 %v894_v58, %v5523_v20 }
 0x10f   : > { %v836_v25 = vsel %vm5419_vm3, 0, %v5482_v52  ;;  %v4682_v37 = vld [vmem:[#allocation2 + $0x4] sm:$0xf0]  ;;  %955 = vst [vmem:[#allocation2 + $0x18] sm:$0xf] %v954_v42  ;;  %v960_v29 = vsel %vm5433_vm6, %v888_v8, %v959_v23  ;;  %v889_v40 = vrot.slane %v5466_v43, 4  ;;  %v769_v59 = vsel %vm5501_vm8, %v5412_v15, %v764_v63 }
 0x110   : > { %v1088_v4 = vld [vmem:[#allocation2 + $0x8] sm:$0xf]  ;;  %v4297_v30 = vor.u32 %v4682_v37, %v4296_v16  ;;  %961 = vst [vmem:[#allocation2 + $0x20] sm:$0xf] %v960_v29  ;;  %v5543_v62 = vld [vmem:[#allocation2 + $0x4] sm:$0x1]  ;;  %v777_v58 = vmul.f32 %v754_v22, %v5179_v51  ;;  %v778_v41 = vmul.f32 %v769_v59, %v5194_v0 }
 0x111   : > { %v1108_v7 = vrot.slane %v1106_v19, 4  ;;  %v1111_v32 = vrot.slane %v1109_v21, 5  ;;  %v944_v36 = vld [vmem:[#allocation2 + $0xc] sm:$0x1]  ;;  %v1115_v26 = vshll.u32 %v5543_v62, 16  ;;  %v1120_v17 = vshrl.u32 %v1088_v4, 16 }
 0x112   : > { %v1123_v38 = vshll.u32 %v1088_v4, 16  ;;  %4318 = vmatmul.msk.bf16.vlgmr.msra.gmra.mxu2 %vm468_vm0, %v4297_v30  ;;  %v945_v12 = vsel %vm5387_vm15, %v865_v24, %v944_v36  ;;  %v947_v44 = vld [vmem:[#allocation2 + $0x10] sm:$0xf]  ;;  %808 = vst [vmem:[#allocation2 + $0x30] sm:$0x1] %v807_v54  ;;  %v5553_v45 = vrot.slane %v899_v9, 7  ;;  %v5599_v23 = vpack.c.bf16 %v777_v58, %v777_v58 }
 0x113   : > { %v1112_v1 = vor.u32 %v1111_v32, %v1108_v7  ;;  %946 = vst [vmem:[#allocation2 + $0xc] sm:$0x1] %v945_v12  ;;  %v1122_v46 = vrot.slane %v1120_v17, 4  ;;  %v948_v50 = vsel %vm5433_vm6, %v872_v56, %v947_v44  ;;  %v5557_v53 = vld [vmem:[#allocation2] sm:$0xe]  ;;  %v1117_v55 = vrot.slane %v1115_v26, 5 }
 0x114   : > { %v1125_v47 = vrot.slane %v1123_v38, 5  ;;  %949 = vst [vmem:[#allocation2 + $0x10] sm:$0xf] %v948_v50  ;;  %v950_v54 = vld [vmem:[#allocation2 + $0x14] sm:$0x1]  ;;  %v897_v6 = vrot.slane %v5523_v20, 4  ;;  %v5606_v4 = vpack.c.bf16 %v778_v41, %v778_v41 }
 0x115   : > { %v1113_v24 = vrot.slane %v1112_v1, 4  ;;  %v5562_v31 = vld [vmem:[#allocation2 + $0x38] sm:$0x1]  ;;  %v951_v2 = vsel %vm5387_vm15, %v873_v33, %v950_v54  ;;  %v956_v8 = vld [vmem:[#allocation2 + $0x1c] sm:$0x1]  ;;  %v904_v33 = vor.u32 %v902_v60, %v5553_v45  ;;  %v4334_v35 = vrot.slane %v5557_v53, 9 }
 0x116   : > { %v965_v9 = vld [vmem:[#allocation2 + $0x28] sm:$0xf]  ;;  %834 = vst [vmem:[#allocation2 + $0x24] sm:$0x1] %v833_v10  ;;  %v4360_v34 = vld [vmem:[#allocation2 + $0x18] sm:$0xf]  ;;  %v1126_v57 = vor.u32 %v1125_v47, %v1122_v46  ;;  %v957_v51 = vsel %vm5387_vm15, %v881_v49, %v956_v8 }
 0x117   : > { %952 = vst [vmem:[#allocation2 + $0x14] sm:$0x1] %v951_v2  ;;  %v1092_v5 = vld [vmem:[#allocation2 + $0x18] sm:$0xf]  ;;  %v966_v10 = vsel %vm5433_vm6, %v896_v39, %v965_v9  ;;  %v5584_v13 = vld [vmem:[#allocation2 + $0x40] sm:$0x1]  ;;  %v1118_v60 = vsel %vm5571_vm1, %v1113_v24, %v1117_v55 }
 0x118   : > { %v4693_v16 = vld [vmem:[#allocation2 + $0x1c] sm:$0xf0]  ;;  %958 = vst [vmem:[#allocation2 + $0x1c] sm:$0x1] %v957_v51  ;;  %v1148_v61 = vshrl.u32 %v1092_v5, 16  ;;  %v1151_v19 = vshll.u32 %v1092_v5, 16  ;;  %v1221_v7 = vunpack.c.l.b16 %v1118_v60 }
 0x119   : > { %v4361_v3 = vor.u32 %v4693_v16, %v4360_v34  ;;  %v905_v49 = vrot.slane %v5553_v45, 4  ;;  %967 = vst [vmem:[#allocation2 + $0x28] sm:$0xf] %v966_v10  ;;  %v971_v42 = vld [vmem:[#allocation2 + $0x30] sm:$0xf]  ;;  %v810_v0 = vsel %vm5387_vm15, 0, %v5562_v31 }
 0x11a   : > { %v1150_v21 = vrot.slane %v1148_v61, 4  ;;  %837 = vst [vmem:[#allocation2 + $0x2c] sm:$0x1] %v836_v25  ;;  %v5602_v20 = vld [vmem:[#allocation2 + $0xc] sm:$0x1]  ;;  %v1127_v22 = vrot.slane %v1126_v57, 4  ;;  %v972_v37 = vsel %vm5433_vm6, %v904_v33, %v971_v42 }
 0x11b   : > { %4379 = vmatmul.msk.bf16.vlgmr.msrb.gmra.mxu1 %vm468_vm0, %v4361_v3  ;;  %v1153_v28 = vrot.slane %v1151_v19, 5  ;;  %v4683_v56 = vld [vmem:[#allocation2 + $0x14] sm:$0xf0]  ;;  %v1094_v29 = vld [vmem:[#allocation2 + $0x20] sm:$0xf]  ;;  %v1129_v52 = vshll.u32 %v5602_v20, 16 }
 0x11c   : > { %v1090_v25 = vld [vmem:[#allocation2 + $0x10] sm:$0xf]  ;;  %v813_v30 = vsel %vm5387_vm15, 0, %v5584_v13  ;;  %973 = vst [vmem:[#allocation2 + $0x30] sm:$0xf] %v972_v37  ;;  %vm1318_vm2 = vcmask 1042432  }
 0x11d   : > { %v4300_v63 = vld [vmem:[#allocation2 + $0x10] sm:$0xf]  ;;  %v1134_v32 = vshrl.u32 %v1090_v25, 16  ;;  %v1137_v36 = vshll.u32 %v1090_v25, 16  ;;  %v1154_v26 = vor.u32 %v1153_v28, %v1150_v21  ;;  %v962_v17 = vld [vmem:[#allocation2 + $0x24] sm:$0x1] }
 0x11e   : > { %vm1319_vm4 = vcmask 1046532   ;;  %v1131_v38 = vrot.slane %v1129_v52, 5  ;;  %v5612_v12 = vld [vmem:[#allocation2 + $0x14] sm:$0x1]  ;;  %v963_v1 = vsel %vm5387_vm15, %v889_v40, %v962_v17  ;;  %v1162_v44 = vshrl.u32 %v1094_v29, 16  ;;  %v4698_v46 = vld [vmem:[%s6866_s5 + $0x40] sm:$0xff] }
 0x11f   : > { %v1165_v39 = vshll.u32 %v1094_v29, 16  ;;  %v5621_v47 = vld [vmem:[#allocation2 + $0x1c] sm:$0x1]  ;;  %v1136_v50 = vrot.slane %v1134_v32, 4  ;;  %v1139_v59 = vrot.slane %v1137_v36, 5  ;;  %v1143_v24 = vshll.u32 %v5612_v12, 16  ;;  %1698 = vmatpush.bf16.msrb.mxu2 %v4698_v46  ;;  %vm5658_vm5 = vmor %vm1318_vm2, %vm1319_vm4 }
 0x120   : > { %v907_v55 = vshrl.u32 %v5599_v23, 16  ;;  %v1132_v43 = vsel %vm5571_vm1, %v1127_v22, %v1131_v38  ;;  %v1155_v54 = vrot.slane %v1154_v26, 4  ;;  %v1157_v40 = vshll.u32 %v5621_v47, 16  ;;  %964 = vst [vmem:[#allocation2 + $0x24] sm:$0x1] %v963_v1  ;;  %v4709_v41 = vld [vmem:[%s6866_s5 + $0x78] sm:$0xff] }
 0x121   : > { %v4301_v31 = vor.u32 %v4683_v56, %v4300_v63  ;;  %v5628_v58 = vld [vmem:[#allocation2 + $0x8] sm:$0xe]  ;;  %v1222_v2 = vunpack.c.l.b16 %v1132_v43  ;;  %v1140_v8 = vor.u32 %v1139_v59, %v1136_v50  ;;  %v968_v9 = vld [vmem:[#allocation2 + $0x2c] sm:$0x1]  ;;  %v1164_v57 = vrot.slane %v1162_v44, 4  ;;  %2129 = vmatpush.bf16.msra.mxu1 %v4709_v41 }
 0x122   : > { %v1096_v34 = vld [vmem:[#allocation2 + $0x28] sm:$0xf]  ;;  %v1167_v51 = vrot.slane %v1165_v39, 5  ;;  %v1159_v5 = vrot.slane %v1157_v40, 5  ;;  %v969_v33 = vsel %vm5387_vm15, %v897_v6, %v968_v9  ;;  %v838_v16 = vld [vmem:[#allocation2 + $0x34] sm:$0x1] }
 0x123   : > { %v1176_v10 = vshrl.u32 %v1096_v34, 16  ;;  %v1179_v13 = vshll.u32 %v1096_v34, 16  ;;  %v1229_v61 = vpack.c.b16 %v1222_v2, %v1221_v7  ;;  %v1323_v3 = vrot.slane %v5543_v62, 5  ;;  %4319 = vmatmul.msk.bf16.gmra.mxu2 %vm468_vm0, %v4301_v31  ;;  %970 = vst [vmem:[#allocation2 + $0x2c] sm:$0x1] %v969_v33 }
 0x124   : > { %v1141_v19 = vrot.slane %v1140_v8, 4  ;;  %v1145_v60 = vrot.slane %v1143_v24, 5  ;;  %v1160_v21 = vsel %vm5571_vm1, %v1155_v54, %v1159_v5  ;;  %v4335_v22 = vrot.slane %v5628_v58, 9  ;;  %811 = vst [vmem:[#allocation2 + $0x38] sm:$0x1] %v810_v0  ;;  %v4701_v5 = vld [vmem:[%s6866_s5 + $0x58] sm:$0xff] }
 0x125   : > { %v1178_v42 = vrot.slane %v1176_v10, 4  ;;  %v1181_v6 = vrot.slane %v1179_v13, 5  ;;  %4330 = vmatmul.msk.bf16.vlgmr.msrb.gmra.mxu0 %vm468_vm0, %v1229_v61  ;;  %v1224_v62 = vunpack.c.l.b16 %v1160_v21  ;;  %v4364_v56 = vld [vmem:[#allocation2 + $0x28] sm:$0xf]  ;;  %v1168_v37 = vor.u32 %v1167_v51, %v1164_v57  ;;  %814 = vst [vmem:[#allocation2 + $0x40] sm:$0x1] %v813_v30  ;;  %1830 = vmatpush.bf16.msrb.mxu3 %v4701_v5 }
 0x126   : > { %v1146_v28 = vsel %vm5571_vm1, %v1141_v19, %v1145_v60  ;;  %v841_v29 = vld [vmem:[#allocation2 + $0x3c] sm:$0x1]  ;;  %v4694_v25 = vld [vmem:[#allocation2 + $0x2c] sm:$0xf0]  ;;  %v5643_v63 = vrot.slane %v907_v55, 7  ;;  %v910_v7 = vshll.u32 %v5599_v23, 16  ;;  %1492 = vmatpush.bf16.msrb.mxu0 %v5214_v11  ;;  %v1324_v40 = vsel %vm5658_vm5, %v4334_v35, %v1323_v3 }
 0x127   : > { %v1223_v52 = vunpack.c.l.b16 %v1146_v28  ;;  %v1098_v32 = vld [vmem:[#allocation2 + $0x30] sm:$0xf]  ;;  %v1327_v0 = vrot.slane %v5602_v20, 5  ;;  %v5648_v36 = vld [vmem:[#allocation2 + $0x24] sm:$0x1]  ;;  %v915_v26 = vshrl.u32 %v5606_v4, 16  ;;  %v1182_v44 = vor.u32 %v1181_v6, %v1178_v42 }
 0x128   : > { %v839_v17 = vsel %vm5419_vm3, 0, %v838_v16  ;;  %v842_v30 = vsel %vm5419_vm3, 0, %v841_v29  ;;  %v1171_v1 = vshll.u32 %v5648_v36, 16  ;;  %v912_v23 = vor.u32 %v910_v7, %v5643_v63  ;;  %v1296_v43 = vld [vmem:[#allocation2 + $0x10] sm:$0xe] }
 0x129   : > { %v1230_v38 = vpack.c.b16 %v1224_v62, %v1223_v52  ;;  %840 = vst [vmem:[#allocation2 + $0x34] sm:$0x1] %v839_v17  ;;  %v4365_v20 = vor.u32 %v4694_v25, %v4364_v56  ;;  %v1169_v39 = vrot.slane %v1168_v37, 4  ;;  %v5663_v46 = vrot.slane %v915_v26, 7  ;;  %v1297_v2 = vld [vmem:[#allocation2 + $0x18] sm:$0xe] }
 0x12a   : > { %v918_v50 = vshll.u32 %v5606_v4, 16  ;;  %843 = vst [vmem:[#allocation2 + $0x3c] sm:$0x1] %v842_v30  ;;  %v5667_v59 = vld [vmem:[#allocation2 + $0x2c] sm:$0x1]  ;;  %v1190_v24 = vshrl.u32 %v1098_v32, 16  ;;  %1493 = vmatpush.bf16.msrb.mxu0 %v5228_v18  ;;  %v1328_v4 = vsel %vm5658_vm5, %v4335_v22, %v1327_v0  ;;  %v1357_v60 = vunpack.c.l.b16 %v1324_v40 }
 0x12b   : > { %4331 = vmatmul.msk.bf16.vlgmr.msra.gmra.mxu3 %vm468_vm0, %v1230_v38  ;;  %v1193_v55 = vshll.u32 %v1098_v32, 16  ;;  %4380 = vmatmul.msk.bf16.gmra.mxu1 %vm468_vm0, %v4365_v20  ;;  %v1185_v54 = vshll.u32 %v5667_v59, 16  ;;  %v977_v58 = vld [vmem:[#allocation2 + $0x38] sm:$0xf]  ;;  %v4708_v18 = vld [vmem:[%s6866_s5 + $0x70] sm:$0xff]  ;;  %v1173_v8 = vrot.slane %v1171_v1, 5  ;;  %v1358_v21 = vunpack.c.l.b16 %v1328_v4 }
 0x12c   : > { %v920_v31 = vor.u32 %v918_v50, %v5663_v46  ;;  %v1183_v9 = vrot.slane %v1182_v44, 4  ;;  %v4304_v34 = vld [vmem:[#allocation2 + $0x20] sm:$0xf]  ;;  %v4684_v57 = vld [vmem:[#allocation2 + $0x24] sm:$0xf0]  ;;  %v913_v53 = vrot.slane %v5643_v63, 4  ;;  %v978_v35 = vsel %vm5433_vm6, %v912_v23, %v977_v58  ;;  %2130 = vmatpush.bf16.msra.mxu1 %v4708_v18 }
 0x12d   : > { %v983_v51 = vld [vmem:[#allocation2 + $0x40] sm:$0xf]  ;;  %979 = vst [vmem:[#allocation2 + $0x38] sm:$0xf] %v978_v35  ;;  %v4336_v10 = vrot.slane %v1296_v43, 9  ;;  %v1331_v13 = vrot.slane %v5612_v12, 5  ;;  %v1174_v62 = vsel %vm5571_vm1, %v1169_v39, %v1173_v8  ;;  %v4305_v25 = vor.u32 %v4684_v57, %v4304_v34 }
 0x12e   : > { %v984_v33 = vsel %vm5433_vm6, %v920_v31, %v983_v51  ;;  %v1955_v41 = vld [vmem:[#allocation2 + $0x10] sm:$0xf]  ;;  %v1187_v16 = vrot.slane %v1185_v54, 5  ;;  %v1192_v61 = vrot.slane %v1190_v24, 4  ;;  %v1195_v3 = vrot.slane %v1193_v55, 5 }
 0x12f   : > { %985 = vst [vmem:[#allocation2 + $0x40] sm:$0xf] %v984_v33  ;;  %v4337_v19 = vrot.slane %v1297_v2, 9  ;;  %v1957_v6 = vld [vmem:[#allocation2 + $0x18] sm:$0xf]  ;;  %v1972_v22 = vshrl.u32 %v1955_v41, 16  ;;  %v1225_v17 = vunpack.c.l.b16 %v1174_v62  ;;  %v1365_v38 = vpack.c.b16 %v1358_v21, %v1357_v60 }
 0x130   : > { %v974_v42 = vld [vmem:[#allocation2 + $0x34] sm:$0x1]  ;;  %v1975_v28 = vshll.u32 %v1955_v41, 16  ;;  %v1188_v12 = vsel %vm5571_vm1, %v1183_v9, %v1187_v16  ;;  %v1335_v29 = vrot.slane %v5621_v47, 5  ;;  %v1196_v45 = vor.u32 %v1195_v3, %v1192_v61  ;;  %v5712_v20 = vld [vmem:[#allocation2 + $0x1c] sm:$0x1] }
 0x131   : > { %v975_v56 = vsel %vm5387_vm15, %v905_v49, %v974_v42  ;;  %v980_v37 = vld [vmem:[#allocation2 + $0x3c] sm:$0x1]  ;;  %v4700_v52 = vld [vmem:[%s6866_s5 + $0x50] sm:$0xff]  ;;  %v1974_v32 = vrot.slane %v1972_v22, 4  ;;  %v1332_v49 = vsel %vm5658_vm5, %v4336_v10, %v1331_v13  ;;  %v1986_v26 = vshrl.u32 %v1957_v6, 16 }
 0x132   : > { %976 = vst [vmem:[#allocation2 + $0x34] sm:$0x1] %v975_v56  ;;  %v981_v63 = vsel %vm5387_vm15, %v913_v53, %v980_v37  ;;  %v5705_v7 = vld [vmem:[#allocation2 + $0x14] sm:$0x1]  ;;  %v1977_v0 = vrot.slane %v1975_v28, 5  ;;  %v1989_v47 = vshll.u32 %v1957_v6, 16  ;;  %1831 = vmatpush.bf16.msrb.mxu3 %v4700_v52  ;;  %v1226_v30 = vunpack.c.l.b16 %v1188_v12 }
 0x133   : > { %982 = vst [vmem:[#allocation2 + $0x3c] sm:$0x1] %v981_v63  ;;  %4320 = vmatmul.msk.bf16.gmra.mxu2 %vm468_vm0, %v4305_v25  ;;  %v1336_v23 = vsel %vm5658_vm5, %v4337_v19, %v1335_v29  ;;  %v1981_v39 = vshll.u32 %v5705_v7, 16  ;;  %v1359_v43 = vunpack.c.l.b16 %v1332_v49  ;;  %v1298_v54 = vld [vmem:[#allocation2 + $0x20] sm:$0xe]  ;;  %v5716_v4 = vrot.slane %v1196_v45, 4 }
 0x134   : > { %v1978_v1 = vor.u32 %v1977_v0, %v1974_v32  ;;  %v1100_v44 = vld [vmem:[#allocation2 + $0x38] sm:$0xf]  ;;  %v1988_v58 = vrot.slane %v1986_v26, 4  ;;  %v1991_v2 = vrot.slane %v1989_v47, 5  ;;  %v1231_v18 = vpack.c.b16 %v1226_v30, %v1225_v17  ;;  %v4308_v57 = vld [vmem:[#allocation2 + $0x30] sm:$0xf] }
 0x135   : > { %4350 = vmatmul.msk.bf16.vlgmr.msra.gmra.mxu0 %vm468_vm0, %v1365_v38  ;;  %v4368_v50 = vld [vmem:[#allocation2 + $0x38] sm:$0xf]  ;;  %v1204_v24 = vshrl.u32 %v1100_v44, 16  ;;  %v1207_v55 = vshll.u32 %v1100_v44, 16  ;;  %v1360_v34 = vunpack.c.l.b16 %v1336_v23  ;;  %v1299_v53 = vld [vmem:[#allocation2 + $0x28] sm:$0xe] }
 0x136   : > { %v4695_v40 = vld [vmem:[#allocation2 + $0x3c] sm:$0xf0]  ;;  %v1979_v31 = vrot.slane %v1978_v1, 4  ;;  %v1983_v51 = vrot.slane %v1981_v39, 5  ;;  %v1992_v5 = vor.u32 %v1991_v2, %v1988_v58  ;;  %v1995_v33 = vshll.u32 %v5712_v20, 16 }
 0x137   : > { %v1206_v8 = vrot.slane %v1204_v24, 4  ;;  %v1209_v9 = vrot.slane %v1207_v55, 5  ;;  %v4338_v10 = vrot.slane %v1298_v54, 9  ;;  %v4369_v13 = vor.u32 %v4695_v40, %v4368_v50  ;;  %v4685_v3 = vld [vmem:[#allocation2 + $0x34] sm:$0xf0] }
 0x138   : > { %v1339_v19 = vrot.slane %v5648_v36, 5  ;;  %v1984_v21 = vsel %vm5571_vm1, %v1979_v31, %v1983_v51  ;;  %v4339_v42 = vrot.slane %v1299_v53, 9  ;;  %v1343_v6 = vrot.slane %v5667_v59, 5  ;;  %v5731_v28 = vld [vmem:[#allocation2 + $0xc] sm:$0x1] }
 0x139   : > { %v5718_v35 = vld [vmem:[#allocation2 + $0x34] sm:$0x1]  ;;  %v1210_v61 = vor.u32 %v1209_v9, %v1206_v8  ;;  %v1993_v22 = vrot.slane %v1992_v5, 4  ;;  %v5733_v62 = vld [vmem:[#allocation2 + $0x8] sm:$0xe]  ;;  %v1366_v56 = vpack.c.b16 %v1360_v34, %v1359_v43  ;;  %v4309_v37 = vor.u32 %v4685_v3, %v4308_v57 }
 0x13a   : > { %v5721_v41 = vld [vmem:[#allocation2 + $0x3c] sm:$0x1]  ;;  %v1199_v16 = vshll.u32 %v5718_v35, 16  ;;  %v4711_v36 = vld [vmem:[%s6866_s5 + $0x88] sm:$0xff]  ;;  %v5738_v29 = vld [vmem:[#allocation2 + $0x10] sm:$0xe]  ;;  %v5740_v59 = vunpack.c.l.b16 %v1984_v21  ;;  %v5744_v32 = vsel %vm5658_vm5, %v4338_v10, %v1339_v19  ;;  %v5748_v49 = vsel %vm5658_vm5, %v4339_v42, %v1343_v6 }
 0x13b   : > { %4332 = vmatmul.msk.bf16.gmra.mxu3 %vm468_vm0, %v1231_v18  ;;  %v1213_v60 = vshll.u32 %v5721_v41, 16  ;;  %4381 = vmatmul.msk.bf16.gmra.mxu1 %vm468_vm0, %v4369_v13  ;;  %v1211_v12 = vrot.slane %v1210_v61, 4  ;;  %v1523_v52 = vld [vmem:[#allocation2 + $0x8] sm:$0xf]  ;;  %v1997_v63 = vrot.slane %v1995_v33, 5  ;;  %v4394_v47 = vrot.slane %v5733_v62, 9 }
 0x13c   : > { %v1201_v25 = vrot.slane %v1199_v16, 5  ;;  %v1525_v0 = vld [vmem:[#allocation2 + $0x10] sm:$0xf]  ;;  %2262 = vmatpush.bf16.msra.mxu2 %v4711_v36  ;;  %v1526_v26 = vld [vmem:[#allocation2 + $0x14] sm:$0x1]  ;;  %v1754_v17 = vrot.slane %v5731_v28, 5 }
 0x13d   : > { %v1215_v45 = vrot.slane %v1213_v60, 5  ;;  %v1998_v38 = vsel %vm5571_vm1, %v1993_v22, %v1997_v63  ;;  %v4395_v1 = vrot.slane %v5738_v29, 9  ;;  %v1540_v44 = vshrl.u32 %v1523_v52, 16  ;;  %v1959_v55 = vld [vmem:[#allocation2 + $0x20] sm:$0xf] }
 0x13e   : > { %v1202_v30 = vsel %vm5571_vm1, %v5716_v4, %v1201_v25  ;;  %v1543_v39 = vshll.u32 %v1523_v52, 16  ;;  %v1554_v50 = vshrl.u32 %v1525_v0, 16  ;;  %v1557_v24 = vshll.u32 %v1525_v0, 16  ;;  %v1961_v58 = vld [vmem:[#allocation2 + $0x28] sm:$0xf] }
 0x13f   : > { %v1216_v23 = vsel %vm5571_vm1, %v1211_v12, %v1215_v45  ;;  %v1758_v43 = vrot.slane %v1526_v26, 5  ;;  %v1542_v54 = vrot.slane %v1540_v44, 4  ;;  %v1549_v40 = vshll.u32 %v5731_v28, 16  ;;  %v5763_v21 = vld [vmem:[#allocation2 + $0x24] sm:$0x1] }
 0x140   : > { %v1563_v31 = vshll.u32 %v1526_v26, 16  ;;  %v2088_v4 = vunpack.c.l.b16 %v1998_v38  ;;  %v1545_v2 = vrot.slane %v1543_v39, 5  ;;  %v1556_v18 = vrot.slane %v1554_v50, 4  ;;  %v5767_v62 = vld [vmem:[#allocation2 + $0x2c] sm:$0x1] }
 0x141   : > { %v1559_v8 = vrot.slane %v1557_v24, 5  ;;  %v1227_v9 = vunpack.c.l.b16 %v1202_v30  ;;  %v1228_v34 = vunpack.c.l.b16 %v1216_v23  ;;  %v2000_v57 = vshrl.u32 %v1959_v55, 16  ;;  %v1300_v36 = vld [vmem:[#allocation2 + $0x30] sm:$0xe]  ;;  %v1527_v30 = vld [vmem:[#allocation2 + $0x18] sm:$0xf] }
 0x142   : > { %v2003_v53 = vshll.u32 %v1959_v55, 16  ;;  %v1546_v51 = vor.u32 %v1545_v2, %v1542_v54  ;;  %v2014_v33 = vshrl.u32 %v1961_v58, 16  ;;  %v2017_v10 = vshll.u32 %v1961_v58, 16  ;;  %v1528_v23 = vld [vmem:[#allocation2 + $0x1c] sm:$0x1] }
 0x143   : > { %4321 = vmatmul.msk.bf16.gmra.mxu2 %vm468_vm0, %v4309_v37  ;;  %v1560_v5 = vor.u32 %v1559_v8, %v1556_v18  ;;  %v1551_v13 = vrot.slane %v1549_v40, 5  ;;  %v1565_v16 = vrot.slane %v1563_v31, 5  ;;  %v2002_v61 = vrot.slane %v2000_v57, 4  ;;  %v1730_v39 = vld [vmem:[#allocation2 + $0x18] sm:$0xe] }
 0x144   : > { %v2005_v3 = vrot.slane %v2003_v53, 5  ;;  %v1547_v19 = vrot.slane %v1546_v51, 4  ;;  %v2016_v42 = vrot.slane %v2014_v33, 4  ;;  %v2019_v6 = vrot.slane %v2017_v10, 5  ;;  %v1529_v55 = vld [vmem:[#allocation2 + $0x20] sm:$0xf] }
 0x145   : > { %4351 = vmatmul.msk.bf16.gmra.mxu0 %vm468_vm0, %v1366_v56  ;;  %v1561_v60 = vrot.slane %v1560_v5, 4  ;;  %v1361_v22 = vunpack.c.l.b16 %v5744_v32  ;;  %v1362_v28 = vunpack.c.l.b16 %v5748_v49  ;;  %v1232_v12 = vpack.c.b16 %v1228_v34, %v1227_v9  ;;  %v1530_v8 = vld [vmem:[#allocation2 + $0x24] sm:$0x1]  ;;  %v1965_v33 = vld [vmem:[#allocation2 + $0x38] sm:$0xf] }
 0x146   : > { %v1552_v56 = vsel %vm5571_vm1, %v1547_v19, %v1551_v13  ;;  %v2006_v29 = vor.u32 %v2005_v3, %v2002_v61  ;;  %v2095_v52 = vpack.c.b16 %v2088_v4, %v5740_v59  ;;  %v5776_v25 = vsel %vm5658_vm5, %v4394_v47, %v1754_v17  ;;  %v1301_v17 = vld [vmem:[#allocation2 + $0x38] sm:$0xe]  ;;  %v1963_v4 = vld [vmem:[#allocation2 + $0x30] sm:$0xf]  ;;  %v1731_v3 = vld [vmem:[#allocation2 + $0x20] sm:$0xe] }
 0x147   : > { %v1566_v37 = vsel %vm5571_vm1, %v1561_v60, %v1565_v16  ;;  %v2009_v63 = vshll.u32 %v5763_v21, 16  ;;  %v2020_v32 = vor.u32 %v2019_v6, %v2016_v42  ;;  %v5782_v0 = vsel %vm5658_vm5, %v4395_v1, %v1758_v43  ;;  %v4796_v11 = vld [vmem:[%s6871_s10] ss:$0 sm:$0xff] }
 0x148   : > { %v2023_v45 = vshll.u32 %v5767_v62, 16  ;;  %v4340_v49 = vrot.slane %v1300_v36, 9  ;;  %v1347_v26 = vrot.slane %v5718_v35, 5  ;;  %v1655_v59 = vunpack.c.l.b16 %v1552_v56 }
 0x149   : > { %v1656_v47 = vunpack.c.l.b16 %v1566_v37  ;;  %v1367_v38 = vpack.c.b16 %v1362_v28, %v1361_v22  ;;  %v1788_v44 = vunpack.c.l.b16 %v5776_v25  ;;  %v2007_v1 = vrot.slane %v2006_v29, 4  ;;  %v5803_v29 = vld [vmem:[#allocation2 + $0x34] sm:$0x1] }
 0x14a   : > { %v1789_v50 = vunpack.c.l.b16 %v5782_v0  ;;  %v2011_v24 = vrot.slane %v2009_v63, 5  ;;  %v2021_v35 = vrot.slane %v2020_v32, 4  ;;  %v1568_v43 = vshrl.u32 %v1527_v30, 16  ;;  %v5810_v0 = vld [vmem:[#allocation2 + $0x3c] sm:$0x1] }
 0x14b   : > { %4333 = vmatmul.msk.bf16.gmra.mxu3 %vm468_vm0, %v1232_v12  ;;  %4450 = vmatmul.msk.bf16.vlgmr.msra.gmra.mxu1 %vm468_vm0, %v2095_v52  ;;  %v2025_v54 = vrot.slane %v2023_v45, 5  ;;  %v5795_v40 = vsel %vm5658_vm5, %v4340_v49, %v1347_v26  ;;  %v4341_v31 = vrot.slane %v1301_v17, 9  ;;  %v1571_v58 = vshll.u32 %v1527_v30, 16 }
 0x14c   : > { %v1663_v2 = vpack.c.b16 %v1656_v47, %v1655_v59  ;;  %v1351_v18 = vrot.slane %v5721_v41, 5  ;;  %v4396_v9 = vrot.slane %v1730_v39, 9  ;;  %v1570_v34 = vrot.slane %v1568_v43, 4  ;;  %v1531_v47 = vld [vmem:[#allocation2 + $0x28] sm:$0xf] }
 0x14d   : > { %v2012_v57 = vsel %vm5571_vm1, %v2007_v1, %v2011_v24  ;;  %v1573_v53 = vrot.slane %v1571_v58, 5  ;;  %v1582_v51 = vshrl.u32 %v1529_v55, 16  ;;  %v1585_v5 = vshll.u32 %v1529_v55, 16  ;;  %v5823_v58 = vld [vmem:[#allocation2 + $0x2c] sm:$0x1] }
 0x14e   : > { %v2026_v10 = vsel %vm5571_vm1, %v2021_v35, %v2025_v54  ;;  %v1762_v13 = vrot.slane %v1528_v23, 5  ;;  %v2028_v16 = vshrl.u32 %v1963_v4, 16  ;;  %v2031_v61 = vshll.u32 %v1963_v4, 16  ;;  %v1533_v4 = vld [vmem:[#allocation2 + $0x30] sm:$0xf] }
 0x14f   : > { %v1574_v19 = vor.u32 %v1573_v53, %v1570_v34  ;;  %v1577_v60 = vshll.u32 %v1528_v23, 16  ;;  %v1584_v41 = vrot.slane %v1582_v51, 4  ;;  %v1587_v42 = vrot.slane %v1585_v5, 5  ;;  %v815_v34 = vld [vmem:[#allocation2 + $0x48] sm:$0x1] }
 0x150   : > { %v1591_v6 = vshll.u32 %v1530_v8, 16  ;;  %v2030_v22 = vrot.slane %v2028_v16, 4  ;;  %v2033_v28 = vrot.slane %v2031_v61, 5  ;;  %v2042_v36 = vshrl.u32 %v1965_v33, 16  ;;  %v1534_v61 = vld [vmem:[#allocation2 + $0x34] sm:$0x1] }
 0x151   : > { %v2089_v12 = vunpack.c.l.b16 %v2012_v57  ;;  %v2090_v56 = vunpack.c.l.b16 %v2026_v10  ;;  %v1588_v37 = vor.u32 %v1587_v42, %v1584_v41  ;;  %v2045_v52 = vshll.u32 %v1965_v33, 16  ;;  %v4710_v33 = vld [vmem:[%s6866_s5 + $0x80] sm:$0xff]  ;;  %v4707_v10 = vld [vmem:[%s6866_s5 + $0x68] sm:$0xff] }
 0x152   : > { %v5808_v25 = vsel %vm5658_vm5, %v4341_v31, %v1351_v18  ;;  %v4397_v63 = vrot.slane %v1731_v3, 9  ;;  %v1575_v32 = vrot.slane %v1574_v19, 4  ;;  %v2044_v45 = vrot.slane %v2042_v36, 4  ;;  %v847_v41 = vld [vmem:[#allocation2 + $0x4c] sm:$0x1]  ;;  %2263 = vmatpush.bf16.msra.mxu2 %v4710_v33  ;;  %1924 = vmatpush.bf16.msra.mxu0 %v4707_v10  ;;  %v4706_v36 = vld [vmem:[%s6866_s5 + $0x60] sm:$0xff] }
 0x153   : > { %4390 = vmatmul.msk.bf16.vlgmr.msrb.gmra.mxu2 %vm468_vm0, %v1663_v2  ;;  %v1766_v49 = vrot.slane %v1530_v8, 5  ;;  %v1589_v26 = vrot.slane %v1588_v37, 4  ;;  %v2034_v30 = vor.u32 %v2033_v28, %v2030_v22  ;;  %v2047_v59 = vrot.slane %v2045_v52, 5  ;;  %v2160_v33 = vld [vmem:[#allocation2 + $0x10] sm:$0xe] }
 0x154   : > { %v5814_v17 = vsel %vm5658_vm5, %v4396_v9, %v1762_v13  ;;  %v1579_v1 = vrot.slane %v1577_v60, 5  ;;  %v2037_v23 = vshll.u32 %v5803_v29, 16  ;;  %v1796_v39 = vpack.c.b16 %v1789_v50, %v1788_v44  ;;  %v1732_v9 = vld [vmem:[#allocation2 + $0x28] sm:$0xe]  ;;  %v844_v60 = vld [vmem:[#allocation2 + $0x44] sm:$0x1] }
 0x155   : > { %4352 = vmatmul.msk.bf16.gmra.mxu0 %vm468_vm0, %v1367_v38  ;;  %v1593_v38 = vrot.slane %v1591_v6, 5  ;;  %v2096_v24 = vpack.c.b16 %v2090_v56, %v2089_v12  ;;  %v1363_v35 = vunpack.c.l.b16 %v5795_v40  ;;  %v2048_v55 = vor.u32 %v2047_v59, %v2044_v45  ;;  %v1733_v45 = vld [vmem:[#allocation2 + $0x30] sm:$0xe] }
 0x156   : > { %v1580_v43 = vsel %vm5571_vm1, %v1575_v32, %v1579_v1  ;;  %v2051_v31 = vshll.u32 %v5810_v0, 16  ;;  %v1596_v2 = vshrl.u32 %v1531_v47, 16  ;;  %v1364_v44 = vunpack.c.l.b16 %v5808_v25  ;;  %v1967_v25 = vld [vmem:[#allocation2 + $0x40] sm:$0xf]  ;;  %v5847_v32 = vld [vmem:[#allocation2 + $0x8] sm:$0xf]  ;;  %1925 = vmatpush.bf16.msra.mxu0 %v4706_v36 }
 0x157   : > { %v1594_v54 = vsel %vm5571_vm1, %v1589_v26, %v1593_v38  ;;  %v1767_v50 = vsel %vm5658_vm5, %v4397_v63, %v1766_v49  ;;  %v1790_v18 = vunpack.c.l.b16 %v5814_v17  ;;  %v2035_v8 = vrot.slane %v2034_v30, 4  ;;  %v5852_v17 = vld [vmem:[#allocation2 + $0xc] sm:$0xf0] }
 0x158   : > { %v2039_v57 = vrot.slane %v2037_v23, 5  ;;  %v2049_v53 = vrot.slane %v2048_v55, 4  ;;  %v1598_v51 = vrot.slane %v1596_v2, 4  ;;  %v1599_v5 = vshll.u32 %v1531_v47, 16 }
 0x159   : > { %v1657_v13 = vunpack.c.l.b16 %v1580_v43  ;;  %v1658_v16 = vunpack.c.l.b16 %v1594_v54  ;;  %v1610_v3 = vshrl.u32 %v1533_v4, 16  ;;  %v1613_v19 = vshll.u32 %v1533_v4, 16 }
 0x15a   : > { %v2053_v42 = vrot.slane %v2051_v31, 5  ;;  %v4398_v6 = vrot.slane %v1732_v9, 9  ;;  %v1770_v22 = vrot.slane %v5823_v58, 5  ;;  %v1601_v28 = vrot.slane %v1599_v5, 5  ;;  %v1535_v9 = vld [vmem:[#allocation2 + $0x38] sm:$0xf] }
 0x15b   : > { %4410 = vmatmul.msk.bf16.vlgmr.msrb.gmra.mxu3 %vm468_vm0, %v1796_v39  ;;  %4451 = vmatmul.msk.bf16.gmra.mxu1 %vm468_vm0, %v2096_v24  ;;  %v2040_v12 = vsel %vm5571_vm1, %v2035_v8, %v2039_v57  ;;  %v1612_v56 = vrot.slane %v1610_v3, 4  ;;  %v1615_v37 = vrot.slane %v1613_v19, 5  ;;  %v816_v52 = vsel %vm5387_vm15, 0, %v815_v34 }
 0x15c   : > { %v2054_v63 = vsel %vm5571_vm1, %v2049_v53, %v2053_v42  ;;  %v1602_v49 = vor.u32 %v1601_v28, %v1598_v51  ;;  %v1605_v26 = vshll.u32 %v5823_v58, 16  ;;  %817 = vst [vmem:[#allocation2 + $0x48] sm:$0x1] %v816_v52  ;;  %v845_v30 = vsel %vm5419_vm3, 0, %v844_v60  ;;  %v1537_v51 = vld [vmem:[#allocation2 + $0x40] sm:$0xf] }
 0x15d   : > { %v1791_v59 = vunpack.c.l.b16 %v1767_v50  ;;  %v1664_v47 = vpack.c.b16 %v1658_v16, %v1657_v13  ;;  %v1616_v1 = vor.u32 %v1615_v37, %v1612_v56  ;;  %846 = vst [vmem:[#allocation2 + $0x44] sm:$0x1] %v845_v30  ;;  %v848_v38 = vsel %vm5419_vm3, 0, %v847_v41  ;;  %v2162_v30 = vld [vmem:[#allocation2 + $0x20] sm:$0xe] }
 0x15e   : > { %v1603_v23 = vrot.slane %v1602_v49, 4  ;;  %v1619_v39 = vshll.u32 %v1534_v61, 16  ;;  %849 = vst [vmem:[#allocation2 + $0x4c] sm:$0x1] %v848_v38  ;;  %v2056_v24 = vshrl.u32 %v1967_v25, 16  ;;  %v2059_v55 = vshll.u32 %v1967_v25, 16 }
 0x15f   : > { %v2091_v43 = vunpack.c.l.b16 %v2040_v12  ;;  %v2092_v54 = vunpack.c.l.b16 %v2054_v63  ;;  %v4399_v31 = vrot.slane %v1733_v45, 9  ;;  %v1774_v58 = vrot.slane %v1534_v61, 5  ;;  %v2161_v61 = vld [vmem:[#allocation2 + $0x18] sm:$0xe] }
 0x160   : > { %v1368_v4 = vpack.c.b16 %v1364_v44, %v1363_v35  ;;  %v5861_v2 = vsel %vm5658_vm5, %v4398_v6, %v1770_v22  ;;  %v1607_v50 = vrot.slane %v1605_v26, 5  ;;  %v1617_v8 = vrot.slane %v1616_v1, 4 }
 0x161   : > { %v921_v34 = vrot.slane %v5663_v46, 4  ;;  %v1797_v57 = vpack.c.b16 %v1791_v59, %v1790_v18  ;;  %v4357_v53 = vor.u32 %v5852_v17, %v5847_v32  ;;  %v1621_v35 = vrot.slane %v1619_v39, 5 }
 0x162   : > { %v1608_v40 = vsel %vm5571_vm1, %v1603_v23, %v1607_v50  ;;  %v2058_v44 = vrot.slane %v2056_v24, 4  ;;  %v2061_v5 = vrot.slane %v2059_v55, 5  ;;  %v2097_v10 = vpack.c.b16 %v2092_v54, %v2091_v43  ;;  %v2163_v23 = vld [vmem:[#allocation2 + $0x28] sm:$0xe]  ;;  %v2164_v54 = vld [vmem:[#allocation2 + $0x30] sm:$0xe] }
 0x163   : > { %4391 = vmatmul.msk.bf16.gmra.mxu2 %vm468_vm0, %v1664_v47  ;;  %v5871_v13 = vsel %vm5658_vm5, %v4399_v31, %v1774_v58  ;;  %v1792_v46 = vunpack.c.l.b16 %v5861_v2  ;;  %v1969_v18 = vld [vmem:[#allocation2 + $0x48] sm:$0xf]  ;;  %v1624_v16 = vshrl.u32 %v1535_v9, 16  ;;  %v1622_v3 = vsel %vm5571_vm1, %v1617_v8, %v1621_v35 }
 0x164   : > { %v986_v19 = vld [vmem:[#allocation2 + $0x44] sm:$0x1]  ;;  %v2070_v60 = vshrl.u32 %v1969_v18, 16  ;;  %v2073_v41 = vshll.u32 %v1969_v18, 16  ;;  %v1627_v42 = vshll.u32 %v1535_v9, 16  ;;  %v1659_v6 = vunpack.c.l.b16 %v1608_v40 }
 0x165   : > { %4353 = vmatmul.msk.bf16.gmra.mxu0 %vm468_vm0, %v1368_v4  ;;  %v987_v22 = vsel %vm5387_vm15, %v921_v34, %v986_v19  ;;  %v5878_v28 = vld [vmem:[#allocation2 + $0x4c] sm:$0x1]  ;;  %v1638_v36 = vshrl.u32 %v1537_v51, 16  ;;  %v1641_v12 = vshll.u32 %v1537_v51, 16  ;;  %v2062_v56 = vor.u32 %v2061_v5, %v2058_v44  ;;  %v2165_v51 = vld [vmem:[#allocation2 + $0x38] sm:$0xe] }
 0x166   : > { %988 = vst [vmem:[#allocation2 + $0x44] sm:$0x1] %v987_v22  ;;  %v2072_v37 = vrot.slane %v2070_v60, 4  ;;  %v2075_v52 = vrot.slane %v2073_v41, 5  ;;  %v2079_v25 = vshll.u32 %v5878_v28, 16  ;;  %v1660_v63 = vunpack.c.l.b16 %v1622_v3 }
 0x167   : > { %v4454_v45 = vrot.slane %v2160_v33, 9  ;;  %v2186_v49 = vrot.slane %v5705_v7, 5  ;;  %v4455_v26 = vrot.slane %v2161_v61, 9  ;;  %v1626_v47 = vrot.slane %v1624_v16, 4  ;;  %v1536_v5 = vld [vmem:[#allocation2 + $0x3c] sm:$0x1] }
 0x168   : > { %v2076_v59 = vor.u32 %v2075_v52, %v2072_v37  ;;  %v1629_v1 = vrot.slane %v1627_v42, 5  ;;  %v2190_v38 = vrot.slane %v5712_v20, 5  ;;  %v2081_v39 = vrot.slane %v2079_v25, 5  ;;  %v2166_v60 = vld [vmem:[#allocation2 + $0x40] sm:$0xe] }
 0x169   : > { %v1640_v24 = vrot.slane %v1638_v36, 4  ;;  %v1643_v55 = vrot.slane %v1641_v12, 5  ;;  %v2187_v43 = vsel %vm5658_vm5, %v4454_v45, %v2186_v49  ;;  %v4456_v4 = vrot.slane %v2162_v30, 9  ;;  %v2167_v37 = vld [vmem:[#allocation2 + $0x48] sm:$0xe] }
 0x16a   : > { %v2077_v31 = vrot.slane %v2076_v59, 4  ;;  %v2191_v7 = vsel %vm5658_vm5, %v4455_v26, %v2190_v38  ;;  %v2220_v58 = vunpack.c.l.b16 %v2187_v43  ;;  %v2194_v8 = vrot.slane %v5763_v21, 5  ;;  %v1734_v43 = vld [vmem:[#allocation2 + $0x38] sm:$0xe] }
 0x16b   : > { %4411 = vmatmul.msk.bf16.gmra.mxu3 %vm468_vm0, %v1797_v57  ;;  %4452 = vmatmul.msk.bf16.gmra.mxu1 %vm468_vm0, %v2097_v10  ;;  %v2221_v50 = vunpack.c.l.b16 %v2191_v7  ;;  %v4457_v9 = vrot.slane %v2163_v23, 9  ;;  %v2198_v20 = vrot.slane %v5767_v62, 5  ;;  %v1665_v34 = vpack.c.b16 %v1660_v63, %v1659_v6 }
 0x16c   : > { %v2063_v57 = vrot.slane %v2062_v56, 4  ;;  %v4458_v40 = vrot.slane %v2164_v54, 9  ;;  %v2202_v35 = vrot.slane %v5803_v29, 5  ;;  %v1630_v33 = vor.u32 %v1629_v1, %v1626_v47 }
 0x16d   : > { %v1968_v44 = vld [vmem:[#allocation2 + $0x44] sm:$0x1]  ;;  %v5892_v10 = vpack.c.b16 %v2221_v50, %v2220_v58  ;;  %v2195_v18 = vsel %vm5658_vm5, %v4456_v4, %v2194_v8  ;;  %v2199_v21 = vsel %vm5658_vm5, %v4457_v9, %v2198_v20  ;;  %v2082_v62 = vsel %vm5571_vm1, %v2077_v31, %v2081_v39  ;;  %v1735_v31 = vld [vmem:[#allocation2 + $0x40] sm:$0xe] }
 0x16e   : > { %v2065_v16 = vshll.u32 %v1968_v44, 16  ;;  %v1538_v61 = vld [vmem:[#allocation2 + $0x44] sm:$0x1]  ;;  %v1644_v3 = vor.u32 %v1643_v55, %v1640_v24  ;;  %v2222_v19 = vunpack.c.l.b16 %v2195_v18  ;;  %v2223_v29 = vunpack.c.l.b16 %v2199_v21  ;;  %v4420_v21 = vld [vmem:[#allocation2 + $0x20] sm:$0xf] }
 0x16f   : > { %v2203_v41 = vsel %vm5658_vm5, %v4458_v40, %v2202_v35  ;;  %v4459_v42 = vrot.slane %v2165_v51, 9  ;;  %v2206_v6 = vrot.slane %v5810_v0, 5  ;;  %v1793_v22 = vunpack.c.l.b16 %v5871_v13 }
 0x170   : > { %v2067_v36 = vrot.slane %v2065_v16, 5  ;;  %v1633_v12 = vshll.u32 %v1536_v5, 16  ;;  %v2224_v56 = vunpack.c.l.b16 %v2203_v41  ;;  %v1647_v52 = vshll.u32 %v1538_v61, 16  ;;  %v4703_v16 = vld [vmem:[#allocation2 + $0x24] sm:$0xf0] }
 0x171   : > { %v2229_v25 = vpack.c.b16 %v2223_v29, %v2222_v19  ;;  %v2207_v63 = vsel %vm5658_vm5, %v4459_v42, %v2206_v6  ;;  %v4460_v45 = vrot.slane %v2166_v60, 9  ;;  %v2094_v13 = vunpack.c.l.b16 %v2082_v62  ;;  %v4424_v29 = vld [vmem:[#allocation2 + $0x30] sm:$0xf]  ;;  %v4704_v41 = vld [vmem:[#allocation2 + $0x34] sm:$0xf0] }
 0x172   : > { %v2068_v0 = vsel %vm5571_vm1, %v2063_v57, %v2067_v36  ;;  %v2225_v49 = vunpack.c.l.b16 %v2207_v63  ;;  %v2210_v26 = vrot.slane %v1968_v44, 5  ;;  %v1631_v59 = vrot.slane %v1630_v33, 4  ;;  %v4702_v57 = vld [vmem:[#allocation2 + $0x14] sm:$0xf0]  ;;  %v4428_v63 = vld [vmem:[#allocation2 + $0x40] sm:$0xf] }
 0x173   : > { %4392 = vmatmul.msk.bf16.gmra.mxu2 %vm468_vm0, %v1665_v34  ;;  %v2093_v30 = vunpack.c.l.b16 %v2068_v0  ;;  %v1645_v47 = vrot.slane %v1644_v3, 4  ;;  %v4461_v1 = vrot.slane %v2167_v37, 9  ;;  %v2214_v39 = vrot.slane %v5878_v28, 5  ;;  %v4416_v34 = vld [vmem:[#allocation2 + $0x10] sm:$0xf] }
 0x174   : > { %v2230_v38 = vpack.c.b16 %v2225_v49, %v2224_v56  ;;  %v2211_v23 = vsel %vm5658_vm5, %v4460_v45, %v2210_v26  ;;  %v1798_v32 = vpack.c.b16 %v1793_v22, %v1792_v46  ;;  %v1635_v17 = vrot.slane %v1633_v12, 5  ;;  %v4705_v45 = vld [vmem:[#allocation2 + $0x44] sm:$0xf0] }
 0x175   : > { %4378 = vmatmul.msk.bf16.vlgmr.msrb.gmra.mxu0 %vm468_vm0, %v4357_v53  ;;  %v1649_v53 = vrot.slane %v1647_v52, 5  ;;  %v2226_v24 = vunpack.c.l.b16 %v2211_v23  ;;  %v2098_v55 = vpack.c.b16 %v2094_v13, %v2093_v30  ;;  %v2215_v54 = vsel %vm5658_vm5, %v4461_v1, %v2214_v39 }
 0x176   : > { %v1636_v7 = vsel %vm5571_vm1, %v1631_v59, %v1635_v17  ;;  %v2227_v58 = vunpack.c.l.b16 %v2215_v54  ;;  %v4400_v2 = vrot.slane %v1734_v43, 9  ;;  %v1778_v46 = vrot.slane %v1536_v5, 5 }
 0x177   : > { %v1650_v28 = vsel %vm5571_vm1, %v1645_v47, %v1649_v53  ;;  %v4401_v50 = vrot.slane %v1735_v31, 9  ;;  %v1782_v8 = vrot.slane %v1538_v61, 5  ;;  %v1661_v9 = vunpack.c.l.b16 %v1636_v7  ;;  %v4793_v61 = vld [vmem:[%s452_s30] ss:$0 sm:$0xff] }
 0x178   : > { %v2231_v4 = vpack.c.b16 %v2227_v58, %v2226_v24  ;;  %v1662_v20 = vunpack.c.l.b16 %v1650_v28  ;;  %v1779_v51 = vsel %vm5658_vm5, %v4400_v2, %v1778_v46  ;;  %v4417_v44 = vor.u32 %v4702_v57, %v4416_v34 }
 0x179   : > { %v1783_v40 = vsel %vm5658_vm5, %v4401_v50, %v1782_v8  ;;  %v1794_v33 = vunpack.c.l.b16 %v1779_v51  ;;  %v4421_v62 = vor.u32 %v4703_v16, %v4420_v21  ;;  %v4425_v6 = vor.u32 %v4704_v41, %v4424_v29 }
 0x17a   : > { %v1666_v35 = vpack.c.b16 %v1662_v20, %v1661_v9  ;;  %v1795_v5 = vunpack.c.l.b16 %v1783_v40  ;;  %v4429_v49 = vor.u32 %v4705_v45, %v4428_v63 }
 0x17b   : > { %4412 = vmatmul.msk.bf16.gmra.mxu3 %vm468_vm0, %v1798_v32  ;;  %4453 = vmatmul.msk.bf16.gmra.mxu1 %vm468_vm0, %v2098_v55 }
 0x17c   : > { %v1799_v18 = vpack.c.b16 %v1795_v5, %v1794_v33 }
 0x183   : > { %4393 = vmatmul.msk.bf16.gmra.mxu2 %vm468_vm0, %v1666_v35 }
 0x185   : > { %4438 = vmatmul.msk.bf16.vlgmr.msra.gmra.mxu0 %vm468_vm0, %v4417_v44 }
 0x18b   : > { %4413 = vmatmul.msk.bf16.gmra.mxu3 %vm468_vm0, %v1799_v18 }
 0x193   : > { %4470 = vmatmul.msk.bf16.vlgmr.msra.gmra.mxu2 %vm468_vm0, %v5892_v10 }
 0x195   : > { %4439 = vmatmul.msk.bf16.gmra.mxu0 %vm468_vm0, %v4421_v62  ;;  %v1055_v3 = vpop.f32.mrf.mxu2 }
 0x196   : > { %v5941_v19 = vadd.f32 %v4793_v61, %v1055_v3 }
 0x198   : > { %v1500_v54 = vpop.f32.mrf.mxu1 }
 0x19d   : > { %v1057_v60 = vpop.f32.mrf.mxu2 }
 0x19e   : > { %v1079_v36 = vadd.f32 %v4793_v61, %v1057_v60 }
 0x1a0   : > { %v5954_v46 = vpop.f32.mrf.mxu1 }
 0x1a2   : > { %v1266_v42 = vpop.f32.mrf.mxu0 }
 0x1a3   : > { %4471 = vmatmul.msk.bf16.gmra.mxu2 %vm468_vm0, %v2229_v25  ;;  %v1286_v41 = vadd.f32 %v1266_v42, %v5941_v19 }
 0x1a5   : > { %4440 = vmatmul.msk.bf16.gmra.mxu0 %vm468_vm0, %v4425_v6 }
 0x1a6   : > { %v1060_v10 = vpop.f32.mrf.mxu2 }
 0x1a7   : > { %v1080_v22 = vadd.f32 %v4793_v61, %v1060_v10 }
 0x1a8   : > { %v1505_v57 = vpop.f32.mrf.mxu1 }
 0x1aa   : > { %v1268_v12 = vpop.f32.mrf.mxu0 }
 0x1ab   : > { %v1287_v56 = vadd.f32 %v1268_v12, %v1079_v36 }
 0x1ae   : > { %v1271_v37 = vpop.f32.mrf.mxu3  ;;  %v1062_v52 = vpop.f32.mrf.mxu2 }
 0x1af   : > { %v1081_v13 = vadd.f32 %v4793_v61, %v1062_v52  ;;  %v1288_v43 = vadd.f32 %v1271_v37, %v1080_v22 }
 0x1b0   : > { %v1507_v21 = vpop.f32.mrf.mxu1 }
 0x1b2   : > { %v1402_v0 = vpop.f32.mrf.mxu0 }
 0x1b3   : > { %4472 = vmatmul.msk.bf16.gmra.mxu2 %vm468_vm0, %v2230_v38  ;;  %v1422_v6 = vadd.f32 %v1402_v0, %v1286_v41 }
 0x1b5   : > { %4441 = vmatmul.msk.bf16.gmra.mxu0 %vm468_vm0, %v4429_v49  ;;  %v2298_v49 = vld [vmem:[%s6869_s8 + $0x18] sm:$0xff] }
 0x1b6   : > { %v1273_v26 = vpop.f32.mrf.mxu3  ;;  %v1065_v25 = vpop.f32.mrf.mxu2  ;;  %2364 = vmatpush.msra.mxu3 %v2298_v49  ;;  %2387 = vmatpush.msrb.mxu0 %v2298_v49 }
 0x1b7   : > { %v1289_v30 = vadd.f32 %v1273_v26, %v1081_v13  ;;  %v1082_v59 = vadd.f32 %v4793_v61, %v1065_v25 }
 0x1b8   : > { %v1510_v10 = vpop.f32.mrf.mxu1 }
 0x1ba   : > { %v1404_v47 = vpop.f32.mrf.mxu0 }
 0x1bb   : > { %v5947_v1 = vadd.f32 %v1404_v47, %v1287_v56 }
 0x1be   : > { %v1276_v23 = vpop.f32.mrf.mxu3  ;;  %v1067_v39 = vpop.f32.mrf.mxu2 }
 0x1bf   : > { %v1083_v17 = vadd.f32 %v4793_v61, %v1067_v39  ;;  %v1290_v9 = vadd.f32 %v1276_v23, %v1082_v59  ;;  %v2297_v23 = vld [vmem:[%s6869_s8 + $0x10] sm:$0xff] }
 0x1c0   : > { %2365 = vmatpush.msra.mxu3 %v2297_v23  ;;  %2388 = vmatpush.msrb.mxu0 %v2297_v23 }
 0x1c2   : > { %v1407_v32 = vpop.f32.mrf.mxu0 }
 0x1c3   : > { %4473 = vmatmul.msk.bf16.gmra.mxu2 %vm468_vm0, %v2231_v4  ;;  %v1424_v31 = vadd.f32 %v1407_v32, %v1288_v43  ;;  %v2296_v43 = vld [vmem:[%s6869_s8 + $0x8] sm:$0xff] }
 0x1c4   : > { %2366 = vmatpush.msra.mxu3 %v2296_v43  ;;  %2389 = vmatpush.msrb.mxu0 %v2296_v43 }
 0x1c5   : > { %v1517_v58 = vadd.f32 %v1500_v54, %v1424_v31 }
 0x1c6   : > { %v1278_v53 = vpop.f32.mrf.mxu3  ;;  %v1070_v24 = vpop.f32.mrf.mxu2 }
 0x1c7   : > { %v1291_v55 = vadd.f32 %v1278_v53, %v1083_v17  ;;  %v5950_v38 = vadd.f32 %v4793_v61, %v1070_v24 }
 0x1ca   : > { %v1409_v7 = vpop.f32.mrf.mxu0 }
 0x1cb   : > { %v5952_v28 = vadd.f32 %v1409_v7, %v1289_v30 }
 0x1ce   : > { %v1072_v2 = vpop.f32.mrf.mxu2  ;;  %v1281_v40 = vpop.f32.mrf.mxu3 }
 0x1cf   : > { %v1085_v33 = vadd.f32 %v4793_v61, %v1072_v2  ;;  %v5961_v61 = vpop.f32.mrf.mxu1 }
 0x1d2   : > { %v1412_v50 = vpop.f32.mrf.mxu0 }
 0x1d3   : > { %v1426_v20 = vadd.f32 %v1412_v50, %v1290_v9 }
 0x1d5   : > { %v1519_v51 = vadd.f32 %v1505_v57, %v1426_v20  ;;  %v1292_v57 = vadd.f32 %v1281_v40, %v5950_v38 }
 0x1d6   : > { %v1700_v8 = vpop.f32.mrf.mxu2  ;;  %v1283_v16 = vpop.f32.mrf.mxu3 }
 0x1d7   : > { %v1293_v62 = vadd.f32 %v1283_v16, %v1085_v33  ;;  %v2132_v19 = vpop.f32.mrf.mxu1 }
 0x1da   : > { %v1414_v4 = vpop.f32.mrf.mxu0 }
 0x1db   : > { %v5956_v34 = vadd.f32 %v1414_v4, %v1291_v55  ;;  %v1518_v4 = vadd.f32 %v5954_v46, %v5952_v28 }
 0x1dd   : > { %v1520_v41 = vadd.f32 %v1507_v21, %v5956_v34  ;;  %v2295_v34 = vld [vmem:[%s6869_s8] sm:$0xff] }
 0x1de   : > { %v1702_v35 = vpop.f32.mrf.mxu2  ;;  %v1833_v45 = vpop.f32.mrf.mxu3  ;;  %2367 = vmatpush.msra.mxu3 %v2295_v34  ;;  %2390 = vmatpush.msrb.mxu0 %v2295_v34 }
 0x1df   : > { %v2134_v30 = vpop.f32.mrf.mxu1 }
 0x1e2   : > { %v1417_v44 = vpop.f32.mrf.mxu0 }
 0x1e3   : > { %v1428_v33 = vadd.f32 %v1417_v44, %v1292_v57 }
 0x1e6   : > { %v1705_v5 = vpop.f32.mrf.mxu2  ;;  %v1835_v0 = vpop.f32.mrf.mxu3 }
 0x1e7   : > { %v1722_v18 = vadd.f32 %v1705_v5, %v1517_v58  ;;  %v2137_v32 = vpop.f32.mrf.mxu1 }
 0x1ea   : > { %v1419_v3 = vpop.f32.mrf.mxu0 }
 0x1eb   : > { %v5958_v60 = vadd.f32 %v1419_v3, %v1293_v62 }
 0x1ee   : > { %v1707_v29 = vpop.f32.mrf.mxu2  ;;  %v1838_v59 = vpop.f32.mrf.mxu3 }
 0x1ef   : > { %v2139_v55 = vpop.f32.mrf.mxu1  ;;  %v1723_v5 = vadd.f32 %v1707_v29, %v1518_v4 }
 0x1f2   : > { %v1495_v22 = vpop.f32.mrf.mxu0 }
 0x1f3   : > { %v1515_v36 = vadd.f32 %v1495_v22, %v1422_v6  ;;  %v1855_v6 = vadd.f32 %v1838_v59, %v1722_v18 }
 0x1f5   : > { %v1720_v12 = vadd.f32 %v1700_v8, %v1515_v36 }
 0x1f6   : > { %v1710_v56 = vpop.f32.mrf.mxu2  ;;  %v1840_v17 = vpop.f32.mrf.mxu3 }
 0x1f7   : > { %v1724_v37 = vadd.f32 %v1710_v56, %v1519_v51  ;;  %v2142_v2 = vpop.f32.mrf.mxu1  ;;  %v1853_v16 = vadd.f32 %v1833_v45, %v1720_v12 }
 0x1fa   : > { %v1497_v52 = vpop.f32.mrf.mxu0 }
 0x1fb   : > { %v1516_v58 = vadd.f32 %v1497_v52, %v5947_v1  ;;  %v1856_v52 = vadd.f32 %v1840_v17, %v1723_v5 }
 0x1fd   : > { %v1721_v8 = vadd.f32 %v1702_v35, %v1516_v58  ;;  %v1521_v35 = vadd.f32 %v1510_v10, %v1428_v33 }
 0x1fe   : > { %v1712_v63 = vpop.f32.mrf.mxu2  ;;  %v1843_v31 = vpop.f32.mrf.mxu3 }
 0x1ff   : > { %v1854_v51 = vadd.f32 %v1835_v0, %v1721_v8  ;;  %v2144_v1 = vpop.f32.mrf.mxu1  ;;  %v1725_v36 = vadd.f32 %v1712_v63, %v1520_v41  ;;  %v1857_v38 = vadd.f32 %v1843_v31, %v1724_v37 }
 0x202   : > { %v1927_v13 = vpop.f32.mrf.mxu0 }
 0x203   : > { %v1947_v22 = vadd.f32 %v1927_v13, %v1853_v16 }
 0x205   : > { %v2152_v40 = vadd.f32 %v2132_v19, %v1947_v22 }
 0x206   : > { %v1715_v42 = vpop.f32.mrf.mxu2  ;;  %v1845_v9 = vpop.f32.mrf.mxu3 }
 0x207   : > { %v1726_v28 = vadd.f32 %v1715_v42, %v1521_v35  ;;  %v1858_v21 = vadd.f32 %v1845_v9, %v1725_v36  ;;  %v1522_v42 = vadd.f32 %v5961_v61, %v5958_v60 }
 0x20a   : > { %v1929_v26 = vpop.f32.mrf.mxu0 }
 0x20b   : > { %v1948_v62 = vadd.f32 %v1929_v26, %v1854_v51 }
 0x20d   : > { %v2153_v49 = vadd.f32 %v2134_v30, %v1948_v62 }
 0x20e   : > { %v5966_v25 = vpop.f32.mrf.mxu2  ;;  %v1848_v23 = vpop.f32.mrf.mxu3 }
 0x20f   : > { %v1859_v37 = vadd.f32 %v1848_v23, %v1726_v28 }
 0x212   : > { %v1932_v47 = vpop.f32.mrf.mxu0 }
 0x213   : > { %v1949_v56 = vadd.f32 %v1932_v47, %v1855_v6  ;;  %v2147_v47 = vpop.f32.mrf.mxu1 }
 0x215   : > { %v2154_v12 = vadd.f32 %v2137_v32, %v1949_v56 }
 0x216   : > { %v2265_v39 = vpop.f32.mrf.mxu2  ;;  %v1850_v43 = vpop.f32.mrf.mxu3 }
 0x217   : > { %v5984_v10 = vadd.f32 %v2265_v39, %v2152_v40  ;;  %v1727_v39 = vadd.f32 %v5966_v25, %v1522_v42 }
 0x219   : > { %v2320_v32 = vmul.f32 %v5984_v10, %v5984_v10 }
 0x21a   : > { %v1934_v53 = vpop.f32.mrf.mxu0 }
 0x21b   : > { %v1950_v46 = vadd.f32 %v1934_v53, %v1856_v52  ;;  %v2328_v58 = vsel %vm468_vm0, %v2320_v32, 0.0  ;;  %v2149_v56 = vpop.f32.mrf.mxu1 }
 0x21d   : > { %v2155_v19 = vadd.f32 %v2139_v55, %v1950_v46 }
 0x21e   : > { %v2267_v24 = vpop.f32.mrf.mxu2 }
 0x21f   : > { %v5979_v44 = vadd.f32 %v2267_v24, %v2153_v49  ;;  %v2299_v24 = vsel %vm468_vm0, %v5984_v10, 0.0 }
 0x221   : > { %v2321_v0 = vmul.f32 %v5979_v44, %v5979_v44  ;;  %v2300_v17 = vsel %vm468_vm0, %v5979_v44, 0.0 }
 0x222   : > { %v1937_v7 = vpop.f32.mrf.mxu0 }
 0x223   : > { %v1951_v18 = vadd.f32 %v1937_v7, %v1857_v38  ;;  %v2329_v55 = vsel %vm468_vm0, %v2321_v0, 0.0 }
 0x224   : > { %v2330_v33 = vadd.f32 %v2329_v55, %v2328_v58 }
 0x225   : > { %v2156_v59 = vadd.f32 %v2142_v2, %v1951_v18  ;;  %v2301_v2 = vadd.f32 %v2300_v17, %v2299_v24 }
 0x226   : > { %v2270_v54 = vpop.f32.mrf.mxu2 }
 0x227   : > { %v5986_v13 = vadd.f32 %v2270_v54, %v2154_v12 }
 0x229   : > { %v2322_v53 = vmul.f32 %v5986_v13, %v5986_v13  ;;  %v2302_v25 = vsel %vm468_vm0, %v5986_v13, 0.0 }
 0x22a   : > { %v1939_v20 = vpop.f32.mrf.mxu0  ;;  %v2303_v5 = vadd.f32 %v2302_v25, %v2301_v2 }
 0x22b   : > { %v1952_v45 = vadd.f32 %v1939_v20, %v1858_v21  ;;  %v2331_v20 = vsel %vm468_vm0, %v2322_v53, 0.0 }
 0x22c   : > { %v2332_v6 = vadd.f32 %v2331_v20, %v2330_v33 }
 0x22d   : > { %v2157_v61 = vadd.f32 %v2144_v1, %v1952_v45 }
 0x22e   : > { %v2272_v50 = vpop.f32.mrf.mxu2 }
 0x22f   : > { %v5992_v30 = vadd.f32 %v2272_v50, %v2155_v19  ;;  %v1860_v50 = vadd.f32 %v1850_v43, %v1727_v39 }
 0x231   : > { %v2323_v54 = vmul.f32 %v5992_v30, %v5992_v30  ;;  %v2304_v4 = vsel %vm468_vm0, %v5992_v30, 0.0 }
 0x232   : > { %v1942_v29 = vpop.f32.mrf.mxu0  ;;  %v2305_v1 = vadd.f32 %v2304_v4, %v2303_v5 }
 0x233   : > { %v1953_v26 = vadd.f32 %v1942_v29, %v1859_v37  ;;  %v2333_v16 = vsel %vm468_vm0, %v2323_v54, 0.0 }
 0x234   : > { %v2334_v52 = vadd.f32 %v2333_v16, %v2332_v6 }
 0x235   : > { %v2158_v7 = vadd.f32 %v2147_v47, %v1953_v26 }
 0x236   : > { %v2275_v3 = vpop.f32.mrf.mxu2 }
 0x237   : > { %v6001_v60 = vadd.f32 %v2275_v3, %v2156_v59 }
 0x239   : > { %v2324_v57 = vmul.f32 %v6001_v60, %v6001_v60  ;;  %v2306_v3 = vsel %vm468_vm0, %v6001_v60, 0.0 }
 0x23a   : > { %v1944_v8 = vpop.f32.mrf.mxu0  ;;  %v2307_v49 = vadd.f32 %v2306_v3, %v2305_v1 }
 0x23b   : > { %v1954_v62 = vadd.f32 %v1944_v8, %v1860_v50  ;;  %v2335_v22 = vsel %vm468_vm0, %v2324_v57, 0.0 }
 0x23c   : > { %v2336_v38 = vadd.f32 %v2335_v22, %v2334_v52 }
 0x23d   : > { %v2159_v46 = vadd.f32 %v2149_v56, %v1954_v62 }
 0x23e   : > { %v2277_v63 = vpop.f32.mrf.mxu2 }
 0x23f   : > { %v6010_v31 = vadd.f32 %v2277_v63, %v2157_v61 }
 0x241   : > { %v2325_v41 = vmul.f32 %v6010_v31, %v6010_v31  ;;  %v2308_v36 = vsel %vm468_vm0, %v6010_v31, 0.0 }
 0x242   : > { %v2309_v40 = vadd.f32 %v2308_v36, %v2307_v49  ;;  %v4794_v36 = vld [vmem:[%s6867_s6] ss:$0 sm:$0xff] }
 0x243   : > { %v2337_v23 = vsel %vm468_vm0, %v2325_v41, 0.0 }
 0x244   : > { %v2338_v21 = vadd.f32 %v2337_v23, %v2336_v38 }
 0x246   : > { %v2280_v9 = vpop.f32.mrf.mxu2 }
 0x247   : > { %v6018_v51 = vadd.f32 %v2280_v9, %v2158_v7 }
 0x249   : > { %v2326_v35 = vmul.f32 %v6018_v51, %v6018_v51  ;;  %v2310_v28 = vsel %vm468_vm0, %v6018_v51, 0.0 }
 0x24a   : > { %v2311_v12 = vadd.f32 %v2310_v28, %v2309_v40 }
 0x24b   : > { %v2339_v34 = vsel %vm468_vm0, %v2326_v35, 0.0 }
 0x24c   : > { %v2340_v37 = vadd.f32 %v2339_v34, %v2338_v21 }
 0x24e   : > { %v2282_v29 = vpop.f32.mrf.mxu2 }
 0x24f   : > { %v6034_v18 = vadd.f32 %v2282_v29, %v2159_v46 }
 0x251   : > { %v2312_v63 = vsel %vm468_vm0, %v6034_v18, 0.0  ;;  %v2327_v45 = vmul.f32 %v6034_v18, %v6034_v18 }
 0x252   : > { %v2313_v19 = vadd.f32 %v2312_v63, %v2311_v12 }
 0x253   : > { %v2341_v42 = vsel %vm468_vm0, %v2327_v45, 0.0 }
 0x254   : > { %v2314_v0 = vrot.slane %v2313_v19, 4  ;;  %v2342_v26 = vadd.f32 %v2341_v42, %v2340_v37 }
 0x256   : > { %v2315_v59 = vadd.f32 %v2314_v0, %v2313_v19  ;;  %v2343_v47 = vrot.slane %v2342_v26, 4 }
 0x258   : > { %v2316_v39 = vrot.slane %v2315_v59, 2  ;;  %v2344_v32 = vadd.f32 %v2343_v47, %v2342_v26 }
 0x25a   : > { %v2317_v17 = vadd.f32 %v2316_v39, %v2315_v59  ;;  %v2345_v53 = vrot.slane %v2344_v32, 2 }
 0x25c   : > { %v2318_v61 = vrot.slane %v2317_v17, 1  ;;  %v2346_v24 = vadd.f32 %v2345_v53, %v2344_v32 }
 0x25e   : > { %v2319_v55 = vadd.f32 %v2318_v61, %v2317_v17  ;;  %v2347_v43 = vrot.slane %v2346_v24, 1 }
 0x260   : > { %4474 = vmatmul.msk.f32.vlgmr.msra.gmra.mxu3 %vm468_vm0, %v2319_v55  ;;  %v2348_v25 = vadd.f32 %v2347_v43, %v2346_v24 }
 0x262   : > { %4475 = vmatmul.msk.f32.vlgmr.msrb.gmra.mxu0 %vm468_vm0, %v2348_v25 }
 0x2df   : > { %v2392_v58 = vpop.f32.mrf.mxu0 }
 0x2e3   : > { %v2369_v54 = vpop.f32.mrf.mxu3 }
 0x2e4   : > { %v2395_v7 = vmul.f32 %v2369_v54, %v2369_v54  ;;  %v2398_v33 = vperm.slane %v2369_v54, 0 }
 0x2e6   : > { %v2396_v2 = vsub.f32 %v2392_v58, %v2395_v7  ;;  %v2399_v62 = vsub.f32 %v5984_v10, %v2398_v33  ;;  %v2400_v41 = vsub.f32 %v5979_v44, %v2398_v33  ;;  %v2401_v6 = vsub.f32 %v5986_v13, %v2398_v33  ;;  %v4795_v44 = vld [vmem:[%s6868_s7] ss:$0 sm:$0xff] }
 0x2e7   : > { %v2402_v1 = vsub.f32 %v5992_v30, %v2398_v33  ;;  %v2403_v35 = vsub.f32 %v6001_v60, %v2398_v33  ;;  %v2404_v56 = vsub.f32 %v6010_v31, %v2398_v33  ;;  %v2405_v13 = vsub.f32 %v6018_v51, %v2398_v33 }
 0x2e8   : > { %v2397_v50 = vmax.f32 %v2396_v2, 0.0  ;;  %v2406_v61 = vsub.f32 %v6034_v18, %v2398_v33 }
 0x2ea   : > { %v2407_v8 = vadd.f32 1e-05, %v2397_v50 }
 0x2ec   : > { %4832 = vrsqrt.f32 %v2407_v8  ;;  %vm2414_vm9 = vweird.f32 %v2407_v8 }
 0x2f2   : > { %v4833_v9 = vpop.eup %4832 }
 0x2f3   : > { %v2409_v20 = vmul.f32 %v4833_v9, %v2407_v8  ;;  %vm2415_vm7 = vweird.f32 %v4833_v9 }
 0x2f4   : > { %vm2416_vm8 = vmor %vm2414_vm9, %vm2415_vm7 }
 0x2f5   : > { %v2410_v4 = vmul.f32 %v4833_v9, %v2409_v20 }
 0x2f7   : > { %v2411_v57 = vmul.f32 0.5, %v2410_v4 }
 0x2f9   : > { %v2412_v5 = vsub.f32 1.5, %v2411_v57 }
 0x2fb   : > { %v2413_v16 = vmul.f32 %v4833_v9, %v2412_v5 }
 0x2fd   : > { %v2417_v3 = vsel %vm2416_vm8, %v4833_v9, %v2413_v16 }
 0x2fe   : > { %v2418_v22 = vperm.slane %v2417_v3, 0 }
 0x300   : > { %v2419_v52 = vmul.f32 %v2418_v22, %v2399_v62  ;;  %v2420_v49 = vmul.f32 %v2418_v22, %v2400_v41  ;;  %v2421_v23 = vmul.f32 %v2418_v22, %v2401_v6  ;;  %v2422_v10 = vmul.f32 %v2418_v22, %v2402_v1 }
 0x301   : > { %v2423_v30 = vmul.f32 %v2418_v22, %v2403_v35  ;;  %v2424_v28 = vmul.f32 %v2418_v22, %v2404_v56  ;;  %v2425_v34 = vmul.f32 %v2418_v22, %v2405_v13  ;;  %v2426_v7 = vmul.f32 %v2418_v22, %v2406_v61 }
 0x302   : > { %v2430_v46 = vmul.f32 %v4794_v36, %v2419_v52  ;;  %v2431_v38 = vmul.f32 %v4794_v36, %v2420_v49  ;;  %v2432_v40 = vmul.f32 %v4794_v36, %v2421_v23  ;;  %v2433_v29 = vmul.f32 %v4794_v36, %v2422_v10  ;;  %v4717_v10 = vld [vmem:[%s6870_s9 + $0x8] sm:$0xff] }
 0x303   : > { %v2434_v60 = vmul.f32 %v4794_v36, %v2423_v30  ;;  %v2435_v21 = vmul.f32 %v4794_v36, %v2424_v28  ;;  %v2436_v0 = vmul.f32 %v4794_v36, %v2425_v34  ;;  %v2437_v8 = vmul.f32 %v4794_v36, %v2426_v7  ;;  %2874 = vmatpush.bf16.msrb.mxu1 %v4717_v10  ;;  %v4716_v34 = vld [vmem:[%s6870_s9] sm:$0xff] }
 0x304   : > { %v6056_v31 = vadd.f32 %v4795_v44, %v2430_v46  ;;  %v6058_v12 = vadd.f32 %v4795_v44, %v2431_v38  ;;  %v6060_v63 = vadd.f32 %v4795_v44, %v2432_v40  ;;  %v6062_v45 = vadd.f32 %v4795_v44, %v2433_v29  ;;  %v4727_v46 = vld [vmem:[%s6870_s9 + $0x38] sm:$0xff] }
 0x305   : > { %v6064_v37 = vadd.f32 %v4795_v44, %v2434_v60  ;;  %v6069_v26 = vadd.f32 %v4795_v44, %v2435_v21  ;;  %v6073_v39 = vadd.f32 %v4795_v44, %v2436_v0  ;;  %v6095_v16 = vadd.f32 %v4795_v44, %v2437_v8  ;;  %v4721_v60 = vld [vmem:[%s6870_s9 + $0x28] sm:$0xff]  ;;  %3308 = vmatpush.bf16.msrb.mxu2 %v4727_v46  ;;  %v2620_v8 = vld [vmem:[#allocation3 + $0x10] sm:$0x1] }
 0x306   : > { %v4476_v51 = vmul.f32 -1.442695, %v6056_v31  ;;  %v4477_v19 = vmul.f32 -1.442695, %v6058_v12  ;;  %v4478_v42 = vmul.f32 -1.442695, %v6060_v63  ;;  %3215 = vmatpush.bf16.msra.mxu0 %v4721_v60 }
 0x307   : > { %v4479_v59 = vmul.f32 -1.442695, %v6062_v45  ;;  %v4480_v47 = vmul.f32 -1.442695, %v6064_v37  ;;  %v4481_v32 = vmul.f32 -1.442695, %v6069_v26  ;;  %2875 = vmatpush.bf16.msrb.mxu1 %v4716_v34 }
 0x308   : > { %4834 = vpow2.f32 %v4476_v51  ;;  %v4482_v24 = vmul.f32 -1.442695, %v6073_v39  ;;  %v4483_v56 = vmul.f32 -1.442695, %v6095_v16  ;;  %v4720_v51 = vld [vmem:[%s6870_s9 + $0x20] sm:$0xff] }
 0x309   : > { %4836 = vpow2.f32 %v4477_v19  ;;  %v4726_v19 = vld [vmem:[%s6870_s9 + $0x30] sm:$0xff] }
 0x30a   : > { %4838 = vpow2.f32 %v4478_v42  ;;  %3309 = vmatpush.bf16.msrb.mxu2 %v4726_v19  ;;  %3216 = vmatpush.bf16.msra.mxu0 %v4720_v51  ;;  %v2623_v51 = vld [vmem:[#allocation3 + $0x18] sm:$0x1] }
 0x30b   : > { %4840 = vpow2.f32 %v4479_v59 }
 0x30c   : > { %4842 = vpow2.f32 %v4480_v47 }
 0x30d   : > { %4844 = vpow2.f32 %v4481_v32 }
 0x30e   : > { %v4835_v17 = vpop.eup %4834  ;;  %3740 = vmatpush.bf16.msrb.mxu0 %v4737_v27 }
 0x30f   : > { %v4837_v53 = vpop.eup %4836  ;;  %v6078_v55 = vadd.f32 1.0, %v4835_v17 }
 0x310   : > { %v4839_v43 = vpop.eup %4838  ;;  %v6080_v25 = vadd.f32 1.0, %v4837_v53 }
 0x311   : > { %v4841_v54 = vpop.eup %4840  ;;  %v6082_v58 = vadd.f32 1.0, %v4839_v43  ;;  %4846 = vrcp.f32 %v6078_v55  ;;  %vm2486_vm11 = vweird.f32 %v6078_v55  ;;  %v2490_v23 = vand.u32 2147483647, %v6078_v55 }
 0x312   : > { %v6085_v2 = vadd.f32 1.0, %v4841_v54  ;;  %4848 = vrcp.f32 %v6080_v25  ;;  %v4843_v18 = vpop.eup %4842  ;;  %v2492_v44 = vand.u32 2147483648, %v6078_v55  ;;  %v2507_v30 = vand.u32 2147483648, %v6080_v25 }
 0x313   : > { %4850 = vpow2.f32 %v4482_v24  ;;  %v4845_v50 = vpop.eup %4844  ;;  %v6090_v20 = vadd.f32 1.0, %v4843_v18  ;;  %vm2501_vm14 = vweird.f32 %v6080_v25  ;;  %v2505_v40 = vand.u32 2147483647, %v6080_v25 }
 0x314   : > { %4852 = vrcp.f32 %v6082_v58  ;;  %v6092_v57 = vadd.f32 1.0, %v4845_v50  ;;  %v2493_v47 = vor.u32 1.1754944e-38, %v2492_v44  ;;  %v2508_v32 = vor.u32 1.1754944e-38, %v2507_v30 }
 0x315   : > { %4854 = vrcp.f32 %v6085_v2  ;;  %vm2491_vm4 = vcmp.eq.f32.partialorder %v2490_v23, 8.507059e+37  ;;  %vm2506_vm7 = vcmp.eq.f32.partialorder %v2505_v40, 8.507059e+37  ;;  %v2520_v54 = vand.u32 2147483647, %v6082_v58 }
 0x316   : > { %4856 = vrcp.f32 %v6090_v20  ;;  %vm2516_vm9 = vweird.f32 %v6082_v58  ;;  %v2522_v18 = vand.u32 2147483648, %v6082_v58  ;;  %v2552_v34 = vand.u32 2147483648, %v6090_v20 }
 0x317   : > { %v4847_v9 = vpop.eup %4846  ;;  %4858 = vrcp.f32 %v6092_v57 }
 0x318   : > { %v4849_v4 = vpop.eup %4848  ;;  %v2482_v33 = vmul.f32 %v4847_v9, %v6078_v55  ;;  %vm2487_vm10 = vweird.f32 %v4847_v9 }
 0x319   : > { %v4851_v5 = vpop.eup %4850  ;;  %v2497_v62 = vmul.f32 %v4849_v4, %v6080_v25  ;;  %vm2502_vm12 = vweird.f32 %v4849_v4  ;;  %vm6121_vm13 = vmor %vm2486_vm11, %vm2487_vm10  ;;  %vm6171_vm10 = vcmp.eq.f32.partialorder %v2520_v54, 8.507059e+37  ;;  %vm2531_vm11 = vweird.f32 %v6085_v2 }
 0x31a   : > { %v6098_v3 = vpop.eup %4852  ;;  %v2483_v41 = vsub.f32 1.0, %v2482_v33  ;;  %v6103_v22 = vadd.f32 1.0, %v4851_v5  ;;  %vm6137_vm2 = vmor %vm2501_vm14, %vm2502_vm12 }
 0x31b   : > { %v2498_v6 = vsub.f32 1.0, %v2497_v62  ;;  %v6101_v1 = vpop.eup %4854  ;;  %v2512_v35 = vmul.f32 %v6098_v3, %v6082_v58  ;;  %vm2517_vm8 = vweird.f32 %v6098_v3  ;;  %v2647_v62 = vld [vmem:[#allocation3 + $0xc] sm:$0x1] }
 0x31c   : > { %v2484_v36 = vmul.f32 %v4847_v9, %v2483_v41  ;;  %v2527_v28 = vmul.f32 %v6101_v1, %v6085_v2  ;;  %4860 = vrcp.f32 %v6103_v22  ;;  %v6134_v21 = vpop.eup %4856  ;;  %v2535_v41 = vand.u32 2147483647, %v6085_v2  ;;  %vm6182_vm12 = vmor %vm2516_vm9, %vm2517_vm8 }
 0x31d   : > { %v2499_v52 = vmul.f32 %v4849_v4, %v2498_v6  ;;  %v2513_v29 = vsub.f32 1.0, %v2512_v35  ;;  %4862 = vpow2.f32 %v4483_v56  ;;  %v6144_v42 = vpop.eup %4858  ;;  %v2542_v61 = vmul.f32 %v6134_v21, %v6090_v20 }
 0x31e   : > { %v2485_v49 = vadd.f32 %v4847_v9, %v2484_v36  ;;  %v2528_v17 = vsub.f32 1.0, %v2527_v28  ;;  %v2557_v43 = vmul.f32 %v6144_v42, %v6092_v57  ;;  %v2537_v6 = vand.u32 2147483648, %v6085_v2  ;;  %v4719_v2 = vld [vmem:[%s6870_s9 + $0x18] sm:$0xff] }
 0x31f   : > { %v2500_v13 = vadd.f32 %v4849_v4, %v2499_v52  ;;  %v2514_v53 = vmul.f32 %v6098_v3, %v2513_v29  ;;  %v2648_v23 = vsel %vm5419_vm3, 0, %v2647_v62  ;;  %vm6196_vm14 = vcmp.eq.f32.partialorder %v2535_v41, 8.507059e+37  ;;  %3082 = vmatpush.bf16.msrb.mxu3 %v4719_v2 }
 0x320   : > { %v2489_v0 = vsel %vm6121_vm13, %v4847_v9, %v2485_v49  ;;  %v2529_v50 = vmul.f32 %v6101_v1, %v2528_v17  ;;  %v2558_v36 = vsub.f32 1.0, %v2557_v43  ;;  %vm2532_vm13 = vweird.f32 %v6101_v1  ;;  %2649 = vst [vmem:[#allocation3 + $0xc] sm:$0x1] %v2648_v23 }
 0x321   : > { %v2504_v59 = vsel %vm6137_vm2, %v4849_v4, %v2500_v13  ;;  %v2494_v24 = vsel %vm2491_vm4, %v2493_v47, %v2489_v0  ;;  %v2515_v9 = vadd.f32 %v6098_v3, %v2514_v53  ;;  %v2543_v4 = vsub.f32 1.0, %v2542_v61  ;;  %vm6203_vm2 = vmor %vm2531_vm11, %vm2532_vm13 }
 0x322   : > { %v2509_v55 = vsel %vm2506_vm7, %v2508_v32, %v2504_v59  ;;  %v6155_v25 = vpop.eup %4860  ;;  %v2601_v33 = vmul.f32 %v2494_v24, %v6056_v31  ;;  %v2621_v31 = vsel %vm5387_vm15, 0, %v2620_v8  ;;  %v2530_v49 = vadd.f32 %v6101_v1, %v2529_v50  ;;  %v4718_v50 = vld [vmem:[%s6870_s9 + $0x10] sm:$0xff] }
 0x323   : > { %v4863_v7 = vpop.eup %4862  ;;  %v2602_v5 = vmul.f32 %v2509_v55, %v6058_v12  ;;  %v2572_v35 = vmul.f32 %v6155_v25, %v6103_v22  ;;  %2622 = vst [vmem:[#allocation3 + $0x10] sm:$0x1] %v2621_v31  ;;  %v2519_v44 = vsel %vm6182_vm12, %v6098_v3, %v2515_v9  ;;  %v2523_v13 = vor.u32 1.1754944e-38, %v2522_v18  ;;  %3083 = vmatpush.bf16.msrb.mxu3 %v4718_v50  ;;  %v2617_v31 = vld [vmem:[#allocation3 + $0x8] sm:$0x1] }
 0x324   : > { %v6169_v56 = vadd.f32 1.0, %v4863_v7  ;;  %v6190_v10 = vpack.c.bf16 %v2601_v33, %v2601_v33  ;;  %v2544_v58 = vmul.f32 %v6134_v21, %v2543_v4  ;;  %v2538_v46 = vor.u32 1.1754944e-38, %v2537_v6  ;;  %v2614_v6 = vld [vmem:[#allocation3] sm:$0x1] }
 0x325   : > { %v2675_v30 = vpack.c.bf16 %v2602_v5, %v2602_v5  ;;  %v2559_v38 = vmul.f32 %v6144_v42, %v2558_v36  ;;  %v2573_v40 = vsub.f32 1.0, %v2572_v35  ;;  %vm2546_vm4 = vweird.f32 %v6090_v20 }
 0x326   : > { %v2550_v3 = vand.u32 2147483647, %v6090_v20  ;;  %v2683_v60 = vshrl.u32 %v6190_v10, 16  ;;  %v2524_v19 = vsel %vm6171_vm10, %v2523_v13, %v2519_v44  ;;  %v2534_v0 = vsel %vm6203_vm2, %v6101_v1, %v2530_v49  ;;  %v2644_v49 = vld [vmem:[#allocation3 + $0x4] sm:$0x1] }
 0x327   : > { %4864 = vrcp.f32 %v6169_v56  ;;  %v2691_v59 = vshrl.u32 %v2675_v30, 16  ;;  %v2545_v47 = vadd.f32 %v6134_v21, %v2544_v58  ;;  %vm2547_vm7 = vweird.f32 %v6134_v21  ;;  %v2766_v4 = vld [vmem:[#allocation3 + $0xc] sm:$0x1] }
 0x328   : > { %v2565_v32 = vand.u32 2147483647, %v6092_v57  ;;  %v6226_v17 = vrot.slane %v2683_v60, 7  ;;  %v2560_v53 = vadd.f32 %v6144_v42, %v2559_v38  ;;  %vm2562_vm9 = vweird.f32 %v6144_v42  ;;  %vm6239_vm8 = vmor %vm2546_vm4, %vm2547_vm7  ;;  %v4731_v60 = vld [vmem:[%s6870_s9 + $0x58] sm:$0xff] }
 0x329   : > { %v2574_v61 = vmul.f32 %v6155_v25, %v2573_v40  ;;  %v6231_v1 = vrot.slane %v2691_v59, 7  ;;  %v2539_v24 = vsel %vm6196_vm14, %v2538_v46, %v2534_v0  ;;  %v2567_v55 = vand.u32 2147483648, %v6092_v57  ;;  %3646 = vmatpush.bf16.msra.mxu3 %v4731_v60 }
 0x32a   : > { %v2603_v43 = vmul.f32 %v2524_v19, %v6060_v63  ;;  %v2694_v54 = vshll.u32 %v2675_v30, 16  ;;  %vm2561_vm10 = vweird.f32 %v6092_v57  ;;  %v2689_v18 = vrot.slane %v6226_v17, 4  ;;  %v2769_v41 = vld [vmem:[#allocation3 + $0x10] sm:$0xf] }
 0x32b   : > { %v2549_v8 = vsel %vm6239_vm8, %v6134_v21, %v2545_v47  ;;  %vm6251_vm11 = vcmp.eq.f32.partialorder %v2550_v3, 8.507059e+37  ;;  %v2553_v20 = vor.u32 1.1754944e-38, %v2552_v34  ;;  %vm6255_vm12 = vmor %vm2561_vm10, %vm2562_vm9  ;;  %v2575_v21 = vadd.f32 %v6155_v25, %v2574_v61  ;;  %v2626_v61 = vld [vmem:[#allocation3 + $0x20] sm:$0x1] }
 0x32c   : > { %v2696_v57 = vor.u32 %v2694_v54, %v6231_v1  ;;  %v2564_v5 = vsel %vm6255_vm12, %v6144_v42, %v2560_v53  ;;  %vm2577_vm13 = vweird.f32 %v6155_v25  ;;  %v2604_v62 = vmul.f32 %v2539_v24, %v6062_v45  ;;  %v4729_v24 = vld [vmem:[%s6870_s9 + $0x48] sm:$0xff] }
 0x32d   : > { %v6260_v33 = vpop.eup %4864  ;;  %vm2566_vm14 = vcmp.eq.f32.partialorder %v2565_v32, 8.507059e+37  ;;  %v2568_v36 = vor.u32 1.1754944e-38, %v2567_v55  ;;  %v2582_v35 = vand.u32 2147483648, %v6103_v22  ;;  %v6269_v52 = vpack.c.bf16 %v2603_v43, %v2603_v43  ;;  %v2650_v55 = vld [vmem:[#allocation3 + $0x14] sm:$0x1]  ;;  %3513 = vmatpush.bf16.msra.mxu1 %v4729_v24 }
 0x32e   : > { %v2554_v12 = vsel %vm6251_vm11, %v2553_v20, %v2549_v8  ;;  %vm2576_vm2 = vweird.f32 %v6103_v22  ;;  %v2580_v42 = vand.u32 2147483647, %v6103_v22  ;;  %v2767_v45 = vsel %vm5387_vm15, %v2689_v18, %v2766_v4  ;;  %v2653_v18 = vld [vmem:[#allocation3 + $0x1c] sm:$0x1] }
 0x32f   : > { %v2569_v23 = vsel %vm2566_vm14, %v2568_v36, %v2564_v5  ;;  %vm6279_vm4 = vmor %vm2576_vm2, %vm2577_vm13  ;;  %v2587_v13 = vmul.f32 %v6260_v33, %v6169_v56  ;;  %v2770_v58 = vsel %vm5433_vm6, %v2696_v57, %v2769_v41  ;;  %2768 = vst [vmem:[#allocation3 + $0xc] sm:$0x1] %v2767_v45  ;;  %v2615_v22 = vsel %vm5387_vm15, 0, %v2614_v6  ;;  %v3113_v57 = vld [vmem:[#allocation3] sm:$0xe] }
 0x330   : > { %v2579_v30 = vsel %vm6279_vm4, %v6155_v25, %v2575_v21  ;;  %v2597_v28 = vand.u32 2147483648, %v6169_v56  ;;  %v6293_v46 = vpack.c.bf16 %v2604_v62, %v2604_v62  ;;  %2771 = vst [vmem:[#allocation3 + $0x10] sm:$0xf] %v2770_v58  ;;  %v2618_v38 = vsel %vm5387_vm15, 0, %v2617_v31 }
 0x331   : > { %v2583_v40 = vor.u32 1.1754944e-38, %v2582_v35  ;;  %v2605_v29 = vmul.f32 %v2554_v12, %v6064_v37  ;;  %v2699_v3 = vshrl.u32 %v6269_v52, 16  ;;  %2616 = vst [vmem:[#allocation3] sm:$0x1] %v2615_v22  ;;  %v2645_v34 = vsel %vm5419_vm3, 0, %v2644_v49 }
 0x332   : > { %vm2581_vm7 = vcmp.eq.f32.partialorder %v2580_v42, 8.507059e+37  ;;  %v2606_v25 = vmul.f32 %v2569_v23, %v6069_v26  ;;  %2619 = vst [vmem:[#allocation3 + $0x8] sm:$0x1] %v2618_v38  ;;  %v2588_v19 = vsub.f32 1.0, %v2587_v13  ;;  %v2595_v0 = vand.u32 2147483647, %v6169_v56 }
 0x333   : > { %v2584_v2 = vsel %vm2581_vm7, %v2583_v40, %v2579_v30  ;;  %2646 = vst [vmem:[#allocation3 + $0x4] sm:$0x1] %v2645_v34  ;;  %v2624_v37 = vsel %vm5387_vm15, 0, %v2623_v51  ;;  %v6308_v59 = vor.u32 1.1754944e-38, %v2597_v28  ;;  %v2686_v47 = vshll.u32 %v6190_v10, 16 }
 0x334   : > { %v2707_v26 = vshrl.u32 %v6293_v46, 16  ;;  %2625 = vst [vmem:[#allocation3 + $0x18] sm:$0x1] %v2624_v37  ;;  %v6312_v32 = vpack.c.bf16 %v2605_v29, %v2605_v29  ;;  %v6314_v53 = vrot.slane %v2699_v3, 7  ;;  %v2607_v43 = vmul.f32 %v2584_v2, %v6073_v39 }
 0x335   : > { %v6320_v54 = vpack.c.bf16 %v2606_v25, %v2606_v25  ;;  %v2688_v10 = vor.u32 %v2686_v47, %v6226_v17  ;;  %v2627_v7 = vsel %vm5387_vm15, 0, %v2626_v61  ;;  %v2589_v50 = vmul.f32 %v6260_v33, %v2588_v19 }
 0x336   : > { %v2702_v8 = vshll.u32 %v6269_v52, 16  ;;  %v2710_v63 = vshll.u32 %v6293_v46, 16  ;;  %v2651_v20 = vsel %vm5419_vm3, 0, %v2650_v55  ;;  %v2697_v39 = vrot.slane %v6231_v1, 4  ;;  %2628 = vst [vmem:[#allocation3 + $0x20] sm:$0x1] %v2627_v7 }
 0x337   : > { %v6331_v9 = vrot.slane %v2707_v26, 7  ;;  %vm6333_vm9 = vcmp.eq.f32.partialorder %v2595_v0, 8.507059e+37  ;;  %v2654_v6 = vsel %vm5419_vm3, 0, %v2653_v18  ;;  %v6340_v36 = vpack.c.bf16 %v2607_v43, %v2607_v43  ;;  %2652 = vst [vmem:[#allocation3 + $0x14] sm:$0x1] %v2651_v20 }
 0x338   : > { %v2908_v17 = vld [vmem:[#allocation3] sm:$0xf]  ;;  %v2704_v41 = vor.u32 %v2702_v8, %v6314_v53  ;;  %v2715_v1 = vshrl.u32 %v6312_v32, 16  ;;  %v2723_v35 = vshrl.u32 %v6320_v54, 16  ;;  %v2590_v12 = vadd.f32 %v6260_v33, %v2589_v50  ;;  %v6348_v42 = vld [vmem:[#allocation3 + $0xc] sm:$0x1] }
 0x339   : > { %v2763_v5 = vld [vmem:[#allocation3 + $0x8] sm:$0xf]  ;;  %v2925_v21 = vshrl.u32 %v2908_v17, 16  ;;  %v2928_v62 = vshll.u32 %v2908_v17, 16  ;;  %vm2592_vm8 = vweird.f32 %v6260_v33  ;;  %vm2591_vm10 = vweird.f32 %v6169_v56  ;;  %2655 = vst [vmem:[#allocation3 + $0x1c] sm:$0x1] %v2654_v6 }
 0x33a   : > { %v2764_v52 = vsel %vm5433_vm6, %v2688_v10, %v2763_v5  ;;  %v2909_v31 = vld [vmem:[#allocation3 + $0x4] sm:$0x1]  ;;  %v2705_v23 = vrot.slane %v6314_v53, 4  ;;  %v2712_v44 = vor.u32 %v2710_v63, %v6331_v9  ;;  %v2718_v22 = vshll.u32 %v6312_v32, 16  ;;  %v2912_v38 = vld [vmem:[#allocation3 + $0x10] sm:$0xf]  ;;  %vm6358_vm11 = vmor %vm2591_vm10, %vm2592_vm8 }
 0x33b   : > { %2765 = vst [vmem:[#allocation3 + $0x8] sm:$0xf] %v2764_v52  ;;  %v2927_v45 = vrot.slane %v2925_v21, 4  ;;  %v2930_v49 = vrot.slane %v2928_v62, 5  ;;  %v2934_v13 = vshll.u32 %v2909_v31, 16  ;;  %v4524_v30 = vrot.slane %v3113_v57, 9 }
 0x33c   : > { %v2775_v58 = vld [vmem:[#allocation3 + $0x18] sm:$0xf]  ;;  %v3139_v28 = vrot.slane %v2909_v31, 5  ;;  %v2713_v56 = vrot.slane %v6331_v9, 4  ;;  %v6363_v29 = vrot.slane %v2715_v1, 7  ;;  %v2726_v3 = vshll.u32 %v6320_v54, 16 }
 0x33d   : > { %v2776_v46 = vsel %vm5433_vm6, %v2704_v41, %v2775_v58  ;;  %v2731_v34 = vshrl.u32 %v6340_v36, 16  ;;  %v2594_v25 = vsel %vm6358_vm11, %v6260_v33, %v2590_v12  ;;  %v6370_v60 = vrot.slane %v2723_v35, 7  ;;  %v4722_v51 = vld [vmem:[#allocation3 + $0xc] sm:$0xf0]  ;;  %v2781_v0 = vld [vmem:[#allocation3 + $0x20] sm:$0xf] }
 0x33e   : > { %2777 = vst [vmem:[#allocation3 + $0x18] sm:$0xf] %v2776_v46  ;;  %v3143_v2 = vrot.slane %v6348_v42, 5  ;;  %v2931_v19 = vor.u32 %v2930_v49, %v2927_v45  ;;  %v4486_v37 = vld [vmem:[#allocation3] sm:$0xf]  ;;  %v2936_v47 = vrot.slane %v2934_v13, 5  ;;  %v2782_v53 = vsel %vm5433_vm6, %v2712_v44, %v2781_v0 }
 0x33f   : > { %v2948_v26 = vshll.u32 %v6348_v42, 16  ;;  %v2953_v61 = vshrl.u32 %v2912_v38, 16  ;;  %v3140_v24 = vsel %vm5658_vm5, %v4524_v30, %v3139_v28  ;;  %2783 = vst [vmem:[#allocation3 + $0x20] sm:$0xf] %v2782_v53  ;;  %v2772_v33 = vld [vmem:[#allocation3 + $0x14] sm:$0x1]  ;;  %v2599_v43 = vsel %vm6333_vm9, %v6308_v59, %v2594_v25 }
 0x340   : > { %v2629_v55 = vld [vmem:[#allocation3 + $0x28] sm:$0x1]  ;;  %v2773_v50 = vsel %vm5387_vm15, %v2697_v39, %v2772_v33  ;;  %v2932_v17 = vrot.slane %v2931_v19, 4  ;;  %v3173_v5 = vunpack.c.l.b16 %v3140_v24  ;;  %v2778_v41 = vld [vmem:[#allocation3 + $0x1c] sm:$0x1]  ;;  %v6385_v59 = vrot.slane %v2731_v34, 7 }
 0x341   : > { %2774 = vst [vmem:[#allocation3 + $0x14] sm:$0x1] %v2773_v50  ;;  %v2630_v4 = vsel %vm5387_vm15, 0, %v2629_v55  ;;  %v2779_v6 = vsel %vm5387_vm15, %v2705_v23, %v2778_v41  ;;  %v2956_v1 = vshll.u32 %v2912_v38, 16  ;;  %v2608_v35 = vmul.f32 %v2599_v43, %v6095_v16  ;;  %v3115_v28 = vld [vmem:[#allocation3 + $0x10] sm:$0xe] }
 0x342   : > { %v4712_v10 = vld [vmem:[#allocation3 + $0x4] sm:$0xf0]  ;;  %2780 = vst [vmem:[#allocation3 + $0x1c] sm:$0x1] %v2779_v6  ;;  %v2734_v45 = vshll.u32 %v6340_v36, 16  ;;  %v2937_v49 = vsel %vm5571_vm1, %v2932_v17, %v2936_v47  ;;  %v2950_v44 = vrot.slane %v2948_v26, 5  ;;  %v2720_v53 = vor.u32 %v2718_v22, %v6363_v29 }
 0x343   : > { %v4546_v7 = vld [vmem:[#allocation3 + $0x8] sm:$0xf]  ;;  %v4487_v8 = vor.u32 %v4712_v10, %v4486_v37  ;;  %v2955_v13 = vrot.slane %v2953_v61, 4  ;;  %2631 = vst [vmem:[#allocation3 + $0x28] sm:$0x1] %v2630_v4  ;;  %v2958_v40 = vrot.slane %v2956_v1, 5  ;;  %v3040_v47 = vunpack.c.l.b16 %v2937_v49 }
 0x344   : > { %v3114_v18 = vld [vmem:[#allocation3 + $0x8] sm:$0xe]  ;;  %v4547_v63 = vor.u32 %v4722_v51, %v4546_v7  ;;  %v2632_v38 = vld [vmem:[#allocation3 + $0x30] sm:$0x1]  ;;  %v2656_v25 = vld [vmem:[#allocation3 + $0x24] sm:$0x1]  ;;  %v6399_v51 = vpack.c.bf16 %v2608_v35, %v2608_v35  ;;  %v2728_v32 = vor.u32 %v2726_v3, %v6370_v60 }
 0x345   : > { %v4525_v20 = vrot.slane %v3114_v18, 9  ;;  %v2910_v57 = vld [vmem:[#allocation3 + $0x8] sm:$0xf]  ;;  %4508 = vmatmul.msk.bf16.vlgmr.msrb.gmra.mxu1 %vm468_vm0, %v4487_v8  ;;  %v2914_v42 = vld [vmem:[#allocation3 + $0x18] sm:$0xf]  ;;  %v2633_v34 = vsel %vm5387_vm15, 0, %v2632_v38  ;;  %v2959_v8 = vor.u32 %v2958_v40, %v2955_v13 }
 0x346   : > { %v2939_v21 = vshrl.u32 %v2910_v57, 16  ;;  %v2942_v62 = vshll.u32 %v2910_v57, 16  ;;  %4568 = vmatmul.msk.bf16.vlgmr.msrb.gmra.mxu2 %vm468_vm0, %v4547_v63  ;;  %v2967_v23 = vshrl.u32 %v2914_v42, 16  ;;  %v2970_v46 = vshll.u32 %v2914_v42, 16  ;;  %v3116_v16 = vld [vmem:[#allocation3 + $0x18] sm:$0xe] }
 0x347   : > { %v3144_v39 = vsel %vm5658_vm5, %v4525_v20, %v3143_v2  ;;  %2634 = vst [vmem:[#allocation3 + $0x30] sm:$0x1] %v2633_v34  ;;  %v2657_v0 = vsel %vm5419_vm3, 0, %v2656_v25  ;;  %v2721_v37 = vrot.slane %v6363_v29, 4  ;;  %v4526_v26 = vrot.slane %v3115_v28, 9  ;;  %v4730_v1 = vld [vmem:[%s6870_s9 + $0x50] sm:$0xff] }
 0x348   : > { %v3174_v52 = vunpack.c.l.b16 %v3144_v39  ;;  %v2941_v31 = vrot.slane %v2939_v21, 4  ;;  %v2944_v12 = vrot.slane %v2942_v62, 5  ;;  %v2913_v19 = vld [vmem:[#allocation3 + $0x14] sm:$0x1]  ;;  %2658 = vst [vmem:[#allocation3 + $0x24] sm:$0x1] %v2657_v0  ;;  %3647 = vmatpush.bf16.msra.mxu3 %v4730_v1 }
 0x349   : > { %v2659_v61 = vld [vmem:[#allocation3 + $0x2c] sm:$0x1]  ;;  %v2969_v33 = vrot.slane %v2967_v23, 4  ;;  %v2972_v55 = vrot.slane %v2970_v46, 5  ;;  %v2915_v7 = vld [vmem:[#allocation3 + $0x1c] sm:$0x1] }
 0x34a   : > { %v3181_v58 = vpack.c.b16 %v3174_v52, %v3173_v5  ;;  %v2945_v30 = vor.u32 %v2944_v12, %v2941_v31  ;;  %v2660_v43 = vsel %vm5419_vm3, 0, %v2659_v61  ;;  %v3147_v18 = vrot.slane %v2913_v19, 5  ;;  %v2787_v63 = vld [vmem:[#allocation3 + $0x28] sm:$0xf]  ;;  %v4490_v57 = vld [vmem:[#allocation3 + $0x10] sm:$0xf] }
 0x34b   : > { %v4527_v50 = vrot.slane %v3116_v16, 9  ;;  %2661 = vst [vmem:[#allocation3 + $0x2c] sm:$0x1] %v2660_v43  ;;  %v2739_v22 = vshrl.u32 %v6399_v51, 16  ;;  %v3151_v29 = vrot.slane %v2915_v7, 5  ;;  %v2788_v21 = vsel %vm5433_vm6, %v2720_v53, %v2787_v63 }
 0x34c   : > { %4540 = vmatmul.msk.bf16.vlgmr.msra.gmra.mxu0 %vm468_vm0, %v3181_v58  ;;  %v2946_v2 = vrot.slane %v2945_v30, 4  ;;  %v4713_v17 = vld [vmem:[#allocation3 + $0x14] sm:$0xf0]  ;;  %v4723_v62 = vld [vmem:[#allocation3 + $0x1c] sm:$0xf0]  ;;  %v2973_v41 = vor.u32 %v2972_v55, %v2969_v33  ;;  %v3148_v54 = vsel %vm5658_vm5, %v4526_v26, %v3147_v18  ;;  %v2962_v39 = vshll.u32 %v2913_v19, 16 }
 0x34d   : > { %v4550_v5 = vld [vmem:[#allocation3 + $0x18] sm:$0xf]  ;;  %2789 = vst [vmem:[#allocation3 + $0x28] sm:$0xf] %v2788_v21  ;;  %v2916_v4 = vld [vmem:[#allocation3 + $0x20] sm:$0xf]  ;;  %v3152_v3 = vsel %vm5658_vm5, %v4527_v50, %v3151_v29  ;;  %v3175_v28 = vunpack.c.l.b16 %v3148_v54 }
 0x34e   : > { %v2951_v24 = vsel %vm5571_vm1, %v2946_v2, %v2950_v44  ;;  %v2793_v6 = vld [vmem:[#allocation3 + $0x30] sm:$0xf]  ;;  %v2635_v35 = vld [vmem:[#allocation3 + $0x38] sm:$0x1]  ;;  %v2960_v52 = vrot.slane %v2959_v8, 4  ;;  %v2976_v31 = vshll.u32 %v2915_v7, 16  ;;  %v4491_v44 = vor.u32 %v4713_v17, %v4490_v57 }
 0x34f   : > { %v3041_v10 = vunpack.c.l.b16 %v2951_v24  ;;  %v2794_v12 = vsel %vm5433_vm6, %v2728_v32, %v2793_v6  ;;  %v2784_v42 = vld [vmem:[#allocation3 + $0x24] sm:$0x1]  ;;  %v2636_v49 = vsel %vm5387_vm15, 0, %v2635_v35  ;;  %v4551_v13 = vor.u32 %v4723_v62, %v4550_v5  ;;  %v2638_v9 = vld [vmem:[#allocation3 + $0x40] sm:$0x1] }
 0x350   : > { %2795 = vst [vmem:[#allocation3 + $0x30] sm:$0xf] %v2794_v12  ;;  %v2785_v58 = vsel %vm5387_vm15, %v2713_v56, %v2784_v42  ;;  %v2981_v30 = vshrl.u32 %v2916_v4, 16  ;;  %v3176_v23 = vunpack.c.l.b16 %v3152_v3  ;;  %v2974_v46 = vrot.slane %v2973_v41, 4  ;;  %v4728_v56 = vld [vmem:[%s6870_s9 + $0x40] sm:$0xff] }
 0x351   : > { %v3048_v20 = vpack.c.b16 %v3041_v10, %v3040_v47  ;;  %2786 = vst [vmem:[#allocation3 + $0x24] sm:$0x1] %v2785_v58  ;;  %v2984_v16 = vshll.u32 %v2916_v4, 16  ;;  %v2964_v40 = vrot.slane %v2962_v39, 5  ;;  %v2978_v25 = vrot.slane %v2976_v31, 5  ;;  %3514 = vmatpush.bf16.msra.mxu1 %v4728_v56 }
 0x352   : > { %v2790_v38 = vld [vmem:[#allocation3 + $0x2c] sm:$0x1]  ;;  %2637 = vst [vmem:[#allocation3 + $0x38] sm:$0x1] %v2636_v49  ;;  %v2639_v2 = vsel %vm5387_vm15, 0, %v2638_v9  ;;  %v6443_v0 = vrot.slane %v2739_v22, 7  ;;  %v3182_v53 = vpack.c.b16 %v3176_v23, %v3175_v28 }
 0x353   : > { %4520 = vmatmul.msk.bf16.vlgmr.msrb.gmra.mxu3 %vm468_vm0, %v3048_v20  ;;  %v2791_v34 = vsel %vm5387_vm15, %v2721_v37, %v2790_v38  ;;  %v2662_v19 = vld [vmem:[#allocation3 + $0x34] sm:$0x1]  ;;  %v2742_v47 = vshll.u32 %v6399_v51, 16  ;;  %v2965_v26 = vsel %vm5571_vm1, %v2960_v52, %v2964_v40  ;;  %v2983_v37 = vrot.slane %v2981_v30, 4  ;;  %2640 = vst [vmem:[#allocation3 + $0x40] sm:$0x1] %v2639_v2 }
 0x354   : > { %2792 = vst [vmem:[#allocation3 + $0x2c] sm:$0x1] %v2791_v34  ;;  %v2979_v61 = vsel %vm5571_vm1, %v2974_v46, %v2978_v25  ;;  %v2918_v24 = vld [vmem:[#allocation3 + $0x28] sm:$0xf]  ;;  %v2986_v33 = vrot.slane %v2984_v16, 5  ;;  %v2663_v55 = vsel %vm5419_vm3, 0, %v2662_v19  ;;  %v2736_v51 = vor.u32 %v2734_v45, %v6385_v59 }
 0x355   : > { %4509 = vmatmul.msk.bf16.gmra.mxu1 %vm468_vm0, %v4491_v44  ;;  %v2995_v43 = vshrl.u32 %v2918_v24, 16  ;;  %v2998_v10 = vshll.u32 %v2918_v24, 16  ;;  %2664 = vst [vmem:[#allocation3 + $0x34] sm:$0x1] %v2663_v55  ;;  %v2665_v7 = vld [vmem:[#allocation3 + $0x3c] sm:$0x1]  ;;  %v3042_v29 = vunpack.c.l.b16 %v2965_v26  ;;  %v3043_v8 = vunpack.c.l.b16 %v2979_v61 }
 0x356   : > { %4569 = vmatmul.msk.bf16.gmra.mxu2 %vm468_vm0, %v4551_v13  ;;  %v3117_v18 = vld [vmem:[#allocation3 + $0x20] sm:$0xe]  ;;  %v3118_v50 = vld [vmem:[#allocation3 + $0x28] sm:$0xe]  ;;  %v2666_v32 = vsel %vm5419_vm3, 0, %v2665_v7  ;;  %v2729_v36 = vrot.slane %v6370_v60, 4  ;;  %v2744_v45 = vor.u32 %v2742_v47, %v6443_v0  ;;  %v2987_v17 = vor.u32 %v2986_v33, %v2983_v37 }
 0x357   : > { %v4739_v22 = vld [vmem:[%s6870_s9 + $0x78] sm:$0xff]  ;;  %v2997_v20 = vrot.slane %v2995_v43, 4  ;;  %v3000_v57 = vrot.slane %v2998_v10, 5  ;;  %2667 = vst [vmem:[#allocation3 + $0x3c] sm:$0x1] %v2666_v32  ;;  %v4528_v62 = vrot.slane %v3117_v18, 9  ;;  %v3049_v52 = vpack.c.b16 %v3043_v8, %v3042_v29 }
 0x358   : > { %v2917_v63 = vld [vmem:[#allocation3 + $0x24] sm:$0x1]  ;;  %3945 = vmatpush.bf16.msra.mxu2 %v4739_v22  ;;  %v4529_v4 = vrot.slane %v3118_v50, 9  ;;  %v4494_v3 = vld [vmem:[#allocation3 + $0x20] sm:$0xf]  ;;  %v2737_v60 = vrot.slane %v6385_v59, 4 }
 0x359   : > { %v2799_v5 = vld [vmem:[#allocation3 + $0x38] sm:$0xf]  ;;  %v3155_v41 = vrot.slane %v2917_v63, 5  ;;  %v4714_v39 = vld [vmem:[#allocation3 + $0x24] sm:$0xf0]  ;;  %v3001_v1 = vor.u32 %v3000_v57, %v2997_v20  ;;  %v2990_v12 = vshll.u32 %v2917_v63, 16 }
 0x35a   : > { %v2800_v54 = vsel %vm5433_vm6, %v2736_v51, %v2799_v5  ;;  %v2920_v35 = vld [vmem:[#allocation3 + $0x30] sm:$0xf]  ;;  %v4554_v31 = vld [vmem:[#allocation3 + $0x28] sm:$0xf]  ;;  %v2805_v42 = vld [vmem:[#allocation3 + $0x40] sm:$0xf]  ;;  %v4495_v9 = vor.u32 %v4714_v39, %v4494_v3 }
 0x35b   : > { %v2919_v21 = vld [vmem:[#allocation3 + $0x2c] sm:$0x1]  ;;  %2801 = vst [vmem:[#allocation3 + $0x38] sm:$0xf] %v2800_v54  ;;  %v4724_v49 = vld [vmem:[#allocation3 + $0x2c] sm:$0xf0]  ;;  %v2806_v58 = vsel %vm5433_vm6, %v2744_v45, %v2805_v42  ;;  %v3156_v28 = vsel %vm5658_vm5, %v4528_v62, %v3155_v41 }
 0x35c   : > { %4541 = vmatmul.msk.bf16.gmra.mxu0 %vm468_vm0, %v3182_v53  ;;  %v3159_v6 = vrot.slane %v2919_v21, 5  ;;  %v2988_v44 = vrot.slane %v2987_v17, 4  ;;  %v3004_v13 = vshll.u32 %v2919_v21, 16  ;;  %v2796_v30 = vld [vmem:[#allocation3 + $0x34] sm:$0x1]  ;;  %v3009_v46 = vshrl.u32 %v2920_v35, 16 }
 0x35d   : > { %2807 = vst [vmem:[#allocation3 + $0x40] sm:$0xf] %v2806_v58  ;;  %v2797_v59 = vsel %vm5387_vm15, %v2729_v36, %v2796_v30  ;;  %v4738_v38 = vld [vmem:[%s6870_s9 + $0x70] sm:$0xff]  ;;  %v3002_v16 = vrot.slane %v3001_v1, 4  ;;  %v3012_v34 = vshll.u32 %v2920_v35, 16  ;;  %v4555_v56 = vor.u32 %v4724_v49, %v4554_v31  ;;  %v4736_v7 = vld [vmem:[%s6870_s9 + $0x60] sm:$0xff] }
 0x35e   : > { %v3160_v23 = vsel %vm5658_vm5, %v4529_v4, %v3159_v6  ;;  %2798 = vst [vmem:[#allocation3 + $0x34] sm:$0x1] %v2797_v59  ;;  %v2802_v40 = vld [vmem:[#allocation3 + $0x3c] sm:$0x1]  ;;  %v2992_v25 = vrot.slane %v2990_v12, 5  ;;  %3946 = vmatpush.bf16.msra.mxu2 %v4738_v38  ;;  %v3177_v47 = vunpack.c.l.b16 %v3156_v28  ;;  %v3006_v37 = vrot.slane %v3004_v13, 5  ;;  %3741 = vmatpush.bf16.msrb.mxu0 %v4736_v7 }
 0x35f   : > { %v2803_v2 = vsel %vm5387_vm15, %v2737_v60, %v2802_v40  ;;  %v3339_v19 = vld [vmem:[#allocation3 + $0x8] sm:$0xf]  ;;  %v3178_v26 = vunpack.c.l.b16 %v3160_v23  ;;  %v3011_v61 = vrot.slane %v3009_v46, 4  ;;  %v3341_v24 = vld [vmem:[#allocation3 + $0x10] sm:$0xf]  ;;  %v3014_v43 = vrot.slane %v3012_v34, 5 }
 0x360   : > { %2804 = vst [vmem:[#allocation3 + $0x3c] sm:$0x1] %v2803_v2  ;;  %v2993_v53 = vsel %vm5571_vm1, %v2988_v44, %v2992_v25  ;;  %v3007_v33 = vsel %vm5571_vm1, %v3002_v16, %v3006_v37  ;;  %v3356_v10 = vshrl.u32 %v3339_v19, 16  ;;  %v3359_v51 = vshll.u32 %v3339_v19, 16  ;;  %v3119_v18 = vld [vmem:[#allocation3 + $0x30] sm:$0xe] }
 0x361   : > { %v3183_v22 = vpack.c.b16 %v3178_v26, %v3177_v47  ;;  %v3370_v8 = vshrl.u32 %v3341_v24, 16  ;;  %v3373_v63 = vshll.u32 %v3341_v24, 16  ;;  %v2668_v20 = vld [vmem:[#allocation3 + $0x44] sm:$0x1]  ;;  %v3044_v57 = vunpack.c.l.b16 %v2993_v53  ;;  %v6492_v45 = vld [vmem:[#allocation3 + $0x30] sm:$0xf] }
 0x362   : > { %v2922_v55 = vld [vmem:[#allocation3 + $0x38] sm:$0xf]  ;;  %v3045_v36 = vunpack.c.l.b16 %v3007_v33  ;;  %v3771_v62 = vld [vmem:[#allocation3 + $0x10] sm:$0xf]  ;;  %v3015_v4 = vor.u32 %v3014_v43, %v3011_v61  ;;  %v6495_v54 = vld [vmem:[#allocation3 + $0xc] sm:$0x1] }
 0x363   : > { %4521 = vmatmul.msk.bf16.gmra.mxu3 %vm468_vm0, %v3049_v52  ;;  %v3023_v50 = vshrl.u32 %v2922_v55, 16  ;;  %v3026_v32 = vshll.u32 %v2922_v55, 16  ;;  %v3120_v29 = vld [vmem:[#allocation3 + $0x38] sm:$0xe]  ;;  %v3358_v3 = vrot.slane %v3356_v10, 4  ;;  %v3361_v39 = vrot.slane %v3359_v51, 5 }
 0x364   : > { %v4715_v41 = vld [vmem:[#allocation3 + $0x34] sm:$0xf0]  ;;  %v4530_v1 = vrot.slane %v3119_v18, 9  ;;  %v3372_v60 = vrot.slane %v3370_v8, 4  ;;  %v3375_v52 = vrot.slane %v3373_v63, 5  ;;  %v4531_v31 = vrot.slane %v3120_v29, 9 }
 0x365   : > { %4510 = vmatmul.msk.bf16.gmra.mxu1 %vm468_vm0, %v4495_v9  ;;  %v2921_v17 = vld [vmem:[#allocation3 + $0x34] sm:$0x1]  ;;  %v3025_v5 = vrot.slane %v3023_v50, 4  ;;  %v3028_v21 = vrot.slane %v3026_v32, 5  ;;  %v3788_v49 = vshrl.u32 %v3771_v62, 16  ;;  %v2669_v44 = vsel %vm5419_vm3, 0, %v2668_v20 }
 0x366   : > { %4570 = vmatmul.msk.bf16.gmra.mxu2 %vm468_vm0, %v4555_v56  ;;  %v3163_v35 = vrot.slane %v2921_v17, 5  ;;  %v6497_v42 = vld [vmem:[#allocation3 + $0x14] sm:$0x1]  ;;  %v3050_v13 = vpack.c.b16 %v3045_v36, %v3044_v57  ;;  %v3365_v30 = vshll.u32 %v6495_v54, 16  ;;  %v3773_v28 = vld [vmem:[#allocation3 + $0x18] sm:$0xf]  ;;  %v4499_v23 = vor.u32 %v4715_v41, %v6492_v45 }
 0x367   : > { %v2923_v6 = vld [vmem:[#allocation3 + $0x3c] sm:$0x1]  ;;  %v3029_v58 = vor.u32 %v3028_v21, %v3025_v5  ;;  %v4558_v59 = vld [vmem:[#allocation3 + $0x38] sm:$0xf]  ;;  %v4725_v46 = vld [vmem:[#allocation3 + $0x3c] sm:$0xf0]  ;;  %v3362_v16 = vor.u32 %v3361_v39, %v3358_v3  ;;  %v3376_v9 = vor.u32 %v3375_v52, %v3372_v60 }
 0x368   : > { %v3167_v12 = vrot.slane %v2923_v6, 5  ;;  %v3016_v38 = vrot.slane %v3015_v4, 4  ;;  %v3018_v27 = vshll.u32 %v2921_v17, 16  ;;  %v3164_v40 = vsel %vm5658_vm5, %v4530_v1, %v3163_v35  ;;  %2670 = vst [vmem:[#allocation3 + $0x44] sm:$0x1] %v2669_v44  ;;  %v4743_v33 = vld [vmem:[%s6872_s11 + $0x8] sm:$0xff] }
 0x369   : > { %v3032_v34 = vshll.u32 %v2923_v6, 16  ;;  %v3379_v56 = vshll.u32 %v6497_v42, 16  ;;  %v3790_v2 = vrot.slane %v3788_v49, 4  ;;  %v3791_v19 = vshll.u32 %v3771_v62, 16  ;;  %v6509_v61 = vld [vmem:[#allocation3 + $0x14] sm:$0x1]  ;;  %4151 = vmatpush.bf16.msrb.mxu3 %v4743_v33 }
 0x36a   : > { %v3168_v25 = vsel %vm5658_vm5, %v4531_v31, %v3167_v12  ;;  %v3802_v47 = vshrl.u32 %v3773_v28, 16  ;;  %v4559_v26 = vor.u32 %v4725_v46, %v4558_v59  ;;  %v3030_v37 = vrot.slane %v3029_v58, 4  ;;  %v6514_v32 = vld [vmem:[#allocation3 + $0x1c] sm:$0x1]  ;;  %v3343_v57 = vld [vmem:[#allocation3 + $0x18] sm:$0xf] }
 0x36b   : > { %v3367_v53 = vrot.slane %v3365_v30, 5  ;;  %v3805_v24 = vshll.u32 %v3773_v28, 16  ;;  %v3020_v55 = vrot.slane %v3018_v27, 5  ;;  %v3363_v43 = vrot.slane %v3362_v16, 4  ;;  %v4741_v5 = vld [vmem:[%s6870_s9 + $0x88] sm:$0xff] }
 0x36c   : > { %4542 = vmatmul.msk.bf16.gmra.mxu0 %vm468_vm0, %v3183_v22  ;;  %v3793_v10 = vrot.slane %v3791_v19, 5  ;;  %v3804_v51 = vrot.slane %v3802_v47, 4  ;;  %v3179_v7 = vunpack.c.l.b16 %v3164_v40  ;;  %v3180_v18 = vunpack.c.l.b16 %v3168_v25  ;;  %v3544_v4 = vld [vmem:[#allocation3 + $0x8] sm:$0xe]  ;;  %v3545_v3 = vld [vmem:[#allocation3 + $0x10] sm:$0xe]  ;;  %4078 = vmatpush.bf16.msrb.mxu1 %v4741_v5 }
 0x36d   : > { %v3034_v50 = vrot.slane %v3032_v34, 5  ;;  %v3807_v22 = vrot.slane %v3805_v24, 5  ;;  %v3021_v29 = vsel %vm5571_vm1, %v3016_v38, %v3020_v55  ;;  %v3377_v8 = vrot.slane %v3376_v9, 4  ;;  %v3345_v1 = vld [vmem:[#allocation3 + $0x20] sm:$0xf] }
 0x36e   : > { %v3794_v63 = vor.u32 %v3793_v10, %v3790_v2  ;;  %v3797_v20 = vshll.u32 %v6509_v61, 16  ;;  %v3381_v45 = vrot.slane %v3379_v56, 5  ;;  %v3368_v21 = vsel %vm5571_vm1, %v3363_v43, %v3367_v53  ;;  %v3775_v44 = vld [vmem:[#allocation3 + $0x20] sm:$0xf]  ;;  %v3777_v27 = vld [vmem:[#allocation3 + $0x28] sm:$0xf] }
 0x36f   : > { %v3035_v36 = vsel %vm5571_vm1, %v3030_v37, %v3034_v50  ;;  %v3808_v17 = vor.u32 %v3807_v22, %v3804_v51  ;;  %v3811_v41 = vshll.u32 %v6514_v32, 16  ;;  %v3184_v39 = vpack.c.b16 %v3180_v18, %v3179_v7  ;;  %v6542_v37 = vld [vmem:[#allocation3 + $0x1c] sm:$0x1]  ;;  %v6544_v7 = vld [vmem:[#allocation3 + $0x24] sm:$0x1] }
 0x370   : > { %v3795_v62 = vrot.slane %v3794_v63, 4  ;;  %v3046_v6 = vunpack.c.l.b16 %v3021_v29  ;;  %v3384_v35 = vshrl.u32 %v3343_v57, 16  ;;  %v3387_v60 = vshll.u32 %v3343_v57, 16  ;;  %v3347_v29 = vld [vmem:[#allocation3 + $0x28] sm:$0xf] }
 0x371   : > { %v3047_v52 = vunpack.c.l.b16 %v3035_v36  ;;  %v3382_v31 = vsel %vm5571_vm1, %v3377_v8, %v3381_v45  ;;  %v3799_v12 = vrot.slane %v3797_v20, 5  ;;  %v3809_v49 = vrot.slane %v3808_v17, 4  ;;  %v4606_v63 = vld [vmem:[#allocation3 + $0x10] sm:$0xf]  ;;  %v4732_v20 = vld [vmem:[#allocation3 + $0x14] sm:$0xf0] }
 0x372   : > { %v3570_v58 = vrot.slane %v6495_v54, 5  ;;  %v4585_v30 = vrot.slane %v3545_v3, 9  ;;  %v3574_v28 = vrot.slane %v6497_v42, 5  ;;  %v3813_v59 = vrot.slane %v3811_v41, 5  ;;  %v6548_v17 = vld [vmem:[#allocation3 + $0x24] sm:$0x1] }
 0x373   : > { %4522 = vmatmul.msk.bf16.gmra.mxu3 %vm468_vm0, %v3050_v13  ;;  %v4584_v13 = vrot.slane %v3544_v4, 9  ;;  %v3398_v46 = vshrl.u32 %v3345_v1, 16  ;;  %v3401_v38 = vshll.u32 %v3345_v1, 16  ;;  %v3386_v16 = vrot.slane %v3384_v35, 4  ;;  %v6551_v41 = vld [vmem:[#allocation3 + $0x2c] sm:$0x1] }
 0x374   : > { %v3389_v40 = vrot.slane %v3387_v60, 5  ;;  %v3816_v34 = vshrl.u32 %v3775_v44, 16  ;;  %v3819_v9 = vshll.u32 %v3775_v44, 16  ;;  %v3471_v56 = vunpack.c.l.b16 %v3368_v21  ;;  %v3349_v3 = vld [vmem:[#allocation3 + $0x30] sm:$0xf] }
 0x375   : > { %4511 = vmatmul.msk.bf16.gmra.mxu1 %vm468_vm0, %v4499_v23  ;;  %v3800_v23 = vsel %vm5571_vm1, %v3795_v62, %v3799_v12  ;;  %v3472_v25 = vunpack.c.l.b16 %v3382_v31  ;;  %v3814_v54 = vsel %vm5571_vm1, %v3809_v49, %v3813_v59  ;;  %v3051_v2 = vpack.c.b16 %v3047_v52, %v3046_v6  ;;  %v3779_v12 = vld [vmem:[#allocation3 + $0x30] sm:$0xf]  ;;  %v3546_v59 = vld [vmem:[#allocation3 + $0x18] sm:$0xe] }
 0x376   : > { %4571 = vmatmul.msk.bf16.gmra.mxu2 %vm468_vm0, %v4559_v26  ;;  %v3571_v42 = vsel %vm5658_vm5, %v4584_v13, %v3570_v58  ;;  %v3575_v19 = vsel %vm5658_vm5, %v4585_v30, %v3574_v28  ;;  %v3830_v47 = vshrl.u32 %v3777_v27, 16  ;;  %v3903_v26 = vunpack.c.l.b16 %v3800_v23 }
 0x377   : > { %v3400_v53 = vrot.slane %v3398_v46, 4  ;;  %v3403_v24 = vrot.slane %v3401_v38, 5  ;;  %v3833_v33 = vshll.u32 %v3777_v27, 16  ;;  %v3904_v55 = vunpack.c.l.b16 %v3814_v54  ;;  %v3781_v46 = vld [vmem:[#allocation3 + $0x38] sm:$0xf] }
 0x378   : > { %v3390_v43 = vor.u32 %v3389_v40, %v3386_v16  ;;  %v3818_v10 = vrot.slane %v3816_v34, 4  ;;  %v3821_v51 = vrot.slane %v3819_v9, 5  ;;  %v3832_v18 = vrot.slane %v3830_v47, 4 }
 0x379   : > { %v3835_v50 = vrot.slane %v3833_v33, 5  ;;  %v3393_v22 = vshll.u32 %v6542_v37, 16  ;;  %v3479_v8 = vpack.c.b16 %v3472_v25, %v3471_v56  ;;  %v3604_v57 = vunpack.c.l.b16 %v3571_v42  ;;  %v3547_v42 = vld [vmem:[#allocation3 + $0x20] sm:$0xe] }
 0x37a   : > { %v3605_v36 = vunpack.c.l.b16 %v3575_v19  ;;  %v3404_v45 = vor.u32 %v3403_v24, %v3400_v53  ;;  %v3911_v5 = vpack.c.b16 %v3904_v55, %v3903_v26  ;;  %v3391_v21 = vrot.slane %v3390_v43, 4  ;;  %v6565_v53 = vld [vmem:[#allocation3 + $0x2c] sm:$0x1] }
 0x37b   : > { %v3407_v62 = vshll.u32 %v6544_v7, 16  ;;  %v3822_v4 = vor.u32 %v3821_v51, %v3818_v10  ;;  %v3412_v6 = vshrl.u32 %v3347_v29, 16  ;;  %v3415_v1 = vshll.u32 %v3347_v29, 16  ;;  %v6570_v51 = vld [vmem:[#allocation3 + $0x34] sm:$0x1] }
 0x37c   : > { %4543 = vmatmul.msk.bf16.gmra.mxu0 %vm468_vm0, %v3184_v39  ;;  %v3836_v39 = vor.u32 %v3835_v50, %v3832_v18  ;;  %v2745_v35 = vrot.slane %v6443_v0, 4  ;;  %v4607_v60 = vor.u32 %v4732_v20, %v4606_v63  ;;  %v3395_v52 = vrot.slane %v3393_v22, 5  ;;  %v2808_v20 = vld [vmem:[#allocation3 + $0x44] sm:$0x1] }
 0x37d   : > { %v3825_v31 = vshll.u32 %v6548_v17, 16  ;;  %v3405_v49 = vrot.slane %v3404_v45, 4  ;;  %v3839_v44 = vshll.u32 %v6551_v41, 16  ;;  %v3426_v13 = vshrl.u32 %v3349_v3, 16 }
 0x37e   : > { %v3429_v58 = vshll.u32 %v3349_v3, 16  ;;  %v3612_v30 = vpack.c.b16 %v3605_v36, %v3604_v57  ;;  %v3396_v28 = vsel %vm5571_vm1, %v3391_v21, %v3395_v52  ;;  %v3409_v23 = vrot.slane %v3407_v62, 5  ;;  %v6574_v21 = vld [vmem:[#allocation3 + $0x34] sm:$0x1]  ;;  %v6576_v62 = vld [vmem:[#allocation3 + $0x3c] sm:$0x1] }
 0x37f   : > { %v3823_v0 = vrot.slane %v3822_v4, 4  ;;  %v3837_v38 = vrot.slane %v3836_v39, 4  ;;  %v3414_v27 = vrot.slane %v3412_v6, 4  ;;  %v3417_v16 = vrot.slane %v3415_v1, 5  ;;  %v3351_v6 = vld [vmem:[#allocation3 + $0x38] sm:$0xf] }
 0x380   : > { %v3844_v40 = vshrl.u32 %v3779_v12, 16  ;;  %v3827_v34 = vrot.slane %v3825_v31, 5  ;;  %v3428_v9 = vrot.slane %v3426_v13, 4  ;;  %v3431_v56 = vrot.slane %v3429_v58, 5  ;;  %v2641_v52 = vld [vmem:[#allocation3 + $0x48] sm:$0x1] }
 0x381   : > { %v3847_v25 = vshll.u32 %v3779_v12, 16  ;;  %v3410_v54 = vsel %vm5571_vm1, %v3405_v49, %v3409_v23  ;;  %v4586_v19 = vrot.slane %v3546_v59, 9  ;;  %v3858_v47 = vshrl.u32 %v3781_v46, 16  ;;  %v4742_v13 = vld [vmem:[%s6872_s11] sm:$0xff] }
 0x382   : > { %v3828_v26 = vsel %vm5571_vm1, %v3823_v0, %v3827_v34  ;;  %v3846_v24 = vrot.slane %v3844_v40, 4  ;;  %v3861_v55 = vshll.u32 %v3781_v46, 16  ;;  %v3578_v10 = vrot.slane %v6542_v37, 5  ;;  %v2671_v0 = vld [vmem:[#allocation3 + $0x4c] sm:$0x1]  ;;  %4152 = vmatpush.bf16.msrb.mxu3 %v4742_v13 }
 0x383   : > { %4523 = vmatmul.msk.bf16.gmra.mxu3 %vm468_vm0, %v3051_v2  ;;  %v3841_v2 = vrot.slane %v3839_v44, 5  ;;  %v3849_v33 = vrot.slane %v3847_v25, 5  ;;  %v3418_v18 = vor.u32 %v3417_v16, %v3414_v27  ;;  %v3860_v50 = vrot.slane %v3858_v47, 4  ;;  %v4733_v46 = vld [vmem:[#allocation3 + $0x24] sm:$0xf0] }
 0x384   : > { %v4587_v22 = vrot.slane %v3547_v42, 9  ;;  %v3582_v29 = vrot.slane %v6544_v7, 5  ;;  %v3863_v63 = vrot.slane %v3861_v55, 5  ;;  %v3473_v57 = vunpack.c.l.b16 %v3396_v28  ;;  %v3548_v40 = vld [vmem:[#allocation3 + $0x28] sm:$0xe] }
 0x385   : > { %4580 = vmatmul.msk.bf16.vlgmr.msra.gmra.mxu1 %vm468_vm0, %v3479_v8  ;;  %v3842_v43 = vsel %vm5571_vm1, %v3837_v38, %v3841_v2  ;;  %v3432_v8 = vor.u32 %v3431_v56, %v3428_v9  ;;  %v3474_v36 = vunpack.c.l.b16 %v3410_v54  ;;  %v3905_v45 = vunpack.c.l.b16 %v3828_v26  ;;  %v3549_v25 = vld [vmem:[#allocation3 + $0x30] sm:$0xe]  ;;  %v3353_v54 = vld [vmem:[#allocation3 + $0x40] sm:$0xf] }
 0x386   : > { %4640 = vmatmul.msk.bf16.vlgmr.msra.gmra.mxu2 %vm468_vm0, %v3911_v5  ;;  %v3421_v5 = vshll.u32 %v6565_v53, 16  ;;  %v3906_v37 = vunpack.c.l.b16 %v3842_v43  ;;  %v3435_v4 = vshll.u32 %v6570_v51, 16  ;;  %v3850_v3 = vor.u32 %v3849_v33, %v3846_v24  ;;  %v3783_v42 = vld [vmem:[#allocation3 + $0x40] sm:$0xf]  ;;  %v4740_v33 = vld [vmem:[%s6870_s9 + $0x80] sm:$0xff] }
 0x387   : > { %v3864_v39 = vor.u32 %v3863_v63, %v3860_v50  ;;  %v3579_v7 = vsel %vm5658_vm5, %v4586_v19, %v3578_v10  ;;  %v3419_v1 = vrot.slane %v3418_v18, 4  ;;  %v3583_v31 = vsel %vm5658_vm5, %v4587_v22, %v3582_v29  ;;  %4079 = vmatpush.bf16.msrb.mxu1 %v4740_v33 }
 0x388   : > { %v3433_v12 = vrot.slane %v3432_v8, 4  ;;  %v3853_v49 = vshll.u32 %v6574_v21, 16  ;;  %v3867_v44 = vshll.u32 %v6576_v62, 16  ;;  %v3480_v58 = vpack.c.b16 %v3474_v36, %v3473_v57 }
 0x389   : > { %v3423_v28 = vrot.slane %v3421_v5, 5  ;;  %v3440_v23 = vshrl.u32 %v3351_v6, 16  ;;  %v3912_v59 = vpack.c.b16 %v3906_v37, %v3905_v45  ;;  %v3437_v38 = vrot.slane %v3435_v4, 5  ;;  %v6615_v45 = vld [vmem:[#allocation3 + $0x34] sm:$0xf0] }
 0x38a   : > { %v3851_v27 = vrot.slane %v3850_v3, 4  ;;  %v3865_v16 = vrot.slane %v3864_v39, 4  ;;  %v3606_v34 = vunpack.c.l.b16 %v3579_v7  ;;  %v3607_v9 = vunpack.c.l.b16 %v3583_v31  ;;  %v3977_v31 = vld [vmem:[#allocation3 + $0x18] sm:$0xe] }
 0x38b   : > { %v3424_v56 = vsel %vm5571_vm1, %v3419_v1, %v3423_v28  ;;  %v2642_v2 = vsel %vm5387_vm15, 0, %v2641_v52  ;;  %v3438_v19 = vsel %vm5571_vm1, %v3433_v12, %v3437_v38  ;;  %v3855_v47 = vrot.slane %v3853_v49, 5 }
 0x38c   : > { %4628 = vmatmul.msk.bf16.vlgmr.msrb.gmra.mxu0 %vm468_vm0, %v4607_v60  ;;  %v2809_v60 = vsel %vm5387_vm15, %v2745_v35, %v2808_v20  ;;  %v3443_v35 = vshll.u32 %v3351_v6, 16  ;;  %v3869_v26 = vrot.slane %v3867_v44, 5  ;;  %2643 = vst [vmem:[#allocation3 + $0x48] sm:$0x1] %v2642_v2  ;;  %v2672_v24 = vsel %vm5419_vm3, 0, %v2671_v0 }
 0x38d   : > { %2810 = vst [vmem:[#allocation3 + $0x44] sm:$0x1] %v2809_v60  ;;  %v4588_v48 = vrot.slane %v3548_v40, 9  ;;  %v3586_v55 = vrot.slane %v6565_v53, 5  ;;  %v3442_v43 = vrot.slane %v3440_v23, 4  ;;  %v3856_v18 = vsel %vm5571_vm1, %v3851_v27, %v3855_v47 }
 0x38e   : > { %v3445_v10 = vrot.slane %v3443_v35, 5  ;;  %2673 = vst [vmem:[#allocation3 + $0x4c] sm:$0x1] %v2672_v24  ;;  %v3870_v50 = vsel %vm5571_vm1, %v3865_v16, %v3869_v26  ;;  %v3454_v22 = vshrl.u32 %v3353_v54, 16  ;;  %v3457_v29 = vshll.u32 %v3353_v54, 16 }
 0x38f   : > { %v3872_v8 = vshrl.u32 %v3783_v42, 16  ;;  %v3875_v63 = vshll.u32 %v3783_v42, 16  ;;  %v3976_v20 = vld [vmem:[#allocation3 + $0x10] sm:$0xe]  ;;  %v6609_v57 = vunpack.c.l.b16 %v3424_v56  ;;  %v6611_v36 = vunpack.c.l.b16 %v3438_v19  ;;  %v6619_v6 = vld [vmem:[#allocation3 + $0x3c] sm:$0x1] }
 0x390   : > { %v6613_v53 = vld [vmem:[#allocation3 + $0x30] sm:$0xf]  ;;  %v4589_v5 = vrot.slane %v3549_v25, 9  ;;  %v3590_v37 = vrot.slane %v6570_v51, 5  ;;  %v3613_v4 = vpack.c.b16 %v3607_v9, %v3606_v34  ;;  %v3907_v3 = vunpack.c.l.b16 %v3856_v18  ;;  %v3978_v16 = vld [vmem:[#allocation3 + $0x20] sm:$0xe] }
 0x391   : > { %v3908_v39 = vunpack.c.l.b16 %v3870_v50  ;;  %v3446_v7 = vor.u32 %v3445_v10, %v3442_v43  ;;  %v6623_v1 = vsel %vm5658_vm5, %v4588_v48, %v3586_v55  ;;  %v3456_v60 = vrot.slane %v3454_v22, 4  ;;  %v3979_v40 = vld [vmem:[#allocation3 + $0x28] sm:$0xe]  ;;  %v3980_v54 = vld [vmem:[#allocation3 + $0x30] sm:$0xe] }
 0x392   : > { %v3459_v52 = vrot.slane %v3457_v29, 5  ;;  %v4644_v12 = vrot.slane %v3976_v20, 9  ;;  %v4615_v49 = vor.u32 %v6615_v45, %v6613_v53  ;;  %v3874_v44 = vrot.slane %v3872_v8, 4  ;;  %v3981_v2 = vld [vmem:[#allocation3 + $0x38] sm:$0xe] }
 0x393   : > { %4600 = vmatmul.msk.bf16.vlgmr.msra.gmra.mxu3 %vm468_vm0, %v3612_v30  ;;  %v4610_v30 = vld [vmem:[#allocation3 + $0x20] sm:$0xf]  ;;  %v3785_v51 = vld [vmem:[#allocation3 + $0x48] sm:$0xf]  ;;  %v3877_v13 = vrot.slane %v3875_v63, 5  ;;  %v3481_v28 = vpack.c.b16 %v6611_v36, %v6609_v57  ;;  %v6632_v23 = vsel %vm5658_vm5, %v4589_v5, %v3590_v37  ;;  %v3608_v38 = vunpack.c.l.b16 %v6623_v1 }
 0x394   : > { %v4611_v14 = vor.u32 %v4733_v46, %v4610_v30  ;;  %v6634_v35 = vld [vmem:[#allocation3 + $0x44] sm:$0x1]  ;;  %v3889_v30 = vshll.u32 %v3785_v51, 16  ;;  %v3913_v46 = vpack.c.b16 %v3908_v39, %v3907_v3  ;;  %v6639_v27 = vrot.slane %v3446_v7, 4  ;;  %v3982_v36 = vld [vmem:[#allocation3 + $0x40] sm:$0xe] }
 0x395   : > { %4581 = vmatmul.msk.bf16.gmra.mxu1 %vm468_vm0, %v3480_v58  ;;  %v4002_v58 = vrot.slane %v6509_v61, 5  ;;  %v6636_v0 = vld [vmem:[#allocation3 + $0x44] sm:$0x1]  ;;  %v3449_v61 = vshll.u32 %v6619_v6, 16  ;;  %v3460_v34 = vor.u32 %v3459_v52, %v3456_v60  ;;  %v3463_v42 = vshll.u32 %v6634_v35, 16 }
 0x396   : > { %4641 = vmatmul.msk.bf16.gmra.mxu2 %vm468_vm0, %v3912_v59  ;;  %v3886_v59 = vshrl.u32 %v3785_v51, 16  ;;  %v3891_v56 = vrot.slane %v3889_v30, 5  ;;  %v3786_v19 = vld [vmem:[#allocation3 + $0x4c] sm:$0x1]  ;;  %v3878_v47 = vor.u32 %v3877_v13, %v3874_v44  ;;  %v3881_v26 = vshll.u32 %v6636_v0, 16 }
 0x397   : > { %v4003_v25 = vsel %vm5658_vm5, %v4644_v12, %v4002_v58  ;;  %v4645_v24 = vrot.slane %v3977_v31, 9  ;;  %v3895_v33 = vshll.u32 %v3786_v19, 16  ;;  %v4006_v48 = vrot.slane %v6514_v32, 5  ;;  %v4618_v1 = vld [vmem:[#allocation3 + $0x40] sm:$0xf] }
 0x398   : > { %v3888_v9 = vrot.slane %v3886_v59, 4  ;;  %v4036_v55 = vunpack.c.l.b16 %v4003_v25  ;;  %v4646_v43 = vrot.slane %v3978_v16, 9  ;;  %v4010_v10 = vrot.slane %v6548_v17, 5 }
 0x399   : > { %v4647_v18 = vrot.slane %v3979_v40, 9  ;;  %v4014_v50 = vrot.slane %v6551_v41, 5  ;;  %v4648_v22 = vrot.slane %v3980_v54, 9  ;;  %v4018_v8 = vrot.slane %v6574_v21, 5 }
 0x39a   : > { %v3892_v29 = vor.u32 %v3891_v56, %v3888_v9  ;;  %v4649_v63 = vrot.slane %v3981_v2, 9  ;;  %v4011_v57 = vsel %vm5658_vm5, %v4646_v43, %v4010_v10  ;;  %v4022_v17 = vrot.slane %v6576_v62, 5 }
 0x39b   : > { %v4015_v32 = vsel %vm5658_vm5, %v4647_v18, %v4014_v50  ;;  %v3461_v41 = vrot.slane %v3460_v34, 4  ;;  %v4038_v5 = vunpack.c.l.b16 %v4011_v57  ;;  %v4019_v21 = vsel %vm5658_vm5, %v4648_v22, %v4018_v8 }
 0x39c   : > { %4629 = vmatmul.msk.bf16.gmra.mxu0 %vm468_vm0, %v4611_v14  ;;  %v4007_v14 = vsel %vm5658_vm5, %v4645_v24, %v4006_v48  ;;  %v4039_v37 = vunpack.c.l.b16 %v4015_v32  ;;  %v3879_v3 = vrot.slane %v3878_v47, 4  ;;  %v4023_v7 = vsel %vm5658_vm5, %v4649_v63, %v4022_v17 }
 0x39d   : > { %v4037_v20 = vunpack.c.l.b16 %v4007_v14  ;;  %v4040_v60 = vunpack.c.l.b16 %v4019_v21  ;;  %v4041_v62 = vunpack.c.l.b16 %v4023_v7  ;;  %v4650_v31 = vrot.slane %v3982_v36, 9  ;;  %v4867_v14 = vld [vmem:[%s5079_s17 + $0x8] sm:$0xff]  ;;  %v4869_v21 = vld [vmem:[%s5079_s17 + $0x18] sm:$0xff] }
 0x39e   : > { %v4045_v52 = vpack.c.b16 %v4039_v37, %v4038_v5  ;;  %v4026_v12 = vrot.slane %v6636_v0, 5  ;;  %v3893_v51 = vrot.slane %v3892_v29, 4  ;;  %v3897_v44 = vrot.slane %v3895_v33, 5  ;;  %v4866_v29 = vld [vmem:[%s5079_s17] sm:$0xff]  ;;  %v4868_v37 = vld [vmem:[%s5079_s17 + $0x10] sm:$0xff] }
 0x39f   : > { %v4044_v39 = vpack.c.b16 %v4037_v20, %v4036_v55  ;;  %v4030_v58 = vrot.slane %v3786_v19, 5  ;;  %v3451_v59 = vrot.slane %v3449_v61, 5  ;;  %v6666_v30 = vpack.c.b16 %v4041_v62, %v4040_v60  ;;  %v3551_v19 = vld [vmem:[#allocation3 + $0x40] sm:$0xe] }
 0x3a0   : > { %v3465_v16 = vrot.slane %v3463_v42, 5  ;;  %v3883_v40 = vrot.slane %v3881_v26, 5  ;;  %v3898_v53 = vsel %vm5571_vm1, %v3893_v51, %v3897_v44  ;;  %v3594_v33 = vrot.slane %v6619_v6, 5  ;;  %v4870_v51 = vld [vmem:[%s5079_s17 + $0x20] sm:$0xff]  ;;  %v4871_v44 = vld [vmem:[%s5079_s17 + $0x28] sm:$0xff] }
 0x3a1   : > { %v3910_v42 = vunpack.c.l.b16 %v3898_v53  ;;  %v4591_v15 = vrot.slane %v3551_v19, 9  ;;  %v3598_v48 = vrot.slane %v6634_v35, 5  ;;  %v4109_v8 = vpack.c.bf16 %v4867_v14, %v4866_v29  ;;  %v4873_v53 = vld [vmem:[%s5079_s17 + $0x38] sm:$0xff] }
 0x3a2   : > { %v3466_v61 = vsel %vm5571_vm1, %v3461_v41, %v3465_v16  ;;  %v3884_v56 = vsel %vm5571_vm1, %v3879_v3, %v3883_v40 }
 0x3a3   : > { %4601 = vmatmul.msk.bf16.gmra.mxu3 %vm468_vm0, %v3613_v4  ;;  %v3983_v4 = vld [vmem:[#allocation3 + $0x48] sm:$0xe]  ;;  %v3478_v54 = vunpack.c.l.b16 %v3466_v61  ;;  %v3909_v2 = vunpack.c.l.b16 %v3884_v56  ;;  %v3599_v10 = vsel %vm5658_vm5, %v4591_v15, %v3598_v48  ;;  %v4872_v56 = vld [vmem:[%s5079_s17 + $0x30] sm:$0xff]  ;;  %s442_s17 = sand.u32 1, %s4928_s26  }
 0x3a4   : > { %v4651_v13 = vrot.slane %v3983_v4, 9  ;;  %v3611_v18 = vunpack.c.l.b16 %v3599_v10  ;;  %v4110_v4 = vpack.c.bf16 %v4869_v21, %v4868_v37  ;;  %s4281_s15 = sshll.u32 %s442_s17, 6  ;;  %s4191_s29 = scalar_lea.sflag [#allocation5], %s442_s17 }
 0x3a5   : > { %4582 = vmatmul.msk.bf16.gmra.mxu1 %vm468_vm0, %v3481_v28  ;;  %v3609_v28 = vunpack.c.l.b16 %v6632_v23  ;;  %v3452_v23 = vsel %vm5571_vm1, %v6639_v27, %v3451_v59  ;;  %v3550_v27 = vld [vmem:[#allocation3 + $0x38] sm:$0xe]  ;;  %v3914_v26 = vpack.c.b16 %v3910_v42, %v3909_v2  ;;  %s6781_s30 = scalar_lea.vmem [#allocation4], %s4281_s15  ;;  %s4888_s15 = sshra.s32 %s4206_s20, 4  ;;  %s4889_s15 = int_to_ptr.hbm [resolvable:$true] %s4888_s15 }
 0x3a6   : > { %4642 = vmatmul.msk.bf16.gmra.mxu2 %vm468_vm0, %v3913_v46  ;;  %v4027_v46 = vsel %vm5658_vm5, %v4650_v31, %v4026_v12  ;;  %v4031_v0 = vsel %vm5658_vm5, %v4651_v13, %v4030_v58  ;;  %v3477_v25 = vunpack.c.l.b16 %v3452_v23  ;;  %v4590_v24 = vrot.slane %v3550_v27, 9  ;;  %s4203_s16 = sshll.u32 %s6781_s30, 4  ;;  %s4890_s21 = scalar_lea.hbm %s4889_s15, 64  ;;  %s4204_s16 = int_to_ptr.vmem [resolvable:$true] %s4203_s16 }
 0x3a7   : > { %v4042_v34 = vunpack.c.l.b16 %v4027_v46  ;;  %v4043_v9 = vunpack.c.l.b16 %v4031_v0  ;;  %v4111_v13 = vpack.c.bf16 %v4871_v44, %v4870_v51  ;;  %p4891_p11 = scmp.ne.s32.totalorder %s4889_s15, %s4890_s21  ;;  %p4895_p0 = scmp.lt.s32.totalorder %s4889_s15, %s6874_s13 }
 0x3a8   : > { %v3482_v47 = vpack.c.b16 %v3478_v54, %v3477_v25  ;;  %v3595_v43 = vsel %vm5658_vm5, %v4590_v24, %v3594_v33  ;;  %p4896_p1 = scmp.lt.s32.totalorder %s4894_s24, %s4890_s21 }
 0x3a9   : > { %v6685_v45 = vpack.c.b16 %v4043_v9, %v4042_v34  ;;  %v3610_v6 = vunpack.c.l.b16 %v3595_v43  ;;  %p4892_p12 = pnand %p4891_p11, %p5049_p5 }
 0x3aa   : > { %p4897_p2 = por %p4896_p1, %p4895_p0 }
 0x3ab   : > { %v3615_v35 = vpack.c.b16 %v3611_v18, %v3610_v6  ;;  %p4893_p13 = pneg %p4892_p12 }
 0x3ac   : > { %4630 = vmatmul.msk.bf16.gmra.mxu0 %vm468_vm0, %v4615_v49  ;;  %v3614_v49 = vpack.c.b16 %v3609_v28, %v3608_v38  ;;  %v4735_v38 = vld [vmem:[#allocation3 + $0x44] sm:$0xf0] }
 0x3ad   : > { %v4619_v55 = vor.u32 %v4735_v38, %v4618_v1  ;;  %p4898_p3 = pnand %p4897_p2, %p4893_p13 }
 0x3b3   : > { %4602 = vmatmul.msk.bf16.gmra.mxu3 %vm468_vm0, %v3614_v49  ;;  %v4112_v49 = vpack.c.bf16 %v4873_v53, %v4872_v56 }
 0x3b5   : > { %4583 = vmatmul.msk.bf16.gmra.mxu1 %vm468_vm0, %v3482_v47 }
 0x3b6   : > { %4643 = vmatmul.msk.bf16.gmra.mxu2 %vm468_vm0, %v3914_v26 }
 0x3bc   : > { %4631 = vmatmul.msk.bf16.gmra.mxu0 %vm468_vm0, %v4619_v55 }
 0x3c2   : > { %v2877_v50 = vpop.f32.mrf.mxu1 }
 0x3c3   : > { %4603 = vmatmul.msk.bf16.gmra.mxu3 %vm468_vm0, %v3615_v35  ;;  %v2900_v20 = vadd.f32 %v4796_v11, %v2877_v50 }
 0x3c5   : > { %4660 = vmatmul.msk.bf16.vlgmr.msrb.gmra.mxu1 %vm468_vm0, %v4044_v39 }
 0x3c9   : > { %v3218_v58 = vpop.f32.mrf.mxu0  ;;  %v3311_v59 = vpop.f32.mrf.mxu2 }
 0x3ca   : > { %v2879_v22 = vpop.f32.mrf.mxu1 }
 0x3cb   : > { %v2901_v36 = vadd.f32 %v4796_v11, %v2879_v22 }
 0x3d1   : > { %v3313_v23 = vpop.f32.mrf.mxu2 }
 0x3d2   : > { %v2882_v63 = vpop.f32.mrf.mxu1 }
 0x3d3   : > { %4672 = vmatmul.msk.bf16.vlgmr.msrb.gmra.mxu3 %vm468_vm0, %v4109_v8  ;;  %v2902_v39 = vadd.f32 %v4796_v11, %v2882_v63 }
 0x3d5   : > { %4661 = vmatmul.msk.bf16.gmra.mxu1 %vm468_vm0, %v4045_v52 }
 0x3d6   : > { %v3085_v57 = vpop.f32.mrf.mxu3 }
 0x3d7   : > { %v6707_v32 = vadd.f32 %v3085_v57, %v2900_v20 }
 0x3d9   : > { %v3316_v19 = vpop.f32.mrf.mxu2  ;;  %v3238_v37 = vadd.f32 %v3218_v58, %v6707_v32  ;;  %v6775_v32 = vld [vmem:[%s6873_s12] ss:$0 sm:$0xff] }
 0x3da   : > { %v2884_v17 = vpop.f32.mrf.mxu1 }
 0x3db   : > { %v2903_v62 = vadd.f32 %v4796_v11, %v2884_v17 }
 0x3de   : > { %v3087_v41 = vpop.f32.mrf.mxu3 }
 0x3df   : > { %v6710_v5 = vadd.f32 %v3087_v41, %v2901_v36 }
 0x3e1   : > { %v3318_v15 = vpop.f32.mrf.mxu2 }
 0x3e2   : > { %v2887_v3 = vpop.f32.mrf.mxu1 }
 0x3e3   : > { %4673 = vmatmul.msk.bf16.gmra.mxu3 %vm468_vm0, %v4110_v4  ;;  %v2904_v46 = vadd.f32 %v4796_v11, %v2887_v3 }
 0x3e5   : > { %4662 = vmatmul.msk.bf16.gmra.mxu1 %vm468_vm0, %v6666_v30  ;;  %v3220_v30 = vpop.f32.mrf.mxu0 }
 0x3e6   : > { %v3090_v7 = vpop.f32.mrf.mxu3 }
 0x3e7   : > { %v6715_v60 = vadd.f32 %v3090_v7, %v2902_v39  ;;  %v3331_v39 = vadd.f32 %v3311_v59, %v3238_v37 }
 0x3e9   : > { %v6739_v43 = vpop.f32.mrf.mxu2 }
 0x3ea   : > { %v2889_v52 = vpop.f32.mrf.mxu1 }
 0x3eb   : > { %v2905_v34 = vadd.f32 %v4796_v11, %v2889_v52 }
 0x3ed   : > { %v3223_v2 = vpop.f32.mrf.mxu0 }
 0x3ee   : > { %v3092_v31 = vpop.f32.mrf.mxu3  ;;  %v3240_v58 = vadd.f32 %v3223_v2, %v6715_v60 }
 0x3ef   : > { %v6719_v12 = vadd.f32 %v3092_v31, %v2903_v62  ;;  %v3239_v62 = vadd.f32 %v3220_v30, %v6710_v5 }
 0x3f1   : > { %v6745_v50 = vpop.f32.mrf.mxu2 }
 0x3f2   : > { %v2892_v28 = vpop.f32.mrf.mxu1 }
 0x3f3   : > { %4674 = vmatmul.msk.bf16.gmra.mxu3 %vm468_vm0, %v4111_v13  ;;  %v2906_v54 = vadd.f32 %v4796_v11, %v2892_v28  ;;  %v3332_v28 = vadd.f32 %v3313_v23, %v3239_v62  ;;  %v3333_v23 = vadd.f32 %v3316_v19, %v3240_v58 }
 0x3f5   : > { %4663 = vmatmul.msk.bf16.gmra.mxu1 %vm468_vm0, %v6685_v45  ;;  %v3225_v33 = vpop.f32.mrf.mxu0 }
 0x3f6   : > { %v3095_v16 = vpop.f32.mrf.mxu3  ;;  %v3241_v60 = vadd.f32 %v3225_v33, %v6719_v12 }
 0x3f7   : > { %v6724_v40 = vadd.f32 %v3095_v16, %v2904_v46 }
 0x3f9   : > { %v6751_v8 = vpop.f32.mrf.mxu2 }
 0x3fa   : > { %v2894_v0 = vpop.f32.mrf.mxu1 }
 0x3fb   : > { %v2907_v47 = vadd.f32 %v4796_v11, %v2894_v0 }
 0x3fd   : > { %v6737_v38 = vpop.f32.mrf.mxu0 }
 0x3fe   : > { %v3097_v9 = vpop.f32.mrf.mxu3 }
 0x3ff   : > { %v6728_v61 = vadd.f32 %v3097_v9, %v2905_v34 }
 0x401   : > { %v6759_v57 = vpop.f32.mrf.mxu2 }
 0x402   : > { %v3516_v25 = vpop.f32.mrf.mxu1 }
 0x403   : > { %4675 = vmatmul.msk.bf16.gmra.mxu3 %vm468_vm0, %v4112_v49  ;;  %v3536_v7 = vadd.f32 %v3516_v25, %v3331_v39 }
 0x405   : > { %v6741_v6 = vpop.f32.mrf.mxu0 }
 0x406   : > { %v3100_v42 = vpop.f32.mrf.mxu3 }
 0x407   : > { %v6733_v27 = vadd.f32 %v3100_v42, %v2906_v54 }
 0x409   : > { %v3948_v21 = vpop.f32.mrf.mxu2 }
 0x40a   : > { %v3518_v45 = vpop.f32.mrf.mxu1 }
 0x40b   : > { %v3537_v16 = vadd.f32 %v3518_v45, %v3332_v28 }
 0x40d   : > { %v6749_v29 = vpop.f32.mrf.mxu0 }
 0x40e   : > { %v3102_v26 = vpop.f32.mrf.mxu3 }
 0x40f   : > { %v6735_v24 = vadd.f32 %v3102_v26, %v2907_v47 }
 0x411   : > { %v3950_v44 = vpop.f32.mrf.mxu2 }
 0x412   : > { %v3521_v48 = vpop.f32.mrf.mxu1 }
 0x413   : > { %v3538_v54 = vadd.f32 %v3521_v48, %v3333_v23 }
 0x415   : > { %v6757_v20 = vpop.f32.mrf.mxu0 }
 0x416   : > { %v3649_v1 = vpop.f32.mrf.mxu3 }
 0x417   : > { %v3669_v31 = vadd.f32 %v3649_v1, %v3536_v7  ;;  %v3334_v1 = vadd.f32 %v3318_v15, %v3241_v60 }
 0x419   : > { %v3953_v56 = vpop.f32.mrf.mxu2 }
 0x41a   : > { %v3523_v55 = vpop.f32.mrf.mxu1 }
 0x41b   : > { %v3539_v48 = vadd.f32 %v3523_v55, %v3334_v1 }
 0x41d   : > { %v3743_v41 = vpop.f32.mrf.mxu0 }
 0x41e   : > { %v3651_v10 = vpop.f32.mrf.mxu3  ;;  %v3763_v46 = vadd.f32 %v3743_v41, %v3669_v31 }
 0x41f   : > { %v3670_v59 = vadd.f32 %v3651_v10, %v3537_v16 }
 0x420   : > { %v3968_v0 = vadd.f32 %v3948_v21, %v3763_v46 }
 0x421   : > { %v3955_v37 = vpop.f32.mrf.mxu2 }
 0x422   : > { %v6743_v18 = vpop.f32.mrf.mxu1 }
 0x425   : > { %v3745_v52 = vpop.f32.mrf.mxu0 }
 0x426   : > { %v3654_v35 = vpop.f32.mrf.mxu3  ;;  %v3764_v53 = vadd.f32 %v3745_v52, %v3670_v59 }
 0x427   : > { %v3671_v2 = vadd.f32 %v3654_v35, %v3538_v54 }
 0x428   : > { %v3969_v42 = vadd.f32 %v3950_v44, %v3764_v53  ;;  %v3243_v44 = vadd.f32 %v6741_v6, %v6728_v61  ;;  %v3244_v61 = vadd.f32 %v6749_v29, %v6733_v27  ;;  %v3245_v27 = vadd.f32 %v6757_v20, %v6735_v24 }
 0x42a   : > { %v6747_v22 = vpop.f32.mrf.mxu1  ;;  %v3336_v16 = vadd.f32 %v6745_v50, %v3243_v44  ;;  %v3337_v23 = vadd.f32 %v6751_v8, %v3244_v61  ;;  %v3338_v8 = vadd.f32 %v6759_v57, %v3245_v27 }
 0x42d   : > { %v3748_v5 = vpop.f32.mrf.mxu0 }
 0x42e   : > { %v3656_v14 = vpop.f32.mrf.mxu3  ;;  %v3765_v10 = vadd.f32 %v3748_v5, %v3671_v2 }
 0x42f   : > { %v3672_v12 = vadd.f32 %v3656_v14, %v3539_v48 }
 0x430   : > { %v3970_v33 = vadd.f32 %v3953_v56, %v3765_v10 }
 0x432   : > { %v6753_v11 = vpop.f32.mrf.mxu1 }
 0x435   : > { %v3750_v19 = vpop.f32.mrf.mxu0 }
 0x436   : > { %v6755_v63 = vpop.f32.mrf.mxu3  ;;  %v3766_v15 = vadd.f32 %v3750_v19, %v3672_v12 }
 0x438   : > { %v3971_v14 = vadd.f32 %v3955_v37, %v3766_v15 }
 0x43a   : > { %v6761_v17 = vpop.f32.mrf.mxu1 }
 0x43d   : > { %v3753_v31 = vpop.f32.mrf.mxu0 }
 0x43e   : > { %v6763_v36 = vpop.f32.mrf.mxu3 }
 0x442   : > { %v4081_v4 = vpop.f32.mrf.mxu1 }
 0x443   : > { %v4101_v34 = vadd.f32 %v4081_v4, %v3968_v0  ;;  %v3242_v4 = vadd.f32 %v6737_v38, %v6724_v40  ;;  %v3958_v40 = vpop.f32.mrf.mxu2 }
 0x445   : > { %v3335_v52 = vadd.f32 %v6739_v43, %v3242_v4  ;;  %v3755_v0 = vpop.f32.mrf.mxu0 }
 0x446   : > { %v6766_v3 = vpop.f32.mrf.mxu3 }
 0x447   : > { %v3540_v55 = vadd.f32 %v6743_v18, %v3335_v52  ;;  %v3541_v18 = vadd.f32 %v6747_v22, %v3336_v16  ;;  %v3542_v22 = vadd.f32 %v6753_v11, %v3337_v23 }
 0x449   : > { %v3673_v38 = vadd.f32 %v6755_v63, %v3540_v55  ;;  %v3674_v6 = vadd.f32 %v6763_v36, %v3541_v18  ;;  %v3675_v29 = vadd.f32 %v6766_v3, %v3542_v22 }
 0x44a   : > { %v4083_v13 = vpop.f32.mrf.mxu1 }
 0x44b   : > { %v4102_v47 = vadd.f32 %v4083_v13, %v3969_v42  ;;  %v3767_v58 = vadd.f32 %v3753_v31, %v3673_v38  ;;  %v3768_v56 = vadd.f32 %v3755_v0, %v3674_v6 }
 0x44d   : > { %v3972_v63 = vadd.f32 %v3958_v40, %v3767_v58 }
 0x44e   : > { %v6769_v51 = vpop.f32.mrf.mxu3 }
 0x452   : > { %v4086_v25 = vpop.f32.mrf.mxu1 }
 0x453   : > { %v4103_v39 = vadd.f32 %v4086_v25, %v3970_v33 }
 0x456   : > { %v4154_v30 = vpop.f32.mrf.mxu3 }
 0x457   : > { %v4155_v9 = vadd.f32 %v6775_v32, %v4154_v30 }
 0x459   : > { %v4174_v49 = vadd.f32 %v4155_v9, %v4101_v34  ;;  %v3960_v9 = vpop.f32.mrf.mxu2 }
 0x45a   : > { %v4088_v21 = vpop.f32.mrf.mxu1  ;;  %v3973_v36 = vadd.f32 %v3960_v9, %v3768_v56 }
 0x45b   : > { %4182 = vst.msk [vmem:[%s6781_s30] sm:$0xff] %vm468_vm0, %v4174_v49  ;;  %v4104_v46 = vadd.f32 %v4088_v21, %v3971_v14  ;;  %v3758_v49 = vpop.f32.mrf.mxu0 }
 0x45c   : > { %v3769_v2 = vadd.f32 %v3758_v49, %v3675_v29 }
 0x45e   : > { %v4156_v45 = vpop.f32.mrf.mxu3 }
 0x45f   : > { %v4157_v26 = vadd.f32 %v6775_v32, %v4156_v45 }
 0x461   : > { %v4175_v41 = vadd.f32 %v4157_v26, %v4102_v47  ;;  %v3963_v11 = vpop.f32.mrf.mxu2  ;;  %v3543_v47 = vadd.f32 %v6761_v17, %v3338_v8 }
 0x462   : > { %v4091_v13 = vpop.f32.mrf.mxu1  ;;  %v3974_v20 = vadd.f32 %v3963_v11, %v3769_v2 }
 0x463   : > { %4183 = vst.msk [vmem:[%s6781_s30 + $0x8] sm:$0xff] %vm468_vm0, %v4175_v41  ;;  %v4105_v30 = vadd.f32 %v4091_v13, %v3972_v63  ;;  %v3676_v24 = vadd.f32 %v6769_v51, %v3543_v47  ;;  %v3760_v1 = vpop.f32.mrf.mxu0 }
 0x465   : > { %v3770_v57 = vadd.f32 %v3760_v1, %v3676_v24 }
 0x466   : > { %v4159_v35 = vpop.f32.mrf.mxu3 }
 0x467   : > { %v4160_v7 = vadd.f32 %v6775_v32, %v4159_v35 }
 0x469   : > { %v4176_v62 = vadd.f32 %v4160_v7, %v4103_v39  ;;  %v3965_v17 = vpop.f32.mrf.mxu2 }
 0x46a   : > { %v4093_v50 = vpop.f32.mrf.mxu1  ;;  %v3975_v51 = vadd.f32 %v3965_v17, %v3770_v57 }
 0x46b   : > { %4184 = vst.msk [vmem:[%s6781_s30 + $0x10] sm:$0xff] %vm468_vm0, %v4176_v62  ;;  %v4106_v54 = vadd.f32 %v4093_v50, %v3973_v36 }
 0x46e   : > { %v4161_v28 = vpop.f32.mrf.mxu3 }
 0x46f   : > { %v4162_v43 = vadd.f32 %v6775_v32, %v4161_v28 }
 0x471   : > { %v4177_v59 = vadd.f32 %v4162_v43, %v4104_v46 }
 0x472   : > { %v4096_v45 = vpop.f32.mrf.mxu1 }
 0x473   : > { %4185 = vst.msk [vmem:[%s6781_s30 + $0x18] sm:$0xff] %vm468_vm0, %v4177_v59  ;;  %v4107_v26 = vadd.f32 %v4096_v45, %v3974_v20 }
 0x476   : > { %v4164_v5 = vpop.f32.mrf.mxu3 }
 0x477   : > { %v4165_v34 = vadd.f32 %v6775_v32, %v4164_v5 }
 0x479   : > { %v4178_v53 = vadd.f32 %v4165_v34, %v4105_v30 }
 0x47a   : > { %v4098_v41 = vpop.f32.mrf.mxu1 }
 0x47b   : > { %4186 = vst.msk [vmem:[%s6781_s30 + $0x20] sm:$0xff] %vm468_vm0, %v4178_v53  ;;  %v4108_v37 = vadd.f32 %v4098_v41, %v3975_v51 }
 0x47e   : > { %v4166_v25 = vpop.f32.mrf.mxu3 }
 0x47f   : > { %v4167_v60 = vadd.f32 %v6775_v32, %v4166_v25 }
 0x481   : > { %v4179_v42 = vadd.f32 %v4167_v60, %v4106_v54 }
 0x483   : > { %4187 = vst.msk [vmem:[%s6781_s30 + $0x28] sm:$0xff] %vm468_vm0, %v4179_v42 }
 0x486   : > { %v4169_v3 = vpop.f32.mrf.mxu3 }
 0x487   : > { %v4170_v19 = vadd.f32 %v6775_v32, %v4169_v3 }
 0x489   : > { %v4180_v10 = vadd.f32 %v4170_v19, %v4107_v26 }
 0x48b   : > { %4188 = vst.msk [vmem:[%s6781_s30 + $0x30] sm:$0xff] %vm468_vm0, %v4180_v10 }
 0x48e   : > { %v4171_v48 = vpop.f32.mrf.mxu3 }
 0x48f   : > { %v4172_v21 = vadd.f32 %v6775_v32, %v4171_v48 }
 0x491   : > { %v4181_v4 = vadd.f32 %v4172_v21, %v4108_v37 }
 0x493   : > { %4189 = vst.msk [vmem:[%s6781_s30 + $0x38] sm:$0xff] %vm468_vm0, %v4181_v4 }
 0x494   : > { %4901 = shalt.err (!%p4898_p3)
}
 0x495   : > { %s4939_s17 = smov 128   ;;  %s4940_s30 = smov 8  }
 0x496   : > { %4749 = dma.vmem_to_hbm [thread:$0]  (%p5049_p5), %s4204_s16, 1024, %s4206_s20, %s4191_s29, %s4939_s17, %s4939_s17, %s4940_s30  }
 0x497 PF: > { %p4755_p4 = scmp.ge.s32.totalorder %s4936_s28, 2  ;;  %s4220_s22 = sand.u32 1, %s4924_s25  }
 0x498   : > { %s4221_s0 = scalar_lea.sflag [#allocation5], %s4220_s22 }
 0x499   : > { %p4752_p7 = pnand %p4755_p4, %p5053_p6 }
 0x49b   : > { %p4753_p8 = pneg %p4752_p7 }
 0x49d   : > { %4919 = dma.done.wait (%p4753_p8), %s4221_s0, 1024  }
 0x49e   : > { %4921 = vsyncadd (%p4753_p8), %s4221_s0, 4294966272  ;;  %s6944_s1 = sld [smem:[#allocation7_spill]]  ;;  %p23_p9 = scmp.ge.s32.totalorder %s5036_s14, 4  }
 0x49f   : > { %s6945_s25 = smov %s4928_s26  ;;  %s6946_s26 = smov %s4932_s27 }
 0x4a0   : > { %s6948_s28 = smov %s5036_s14  ;;  %25 = sbr.rel (!%p23_p9) target bundleno = 6 (0x6), region = 116 }
 0x4a4   : > { %s6947_s27 = smov %s6944_s1 }
 0x4a5   :  { %4227 = vsyncpa [#allocation5], 1 }
 0x4a6   :  { %4229 = vsyncpa [#allocation5 + $0x1], 1 }

</bundles_post_ra>
